<compile_context>
chip_gen: v6e
topology: v6e:2x2x1
jax: 0.10.0
libtpu: 0.0.40
codegen_flags: <defaults>
</compile_context>

<pallas_src>
import functools

import numpy as np
import jax
import jax.numpy as jnp
from jax.experimental import pallas as pl
from jax.experimental.pallas import tpu as pltpu


# attention1..attention9 read histories (0=text, 1=visual, 2=audio) in order
#   [t, v, a, t, a, t, v, a, v];  _HEADS_PER_HIST groups the 9 heads by history.
_HIST_IDX = (0, 1, 2, 0, 2, 0, 1, 2, 1)
_HEADS_PER_HIST = tuple(tuple(k for k in range(9) if _HIST_IDX[k] == m)
                        for m in range(3))          # ((0,3,5), (1,6,8), (2,4,7))


def _round_up(x, m):
    return (x + m - 1) // m * m


# ----------------------------------------------------------------------------
# Fused Pallas kernel: full forward scan over T timesteps (one direction)
# ----------------------------------------------------------------------------
def _dialogue_tri_scan_kernel(
        # per-step inputs (block (1, B, ...), index_map = t)
        u_ref, qmask_ref, qsel_ref,
        # resident weights (constant-index full blocks, DMA'd once)
        w_dense_ref, b_dense_ref,
        wih_g_ref, whh_g_ref, bih_g_ref, bhh_g_ref,
        wih_p_ref, whh_p_ref, bih_p_ref, bhh_p_ref,
        wih_e_ref, whh_e_ref, bih_e_ref, bhh_e_ref,
        att_w_ref, sa_w_ref, sa_b_ref, wd_ref, bd_ref,
        # lane-dense packed per-step output slab (1, B, K)
        out_ref,
        # carried state: VMEM scratch persists across grid steps
        hist_ref, q_state_ref, e_state_ref,
        *, D_m, D_g, D_p, D_e, B, P, T, K):
    f32 = jnp.float32
    t = pl.program_id(0)

    # ---- t == 0: reset carried state ----------------------------------------
    @pl.when(t == 0)
    def _():
        hist_ref[...] = jnp.zeros_like(hist_ref)
        q_state_ref[...] = jnp.zeros_like(q_state_ref)
        e_state_ref[...] = jnp.zeros_like(e_state_ref)

    qmask = qmask_ref[0]                                   # (B, P)
    qsel = qsel_ref[0]                                     # (B, P) speaker one-hot
    q0 = q_state_ref[...]                                  # (3, B, P, D_p)
    e0 = e_state_ref[...]                                  # (3, B, D_e)
    g_prev_all = hist_ref[jnp.maximum(t - 1, 0)]           # (3, B, D_g); zeros at t==0

    # ---- dense_t / dense_v / dense_a : one block-diagonal matmul -------------
    U_all = jnp.dot(u_ref[0], w_dense_ref[...],
                    preferred_element_type=f32) + b_dense_ref[...]
    U = [U_all[:, m * D_m:(m + 1) * D_m] for m in range(3)]        # t, v, a

    def gru_gates(gx, gh, h, H):
        # PyTorch GRUCell gate order (r, z, n); bhh is already folded into gh.
        r = jax.nn.sigmoid(gx[..., :H] + gh[..., :H])
        z = jax.nn.sigmoid(gx[..., H:2 * H] + gh[..., H:2 * H])
        n = jnp.tanh(gx[..., 2 * H:] + r * gh[..., 2 * H:])
        return (1.0 - z) * n + z * h

    # ---- g_cell_{t,v,a} -------------------------------------------------------
    g_new = []
    for m in range(3):
        q0_sel = jnp.sum(qsel[:, :, None] * q0[m], axis=1)          # (B, D_p)
        x = jnp.concatenate([U[m], q0_sel], axis=-1)                # (B, D_m + D_p)
        gx = jnp.dot(x, wih_g_ref[m], preferred_element_type=f32) + bih_g_ref[m]
        gh = (jnp.dot(g_prev_all[m], whh_g_ref[m], preferred_element_type=f32)
              + bhh_g_ref[m])
        g_new.append(gru_gates(gx, gh, g_prev_all[m], D_g))
    hist_ref[t] = jnp.stack(g_new, axis=0)                 # append to g history

    # ---- 9 SimpleAttention heads over the 3 unique histories -----------------
    # scores via MXU: one (T*B, D_g) @ (D_g, 3) matmul per unique history
    H_all = hist_ref[...]                                  # (T, 3, B, D_g)
    mask_b = jax.lax.broadcasted_iota(jnp.int32, (T, B), 0) < t     # history j < t
    maskf = mask_b.astype(f32)
    pools = [None] * 9
    alpha_acc = jnp.zeros((T, B), f32)
    for m in range(3):
        Hm = H_all[:, m]                                   # (T, B, D_g)
        scores = jnp.dot(Hm.reshape(T * B, D_g), att_w_ref[m],
                         preferred_element_type=f32).reshape(T, B, 3)
        for c in range(3):
            s = jnp.where(mask_b, scores[:, :, c], -1e30)
            s = s - jnp.max(s, axis=0, keepdims=True)
            es = jnp.exp(s) * maskf
            denom = jnp.maximum(jnp.sum(es, axis=0, keepdims=True), 1e-30)
            a = es / denom                                 # softmax over history
            pools[_HEADS_PER_HIST[m][c]] = jnp.sum(a[:, :, None] * Hm, axis=0)
            alpha_acc = alpha_acc + a

    # ---- SelfAttention('general2') + Linear(3*D_g -> D_g) --------------------
    # NOTE: softmax over dim 0 (the batch) reproduces the PyTorch code.
    valid = jnp.where(t > 0, 1.0, 0.0).astype(f32)         # c == 0 at t == 0

    def self_att_dense(ctxs, g):
        ws = sa_w_ref[g]                                   # (1, D_g)
        bs = sa_b_ref[g]                                   # (1, 1)
        parts = []
        for cc in ctxs:
            scale = jnp.sum(cc * ws, axis=-1, keepdims=True) + bs   # (B, 1)
            scale = scale - jnp.max(scale, axis=0, keepdims=True)
            ez = jnp.exp(scale)
            alp = ez / jnp.sum(ez, axis=0, keepdims=True)  # softmax over batch
            parts.append((alp + 1.0) * cc)
        att = jnp.concatenate(parts, axis=-1)              # (B, 3*D_g)
        return jnp.dot(att, wd_ref[g], preferred_element_type=f32) + bd_ref[g]

    # pools = [c_tt, c_vv, c_aa, c_at, c_ta, c_vt, c_tv, c_va, c_av]
    c_t = self_att_dense((pools[0], pools[4], pools[6]), 0) * valid   # sa1/dense1
    c_a = self_att_dense((pools[2], pools[3], pools[8]), 1) * valid   # sa2/dense2
    c_v = self_att_dense((pools[1], pools[5], pools[7]), 2) * valid   # sa3/dense3
    c = [c_t, c_v, c_a]                                    # modality order t, v, a

    # ---- p_cell_{t,v,a}: parties fused on the sublane axis -------------------
    q_new = []
    for m in range(3):
        Uc = jnp.concatenate([U[m], c[m]], axis=-1)        # (B, D_m + D_g)
        gx = (jnp.dot(Uc, wih_p_ref[m], preferred_element_type=f32)
              + bih_p_ref[m])[:, None, :]                  # (B, 1, 3*D_p) - shared
        gh = (jnp.dot(q0[m].reshape(B * P, D_p), whh_p_ref[m],
                      preferred_element_type=f32)
              + bhh_p_ref[m]).reshape(B, P, 3 * D_p)
        qs = gru_gates(gx, gh, q0[m], D_p)                 # (B, P, D_p)
        qm = qmask[:, :, None]
        q_new.append(q0[m] * (1.0 - qm) + qs * qm)
    q_state_ref[...] = jnp.stack(q_new, axis=0)

    # ---- e_cell_{t,v,a} -------------------------------------------------------
    e_new = []
    for m in range(3):
        q_sel = jnp.sum(qsel[:, :, None] * q_new[m], axis=1)        # (B, D_p)
        gx = jnp.dot(q_sel, wih_e_ref[m], preferred_element_type=f32) + bih_e_ref[m]
        gh = jnp.dot(e0[m], whh_e_ref[m], preferred_element_type=f32) + bhh_e_ref[m]
        e_new.append(gru_gates(gx, gh, e0[m], D_e))
    e_state_ref[...] = jnp.stack(e_new, axis=0)

    # ---- lane-dense packed per-step output slab -------------------------------
    used = 3 * D_g + 3 * P * D_p + 3 * D_e + T
    pieces = (g_new
              + [q_new[m].reshape(B, P * D_p) for m in range(3)]
              + e_new
              + [alpha_acc.T])                             # (B, T), zeros at t == 0
    if K > used:
        pieces.append(jnp.zeros((B, K - used), f32))
    out_ref[0] = jnp.concatenate(pieces, axis=-1)


# ----------------------------------------------------------------------------
# Host-side parameter fusion (stacked per-modality weights, done once)
# ----------------------------------------------------------------------------
def _block_diag(blocks):
    rows = sum(b.shape[0] for b in blocks)
    cols = sum(b.shape[1] for b in blocks)
    out = jnp.zeros((rows, cols), jnp.float32)
    r = c = 0
    for b in blocks:
        out = out.at[r:r + b.shape[0], c:c + b.shape[1]].set(b)
        r += b.shape[0]
        c += b.shape[1]
    return out


def prepare_fused_params(params):
    fp = {}
    fp["w_dense"] = _block_diag([params["dense_t"]["w_t"],
                                 params["dense_v"]["w_t"],
                                 params["dense_a"]["w_t"]])
    fp["b_dense"] = jnp.concatenate([params["dense_t"]["b"],
                                     params["dense_v"]["b"],
                                     params["dense_a"]["b"]])[None, :]
    for tag, names in (("g", ("g_cell_t", "g_cell_v", "g_cell_a")),
                       ("p", ("p_cell_t", "p_cell_v", "p_cell_a")),
                       ("e", ("e_cell_t", "e_cell_v", "e_cell_a"))):
        fp["wih_" + tag] = jnp.stack([params[n]["wih_t"] for n in names], axis=0)
        fp["whh_" + tag] = jnp.stack([params[n]["whh_t"] for n in names], axis=0)
        fp["bih_" + tag] = jnp.stack([params[n]["bih"][None, :] for n in names], axis=0)
        fp["bhh_" + tag] = jnp.stack([params[n]["bhh"][None, :] for n in names], axis=0)
    # per-history (D_g, 3) score projections for the 9 SimpleAttention heads
    fp["att_w"] = jnp.stack(
        [jnp.stack([params["simple_att_w"][k, 0, :] for k in _HEADS_PER_HIST[m]],
                   axis=1) for m in range(3)], axis=0)                 # (3, D_g, 3)
    fp["sa_w"] = jnp.stack([params["sa1"]["w"], params["sa2"]["w"],
                            params["sa3"]["w"]], axis=0)               # (3, 1, D_g)
    fp["sa_b"] = jnp.stack([params["sa1"]["b"], params["sa2"]["b"],
                            params["sa3"]["b"]], axis=0)[:, :, None]   # (3, 1, 1)
    fp["wd"] = jnp.stack([params["dense1"]["w_t"], params["dense2"]["w_t"],
                          params["dense3"]["w_t"]], axis=0)            # (3, 3*D_g, D_g)
    fp["bd"] = jnp.stack([params["dense1"]["b"][None, :],
                          params["dense2"]["b"][None, :],
                          params["dense3"]["b"][None, :]], axis=0)     # (3, 1, D_g)
    return fp


# ----------------------------------------------------------------------------
# Wrapper: ONE pallas_call per sequence direction (weight-resident scan)
# ----------------------------------------------------------------------------
def dialogue_rnn_tri_scan(fused, Ut, Uv, Ua, qmask):
    """Full forward scan of the tri-modal DialogueRNN (one direction).

    Ut/Uv/Ua: (T, B, D_m_*), qmask: (T, B, P) speaker one-hot.
    Returns (g_seq (3,T,B,D_g), q_seq (3,T,B,P,D_p), e_seq (3,T,B,D_e),
             alpha_seq (T,B,T) — row t has t valid columns, zeros elsewhere).
    """
    T, B, _ = Ut.shape
    P = qmask.shape[-1]
    D_m = fused["b_dense"].shape[-1] // 3
    D_g = fused["whh_g"].shape[1]
    D_p = fused["whh_p"].shape[1]
    D_e = fused["whh_e"].shape[1]

    # once-per-sequence host precompute (not per step)
    u_cat = jnp.concatenate([Ut, Uv, Ua], axis=-1)                     # (T, B, Din)
    qsel = jax.nn.one_hot(jnp.argmax(qmask, axis=-1), P, dtype=jnp.float32)

    used = 3 * D_g + 3 * P * D_p + 3 * D_e + T
    K = max(_round_up(used, 128), 128)

    weight_names = ("w_dense", "b_dense",
                    "wih_g", "whh_g", "bih_g", "bhh_g",
                    "wih_p", "whh_p", "bih_p", "bhh_p",
                    "wih_e", "whh_e", "bih_e", "bhh_e",
                    "att_w", "sa_w", "sa_b", "wd", "bd")
    weights = [fused[n] for n in weight_names]

    def _step_spec(shape):
        nd = len(shape)

        def idx(t):
            return (t,) + (0,) * (nd - 1)

        return pl.BlockSpec((1,) + tuple(shape[1:]), idx)

    def _const_spec(x):
        nd = x.ndim

        def idx(t):
            return (0,) * nd

        return pl.BlockSpec(x.shape, idx)

    in_specs = [_step_spec(u_cat.shape), _step_spec(qmask.shape),
                _step_spec(qsel.shape)]
    in_specs += [_const_spec(w) for w in weights]

    kernel = functools.partial(_dialogue_tri_scan_kernel,
                               D_m=D_m, D_g=D_g, D_p=D_p, D_e=D_e,
                               B=B, P=P, T=T, K=K)

    slab = pl.pallas_call(
        kernel,
        grid=(T,),
        in_specs=in_specs,
        out_specs=pl.BlockSpec((1, B, K), lambda t: (t, 0, 0)),
        out_shape=jax.ShapeDtypeStruct((T, B, K), jnp.float32),
        scratch_shapes=[pltpu.VMEM((T, 3, B, D_g), jnp.float32),   # g history
                        pltpu.VMEM((3, B, P, D_p), jnp.float32),   # party state q
                        pltpu.VMEM((3, B, D_e), jnp.float32)],     # emotion state e
        compiler_params=pltpu.CompilerParams(
            dimension_semantics=("arbitrary",),        # sequential recurrence
            vmem_limit_bytes=32 * 1024 * 1024),
    )(u_cat, qmask, qsel, *weights)

    # once-per-sequence unpack of the lane-dense slab
    off = 0
    g_seq = jnp.stack([slab[:, :, off + m * D_g: off + (m + 1) * D_g]
                       for m in range(3)], axis=0)
    off += 3 * D_g
    q_seq = jnp.stack([slab[:, :, off + m * P * D_p: off + (m + 1) * P * D_p]
                       .reshape(T, B, P, D_p) for m in range(3)], axis=0)
    off += 3 * P * D_p
    e_seq = jnp.stack([slab[:, :, off + m * D_e: off + (m + 1) * D_e]
                       for m in range(3)], axis=0)
    off += 3 * D_e
    alpha_seq = slab[:, :, off:off + T]
    return g_seq, q_seq, e_seq, alpha_seq


# ----------------------------------------------------------------------------
# Parameter init (deterministic, synthetic)
# ----------------------------------------------------------------------------
def init_params(key, D_m_T, D_m_V, D_m_A, D_m, D_g, D_p, D_e):
    keys = iter(jax.random.split(key, 64))

    def lin(din, dout):
        return {"w_t": 0.1 * jax.random.normal(next(keys), (din, dout), jnp.float32),
                "b": 0.1 * jax.random.normal(next(keys), (dout,), jnp.float32)}

    def gru(din, dh):
        return {"wih_t": 0.1 * jax.random.normal(next(keys), (din, 3 * dh), jnp.float32),
                "whh_t": 0.1 * jax.random.normal(next(keys), (dh, 3 * dh), jnp.float32),
                "bih": 0.1 * jax.random.normal(next(keys), (3 * dh,), jnp.float32),
                "bhh": 0.1 * jax.random.normal(next(keys), (3 * dh,), jnp.float32)}

    def sa():
        return {"w": 0.1 * jax.random.normal(next(keys), (1, D_g), jnp.float32),
                "b": 0.1 * jax.random.normal(next(keys), (1,), jnp.float32)}

    return {
        "dense_t": lin(D_m_T, D_m), "dense_a": lin(D_m_A, D_m), "dense_v": lin(D_m_V, D_m),
        "g_cell_t": gru(D_m + D_p, D_g), "p_cell_t": gru(D_m + D_g, D_p), "e_cell_t": gru(D_p, D_e),
        "g_cell_a": gru(D_m + D_p, D_g), "p_cell_a": gru(D_m + D_g, D_p), "e_cell_a": gru(D_p, D_e),
        "g_cell_v": gru(D_m + D_p, D_g), "p_cell_v": gru(D_m + D_g, D_p), "e_cell_v": gru(D_p, D_e),
        "simple_att_w": 0.1 * jax.random.normal(next(keys), (9, 1, D_g), jnp.float32),
        "sa1": sa(), "sa2": sa(), "sa3": sa(),
        "dense1": lin(3 * D_g, D_g), "dense2": lin(3 * D_g, D_g), "dense3": lin(3 * D_g, D_g),
        # self.self_attention and self.l_cell are unused in forward (listener_state=False)
    }


# ----------------------------------------------------------------------------
# Plain-JAX per-step reference (validation only)
# ----------------------------------------------------------------------------
def _reference_cell(params, Ut, Uv, Ua, qmask,
                    g_hist_t, g_hist_v, g_hist_a,
                    q0_t, q0_v, q0_a, e0_t, e0_v, e0_a):
    B, P = qmask.shape
    D_g = params["g_cell_t"]["whh_t"].shape[0]
    D_p = params["p_cell_t"]["whh_t"].shape[0]
    D_e = params["e_cell_t"]["whh_t"].shape[0]

    def linear(x, p):
        return x @ p["w_t"] + p["b"]

    def gru(x, h, p):
        H = h.shape[1]
        gx = x @ p["wih_t"] + p["bih"]
        gh = h @ p["whh_t"] + p["bhh"]
        r = jax.nn.sigmoid(gx[:, :H] + gh[:, :H])
        z = jax.nn.sigmoid(gx[:, H:2 * H] + gh[:, H:2 * H])
        n = jnp.tanh(gx[:, 2 * H:] + r * gh[:, 2 * H:])
        return (1.0 - z) * n + z * h

    def simple_att(M, w):
        a = jax.nn.softmax(jnp.sum(M * w, axis=-1), axis=0)        # (T, B)
        return jnp.sum(a[:, :, None] * M, axis=0), a

    def self_att_dense(c0, c1, c2, sa, dn):
        parts = []
        for cc in (c0, c1, c2):
            scale = cc @ sa["w"].T + sa["b"]
            alp = jax.nn.softmax(scale, axis=0)
            parts.append((alp + 1.0) * cc)
        return jnp.concatenate(parts, axis=-1) @ dn["w_t"] + dn["b"]

    Ut = linear(Ut, params["dense_t"])
    Ua = linear(Ua, params["dense_a"])
    Uv = linear(Uv, params["dense_v"])

    qm_idx = jnp.argmax(qmask, axis=1)

    def sel(X):
        return jnp.take_along_axis(X, qm_idx[:, None, None], axis=1)[:, 0, :]

    def hist_last(h):
        return h[-1] if h.shape[0] else jnp.zeros((B, D_g), jnp.float32)

    g_t = gru(jnp.concatenate([Ut, sel(q0_t)], 1), hist_last(g_hist_t), params["g_cell_t"])
    g_v = gru(jnp.concatenate([Uv, sel(q0_v)], 1), hist_last(g_hist_v), params["g_cell_v"])
    g_a = gru(jnp.concatenate([Ua, sel(q0_a)], 1), hist_last(g_hist_a), params["g_cell_a"])

    if g_hist_t.shape[0] == 0:
        c_t = c_a = c_v = jnp.zeros((B, D_g), jnp.float32)
        alpha = None
    else:
        hists = [g_hist_t, g_hist_v, g_hist_a, g_hist_t, g_hist_a,
                 g_hist_t, g_hist_v, g_hist_a, g_hist_v]
        pa = [simple_att(hists[k], params["simple_att_w"][k]) for k in range(9)]
        pools = [x[0] for x in pa]
        alpha = sum(x[1] for x in pa).T[:, None, :]
        c_t = self_att_dense(pools[0], pools[4], pools[6], params["sa1"], params["dense1"])
        c_a = self_att_dense(pools[2], pools[3], pools[8], params["sa2"], params["dense2"])
        c_v = self_att_dense(pools[1], pools[5], pools[7], params["sa3"], params["dense3"])

    def rnn_cell(U, c_, q0, e0, pp, ep):
        Uc = jnp.concatenate([U, c_], axis=1)
        Uc_exp = jnp.broadcast_to(Uc[:, None, :], (B, P, Uc.shape[1])).reshape(B * P, -1)
        qs = gru(Uc_exp, q0.reshape(B * P, D_p), pp).reshape(B, P, D_p)
        q_ = q0 * (1.0 - qmask[:, :, None]) + qs * qmask[:, :, None]
        e0_ = jnp.zeros((B, D_e), jnp.float32) if e0.shape[0] == 0 else e0
        e_ = gru(sel(q_), e0_, ep)
        return q_, e_

    q_t, e_t = rnn_cell(Ut, c_t, q0_t, e0_t, params["p_cell_t"], params["e_cell_t"])
    q_a, e_a = rnn_cell(Ua, c_a, q0_a, e0_a, params["p_cell_a"], params["e_cell_a"])
    q_v, e_v = rnn_cell(Uv, c_v, q0_v, e0_v, params["p_cell_v"], params["e_cell_v"])
    return g_t, q_t, e_t, g_v, q_v, e_v, g_a, q_a, e_a, alpha


# ----------------------------------------------------------------------------
if __name__ == "__main__":
    B, P, T = 4, 2, 6
    D_m_T, D_m_V, D_m_A = 12, 20, 16
    D_m, D_g, D_p, D_e = 32, 32, 32, 32

    key = jax.random.PRNGKey(0)
    k_param, k_in = jax.random.split(key)
    params = init_params(k_param, D_m_T, D_m_V, D_m_A, D_m, D_g, D_p, D_e)
    fused = prepare_fused_params(params)

    ks = jax.random.split(k_in, 4)
    Ut = jax.random.normal(ks[0], (T, B, D_m_T), jnp.float32)
    Uv = jax.random.normal(ks[1], (T, B, D_m_V), jnp.float32)
    Ua = jax.random.normal(ks[2], (T, B, D_m_A), jnp.float32)
    qmask = jax.nn.one_hot(jax.random.randint(ks[3], (T, B), 0, P), P,
                           dtype=jnp.float32)

    scan = jax.jit(dialogue_rnn_tri_scan)
    g_seq, q_seq, e_seq, alpha_seq = jax.block_until_ready(
        scan(fused, Ut, Uv, Ua, qmask))

    # ---- validate the in-kernel scan against the per-step plain-JAX reference
    hist = [jnp.zeros((0, B, D_g), jnp.float32) for _ in range(3)]
    q_st = [jnp.zeros((B, P, D_p), jnp.float32) for _ in range(3)]
    e_st = [jnp.zeros((B, D_e), jnp.float32) for _ in range(3)]
    tol = dict(rtol=2e-2, atol=2e-2)
    for t in range(T):
        (g_t, q_t, e_t, g_v, q_v, e_v, g_a, q_a, e_a, alpha) = _reference_cell(
            params, Ut[t], Uv[t], Ua[t], qmask[t],
            hist[0], hist[1], hist[2],
            q_st[0], q_st[1], q_st[2], e_st[0], e_st[1], e_st[2])
        ref_g = (g_t, g_v, g_a)
        ref_q = (q_t, q_v, q_a)
        ref_e = (e_t, e_v, e_a)
        for m in range(3):
            np.testing.assert_allclose(np.asarray(g_seq[m, t]), np.asarray(ref_g[m]),
                                       err_msg=f"g[{m}] step {t}", **tol)
            np.testing.assert_allclose(np.asarray(q_seq[m, t]), np.asarray(ref_q[m]),
                                       err_msg=f"q[{m}] step {t}", **tol)
            np.testing.assert_allclose(np.asarray(e_seq[m, t]), np.asarray(ref_e[m]),
                                       err_msg=f"e[{m}] step {t}", **tol)
        if t == 0:
            np.testing.assert_allclose(np.asarray(alpha_seq[0]), 0.0, atol=1e-6,
                                       err_msg="alpha step 0")
        else:
            np.testing.assert_allclose(np.asarray(alpha_seq[t, :, :t]),
                                       np.asarray(alpha[:, 0, :]),
                                       err_msg=f"alpha step {t}", **tol)
        hist = [jnp.concatenate([hist[m], ref_g[m][None]], axis=0) for m in range(3)]
        q_st = list(ref_q)
        e_st = list(ref_e)

    print("KERNEL_OK")
</pallas_src>

<mosaic_0001>
module attributes {stable_mosaic.version = 11 : i64} {
  func.func @_dialogue_tri_scan_kernel(%arg0: i32, %arg1: memref<1x4x48xf32, #tpu.memory_space<vmem>>, %arg2: memref<1x4x2xf32, #tpu.memory_space<vmem>>, %arg3: memref<1x4x2xf32, #tpu.memory_space<vmem>>, %arg4: memref<48x96xf32, #tpu.memory_space<vmem>>, %arg5: memref<1x96xf32, #tpu.memory_space<vmem>>, %arg6: memref<3x64x96xf32, #tpu.memory_space<vmem>>, %arg7: memref<3x32x96xf32, #tpu.memory_space<vmem>>, %arg8: memref<3x1x96xf32, #tpu.memory_space<vmem>>, %arg9: memref<3x1x96xf32, #tpu.memory_space<vmem>>, %arg10: memref<3x64x96xf32, #tpu.memory_space<vmem>>, %arg11: memref<3x32x96xf32, #tpu.memory_space<vmem>>, %arg12: memref<3x1x96xf32, #tpu.memory_space<vmem>>, %arg13: memref<3x1x96xf32, #tpu.memory_space<vmem>>, %arg14: memref<3x32x96xf32, #tpu.memory_space<vmem>>, %arg15: memref<3x32x96xf32, #tpu.memory_space<vmem>>, %arg16: memref<3x1x96xf32, #tpu.memory_space<vmem>>, %arg17: memref<3x1x96xf32, #tpu.memory_space<vmem>>, %arg18: memref<3x32x3xf32, #tpu.memory_space<vmem>>, %arg19: memref<3x1x32xf32, #tpu.memory_space<vmem>>, %arg20: memref<3x1x1xf32, #tpu.memory_space<vmem>>, %arg21: memref<3x96x32xf32, #tpu.memory_space<vmem>>, %arg22: memref<3x1x32xf32, #tpu.memory_space<vmem>>, %arg23: memref<1x4x512xf32, #tpu.memory_space<vmem>>, %arg24: memref<6x3x4x32xf32, #tpu.memory_space<vmem>>, %arg25: memref<3x4x2x32xf32, #tpu.memory_space<vmem>>, %arg26: memref<3x4x32xf32, #tpu.memory_space<vmem>>) attributes {dimension_semantics = [#tpu.dimension_semantics<arbitrary>], iteration_bounds = array<i64: 6>, scalar_prefetch = 0 : i64, scratch_operands = 3 : i64, tpu.core_type = #tpu.core_type<tc>, window_params = [{transform_indices = @transform_0, window_bounds = array<i64: 1, 4, 48>}, {transform_indices = @transform_1, window_bounds = array<i64: 1, 4, 2>}, {transform_indices = @transform_2, window_bounds = array<i64: 1, 4, 2>}, {pipeline_mode = #tpu.pipeline_mode<synchronous>, transform_indices = @transform_3, window_bounds = array<i64: 48, 96>}, {pipeline_mode = #tpu.pipeline_mode<synchronous>, transform_indices = @transform_4, window_bounds = array<i64: 1, 96>}, {pipeline_mode = #tpu.pipeline_mode<synchronous>, transform_indices = @transform_5, window_bounds = array<i64: 3, 64, 96>}, {pipeline_mode = #tpu.pipeline_mode<synchronous>, transform_indices = @transform_6, window_bounds = array<i64: 3, 32, 96>}, {pipeline_mode = #tpu.pipeline_mode<synchronous>, transform_indices = @transform_7, window_bounds = array<i64: 3, 1, 96>}, {pipeline_mode = #tpu.pipeline_mode<synchronous>, transform_indices = @transform_8, window_bounds = array<i64: 3, 1, 96>}, {pipeline_mode = #tpu.pipeline_mode<synchronous>, transform_indices = @transform_9, window_bounds = array<i64: 3, 64, 96>}, {pipeline_mode = #tpu.pipeline_mode<synchronous>, transform_indices = @transform_10, window_bounds = array<i64: 3, 32, 96>}, {pipeline_mode = #tpu.pipeline_mode<synchronous>, transform_indices = @transform_11, window_bounds = array<i64: 3, 1, 96>}, {pipeline_mode = #tpu.pipeline_mode<synchronous>, transform_indices = @transform_12, window_bounds = array<i64: 3, 1, 96>}, {pipeline_mode = #tpu.pipeline_mode<synchronous>, transform_indices = @transform_13, window_bounds = array<i64: 3, 32, 96>}, {pipeline_mode = #tpu.pipeline_mode<synchronous>, transform_indices = @transform_14, window_bounds = array<i64: 3, 32, 96>}, {pipeline_mode = #tpu.pipeline_mode<synchronous>, transform_indices = @transform_15, window_bounds = array<i64: 3, 1, 96>}, {pipeline_mode = #tpu.pipeline_mode<synchronous>, transform_indices = @transform_16, window_bounds = array<i64: 3, 1, 96>}, {pipeline_mode = #tpu.pipeline_mode<synchronous>, transform_indices = @transform_17, window_bounds = array<i64: 3, 32, 3>}, {pipeline_mode = #tpu.pipeline_mode<synchronous>, transform_indices = @transform_18, window_bounds = array<i64: 3, 1, 32>}, {pipeline_mode = #tpu.pipeline_mode<synchronous>, transform_indices = @transform_19, window_bounds = array<i64: 3, 1, 1>}, {pipeline_mode = #tpu.pipeline_mode<synchronous>, transform_indices = @transform_20, window_bounds = array<i64: 3, 96, 32>}, {pipeline_mode = #tpu.pipeline_mode<synchronous>, transform_indices = @transform_21, window_bounds = array<i64: 3, 1, 32>}, {transform_indices = @transform_22, window_bounds = array<i64: 1, 4, 512>}]} {
    %c0_i32 = arith.constant 0 : i32
    %0 = arith.cmpi eq, %arg0, %c0_i32 : i32
    %1 = arith.extui %0 : i1 to i32
    %c0_i32_0 = arith.constant 0 : i32
    %2 = arith.cmpi ne, %1, %c0_i32_0 : i32
    scf.if %2 {
      %cst_338 = arith.constant 0.000000e+00 : f32
      %963 = vector.broadcast %cst_338 : f32 to vector<6x3x4x32xf32>
      %c0_339 = arith.constant 0 : index
      %c0_340 = arith.constant 0 : index
      %c0_341 = arith.constant 0 : index
      %c0_342 = arith.constant 0 : index
      %964 = vector.load %arg24[%c0_339, %c0_340, %c0_341, %c0_342] : memref<6x3x4x32xf32, #tpu.memory_space<vmem>>, vector<6x3x4x32xf32>
      tpu.vector_store %arg24[%c0_339, %c0_340, %c0_341, %c0_342], %963 {strides = array<i32>} : memref<6x3x4x32xf32, #tpu.memory_space<vmem>>, vector<6x3x4x32xf32>,
      %cst_343 = arith.constant 0.000000e+00 : f32
      %965 = vector.broadcast %cst_343 : f32 to vector<3x4x2x32xf32>
      %c0_344 = arith.constant 0 : index
      %c0_345 = arith.constant 0 : index
      %c0_346 = arith.constant 0 : index
      %c0_347 = arith.constant 0 : index
      %966 = vector.load %arg25[%c0_344, %c0_345, %c0_346, %c0_347] : memref<3x4x2x32xf32, #tpu.memory_space<vmem>>, vector<3x4x2x32xf32>
      tpu.vector_store %arg25[%c0_344, %c0_345, %c0_346, %c0_347], %965 {strides = array<i32>} : memref<3x4x2x32xf32, #tpu.memory_space<vmem>>, vector<3x4x2x32xf32>,
      %cst_348 = arith.constant 0.000000e+00 : f32
      %967 = vector.broadcast %cst_348 : f32 to vector<3x4x32xf32>
      %c0_349 = arith.constant 0 : index
      %c0_350 = arith.constant 0 : index
      %c0_351 = arith.constant 0 : index
      %968 = vector.load %arg26[%c0_349, %c0_350, %c0_351] : memref<3x4x32xf32, #tpu.memory_space<vmem>>, vector<3x4x32xf32>
      tpu.vector_store %arg26[%c0_349, %c0_350, %c0_351], %967 {strides = array<i32>} : memref<3x4x32xf32, #tpu.memory_space<vmem>>, vector<3x4x32xf32>,
    } else {
    }
    %c0 = arith.constant 0 : index
    %c0_1 = arith.constant 0 : index
    %c0_2 = arith.constant 0 : index
    %3 = vector.load %arg2[%c0, %c0_1, %c0_2] : memref<1x4x2xf32, #tpu.memory_space<vmem>>, vector<1x4x2xf32>
    %4 = vector.shape_cast %3 : vector<1x4x2xf32> to vector<4x2xf32>
    %c0_3 = arith.constant 0 : index
    %c0_4 = arith.constant 0 : index
    %c0_5 = arith.constant 0 : index
    %5 = vector.load %arg3[%c0_3, %c0_4, %c0_5] : memref<1x4x2xf32, #tpu.memory_space<vmem>>, vector<1x4x2xf32>
    %6 = vector.shape_cast %5 : vector<1x4x2xf32> to vector<4x2xf32>
    %c0_6 = arith.constant 0 : index
    %c0_7 = arith.constant 0 : index
    %c0_8 = arith.constant 0 : index
    %c0_9 = arith.constant 0 : index
    %7 = vector.load %arg25[%c0_6, %c0_7, %c0_8, %c0_9] : memref<3x4x2x32xf32, #tpu.memory_space<vmem>>, vector<3x4x2x32xf32>
    %c0_10 = arith.constant 0 : index
    %c0_11 = arith.constant 0 : index
    %c0_12 = arith.constant 0 : index
    %8 = vector.load %arg26[%c0_10, %c0_11, %c0_12] : memref<3x4x32xf32, #tpu.memory_space<vmem>>, vector<3x4x32xf32>
    %c1_i32 = arith.constant 1 : i32
    %9 = arith.subi %arg0, %c1_i32 : i32
    %c0_i32_13 = arith.constant 0 : i32
    %10 = arith.maxsi %9, %c0_i32_13 : i32
    %11 = arith.index_cast %10 : i32 to index
    %c0_14 = arith.constant 0 : index
    %c0_15 = arith.constant 0 : index
    %c0_16 = arith.constant 0 : index
    %12 = vector.load %arg24[%11, %c0_14, %c0_15, %c0_16] : memref<6x3x4x32xf32, #tpu.memory_space<vmem>>, vector<1x3x4x32xf32>
    %13 = vector.shape_cast %12 : vector<1x3x4x32xf32> to vector<3x4x32xf32>
    %c0_17 = arith.constant 0 : index
    %c0_18 = arith.constant 0 : index
    %c0_19 = arith.constant 0 : index
    %14 = vector.load %arg1[%c0_17, %c0_18, %c0_19] : memref<1x4x48xf32, #tpu.memory_space<vmem>>, vector<1x4x48xf32>
    %15 = vector.shape_cast %14 : vector<1x4x48xf32> to vector<4x48xf32>
    %c0_20 = arith.constant 0 : index
    %c0_21 = arith.constant 0 : index
    %16 = vector.load %arg4[%c0_20, %c0_21] : memref<48x96xf32, #tpu.memory_space<vmem>>, vector<48x96xf32>
    %cst = arith.constant dense<0.000000e+00> : vector<4x96xf32>
    %17 = tpu.matmul %15, %16, %cst {dimension_numbers = #tpu.dot_dimension_numbers<[1], [0], [0], [1], [0, 0, 1, 1], [], []>} : vector<4x48xf32>, vector<48x96xf32>, vector<4x96xf32> -> vector<4x96xf32>
    %c0_22 = arith.constant 0 : index
    %c0_23 = arith.constant 0 : index
    %18 = vector.load %arg5[%c0_22, %c0_23] : memref<1x96xf32, #tpu.memory_space<vmem>>, vector<1x96xf32>
    %19 = vector.broadcast %18 : vector<1x96xf32> to vector<4x96xf32>
    %20 = arith.addf %17, %19 : vector<4x96xf32>
    %21 = vector.extract_strided_slice %20 {offsets = [0, 0], sizes = [4, 32], strides = [1, 1]} : vector<4x96xf32> to vector<4x32xf32>
    %22 = vector.extract_strided_slice %20 {offsets = [0, 32], sizes = [4, 32], strides = [1, 1]} : vector<4x96xf32> to vector<4x32xf32>
    %23 = vector.extract_strided_slice %20 {offsets = [0, 64], sizes = [4, 32], strides = [1, 1]} : vector<4x96xf32> to vector<4x32xf32>
    %24 = vector.shape_cast %6 : vector<4x2xf32> to vector<4x2x1xf32>
    %25 = vector.extract_strided_slice %7 {offsets = [0, 0, 0, 0], sizes = [1, 4, 2, 32], strides = [1, 1, 1, 1]} : vector<3x4x2x32xf32> to vector<1x4x2x32xf32>
    %26 = vector.shape_cast %25 : vector<1x4x2x32xf32> to vector<4x2x32xf32>
    %27 = vector.broadcast %24 : vector<4x2x1xf32> to vector<4x2x32xf32>
    %28 = arith.mulf %27, %26 : vector<4x2x32xf32>
    %cst_24 = arith.constant dense<0.000000e+00> : vector<4x32xf32>
    %29 = vector.multi_reduction <add>, %28, %cst_24 [1] : vector<4x2x32xf32> to vector<4x32xf32>
    %30 = tpu.concatenate %21, %29 in 1 : vector<4x32xf32>, vector<4x32xf32> -> vector<4x64xf32>
    %c0_25 = arith.constant 0 : index
    %c0_26 = arith.constant 0 : index
    %c0_27 = arith.constant 0 : index
    %31 = vector.load %arg6[%c0_25, %c0_26, %c0_27] : memref<3x64x96xf32, #tpu.memory_space<vmem>>, vector<1x64x96xf32>
    %32 = vector.shape_cast %31 : vector<1x64x96xf32> to vector<64x96xf32>
    %cst_28 = arith.constant dense<0.000000e+00> : vector<4x96xf32>
    %33 = tpu.matmul %30, %32, %cst_28 {dimension_numbers = #tpu.dot_dimension_numbers<[1], [0], [0], [1], [0, 0, 1, 1], [], []>} : vector<4x64xf32>, vector<64x96xf32>, vector<4x96xf32> -> vector<4x96xf32>
    %c0_29 = arith.constant 0 : index
    %c0_30 = arith.constant 0 : index
    %c0_31 = arith.constant 0 : index
    %34 = vector.load %arg8[%c0_29, %c0_30, %c0_31] : memref<3x1x96xf32, #tpu.memory_space<vmem>>, vector<1x1x96xf32>
    %35 = vector.shape_cast %34 : vector<1x1x96xf32> to vector<1x96xf32>
    %36 = vector.broadcast %35 : vector<1x96xf32> to vector<4x96xf32>
    %37 = arith.addf %33, %36 : vector<4x96xf32>
    %38 = vector.extract_strided_slice %13 {offsets = [0, 0, 0], sizes = [1, 4, 32], strides = [1, 1, 1]} : vector<3x4x32xf32> to vector<1x4x32xf32>
    %39 = vector.shape_cast %38 : vector<1x4x32xf32> to vector<4x32xf32>
    %c0_32 = arith.constant 0 : index
    %c0_33 = arith.constant 0 : index
    %c0_34 = arith.constant 0 : index
    %40 = vector.load %arg7[%c0_32, %c0_33, %c0_34] : memref<3x32x96xf32, #tpu.memory_space<vmem>>, vector<1x32x96xf32>
    %41 = vector.shape_cast %40 : vector<1x32x96xf32> to vector<32x96xf32>
    %cst_35 = arith.constant dense<0.000000e+00> : vector<4x96xf32>
    %42 = tpu.matmul %39, %41, %cst_35 {dimension_numbers = #tpu.dot_dimension_numbers<[1], [0], [0], [1], [0, 0, 1, 1], [], []>} : vector<4x32xf32>, vector<32x96xf32>, vector<4x96xf32> -> vector<4x96xf32>
    %c0_36 = arith.constant 0 : index
    %c0_37 = arith.constant 0 : index
    %c0_38 = arith.constant 0 : index
    %43 = vector.load %arg9[%c0_36, %c0_37, %c0_38] : memref<3x1x96xf32, #tpu.memory_space<vmem>>, vector<1x1x96xf32>
    %44 = vector.shape_cast %43 : vector<1x1x96xf32> to vector<1x96xf32>
    %45 = vector.broadcast %44 : vector<1x96xf32> to vector<4x96xf32>
    %46 = arith.addf %42, %45 : vector<4x96xf32>
    %47 = vector.extract_strided_slice %13 {offsets = [0, 0, 0], sizes = [1, 4, 32], strides = [1, 1, 1]} : vector<3x4x32xf32> to vector<1x4x32xf32>
    %48 = vector.shape_cast %47 : vector<1x4x32xf32> to vector<4x32xf32>
    %49 = vector.extract_strided_slice %37 {offsets = [0, 0], sizes = [4, 32], strides = [1, 1]} : vector<4x96xf32> to vector<4x32xf32>
    %50 = vector.extract_strided_slice %46 {offsets = [0, 0], sizes = [4, 32], strides = [1, 1]} : vector<4x96xf32> to vector<4x32xf32>
    %51 = arith.addf %49, %50 : vector<4x32xf32>
    %52 = arith.negf %51 : vector<4x32xf32>
    %53 = math.exp %52 : vector<4x32xf32>
    %cst_39 = arith.constant 1.000000e+00 : f32
    %54 = vector.broadcast %cst_39 : f32 to vector<4x32xf32>
    %55 = arith.addf %54, %53 : vector<4x32xf32>
    %56 = arith.divf %54, %55 : vector<4x32xf32>
    %57 = vector.extract_strided_slice %37 {offsets = [0, 32], sizes = [4, 32], strides = [1, 1]} : vector<4x96xf32> to vector<4x32xf32>
    %58 = vector.extract_strided_slice %46 {offsets = [0, 32], sizes = [4, 32], strides = [1, 1]} : vector<4x96xf32> to vector<4x32xf32>
    %59 = arith.addf %57, %58 : vector<4x32xf32>
    %60 = arith.negf %59 : vector<4x32xf32>
    %61 = math.exp %60 : vector<4x32xf32>
    %cst_40 = arith.constant 1.000000e+00 : f32
    %62 = vector.broadcast %cst_40 : f32 to vector<4x32xf32>
    %63 = arith.addf %62, %61 : vector<4x32xf32>
    %64 = arith.divf %62, %63 : vector<4x32xf32>
    %65 = vector.extract_strided_slice %37 {offsets = [0, 64], sizes = [4, 32], strides = [1, 1]} : vector<4x96xf32> to vector<4x32xf32>
    %66 = vector.extract_strided_slice %46 {offsets = [0, 64], sizes = [4, 32], strides = [1, 1]} : vector<4x96xf32> to vector<4x32xf32>
    %67 = arith.mulf %56, %66 : vector<4x32xf32>
    %68 = arith.addf %65, %67 : vector<4x32xf32>
    %69 = math.tanh %68 : vector<4x32xf32>
    %cst_41 = arith.constant 1.000000e+00 : f32
    %70 = vector.broadcast %cst_41 : f32 to vector<4x32xf32>
    %71 = arith.subf %70, %64 : vector<4x32xf32>
    %72 = arith.mulf %71, %69 : vector<4x32xf32>
    %73 = arith.mulf %64, %48 : vector<4x32xf32>
    %74 = arith.addf %72, %73 : vector<4x32xf32>
    %75 = vector.shape_cast %6 : vector<4x2xf32> to vector<4x2x1xf32>
    %76 = vector.extract_strided_slice %7 {offsets = [1, 0, 0, 0], sizes = [1, 4, 2, 32], strides = [1, 1, 1, 1]} : vector<3x4x2x32xf32> to vector<1x4x2x32xf32>
    %77 = vector.shape_cast %76 : vector<1x4x2x32xf32> to vector<4x2x32xf32>
    %78 = vector.broadcast %75 : vector<4x2x1xf32> to vector<4x2x32xf32>
    %79 = arith.mulf %78, %77 : vector<4x2x32xf32>
    %cst_42 = arith.constant dense<0.000000e+00> : vector<4x32xf32>
    %80 = vector.multi_reduction <add>, %79, %cst_42 [1] : vector<4x2x32xf32> to vector<4x32xf32>
    %81 = tpu.concatenate %22, %80 in 1 : vector<4x32xf32>, vector<4x32xf32> -> vector<4x64xf32>
    %c1 = arith.constant 1 : index
    %c0_43 = arith.constant 0 : index
    %c0_44 = arith.constant 0 : index
    %82 = vector.load %arg6[%c1, %c0_43, %c0_44] : memref<3x64x96xf32, #tpu.memory_space<vmem>>, vector<1x64x96xf32>
    %83 = vector.shape_cast %82 : vector<1x64x96xf32> to vector<64x96xf32>
    %cst_45 = arith.constant dense<0.000000e+00> : vector<4x96xf32>
    %84 = tpu.matmul %81, %83, %cst_45 {dimension_numbers = #tpu.dot_dimension_numbers<[1], [0], [0], [1], [0, 0, 1, 1], [], []>} : vector<4x64xf32>, vector<64x96xf32>, vector<4x96xf32> -> vector<4x96xf32>
    %c1_46 = arith.constant 1 : index
    %c0_47 = arith.constant 0 : index
    %c0_48 = arith.constant 0 : index
    %85 = vector.load %arg8[%c1_46, %c0_47, %c0_48] : memref<3x1x96xf32, #tpu.memory_space<vmem>>, vector<1x1x96xf32>
    %86 = vector.shape_cast %85 : vector<1x1x96xf32> to vector<1x96xf32>
    %87 = vector.broadcast %86 : vector<1x96xf32> to vector<4x96xf32>
    %88 = arith.addf %84, %87 : vector<4x96xf32>
    %89 = vector.extract_strided_slice %13 {offsets = [1, 0, 0], sizes = [1, 4, 32], strides = [1, 1, 1]} : vector<3x4x32xf32> to vector<1x4x32xf32>
    %90 = vector.shape_cast %89 : vector<1x4x32xf32> to vector<4x32xf32>
    %c1_49 = arith.constant 1 : index
    %c0_50 = arith.constant 0 : index
    %c0_51 = arith.constant 0 : index
    %91 = vector.load %arg7[%c1_49, %c0_50, %c0_51] : memref<3x32x96xf32, #tpu.memory_space<vmem>>, vector<1x32x96xf32>
    %92 = vector.shape_cast %91 : vector<1x32x96xf32> to vector<32x96xf32>
    %cst_52 = arith.constant dense<0.000000e+00> : vector<4x96xf32>
    %93 = tpu.matmul %90, %92, %cst_52 {dimension_numbers = #tpu.dot_dimension_numbers<[1], [0], [0], [1], [0, 0, 1, 1], [], []>} : vector<4x32xf32>, vector<32x96xf32>, vector<4x96xf32> -> vector<4x96xf32>
    %c1_53 = arith.constant 1 : index
    %c0_54 = arith.constant 0 : index
    %c0_55 = arith.constant 0 : index
    %94 = vector.load %arg9[%c1_53, %c0_54, %c0_55] : memref<3x1x96xf32, #tpu.memory_space<vmem>>, vector<1x1x96xf32>
    %95 = vector.shape_cast %94 : vector<1x1x96xf32> to vector<1x96xf32>
    %96 = vector.broadcast %95 : vector<1x96xf32> to vector<4x96xf32>
    %97 = arith.addf %93, %96 : vector<4x96xf32>
    %98 = vector.extract_strided_slice %13 {offsets = [1, 0, 0], sizes = [1, 4, 32], strides = [1, 1, 1]} : vector<3x4x32xf32> to vector<1x4x32xf32>
    %99 = vector.shape_cast %98 : vector<1x4x32xf32> to vector<4x32xf32>
    %100 = vector.extract_strided_slice %88 {offsets = [0, 0], sizes = [4, 32], strides = [1, 1]} : vector<4x96xf32> to vector<4x32xf32>
    %101 = vector.extract_strided_slice %97 {offsets = [0, 0], sizes = [4, 32], strides = [1, 1]} : vector<4x96xf32> to vector<4x32xf32>
    %102 = arith.addf %100, %101 : vector<4x32xf32>
    %103 = arith.negf %102 : vector<4x32xf32>
    %104 = math.exp %103 : vector<4x32xf32>
    %cst_56 = arith.constant 1.000000e+00 : f32
    %105 = vector.broadcast %cst_56 : f32 to vector<4x32xf32>
    %106 = arith.addf %105, %104 : vector<4x32xf32>
    %107 = arith.divf %105, %106 : vector<4x32xf32>
    %108 = vector.extract_strided_slice %88 {offsets = [0, 32], sizes = [4, 32], strides = [1, 1]} : vector<4x96xf32> to vector<4x32xf32>
    %109 = vector.extract_strided_slice %97 {offsets = [0, 32], sizes = [4, 32], strides = [1, 1]} : vector<4x96xf32> to vector<4x32xf32>
    %110 = arith.addf %108, %109 : vector<4x32xf32>
    %111 = arith.negf %110 : vector<4x32xf32>
    %112 = math.exp %111 : vector<4x32xf32>
    %cst_57 = arith.constant 1.000000e+00 : f32
    %113 = vector.broadcast %cst_57 : f32 to vector<4x32xf32>
    %114 = arith.addf %113, %112 : vector<4x32xf32>
    %115 = arith.divf %113, %114 : vector<4x32xf32>
    %116 = vector.extract_strided_slice %88 {offsets = [0, 64], sizes = [4, 32], strides = [1, 1]} : vector<4x96xf32> to vector<4x32xf32>
    %117 = vector.extract_strided_slice %97 {offsets = [0, 64], sizes = [4, 32], strides = [1, 1]} : vector<4x96xf32> to vector<4x32xf32>
    %118 = arith.mulf %107, %117 : vector<4x32xf32>
    %119 = arith.addf %116, %118 : vector<4x32xf32>
    %120 = math.tanh %119 : vector<4x32xf32>
    %cst_58 = arith.constant 1.000000e+00 : f32
    %121 = vector.broadcast %cst_58 : f32 to vector<4x32xf32>
    %122 = arith.subf %121, %115 : vector<4x32xf32>
    %123 = arith.mulf %122, %120 : vector<4x32xf32>
    %124 = arith.mulf %115, %99 : vector<4x32xf32>
    %125 = arith.addf %123, %124 : vector<4x32xf32>
    %126 = vector.shape_cast %6 : vector<4x2xf32> to vector<4x2x1xf32>
    %127 = vector.extract_strided_slice %7 {offsets = [2, 0, 0, 0], sizes = [1, 4, 2, 32], strides = [1, 1, 1, 1]} : vector<3x4x2x32xf32> to vector<1x4x2x32xf32>
    %128 = vector.shape_cast %127 : vector<1x4x2x32xf32> to vector<4x2x32xf32>
    %129 = vector.broadcast %126 : vector<4x2x1xf32> to vector<4x2x32xf32>
    %130 = arith.mulf %129, %128 : vector<4x2x32xf32>
    %cst_59 = arith.constant dense<0.000000e+00> : vector<4x32xf32>
    %131 = vector.multi_reduction <add>, %130, %cst_59 [1] : vector<4x2x32xf32> to vector<4x32xf32>
    %132 = tpu.concatenate %23, %131 in 1 : vector<4x32xf32>, vector<4x32xf32> -> vector<4x64xf32>
    %c2 = arith.constant 2 : index
    %c0_60 = arith.constant 0 : index
    %c0_61 = arith.constant 0 : index
    %133 = vector.load %arg6[%c2, %c0_60, %c0_61] : memref<3x64x96xf32, #tpu.memory_space<vmem>>, vector<1x64x96xf32>
    %134 = vector.shape_cast %133 : vector<1x64x96xf32> to vector<64x96xf32>
    %cst_62 = arith.constant dense<0.000000e+00> : vector<4x96xf32>
    %135 = tpu.matmul %132, %134, %cst_62 {dimension_numbers = #tpu.dot_dimension_numbers<[1], [0], [0], [1], [0, 0, 1, 1], [], []>} : vector<4x64xf32>, vector<64x96xf32>, vector<4x96xf32> -> vector<4x96xf32>
    %c2_63 = arith.constant 2 : index
    %c0_64 = arith.constant 0 : index
    %c0_65 = arith.constant 0 : index
    %136 = vector.load %arg8[%c2_63, %c0_64, %c0_65] : memref<3x1x96xf32, #tpu.memory_space<vmem>>, vector<1x1x96xf32>
    %137 = vector.shape_cast %136 : vector<1x1x96xf32> to vector<1x96xf32>
    %138 = vector.broadcast %137 : vector<1x96xf32> to vector<4x96xf32>
    %139 = arith.addf %135, %138 : vector<4x96xf32>
    %140 = vector.extract_strided_slice %13 {offsets = [2, 0, 0], sizes = [1, 4, 32], strides = [1, 1, 1]} : vector<3x4x32xf32> to vector<1x4x32xf32>
    %141 = vector.shape_cast %140 : vector<1x4x32xf32> to vector<4x32xf32>
    %c2_66 = arith.constant 2 : index
    %c0_67 = arith.constant 0 : index
    %c0_68 = arith.constant 0 : index
    %142 = vector.load %arg7[%c2_66, %c0_67, %c0_68] : memref<3x32x96xf32, #tpu.memory_space<vmem>>, vector<1x32x96xf32>
    %143 = vector.shape_cast %142 : vector<1x32x96xf32> to vector<32x96xf32>
    %cst_69 = arith.constant dense<0.000000e+00> : vector<4x96xf32>
    %144 = tpu.matmul %141, %143, %cst_69 {dimension_numbers = #tpu.dot_dimension_numbers<[1], [0], [0], [1], [0, 0, 1, 1], [], []>} : vector<4x32xf32>, vector<32x96xf32>, vector<4x96xf32> -> vector<4x96xf32>
    %c2_70 = arith.constant 2 : index
    %c0_71 = arith.constant 0 : index
    %c0_72 = arith.constant 0 : index
    %145 = vector.load %arg9[%c2_70, %c0_71, %c0_72] : memref<3x1x96xf32, #tpu.memory_space<vmem>>, vector<1x1x96xf32>
    %146 = vector.shape_cast %145 : vector<1x1x96xf32> to vector<1x96xf32>
    %147 = vector.broadcast %146 : vector<1x96xf32> to vector<4x96xf32>
    %148 = arith.addf %144, %147 : vector<4x96xf32>
    %149 = vector.extract_strided_slice %13 {offsets = [2, 0, 0], sizes = [1, 4, 32], strides = [1, 1, 1]} : vector<3x4x32xf32> to vector<1x4x32xf32>
    %150 = vector.shape_cast %149 : vector<1x4x32xf32> to vector<4x32xf32>
    %151 = vector.extract_strided_slice %139 {offsets = [0, 0], sizes = [4, 32], strides = [1, 1]} : vector<4x96xf32> to vector<4x32xf32>
    %152 = vector.extract_strided_slice %148 {offsets = [0, 0], sizes = [4, 32], strides = [1, 1]} : vector<4x96xf32> to vector<4x32xf32>
    %153 = arith.addf %151, %152 : vector<4x32xf32>
    %154 = arith.negf %153 : vector<4x32xf32>
    %155 = math.exp %154 : vector<4x32xf32>
    %cst_73 = arith.constant 1.000000e+00 : f32
    %156 = vector.broadcast %cst_73 : f32 to vector<4x32xf32>
    %157 = arith.addf %156, %155 : vector<4x32xf32>
    %158 = arith.divf %156, %157 : vector<4x32xf32>
    %159 = vector.extract_strided_slice %139 {offsets = [0, 32], sizes = [4, 32], strides = [1, 1]} : vector<4x96xf32> to vector<4x32xf32>
    %160 = vector.extract_strided_slice %148 {offsets = [0, 32], sizes = [4, 32], strides = [1, 1]} : vector<4x96xf32> to vector<4x32xf32>
    %161 = arith.addf %159, %160 : vector<4x32xf32>
    %162 = arith.negf %161 : vector<4x32xf32>
    %163 = math.exp %162 : vector<4x32xf32>
    %cst_74 = arith.constant 1.000000e+00 : f32
    %164 = vector.broadcast %cst_74 : f32 to vector<4x32xf32>
    %165 = arith.addf %164, %163 : vector<4x32xf32>
    %166 = arith.divf %164, %165 : vector<4x32xf32>
    %167 = vector.extract_strided_slice %139 {offsets = [0, 64], sizes = [4, 32], strides = [1, 1]} : vector<4x96xf32> to vector<4x32xf32>
    %168 = vector.extract_strided_slice %148 {offsets = [0, 64], sizes = [4, 32], strides = [1, 1]} : vector<4x96xf32> to vector<4x32xf32>
    %169 = arith.mulf %158, %168 : vector<4x32xf32>
    %170 = arith.addf %167, %169 : vector<4x32xf32>
    %171 = math.tanh %170 : vector<4x32xf32>
    %cst_75 = arith.constant 1.000000e+00 : f32
    %172 = vector.broadcast %cst_75 : f32 to vector<4x32xf32>
    %173 = arith.subf %172, %166 : vector<4x32xf32>
    %174 = arith.mulf %173, %171 : vector<4x32xf32>
    %175 = arith.mulf %166, %150 : vector<4x32xf32>
    %176 = arith.addf %174, %175 : vector<4x32xf32>
    %177 = vector.shape_cast %74 : vector<4x32xf32> to vector<1x4x32xf32>
    %178 = vector.shape_cast %125 : vector<4x32xf32> to vector<1x4x32xf32>
    %179 = vector.shape_cast %176 : vector<4x32xf32> to vector<1x4x32xf32>
    %180 = tpu.concatenate %177, %178, %179 in 0 : vector<1x4x32xf32>, vector<1x4x32xf32>, vector<1x4x32xf32> -> vector<3x4x32xf32>
    %181 = arith.index_cast %arg0 : i32 to index
    %c0_76 = arith.constant 0 : index
    %c0_77 = arith.constant 0 : index
    %c0_78 = arith.constant 0 : index
    %182 = vector.load %arg24[%181, %c0_76, %c0_77, %c0_78] : memref<6x3x4x32xf32, #tpu.memory_space<vmem>>, vector<1x3x4x32xf32>
    %183 = vector.shape_cast %182 : vector<1x3x4x32xf32> to vector<3x4x32xf32>
    %184 = vector.shape_cast %180 : vector<3x4x32xf32> to vector<1x3x4x32xf32>
    tpu.vector_store %arg24[%181, %c0_76, %c0_77, %c0_78], %184 {strides = array<i32>} : memref<6x3x4x32xf32, #tpu.memory_space<vmem>>, vector<1x3x4x32xf32>,
    %c0_79 = arith.constant 0 : index
    %c0_80 = arith.constant 0 : index
    %c0_81 = arith.constant 0 : index
    %c0_82 = arith.constant 0 : index
    %185 = vector.load %arg24[%c0_79, %c0_80, %c0_81, %c0_82] : memref<6x3x4x32xf32, #tpu.memory_space<vmem>>, vector<6x3x4x32xf32>
    %186 = tpu.iota {dimensions = array<i32: 0>} : vector<6x4xi32>
    %187 = vector.broadcast %arg0 : i32 to vector<6x4xi32>
    %188 = arith.cmpi slt, %186, %187 : vector<6x4xi32>
    %189 = arith.extui %188 : vector<6x4xi1> to vector<6x4xi32>
    %190 = arith.sitofp %189 : vector<6x4xi32> to vector<6x4xf32>
    %cst_83 = arith.constant 0.000000e+00 : f32
    %191 = vector.broadcast %cst_83 : f32 to vector<6x4xf32>
    %192 = vector.extract_strided_slice %185 {offsets = [0, 0, 0, 0], sizes = [6, 1, 4, 32], strides = [1, 1, 1, 1]} : vector<6x3x4x32xf32> to vector<6x1x4x32xf32>
    %193 = vector.shape_cast %192 : vector<6x1x4x32xf32> to vector<6x4x32xf32>
    %194 = vector.shape_cast %193 : vector<6x4x32xf32> to vector<24x32xf32>
    %c0_84 = arith.constant 0 : index
    %c0_85 = arith.constant 0 : index
    %c0_86 = arith.constant 0 : index
    %195 = vector.load %arg18[%c0_84, %c0_85, %c0_86] : memref<3x32x3xf32, #tpu.memory_space<vmem>>, vector<1x32x3xf32>
    %196 = vector.shape_cast %195 : vector<1x32x3xf32> to vector<32x3xf32>
    %cst_87 = arith.constant dense<0.000000e+00> : vector<24x3xf32>
    %197 = tpu.matmul %194, %196, %cst_87 {dimension_numbers = #tpu.dot_dimension_numbers<[1], [0], [0], [1], [0, 0, 1, 1], [], []>} : vector<24x32xf32>, vector<32x3xf32>, vector<24x3xf32> -> vector<24x3xf32>
    %198 = vector.shape_cast %197 : vector<24x3xf32> to vector<6x4x3xf32>
    %199 = vector.extract_strided_slice %198 {offsets = [0, 0, 0], sizes = [6, 4, 1], strides = [1, 1, 1]} : vector<6x4x3xf32> to vector<6x4x1xf32>
    %200 = vector.shape_cast %199 : vector<6x4x1xf32> to vector<6x4xf32>
    %cst_88 = arith.constant -1.000000e+30 : f32
    %201 = vector.broadcast %cst_88 : f32 to vector<6x4xf32>
    %202 = arith.select %188, %200, %201 : vector<6x4xi1>, vector<6x4xf32>
    %cst_89 = arith.constant dense<0xFF800000> : vector<4xf32>
    %203 = vector.multi_reduction <maximumf>, %202, %cst_89 [0] : vector<6x4xf32> to vector<4xf32>
    %204 = vector.shape_cast %203 : vector<4xf32> to vector<1x4xf32>
    %205 = vector.broadcast %204 : vector<1x4xf32> to vector<6x4xf32>
    %206 = arith.subf %202, %205 : vector<6x4xf32>
    %207 = math.exp %206 : vector<6x4xf32>
    %208 = arith.mulf %207, %190 : vector<6x4xf32>
    %cst_90 = arith.constant dense<0.000000e+00> : vector<4xf32>
    %209 = vector.multi_reduction <add>, %208, %cst_90 [0] : vector<6x4xf32> to vector<4xf32>
    %210 = vector.shape_cast %209 : vector<4xf32> to vector<1x4xf32>
    %cst_91 = arith.constant 1.000000e-30 : f32
    %211 = vector.broadcast %cst_91 : f32 to vector<1x4xf32>
    %212 = arith.maximumf %210, %211 : vector<1x4xf32>
    %213 = vector.broadcast %212 : vector<1x4xf32> to vector<6x4xf32>
    %214 = arith.divf %208, %213 : vector<6x4xf32>
    %215 = vector.shape_cast %214 : vector<6x4xf32> to vector<6x4x1xf32>
    %216 = vector.broadcast %215 : vector<6x4x1xf32> to vector<6x4x32xf32>
    %217 = arith.mulf %216, %193 : vector<6x4x32xf32>
    %cst_92 = arith.constant dense<0.000000e+00> : vector<4x32xf32>
    %218 = vector.multi_reduction <add>, %217, %cst_92 [0] : vector<6x4x32xf32> to vector<4x32xf32>
    %219 = arith.addf %191, %214 : vector<6x4xf32>
    %220 = vector.extract_strided_slice %198 {offsets = [0, 0, 1], sizes = [6, 4, 1], strides = [1, 1, 1]} : vector<6x4x3xf32> to vector<6x4x1xf32>
    %221 = vector.shape_cast %220 : vector<6x4x1xf32> to vector<6x4xf32>
    %cst_93 = arith.constant -1.000000e+30 : f32
    %222 = vector.broadcast %cst_93 : f32 to vector<6x4xf32>
    %223 = arith.select %188, %221, %222 : vector<6x4xi1>, vector<6x4xf32>
    %cst_94 = arith.constant dense<0xFF800000> : vector<4xf32>
    %224 = vector.multi_reduction <maximumf>, %223, %cst_94 [0] : vector<6x4xf32> to vector<4xf32>
    %225 = vector.shape_cast %224 : vector<4xf32> to vector<1x4xf32>
    %226 = vector.broadcast %225 : vector<1x4xf32> to vector<6x4xf32>
    %227 = arith.subf %223, %226 : vector<6x4xf32>
    %228 = math.exp %227 : vector<6x4xf32>
    %229 = arith.mulf %228, %190 : vector<6x4xf32>
    %cst_95 = arith.constant dense<0.000000e+00> : vector<4xf32>
    %230 = vector.multi_reduction <add>, %229, %cst_95 [0] : vector<6x4xf32> to vector<4xf32>
    %231 = vector.shape_cast %230 : vector<4xf32> to vector<1x4xf32>
    %cst_96 = arith.constant 1.000000e-30 : f32
    %232 = vector.broadcast %cst_96 : f32 to vector<1x4xf32>
    %233 = arith.maximumf %231, %232 : vector<1x4xf32>
    %234 = vector.broadcast %233 : vector<1x4xf32> to vector<6x4xf32>
    %235 = arith.divf %229, %234 : vector<6x4xf32>
    %236 = vector.shape_cast %235 : vector<6x4xf32> to vector<6x4x1xf32>
    %237 = vector.broadcast %236 : vector<6x4x1xf32> to vector<6x4x32xf32>
    %238 = arith.mulf %237, %193 : vector<6x4x32xf32>
    %cst_97 = arith.constant dense<0.000000e+00> : vector<4x32xf32>
    %239 = vector.multi_reduction <add>, %238, %cst_97 [0] : vector<6x4x32xf32> to vector<4x32xf32>
    %240 = arith.addf %219, %235 : vector<6x4xf32>
    %241 = vector.extract_strided_slice %198 {offsets = [0, 0, 2], sizes = [6, 4, 1], strides = [1, 1, 1]} : vector<6x4x3xf32> to vector<6x4x1xf32>
    %242 = vector.shape_cast %241 : vector<6x4x1xf32> to vector<6x4xf32>
    %cst_98 = arith.constant -1.000000e+30 : f32
    %243 = vector.broadcast %cst_98 : f32 to vector<6x4xf32>
    %244 = arith.select %188, %242, %243 : vector<6x4xi1>, vector<6x4xf32>
    %cst_99 = arith.constant dense<0xFF800000> : vector<4xf32>
    %245 = vector.multi_reduction <maximumf>, %244, %cst_99 [0] : vector<6x4xf32> to vector<4xf32>
    %246 = vector.shape_cast %245 : vector<4xf32> to vector<1x4xf32>
    %247 = vector.broadcast %246 : vector<1x4xf32> to vector<6x4xf32>
    %248 = arith.subf %244, %247 : vector<6x4xf32>
    %249 = math.exp %248 : vector<6x4xf32>
    %250 = arith.mulf %249, %190 : vector<6x4xf32>
    %cst_100 = arith.constant dense<0.000000e+00> : vector<4xf32>
    %251 = vector.multi_reduction <add>, %250, %cst_100 [0] : vector<6x4xf32> to vector<4xf32>
    %252 = vector.shape_cast %251 : vector<4xf32> to vector<1x4xf32>
    %cst_101 = arith.constant 1.000000e-30 : f32
    %253 = vector.broadcast %cst_101 : f32 to vector<1x4xf32>
    %254 = arith.maximumf %252, %253 : vector<1x4xf32>
    %255 = vector.broadcast %254 : vector<1x4xf32> to vector<6x4xf32>
    %256 = arith.divf %250, %255 : vector<6x4xf32>
    %257 = vector.shape_cast %256 : vector<6x4xf32> to vector<6x4x1xf32>
    %258 = vector.broadcast %257 : vector<6x4x1xf32> to vector<6x4x32xf32>
    %259 = arith.mulf %258, %193 : vector<6x4x32xf32>
    %cst_102 = arith.constant dense<0.000000e+00> : vector<4x32xf32>
    %260 = vector.multi_reduction <add>, %259, %cst_102 [0] : vector<6x4x32xf32> to vector<4x32xf32>
    %261 = arith.addf %240, %256 : vector<6x4xf32>
    %262 = vector.extract_strided_slice %185 {offsets = [0, 1, 0, 0], sizes = [6, 1, 4, 32], strides = [1, 1, 1, 1]} : vector<6x3x4x32xf32> to vector<6x1x4x32xf32>
    %263 = vector.shape_cast %262 : vector<6x1x4x32xf32> to vector<6x4x32xf32>
    %264 = vector.shape_cast %263 : vector<6x4x32xf32> to vector<24x32xf32>
    %c1_103 = arith.constant 1 : index
    %c0_104 = arith.constant 0 : index
    %c0_105 = arith.constant 0 : index
    %265 = vector.load %arg18[%c1_103, %c0_104, %c0_105] : memref<3x32x3xf32, #tpu.memory_space<vmem>>, vector<1x32x3xf32>
    %266 = vector.shape_cast %265 : vector<1x32x3xf32> to vector<32x3xf32>
    %cst_106 = arith.constant dense<0.000000e+00> : vector<24x3xf32>
    %267 = tpu.matmul %264, %266, %cst_106 {dimension_numbers = #tpu.dot_dimension_numbers<[1], [0], [0], [1], [0, 0, 1, 1], [], []>} : vector<24x32xf32>, vector<32x3xf32>, vector<24x3xf32> -> vector<24x3xf32>
    %268 = vector.shape_cast %267 : vector<24x3xf32> to vector<6x4x3xf32>
    %269 = vector.extract_strided_slice %268 {offsets = [0, 0, 0], sizes = [6, 4, 1], strides = [1, 1, 1]} : vector<6x4x3xf32> to vector<6x4x1xf32>
    %270 = vector.shape_cast %269 : vector<6x4x1xf32> to vector<6x4xf32>
    %cst_107 = arith.constant -1.000000e+30 : f32
    %271 = vector.broadcast %cst_107 : f32 to vector<6x4xf32>
    %272 = arith.select %188, %270, %271 : vector<6x4xi1>, vector<6x4xf32>
    %cst_108 = arith.constant dense<0xFF800000> : vector<4xf32>
    %273 = vector.multi_reduction <maximumf>, %272, %cst_108 [0] : vector<6x4xf32> to vector<4xf32>
    %274 = vector.shape_cast %273 : vector<4xf32> to vector<1x4xf32>
    %275 = vector.broadcast %274 : vector<1x4xf32> to vector<6x4xf32>
    %276 = arith.subf %272, %275 : vector<6x4xf32>
    %277 = math.exp %276 : vector<6x4xf32>
    %278 = arith.mulf %277, %190 : vector<6x4xf32>
    %cst_109 = arith.constant dense<0.000000e+00> : vector<4xf32>
    %279 = vector.multi_reduction <add>, %278, %cst_109 [0] : vector<6x4xf32> to vector<4xf32>
    %280 = vector.shape_cast %279 : vector<4xf32> to vector<1x4xf32>
    %cst_110 = arith.constant 1.000000e-30 : f32
    %281 = vector.broadcast %cst_110 : f32 to vector<1x4xf32>
    %282 = arith.maximumf %280, %281 : vector<1x4xf32>
    %283 = vector.broadcast %282 : vector<1x4xf32> to vector<6x4xf32>
    %284 = arith.divf %278, %283 : vector<6x4xf32>
    %285 = vector.shape_cast %284 : vector<6x4xf32> to vector<6x4x1xf32>
    %286 = vector.broadcast %285 : vector<6x4x1xf32> to vector<6x4x32xf32>
    %287 = arith.mulf %286, %263 : vector<6x4x32xf32>
    %cst_111 = arith.constant dense<0.000000e+00> : vector<4x32xf32>
    %288 = vector.multi_reduction <add>, %287, %cst_111 [0] : vector<6x4x32xf32> to vector<4x32xf32>
    %289 = arith.addf %261, %284 : vector<6x4xf32>
    %290 = vector.extract_strided_slice %268 {offsets = [0, 0, 1], sizes = [6, 4, 1], strides = [1, 1, 1]} : vector<6x4x3xf32> to vector<6x4x1xf32>
    %291 = vector.shape_cast %290 : vector<6x4x1xf32> to vector<6x4xf32>
    %cst_112 = arith.constant -1.000000e+30 : f32
    %292 = vector.broadcast %cst_112 : f32 to vector<6x4xf32>
    %293 = arith.select %188, %291, %292 : vector<6x4xi1>, vector<6x4xf32>
    %cst_113 = arith.constant dense<0xFF800000> : vector<4xf32>
    %294 = vector.multi_reduction <maximumf>, %293, %cst_113 [0] : vector<6x4xf32> to vector<4xf32>
    %295 = vector.shape_cast %294 : vector<4xf32> to vector<1x4xf32>
    %296 = vector.broadcast %295 : vector<1x4xf32> to vector<6x4xf32>
    %297 = arith.subf %293, %296 : vector<6x4xf32>
    %298 = math.exp %297 : vector<6x4xf32>
    %299 = arith.mulf %298, %190 : vector<6x4xf32>
    %cst_114 = arith.constant dense<0.000000e+00> : vector<4xf32>
    %300 = vector.multi_reduction <add>, %299, %cst_114 [0] : vector<6x4xf32> to vector<4xf32>
    %301 = vector.shape_cast %300 : vector<4xf32> to vector<1x4xf32>
    %cst_115 = arith.constant 1.000000e-30 : f32
    %302 = vector.broadcast %cst_115 : f32 to vector<1x4xf32>
    %303 = arith.maximumf %301, %302 : vector<1x4xf32>
    %304 = vector.broadcast %303 : vector<1x4xf32> to vector<6x4xf32>
    %305 = arith.divf %299, %304 : vector<6x4xf32>
    %306 = vector.shape_cast %305 : vector<6x4xf32> to vector<6x4x1xf32>
    %307 = vector.broadcast %306 : vector<6x4x1xf32> to vector<6x4x32xf32>
    %308 = arith.mulf %307, %263 : vector<6x4x32xf32>
    %cst_116 = arith.constant dense<0.000000e+00> : vector<4x32xf32>
    %309 = vector.multi_reduction <add>, %308, %cst_116 [0] : vector<6x4x32xf32> to vector<4x32xf32>
    %310 = arith.addf %289, %305 : vector<6x4xf32>
    %311 = vector.extract_strided_slice %268 {offsets = [0, 0, 2], sizes = [6, 4, 1], strides = [1, 1, 1]} : vector<6x4x3xf32> to vector<6x4x1xf32>
    %312 = vector.shape_cast %311 : vector<6x4x1xf32> to vector<6x4xf32>
    %cst_117 = arith.constant -1.000000e+30 : f32
    %313 = vector.broadcast %cst_117 : f32 to vector<6x4xf32>
    %314 = arith.select %188, %312, %313 : vector<6x4xi1>, vector<6x4xf32>
    %cst_118 = arith.constant dense<0xFF800000> : vector<4xf32>
    %315 = vector.multi_reduction <maximumf>, %314, %cst_118 [0] : vector<6x4xf32> to vector<4xf32>
    %316 = vector.shape_cast %315 : vector<4xf32> to vector<1x4xf32>
    %317 = vector.broadcast %316 : vector<1x4xf32> to vector<6x4xf32>
    %318 = arith.subf %314, %317 : vector<6x4xf32>
    %319 = math.exp %318 : vector<6x4xf32>
    %320 = arith.mulf %319, %190 : vector<6x4xf32>
    %cst_119 = arith.constant dense<0.000000e+00> : vector<4xf32>
    %321 = vector.multi_reduction <add>, %320, %cst_119 [0] : vector<6x4xf32> to vector<4xf32>
    %322 = vector.shape_cast %321 : vector<4xf32> to vector<1x4xf32>
    %cst_120 = arith.constant 1.000000e-30 : f32
    %323 = vector.broadcast %cst_120 : f32 to vector<1x4xf32>
    %324 = arith.maximumf %322, %323 : vector<1x4xf32>
    %325 = vector.broadcast %324 : vector<1x4xf32> to vector<6x4xf32>
    %326 = arith.divf %320, %325 : vector<6x4xf32>
    %327 = vector.shape_cast %326 : vector<6x4xf32> to vector<6x4x1xf32>
    %328 = vector.broadcast %327 : vector<6x4x1xf32> to vector<6x4x32xf32>
    %329 = arith.mulf %328, %263 : vector<6x4x32xf32>
    %cst_121 = arith.constant dense<0.000000e+00> : vector<4x32xf32>
    %330 = vector.multi_reduction <add>, %329, %cst_121 [0] : vector<6x4x32xf32> to vector<4x32xf32>
    %331 = arith.addf %310, %326 : vector<6x4xf32>
    %332 = vector.extract_strided_slice %185 {offsets = [0, 2, 0, 0], sizes = [6, 1, 4, 32], strides = [1, 1, 1, 1]} : vector<6x3x4x32xf32> to vector<6x1x4x32xf32>
    %333 = vector.shape_cast %332 : vector<6x1x4x32xf32> to vector<6x4x32xf32>
    %334 = vector.shape_cast %333 : vector<6x4x32xf32> to vector<24x32xf32>
    %c2_122 = arith.constant 2 : index
    %c0_123 = arith.constant 0 : index
    %c0_124 = arith.constant 0 : index
    %335 = vector.load %arg18[%c2_122, %c0_123, %c0_124] : memref<3x32x3xf32, #tpu.memory_space<vmem>>, vector<1x32x3xf32>
    %336 = vector.shape_cast %335 : vector<1x32x3xf32> to vector<32x3xf32>
    %cst_125 = arith.constant dense<0.000000e+00> : vector<24x3xf32>
    %337 = tpu.matmul %334, %336, %cst_125 {dimension_numbers = #tpu.dot_dimension_numbers<[1], [0], [0], [1], [0, 0, 1, 1], [], []>} : vector<24x32xf32>, vector<32x3xf32>, vector<24x3xf32> -> vector<24x3xf32>
    %338 = vector.shape_cast %337 : vector<24x3xf32> to vector<6x4x3xf32>
    %339 = vector.extract_strided_slice %338 {offsets = [0, 0, 0], sizes = [6, 4, 1], strides = [1, 1, 1]} : vector<6x4x3xf32> to vector<6x4x1xf32>
    %340 = vector.shape_cast %339 : vector<6x4x1xf32> to vector<6x4xf32>
    %cst_126 = arith.constant -1.000000e+30 : f32
    %341 = vector.broadcast %cst_126 : f32 to vector<6x4xf32>
    %342 = arith.select %188, %340, %341 : vector<6x4xi1>, vector<6x4xf32>
    %cst_127 = arith.constant dense<0xFF800000> : vector<4xf32>
    %343 = vector.multi_reduction <maximumf>, %342, %cst_127 [0] : vector<6x4xf32> to vector<4xf32>
    %344 = vector.shape_cast %343 : vector<4xf32> to vector<1x4xf32>
    %345 = vector.broadcast %344 : vector<1x4xf32> to vector<6x4xf32>
    %346 = arith.subf %342, %345 : vector<6x4xf32>
    %347 = math.exp %346 : vector<6x4xf32>
    %348 = arith.mulf %347, %190 : vector<6x4xf32>
    %cst_128 = arith.constant dense<0.000000e+00> : vector<4xf32>
    %349 = vector.multi_reduction <add>, %348, %cst_128 [0] : vector<6x4xf32> to vector<4xf32>
    %350 = vector.shape_cast %349 : vector<4xf32> to vector<1x4xf32>
    %cst_129 = arith.constant 1.000000e-30 : f32
    %351 = vector.broadcast %cst_129 : f32 to vector<1x4xf32>
    %352 = arith.maximumf %350, %351 : vector<1x4xf32>
    %353 = vector.broadcast %352 : vector<1x4xf32> to vector<6x4xf32>
    %354 = arith.divf %348, %353 : vector<6x4xf32>
    %355 = vector.shape_cast %354 : vector<6x4xf32> to vector<6x4x1xf32>
    %356 = vector.broadcast %355 : vector<6x4x1xf32> to vector<6x4x32xf32>
    %357 = arith.mulf %356, %333 : vector<6x4x32xf32>
    %cst_130 = arith.constant dense<0.000000e+00> : vector<4x32xf32>
    %358 = vector.multi_reduction <add>, %357, %cst_130 [0] : vector<6x4x32xf32> to vector<4x32xf32>
    %359 = arith.addf %331, %354 : vector<6x4xf32>
    %360 = vector.extract_strided_slice %338 {offsets = [0, 0, 1], sizes = [6, 4, 1], strides = [1, 1, 1]} : vector<6x4x3xf32> to vector<6x4x1xf32>
    %361 = vector.shape_cast %360 : vector<6x4x1xf32> to vector<6x4xf32>
    %cst_131 = arith.constant -1.000000e+30 : f32
    %362 = vector.broadcast %cst_131 : f32 to vector<6x4xf32>
    %363 = arith.select %188, %361, %362 : vector<6x4xi1>, vector<6x4xf32>
    %cst_132 = arith.constant dense<0xFF800000> : vector<4xf32>
    %364 = vector.multi_reduction <maximumf>, %363, %cst_132 [0] : vector<6x4xf32> to vector<4xf32>
    %365 = vector.shape_cast %364 : vector<4xf32> to vector<1x4xf32>
    %366 = vector.broadcast %365 : vector<1x4xf32> to vector<6x4xf32>
    %367 = arith.subf %363, %366 : vector<6x4xf32>
    %368 = math.exp %367 : vector<6x4xf32>
    %369 = arith.mulf %368, %190 : vector<6x4xf32>
    %cst_133 = arith.constant dense<0.000000e+00> : vector<4xf32>
    %370 = vector.multi_reduction <add>, %369, %cst_133 [0] : vector<6x4xf32> to vector<4xf32>
    %371 = vector.shape_cast %370 : vector<4xf32> to vector<1x4xf32>
    %cst_134 = arith.constant 1.000000e-30 : f32
    %372 = vector.broadcast %cst_134 : f32 to vector<1x4xf32>
    %373 = arith.maximumf %371, %372 : vector<1x4xf32>
    %374 = vector.broadcast %373 : vector<1x4xf32> to vector<6x4xf32>
    %375 = arith.divf %369, %374 : vector<6x4xf32>
    %376 = vector.shape_cast %375 : vector<6x4xf32> to vector<6x4x1xf32>
    %377 = vector.broadcast %376 : vector<6x4x1xf32> to vector<6x4x32xf32>
    %378 = arith.mulf %377, %333 : vector<6x4x32xf32>
    %cst_135 = arith.constant dense<0.000000e+00> : vector<4x32xf32>
    %379 = vector.multi_reduction <add>, %378, %cst_135 [0] : vector<6x4x32xf32> to vector<4x32xf32>
    %380 = arith.addf %359, %375 : vector<6x4xf32>
    %381 = vector.extract_strided_slice %338 {offsets = [0, 0, 2], sizes = [6, 4, 1], strides = [1, 1, 1]} : vector<6x4x3xf32> to vector<6x4x1xf32>
    %382 = vector.shape_cast %381 : vector<6x4x1xf32> to vector<6x4xf32>
    %cst_136 = arith.constant -1.000000e+30 : f32
    %383 = vector.broadcast %cst_136 : f32 to vector<6x4xf32>
    %384 = arith.select %188, %382, %383 : vector<6x4xi1>, vector<6x4xf32>
    %cst_137 = arith.constant dense<0xFF800000> : vector<4xf32>
    %385 = vector.multi_reduction <maximumf>, %384, %cst_137 [0] : vector<6x4xf32> to vector<4xf32>
    %386 = vector.shape_cast %385 : vector<4xf32> to vector<1x4xf32>
    %387 = vector.broadcast %386 : vector<1x4xf32> to vector<6x4xf32>
    %388 = arith.subf %384, %387 : vector<6x4xf32>
    %389 = math.exp %388 : vector<6x4xf32>
    %390 = arith.mulf %389, %190 : vector<6x4xf32>
    %cst_138 = arith.constant dense<0.000000e+00> : vector<4xf32>
    %391 = vector.multi_reduction <add>, %390, %cst_138 [0] : vector<6x4xf32> to vector<4xf32>
    %392 = vector.shape_cast %391 : vector<4xf32> to vector<1x4xf32>
    %cst_139 = arith.constant 1.000000e-30 : f32
    %393 = vector.broadcast %cst_139 : f32 to vector<1x4xf32>
    %394 = arith.maximumf %392, %393 : vector<1x4xf32>
    %395 = vector.broadcast %394 : vector<1x4xf32> to vector<6x4xf32>
    %396 = arith.divf %390, %395 : vector<6x4xf32>
    %397 = vector.shape_cast %396 : vector<6x4xf32> to vector<6x4x1xf32>
    %398 = vector.broadcast %397 : vector<6x4x1xf32> to vector<6x4x32xf32>
    %399 = arith.mulf %398, %333 : vector<6x4x32xf32>
    %cst_140 = arith.constant dense<0.000000e+00> : vector<4x32xf32>
    %400 = vector.multi_reduction <add>, %399, %cst_140 [0] : vector<6x4x32xf32> to vector<4x32xf32>
    %401 = arith.addf %380, %396 : vector<6x4xf32>
    %c0_i32_141 = arith.constant 0 : i32
    %402 = arith.cmpi sgt, %arg0, %c0_i32_141 : i32
    %cst_142 = arith.constant 1.000000e+00 : f32
    %cst_143 = arith.constant 0.000000e+00 : f32
    %403 = arith.select %402, %cst_142, %cst_143 : f32
    %c0_144 = arith.constant 0 : index
    %c0_145 = arith.constant 0 : index
    %c0_146 = arith.constant 0 : index
    %404 = vector.load %arg19[%c0_144, %c0_145, %c0_146] : memref<3x1x32xf32, #tpu.memory_space<vmem>>, vector<1x1x32xf32>
    %405 = vector.shape_cast %404 : vector<1x1x32xf32> to vector<1x32xf32>
    %c0_147 = arith.constant 0 : index
    %c0_148 = arith.constant 0 : index
    %c0_149 = arith.constant 0 : index
    %406 = vector.load %arg20[%c0_147, %c0_148, %c0_149] : memref<3x1x1xf32, #tpu.memory_space<vmem>>, vector<1x1x1xf32>
    %407 = vector.shape_cast %406 : vector<1x1x1xf32> to vector<1x1xf32>
    %408 = vector.broadcast %405 : vector<1x32xf32> to vector<4x32xf32>
    %409 = arith.mulf %218, %408 : vector<4x32xf32>
    %cst_150 = arith.constant dense<0.000000e+00> : vector<4xf32>
    %410 = vector.multi_reduction <add>, %409, %cst_150 [1] : vector<4x32xf32> to vector<4xf32>
    %411 = vector.shape_cast %410 : vector<4xf32> to vector<4x1xf32>
    %412 = vector.broadcast %407 : vector<1x1xf32> to vector<4x1xf32>
    %413 = arith.addf %411, %412 : vector<4x1xf32>
    %cst_151 = arith.constant dense<0xFF800000> : vector<1xf32>
    %414 = vector.multi_reduction <maximumf>, %413, %cst_151 [0] : vector<4x1xf32> to vector<1xf32>
    %415 = vector.shape_cast %414 : vector<1xf32> to vector<1x1xf32>
    %416 = vector.broadcast %415 : vector<1x1xf32> to vector<4x1xf32>
    %417 = arith.subf %413, %416 : vector<4x1xf32>
    %418 = math.exp %417 : vector<4x1xf32>
    %cst_152 = arith.constant dense<0.000000e+00> : vector<1xf32>
    %419 = vector.multi_reduction <add>, %418, %cst_152 [0] : vector<4x1xf32> to vector<1xf32>
    %420 = vector.shape_cast %419 : vector<1xf32> to vector<1x1xf32>
    %421 = vector.broadcast %420 : vector<1x1xf32> to vector<4x1xf32>
    %422 = arith.divf %418, %421 : vector<4x1xf32>
    %cst_153 = arith.constant 1.000000e+00 : f32
    %423 = vector.broadcast %cst_153 : f32 to vector<4x1xf32>
    %424 = arith.addf %422, %423 : vector<4x1xf32>
    %425 = vector.broadcast %424 : vector<4x1xf32> to vector<4x32xf32>
    %426 = arith.mulf %425, %218 : vector<4x32xf32>
    %427 = vector.broadcast %405 : vector<1x32xf32> to vector<4x32xf32>
    %428 = arith.mulf %379, %427 : vector<4x32xf32>
    %cst_154 = arith.constant dense<0.000000e+00> : vector<4xf32>
    %429 = vector.multi_reduction <add>, %428, %cst_154 [1] : vector<4x32xf32> to vector<4xf32>
    %430 = vector.shape_cast %429 : vector<4xf32> to vector<4x1xf32>
    %431 = vector.broadcast %407 : vector<1x1xf32> to vector<4x1xf32>
    %432 = arith.addf %430, %431 : vector<4x1xf32>
    %cst_155 = arith.constant dense<0xFF800000> : vector<1xf32>
    %433 = vector.multi_reduction <maximumf>, %432, %cst_155 [0] : vector<4x1xf32> to vector<1xf32>
    %434 = vector.shape_cast %433 : vector<1xf32> to vector<1x1xf32>
    %435 = vector.broadcast %434 : vector<1x1xf32> to vector<4x1xf32>
    %436 = arith.subf %432, %435 : vector<4x1xf32>
    %437 = math.exp %436 : vector<4x1xf32>
    %cst_156 = arith.constant dense<0.000000e+00> : vector<1xf32>
    %438 = vector.multi_reduction <add>, %437, %cst_156 [0] : vector<4x1xf32> to vector<1xf32>
    %439 = vector.shape_cast %438 : vector<1xf32> to vector<1x1xf32>
    %440 = vector.broadcast %439 : vector<1x1xf32> to vector<4x1xf32>
    %441 = arith.divf %437, %440 : vector<4x1xf32>
    %cst_157 = arith.constant 1.000000e+00 : f32
    %442 = vector.broadcast %cst_157 : f32 to vector<4x1xf32>
    %443 = arith.addf %441, %442 : vector<4x1xf32>
    %444 = vector.broadcast %443 : vector<4x1xf32> to vector<4x32xf32>
    %445 = arith.mulf %444, %379 : vector<4x32xf32>
    %446 = vector.broadcast %405 : vector<1x32xf32> to vector<4x32xf32>
    %447 = arith.mulf %309, %446 : vector<4x32xf32>
    %cst_158 = arith.constant dense<0.000000e+00> : vector<4xf32>
    %448 = vector.multi_reduction <add>, %447, %cst_158 [1] : vector<4x32xf32> to vector<4xf32>
    %449 = vector.shape_cast %448 : vector<4xf32> to vector<4x1xf32>
    %450 = vector.broadcast %407 : vector<1x1xf32> to vector<4x1xf32>
    %451 = arith.addf %449, %450 : vector<4x1xf32>
    %cst_159 = arith.constant dense<0xFF800000> : vector<1xf32>
    %452 = vector.multi_reduction <maximumf>, %451, %cst_159 [0] : vector<4x1xf32> to vector<1xf32>
    %453 = vector.shape_cast %452 : vector<1xf32> to vector<1x1xf32>
    %454 = vector.broadcast %453 : vector<1x1xf32> to vector<4x1xf32>
    %455 = arith.subf %451, %454 : vector<4x1xf32>
    %456 = math.exp %455 : vector<4x1xf32>
    %cst_160 = arith.constant dense<0.000000e+00> : vector<1xf32>
    %457 = vector.multi_reduction <add>, %456, %cst_160 [0] : vector<4x1xf32> to vector<1xf32>
    %458 = vector.shape_cast %457 : vector<1xf32> to vector<1x1xf32>
    %459 = vector.broadcast %458 : vector<1x1xf32> to vector<4x1xf32>
    %460 = arith.divf %456, %459 : vector<4x1xf32>
    %cst_161 = arith.constant 1.000000e+00 : f32
    %461 = vector.broadcast %cst_161 : f32 to vector<4x1xf32>
    %462 = arith.addf %460, %461 : vector<4x1xf32>
    %463 = vector.broadcast %462 : vector<4x1xf32> to vector<4x32xf32>
    %464 = arith.mulf %463, %309 : vector<4x32xf32>
    %465 = tpu.concatenate %426, %445, %464 in 1 : vector<4x32xf32>, vector<4x32xf32>, vector<4x32xf32> -> vector<4x96xf32>
    %c0_162 = arith.constant 0 : index
    %c0_163 = arith.constant 0 : index
    %c0_164 = arith.constant 0 : index
    %466 = vector.load %arg21[%c0_162, %c0_163, %c0_164] : memref<3x96x32xf32, #tpu.memory_space<vmem>>, vector<1x96x32xf32>
    %467 = vector.shape_cast %466 : vector<1x96x32xf32> to vector<96x32xf32>
    %cst_165 = arith.constant dense<0.000000e+00> : vector<4x32xf32>
    %468 = tpu.matmul %465, %467, %cst_165 {dimension_numbers = #tpu.dot_dimension_numbers<[1], [0], [0], [1], [0, 0, 1, 1], [], []>} : vector<4x96xf32>, vector<96x32xf32>, vector<4x32xf32> -> vector<4x32xf32>
    %c0_166 = arith.constant 0 : index
    %c0_167 = arith.constant 0 : index
    %c0_168 = arith.constant 0 : index
    %469 = vector.load %arg22[%c0_166, %c0_167, %c0_168] : memref<3x1x32xf32, #tpu.memory_space<vmem>>, vector<1x1x32xf32>
    %470 = vector.shape_cast %469 : vector<1x1x32xf32> to vector<1x32xf32>
    %471 = vector.broadcast %470 : vector<1x32xf32> to vector<4x32xf32>
    %472 = arith.addf %468, %471 : vector<4x32xf32>
    %473 = vector.broadcast %403 : f32 to vector<4x32xf32>
    %474 = arith.mulf %472, %473 : vector<4x32xf32>
    %c1_169 = arith.constant 1 : index
    %c0_170 = arith.constant 0 : index
    %c0_171 = arith.constant 0 : index
    %475 = vector.load %arg19[%c1_169, %c0_170, %c0_171] : memref<3x1x32xf32, #tpu.memory_space<vmem>>, vector<1x1x32xf32>
    %476 = vector.shape_cast %475 : vector<1x1x32xf32> to vector<1x32xf32>
    %c1_172 = arith.constant 1 : index
    %c0_173 = arith.constant 0 : index
    %c0_174 = arith.constant 0 : index
    %477 = vector.load %arg20[%c1_172, %c0_173, %c0_174] : memref<3x1x1xf32, #tpu.memory_space<vmem>>, vector<1x1x1xf32>
    %478 = vector.shape_cast %477 : vector<1x1x1xf32> to vector<1x1xf32>
    %479 = vector.broadcast %476 : vector<1x32xf32> to vector<4x32xf32>
    %480 = arith.mulf %358, %479 : vector<4x32xf32>
    %cst_175 = arith.constant dense<0.000000e+00> : vector<4xf32>
    %481 = vector.multi_reduction <add>, %480, %cst_175 [1] : vector<4x32xf32> to vector<4xf32>
    %482 = vector.shape_cast %481 : vector<4xf32> to vector<4x1xf32>
    %483 = vector.broadcast %478 : vector<1x1xf32> to vector<4x1xf32>
    %484 = arith.addf %482, %483 : vector<4x1xf32>
    %cst_176 = arith.constant dense<0xFF800000> : vector<1xf32>
    %485 = vector.multi_reduction <maximumf>, %484, %cst_176 [0] : vector<4x1xf32> to vector<1xf32>
    %486 = vector.shape_cast %485 : vector<1xf32> to vector<1x1xf32>
    %487 = vector.broadcast %486 : vector<1x1xf32> to vector<4x1xf32>
    %488 = arith.subf %484, %487 : vector<4x1xf32>
    %489 = math.exp %488 : vector<4x1xf32>
    %cst_177 = arith.constant dense<0.000000e+00> : vector<1xf32>
    %490 = vector.multi_reduction <add>, %489, %cst_177 [0] : vector<4x1xf32> to vector<1xf32>
    %491 = vector.shape_cast %490 : vector<1xf32> to vector<1x1xf32>
    %492 = vector.broadcast %491 : vector<1x1xf32> to vector<4x1xf32>
    %493 = arith.divf %489, %492 : vector<4x1xf32>
    %cst_178 = arith.constant 1.000000e+00 : f32
    %494 = vector.broadcast %cst_178 : f32 to vector<4x1xf32>
    %495 = arith.addf %493, %494 : vector<4x1xf32>
    %496 = vector.broadcast %495 : vector<4x1xf32> to vector<4x32xf32>
    %497 = arith.mulf %496, %358 : vector<4x32xf32>
    %498 = vector.broadcast %476 : vector<1x32xf32> to vector<4x32xf32>
    %499 = arith.mulf %239, %498 : vector<4x32xf32>
    %cst_179 = arith.constant dense<0.000000e+00> : vector<4xf32>
    %500 = vector.multi_reduction <add>, %499, %cst_179 [1] : vector<4x32xf32> to vector<4xf32>
    %501 = vector.shape_cast %500 : vector<4xf32> to vector<4x1xf32>
    %502 = vector.broadcast %478 : vector<1x1xf32> to vector<4x1xf32>
    %503 = arith.addf %501, %502 : vector<4x1xf32>
    %cst_180 = arith.constant dense<0xFF800000> : vector<1xf32>
    %504 = vector.multi_reduction <maximumf>, %503, %cst_180 [0] : vector<4x1xf32> to vector<1xf32>
    %505 = vector.shape_cast %504 : vector<1xf32> to vector<1x1xf32>
    %506 = vector.broadcast %505 : vector<1x1xf32> to vector<4x1xf32>
    %507 = arith.subf %503, %506 : vector<4x1xf32>
    %508 = math.exp %507 : vector<4x1xf32>
    %cst_181 = arith.constant dense<0.000000e+00> : vector<1xf32>
    %509 = vector.multi_reduction <add>, %508, %cst_181 [0] : vector<4x1xf32> to vector<1xf32>
    %510 = vector.shape_cast %509 : vector<1xf32> to vector<1x1xf32>
    %511 = vector.broadcast %510 : vector<1x1xf32> to vector<4x1xf32>
    %512 = arith.divf %508, %511 : vector<4x1xf32>
    %cst_182 = arith.constant 1.000000e+00 : f32
    %513 = vector.broadcast %cst_182 : f32 to vector<4x1xf32>
    %514 = arith.addf %512, %513 : vector<4x1xf32>
    %515 = vector.broadcast %514 : vector<4x1xf32> to vector<4x32xf32>
    %516 = arith.mulf %515, %239 : vector<4x32xf32>
    %517 = vector.broadcast %476 : vector<1x32xf32> to vector<4x32xf32>
    %518 = arith.mulf %330, %517 : vector<4x32xf32>
    %cst_183 = arith.constant dense<0.000000e+00> : vector<4xf32>
    %519 = vector.multi_reduction <add>, %518, %cst_183 [1] : vector<4x32xf32> to vector<4xf32>
    %520 = vector.shape_cast %519 : vector<4xf32> to vector<4x1xf32>
    %521 = vector.broadcast %478 : vector<1x1xf32> to vector<4x1xf32>
    %522 = arith.addf %520, %521 : vector<4x1xf32>
    %cst_184 = arith.constant dense<0xFF800000> : vector<1xf32>
    %523 = vector.multi_reduction <maximumf>, %522, %cst_184 [0] : vector<4x1xf32> to vector<1xf32>
    %524 = vector.shape_cast %523 : vector<1xf32> to vector<1x1xf32>
    %525 = vector.broadcast %524 : vector<1x1xf32> to vector<4x1xf32>
    %526 = arith.subf %522, %525 : vector<4x1xf32>
    %527 = math.exp %526 : vector<4x1xf32>
    %cst_185 = arith.constant dense<0.000000e+00> : vector<1xf32>
    %528 = vector.multi_reduction <add>, %527, %cst_185 [0] : vector<4x1xf32> to vector<1xf32>
    %529 = vector.shape_cast %528 : vector<1xf32> to vector<1x1xf32>
    %530 = vector.broadcast %529 : vector<1x1xf32> to vector<4x1xf32>
    %531 = arith.divf %527, %530 : vector<4x1xf32>
    %cst_186 = arith.constant 1.000000e+00 : f32
    %532 = vector.broadcast %cst_186 : f32 to vector<4x1xf32>
    %533 = arith.addf %531, %532 : vector<4x1xf32>
    %534 = vector.broadcast %533 : vector<4x1xf32> to vector<4x32xf32>
    %535 = arith.mulf %534, %330 : vector<4x32xf32>
    %536 = tpu.concatenate %497, %516, %535 in 1 : vector<4x32xf32>, vector<4x32xf32>, vector<4x32xf32> -> vector<4x96xf32>
    %c1_187 = arith.constant 1 : index
    %c0_188 = arith.constant 0 : index
    %c0_189 = arith.constant 0 : index
    %537 = vector.load %arg21[%c1_187, %c0_188, %c0_189] : memref<3x96x32xf32, #tpu.memory_space<vmem>>, vector<1x96x32xf32>
    %538 = vector.shape_cast %537 : vector<1x96x32xf32> to vector<96x32xf32>
    %cst_190 = arith.constant dense<0.000000e+00> : vector<4x32xf32>
    %539 = tpu.matmul %536, %538, %cst_190 {dimension_numbers = #tpu.dot_dimension_numbers<[1], [0], [0], [1], [0, 0, 1, 1], [], []>} : vector<4x96xf32>, vector<96x32xf32>, vector<4x32xf32> -> vector<4x32xf32>
    %c1_191 = arith.constant 1 : index
    %c0_192 = arith.constant 0 : index
    %c0_193 = arith.constant 0 : index
    %540 = vector.load %arg22[%c1_191, %c0_192, %c0_193] : memref<3x1x32xf32, #tpu.memory_space<vmem>>, vector<1x1x32xf32>
    %541 = vector.shape_cast %540 : vector<1x1x32xf32> to vector<1x32xf32>
    %542 = vector.broadcast %541 : vector<1x32xf32> to vector<4x32xf32>
    %543 = arith.addf %539, %542 : vector<4x32xf32>
    %544 = vector.broadcast %403 : f32 to vector<4x32xf32>
    %545 = arith.mulf %543, %544 : vector<4x32xf32>
    %c2_194 = arith.constant 2 : index
    %c0_195 = arith.constant 0 : index
    %c0_196 = arith.constant 0 : index
    %546 = vector.load %arg19[%c2_194, %c0_195, %c0_196] : memref<3x1x32xf32, #tpu.memory_space<vmem>>, vector<1x1x32xf32>
    %547 = vector.shape_cast %546 : vector<1x1x32xf32> to vector<1x32xf32>
    %c2_197 = arith.constant 2 : index
    %c0_198 = arith.constant 0 : index
    %c0_199 = arith.constant 0 : index
    %548 = vector.load %arg20[%c2_197, %c0_198, %c0_199] : memref<3x1x1xf32, #tpu.memory_space<vmem>>, vector<1x1x1xf32>
    %549 = vector.shape_cast %548 : vector<1x1x1xf32> to vector<1x1xf32>
    %550 = vector.broadcast %547 : vector<1x32xf32> to vector<4x32xf32>
    %551 = arith.mulf %288, %550 : vector<4x32xf32>
    %cst_200 = arith.constant dense<0.000000e+00> : vector<4xf32>
    %552 = vector.multi_reduction <add>, %551, %cst_200 [1] : vector<4x32xf32> to vector<4xf32>
    %553 = vector.shape_cast %552 : vector<4xf32> to vector<4x1xf32>
    %554 = vector.broadcast %549 : vector<1x1xf32> to vector<4x1xf32>
    %555 = arith.addf %553, %554 : vector<4x1xf32>
    %cst_201 = arith.constant dense<0xFF800000> : vector<1xf32>
    %556 = vector.multi_reduction <maximumf>, %555, %cst_201 [0] : vector<4x1xf32> to vector<1xf32>
    %557 = vector.shape_cast %556 : vector<1xf32> to vector<1x1xf32>
    %558 = vector.broadcast %557 : vector<1x1xf32> to vector<4x1xf32>
    %559 = arith.subf %555, %558 : vector<4x1xf32>
    %560 = math.exp %559 : vector<4x1xf32>
    %cst_202 = arith.constant dense<0.000000e+00> : vector<1xf32>
    %561 = vector.multi_reduction <add>, %560, %cst_202 [0] : vector<4x1xf32> to vector<1xf32>
    %562 = vector.shape_cast %561 : vector<1xf32> to vector<1x1xf32>
    %563 = vector.broadcast %562 : vector<1x1xf32> to vector<4x1xf32>
    %564 = arith.divf %560, %563 : vector<4x1xf32>
    %cst_203 = arith.constant 1.000000e+00 : f32
    %565 = vector.broadcast %cst_203 : f32 to vector<4x1xf32>
    %566 = arith.addf %564, %565 : vector<4x1xf32>
    %567 = vector.broadcast %566 : vector<4x1xf32> to vector<4x32xf32>
    %568 = arith.mulf %567, %288 : vector<4x32xf32>
    %569 = vector.broadcast %547 : vector<1x32xf32> to vector<4x32xf32>
    %570 = arith.mulf %260, %569 : vector<4x32xf32>
    %cst_204 = arith.constant dense<0.000000e+00> : vector<4xf32>
    %571 = vector.multi_reduction <add>, %570, %cst_204 [1] : vector<4x32xf32> to vector<4xf32>
    %572 = vector.shape_cast %571 : vector<4xf32> to vector<4x1xf32>
    %573 = vector.broadcast %549 : vector<1x1xf32> to vector<4x1xf32>
    %574 = arith.addf %572, %573 : vector<4x1xf32>
    %cst_205 = arith.constant dense<0xFF800000> : vector<1xf32>
    %575 = vector.multi_reduction <maximumf>, %574, %cst_205 [0] : vector<4x1xf32> to vector<1xf32>
    %576 = vector.shape_cast %575 : vector<1xf32> to vector<1x1xf32>
    %577 = vector.broadcast %576 : vector<1x1xf32> to vector<4x1xf32>
    %578 = arith.subf %574, %577 : vector<4x1xf32>
    %579 = math.exp %578 : vector<4x1xf32>
    %cst_206 = arith.constant dense<0.000000e+00> : vector<1xf32>
    %580 = vector.multi_reduction <add>, %579, %cst_206 [0] : vector<4x1xf32> to vector<1xf32>
    %581 = vector.shape_cast %580 : vector<1xf32> to vector<1x1xf32>
    %582 = vector.broadcast %581 : vector<1x1xf32> to vector<4x1xf32>
    %583 = arith.divf %579, %582 : vector<4x1xf32>
    %cst_207 = arith.constant 1.000000e+00 : f32
    %584 = vector.broadcast %cst_207 : f32 to vector<4x1xf32>
    %585 = arith.addf %583, %584 : vector<4x1xf32>
    %586 = vector.broadcast %585 : vector<4x1xf32> to vector<4x32xf32>
    %587 = arith.mulf %586, %260 : vector<4x32xf32>
    %588 = vector.broadcast %547 : vector<1x32xf32> to vector<4x32xf32>
    %589 = arith.mulf %400, %588 : vector<4x32xf32>
    %cst_208 = arith.constant dense<0.000000e+00> : vector<4xf32>
    %590 = vector.multi_reduction <add>, %589, %cst_208 [1] : vector<4x32xf32> to vector<4xf32>
    %591 = vector.shape_cast %590 : vector<4xf32> to vector<4x1xf32>
    %592 = vector.broadcast %549 : vector<1x1xf32> to vector<4x1xf32>
    %593 = arith.addf %591, %592 : vector<4x1xf32>
    %cst_209 = arith.constant dense<0xFF800000> : vector<1xf32>
    %594 = vector.multi_reduction <maximumf>, %593, %cst_209 [0] : vector<4x1xf32> to vector<1xf32>
    %595 = vector.shape_cast %594 : vector<1xf32> to vector<1x1xf32>
    %596 = vector.broadcast %595 : vector<1x1xf32> to vector<4x1xf32>
    %597 = arith.subf %593, %596 : vector<4x1xf32>
    %598 = math.exp %597 : vector<4x1xf32>
    %cst_210 = arith.constant dense<0.000000e+00> : vector<1xf32>
    %599 = vector.multi_reduction <add>, %598, %cst_210 [0] : vector<4x1xf32> to vector<1xf32>
    %600 = vector.shape_cast %599 : vector<1xf32> to vector<1x1xf32>
    %601 = vector.broadcast %600 : vector<1x1xf32> to vector<4x1xf32>
    %602 = arith.divf %598, %601 : vector<4x1xf32>
    %cst_211 = arith.constant 1.000000e+00 : f32
    %603 = vector.broadcast %cst_211 : f32 to vector<4x1xf32>
    %604 = arith.addf %602, %603 : vector<4x1xf32>
    %605 = vector.broadcast %604 : vector<4x1xf32> to vector<4x32xf32>
    %606 = arith.mulf %605, %400 : vector<4x32xf32>
    %607 = tpu.concatenate %568, %587, %606 in 1 : vector<4x32xf32>, vector<4x32xf32>, vector<4x32xf32> -> vector<4x96xf32>
    %c2_212 = arith.constant 2 : index
    %c0_213 = arith.constant 0 : index
    %c0_214 = arith.constant 0 : index
    %608 = vector.load %arg21[%c2_212, %c0_213, %c0_214] : memref<3x96x32xf32, #tpu.memory_space<vmem>>, vector<1x96x32xf32>
    %609 = vector.shape_cast %608 : vector<1x96x32xf32> to vector<96x32xf32>
    %cst_215 = arith.constant dense<0.000000e+00> : vector<4x32xf32>
    %610 = tpu.matmul %607, %609, %cst_215 {dimension_numbers = #tpu.dot_dimension_numbers<[1], [0], [0], [1], [0, 0, 1, 1], [], []>} : vector<4x96xf32>, vector<96x32xf32>, vector<4x32xf32> -> vector<4x32xf32>
    %c2_216 = arith.constant 2 : index
    %c0_217 = arith.constant 0 : index
    %c0_218 = arith.constant 0 : index
    %611 = vector.load %arg22[%c2_216, %c0_217, %c0_218] : memref<3x1x32xf32, #tpu.memory_space<vmem>>, vector<1x1x32xf32>
    %612 = vector.shape_cast %611 : vector<1x1x32xf32> to vector<1x32xf32>
    %613 = vector.broadcast %612 : vector<1x32xf32> to vector<4x32xf32>
    %614 = arith.addf %610, %613 : vector<4x32xf32>
    %615 = vector.broadcast %403 : f32 to vector<4x32xf32>
    %616 = arith.mulf %614, %615 : vector<4x32xf32>
    %617 = tpu.concatenate %21, %474 in 1 : vector<4x32xf32>, vector<4x32xf32> -> vector<4x64xf32>
    %c0_219 = arith.constant 0 : index
    %c0_220 = arith.constant 0 : index
    %c0_221 = arith.constant 0 : index
    %618 = vector.load %arg10[%c0_219, %c0_220, %c0_221] : memref<3x64x96xf32, #tpu.memory_space<vmem>>, vector<1x64x96xf32>
    %619 = vector.shape_cast %618 : vector<1x64x96xf32> to vector<64x96xf32>
    %cst_222 = arith.constant dense<0.000000e+00> : vector<4x96xf32>
    %620 = tpu.matmul %617, %619, %cst_222 {dimension_numbers = #tpu.dot_dimension_numbers<[1], [0], [0], [1], [0, 0, 1, 1], [], []>} : vector<4x64xf32>, vector<64x96xf32>, vector<4x96xf32> -> vector<4x96xf32>
    %c0_223 = arith.constant 0 : index
    %c0_224 = arith.constant 0 : index
    %c0_225 = arith.constant 0 : index
    %621 = vector.load %arg12[%c0_223, %c0_224, %c0_225] : memref<3x1x96xf32, #tpu.memory_space<vmem>>, vector<1x1x96xf32>
    %622 = vector.shape_cast %621 : vector<1x1x96xf32> to vector<1x96xf32>
    %623 = vector.broadcast %622 : vector<1x96xf32> to vector<4x96xf32>
    %624 = arith.addf %620, %623 : vector<4x96xf32>
    %625 = vector.shape_cast %624 : vector<4x96xf32> to vector<4x1x96xf32>
    %626 = vector.extract_strided_slice %7 {offsets = [0, 0, 0, 0], sizes = [1, 4, 2, 32], strides = [1, 1, 1, 1]} : vector<3x4x2x32xf32> to vector<1x4x2x32xf32>
    %627 = vector.shape_cast %626 : vector<1x4x2x32xf32> to vector<4x2x32xf32>
    %628 = vector.shape_cast %627 : vector<4x2x32xf32> to vector<8x32xf32>
    %c0_226 = arith.constant 0 : index
    %c0_227 = arith.constant 0 : index
    %c0_228 = arith.constant 0 : index
    %629 = vector.load %arg11[%c0_226, %c0_227, %c0_228] : memref<3x32x96xf32, #tpu.memory_space<vmem>>, vector<1x32x96xf32>
    %630 = vector.shape_cast %629 : vector<1x32x96xf32> to vector<32x96xf32>
    %cst_229 = arith.constant dense<0.000000e+00> : vector<8x96xf32>
    %631 = tpu.matmul %628, %630, %cst_229 {dimension_numbers = #tpu.dot_dimension_numbers<[1], [0], [0], [1], [0, 0, 1, 1], [], []>} : vector<8x32xf32>, vector<32x96xf32>, vector<8x96xf32> -> vector<8x96xf32>
    %c0_230 = arith.constant 0 : index
    %c0_231 = arith.constant 0 : index
    %c0_232 = arith.constant 0 : index
    %632 = vector.load %arg13[%c0_230, %c0_231, %c0_232] : memref<3x1x96xf32, #tpu.memory_space<vmem>>, vector<1x1x96xf32>
    %633 = vector.shape_cast %632 : vector<1x1x96xf32> to vector<1x96xf32>
    %634 = vector.broadcast %633 : vector<1x96xf32> to vector<8x96xf32>
    %635 = arith.addf %631, %634 : vector<8x96xf32>
    %636 = vector.shape_cast %635 : vector<8x96xf32> to vector<4x2x96xf32>
    %637 = vector.extract_strided_slice %7 {offsets = [0, 0, 0, 0], sizes = [1, 4, 2, 32], strides = [1, 1, 1, 1]} : vector<3x4x2x32xf32> to vector<1x4x2x32xf32>
    %638 = vector.shape_cast %637 : vector<1x4x2x32xf32> to vector<4x2x32xf32>
    %639 = vector.extract_strided_slice %625 {offsets = [0, 0, 0], sizes = [4, 1, 32], strides = [1, 1, 1]} : vector<4x1x96xf32> to vector<4x1x32xf32>
    %640 = vector.extract_strided_slice %636 {offsets = [0, 0, 0], sizes = [4, 2, 32], strides = [1, 1, 1]} : vector<4x2x96xf32> to vector<4x2x32xf32>
    %641 = vector.broadcast %639 : vector<4x1x32xf32> to vector<4x2x32xf32>
    %642 = arith.addf %641, %640 : vector<4x2x32xf32>
    %643 = arith.negf %642 : vector<4x2x32xf32>
    %644 = math.exp %643 : vector<4x2x32xf32>
    %cst_233 = arith.constant 1.000000e+00 : f32
    %645 = vector.broadcast %cst_233 : f32 to vector<4x2x32xf32>
    %646 = arith.addf %645, %644 : vector<4x2x32xf32>
    %647 = arith.divf %645, %646 : vector<4x2x32xf32>
    %648 = vector.extract_strided_slice %625 {offsets = [0, 0, 32], sizes = [4, 1, 32], strides = [1, 1, 1]} : vector<4x1x96xf32> to vector<4x1x32xf32>
    %649 = vector.extract_strided_slice %636 {offsets = [0, 0, 32], sizes = [4, 2, 32], strides = [1, 1, 1]} : vector<4x2x96xf32> to vector<4x2x32xf32>
    %650 = vector.broadcast %648 : vector<4x1x32xf32> to vector<4x2x32xf32>
    %651 = arith.addf %650, %649 : vector<4x2x32xf32>
    %652 = arith.negf %651 : vector<4x2x32xf32>
    %653 = math.exp %652 : vector<4x2x32xf32>
    %cst_234 = arith.constant 1.000000e+00 : f32
    %654 = vector.broadcast %cst_234 : f32 to vector<4x2x32xf32>
    %655 = arith.addf %654, %653 : vector<4x2x32xf32>
    %656 = arith.divf %654, %655 : vector<4x2x32xf32>
    %657 = vector.extract_strided_slice %625 {offsets = [0, 0, 64], sizes = [4, 1, 32], strides = [1, 1, 1]} : vector<4x1x96xf32> to vector<4x1x32xf32>
    %658 = vector.extract_strided_slice %636 {offsets = [0, 0, 64], sizes = [4, 2, 32], strides = [1, 1, 1]} : vector<4x2x96xf32> to vector<4x2x32xf32>
    %659 = arith.mulf %647, %658 : vector<4x2x32xf32>
    %660 = vector.broadcast %657 : vector<4x1x32xf32> to vector<4x2x32xf32>
    %661 = arith.addf %660, %659 : vector<4x2x32xf32>
    %662 = math.tanh %661 : vector<4x2x32xf32>
    %cst_235 = arith.constant 1.000000e+00 : f32
    %663 = vector.broadcast %cst_235 : f32 to vector<4x2x32xf32>
    %664 = arith.subf %663, %656 : vector<4x2x32xf32>
    %665 = arith.mulf %664, %662 : vector<4x2x32xf32>
    %666 = arith.mulf %656, %638 : vector<4x2x32xf32>
    %667 = arith.addf %665, %666 : vector<4x2x32xf32>
    %668 = vector.shape_cast %4 : vector<4x2xf32> to vector<4x2x1xf32>
    %669 = vector.extract_strided_slice %7 {offsets = [0, 0, 0, 0], sizes = [1, 4, 2, 32], strides = [1, 1, 1, 1]} : vector<3x4x2x32xf32> to vector<1x4x2x32xf32>
    %670 = vector.shape_cast %669 : vector<1x4x2x32xf32> to vector<4x2x32xf32>
    %cst_236 = arith.constant 1.000000e+00 : f32
    %671 = vector.broadcast %cst_236 : f32 to vector<4x2x1xf32>
    %672 = arith.subf %671, %668 : vector<4x2x1xf32>
    %673 = vector.broadcast %672 : vector<4x2x1xf32> to vector<4x2x32xf32>
    %674 = arith.mulf %670, %673 : vector<4x2x32xf32>
    %675 = vector.broadcast %668 : vector<4x2x1xf32> to vector<4x2x32xf32>
    %676 = arith.mulf %667, %675 : vector<4x2x32xf32>
    %677 = arith.addf %674, %676 : vector<4x2x32xf32>
    %678 = tpu.concatenate %22, %616 in 1 : vector<4x32xf32>, vector<4x32xf32> -> vector<4x64xf32>
    %c1_237 = arith.constant 1 : index
    %c0_238 = arith.constant 0 : index
    %c0_239 = arith.constant 0 : index
    %679 = vector.load %arg10[%c1_237, %c0_238, %c0_239] : memref<3x64x96xf32, #tpu.memory_space<vmem>>, vector<1x64x96xf32>
    %680 = vector.shape_cast %679 : vector<1x64x96xf32> to vector<64x96xf32>
    %cst_240 = arith.constant dense<0.000000e+00> : vector<4x96xf32>
    %681 = tpu.matmul %678, %680, %cst_240 {dimension_numbers = #tpu.dot_dimension_numbers<[1], [0], [0], [1], [0, 0, 1, 1], [], []>} : vector<4x64xf32>, vector<64x96xf32>, vector<4x96xf32> -> vector<4x96xf32>
    %c1_241 = arith.constant 1 : index
    %c0_242 = arith.constant 0 : index
    %c0_243 = arith.constant 0 : index
    %682 = vector.load %arg12[%c1_241, %c0_242, %c0_243] : memref<3x1x96xf32, #tpu.memory_space<vmem>>, vector<1x1x96xf32>
    %683 = vector.shape_cast %682 : vector<1x1x96xf32> to vector<1x96xf32>
    %684 = vector.broadcast %683 : vector<1x96xf32> to vector<4x96xf32>
    %685 = arith.addf %681, %684 : vector<4x96xf32>
    %686 = vector.shape_cast %685 : vector<4x96xf32> to vector<4x1x96xf32>
    %687 = vector.extract_strided_slice %7 {offsets = [1, 0, 0, 0], sizes = [1, 4, 2, 32], strides = [1, 1, 1, 1]} : vector<3x4x2x32xf32> to vector<1x4x2x32xf32>
    %688 = vector.shape_cast %687 : vector<1x4x2x32xf32> to vector<4x2x32xf32>
    %689 = vector.shape_cast %688 : vector<4x2x32xf32> to vector<8x32xf32>
    %c1_244 = arith.constant 1 : index
    %c0_245 = arith.constant 0 : index
    %c0_246 = arith.constant 0 : index
    %690 = vector.load %arg11[%c1_244, %c0_245, %c0_246] : memref<3x32x96xf32, #tpu.memory_space<vmem>>, vector<1x32x96xf32>
    %691 = vector.shape_cast %690 : vector<1x32x96xf32> to vector<32x96xf32>
    %cst_247 = arith.constant dense<0.000000e+00> : vector<8x96xf32>
    %692 = tpu.matmul %689, %691, %cst_247 {dimension_numbers = #tpu.dot_dimension_numbers<[1], [0], [0], [1], [0, 0, 1, 1], [], []>} : vector<8x32xf32>, vector<32x96xf32>, vector<8x96xf32> -> vector<8x96xf32>
    %c1_248 = arith.constant 1 : index
    %c0_249 = arith.constant 0 : index
    %c0_250 = arith.constant 0 : index
    %693 = vector.load %arg13[%c1_248, %c0_249, %c0_250] : memref<3x1x96xf32, #tpu.memory_space<vmem>>, vector<1x1x96xf32>
    %694 = vector.shape_cast %693 : vector<1x1x96xf32> to vector<1x96xf32>
    %695 = vector.broadcast %694 : vector<1x96xf32> to vector<8x96xf32>
    %696 = arith.addf %692, %695 : vector<8x96xf32>
    %697 = vector.shape_cast %696 : vector<8x96xf32> to vector<4x2x96xf32>
    %698 = vector.extract_strided_slice %7 {offsets = [1, 0, 0, 0], sizes = [1, 4, 2, 32], strides = [1, 1, 1, 1]} : vector<3x4x2x32xf32> to vector<1x4x2x32xf32>
    %699 = vector.shape_cast %698 : vector<1x4x2x32xf32> to vector<4x2x32xf32>
    %700 = vector.extract_strided_slice %686 {offsets = [0, 0, 0], sizes = [4, 1, 32], strides = [1, 1, 1]} : vector<4x1x96xf32> to vector<4x1x32xf32>
    %701 = vector.extract_strided_slice %697 {offsets = [0, 0, 0], sizes = [4, 2, 32], strides = [1, 1, 1]} : vector<4x2x96xf32> to vector<4x2x32xf32>
    %702 = vector.broadcast %700 : vector<4x1x32xf32> to vector<4x2x32xf32>
    %703 = arith.addf %702, %701 : vector<4x2x32xf32>
    %704 = arith.negf %703 : vector<4x2x32xf32>
    %705 = math.exp %704 : vector<4x2x32xf32>
    %cst_251 = arith.constant 1.000000e+00 : f32
    %706 = vector.broadcast %cst_251 : f32 to vector<4x2x32xf32>
    %707 = arith.addf %706, %705 : vector<4x2x32xf32>
    %708 = arith.divf %706, %707 : vector<4x2x32xf32>
    %709 = vector.extract_strided_slice %686 {offsets = [0, 0, 32], sizes = [4, 1, 32], strides = [1, 1, 1]} : vector<4x1x96xf32> to vector<4x1x32xf32>
    %710 = vector.extract_strided_slice %697 {offsets = [0, 0, 32], sizes = [4, 2, 32], strides = [1, 1, 1]} : vector<4x2x96xf32> to vector<4x2x32xf32>
    %711 = vector.broadcast %709 : vector<4x1x32xf32> to vector<4x2x32xf32>
    %712 = arith.addf %711, %710 : vector<4x2x32xf32>
    %713 = arith.negf %712 : vector<4x2x32xf32>
    %714 = math.exp %713 : vector<4x2x32xf32>
    %cst_252 = arith.constant 1.000000e+00 : f32
    %715 = vector.broadcast %cst_252 : f32 to vector<4x2x32xf32>
    %716 = arith.addf %715, %714 : vector<4x2x32xf32>
    %717 = arith.divf %715, %716 : vector<4x2x32xf32>
    %718 = vector.extract_strided_slice %686 {offsets = [0, 0, 64], sizes = [4, 1, 32], strides = [1, 1, 1]} : vector<4x1x96xf32> to vector<4x1x32xf32>
    %719 = vector.extract_strided_slice %697 {offsets = [0, 0, 64], sizes = [4, 2, 32], strides = [1, 1, 1]} : vector<4x2x96xf32> to vector<4x2x32xf32>
    %720 = arith.mulf %708, %719 : vector<4x2x32xf32>
    %721 = vector.broadcast %718 : vector<4x1x32xf32> to vector<4x2x32xf32>
    %722 = arith.addf %721, %720 : vector<4x2x32xf32>
    %723 = math.tanh %722 : vector<4x2x32xf32>
    %cst_253 = arith.constant 1.000000e+00 : f32
    %724 = vector.broadcast %cst_253 : f32 to vector<4x2x32xf32>
    %725 = arith.subf %724, %717 : vector<4x2x32xf32>
    %726 = arith.mulf %725, %723 : vector<4x2x32xf32>
    %727 = arith.mulf %717, %699 : vector<4x2x32xf32>
    %728 = arith.addf %726, %727 : vector<4x2x32xf32>
    %729 = vector.shape_cast %4 : vector<4x2xf32> to vector<4x2x1xf32>
    %730 = vector.extract_strided_slice %7 {offsets = [1, 0, 0, 0], sizes = [1, 4, 2, 32], strides = [1, 1, 1, 1]} : vector<3x4x2x32xf32> to vector<1x4x2x32xf32>
    %731 = vector.shape_cast %730 : vector<1x4x2x32xf32> to vector<4x2x32xf32>
    %cst_254 = arith.constant 1.000000e+00 : f32
    %732 = vector.broadcast %cst_254 : f32 to vector<4x2x1xf32>
    %733 = arith.subf %732, %729 : vector<4x2x1xf32>
    %734 = vector.broadcast %733 : vector<4x2x1xf32> to vector<4x2x32xf32>
    %735 = arith.mulf %731, %734 : vector<4x2x32xf32>
    %736 = vector.broadcast %729 : vector<4x2x1xf32> to vector<4x2x32xf32>
    %737 = arith.mulf %728, %736 : vector<4x2x32xf32>
    %738 = arith.addf %735, %737 : vector<4x2x32xf32>
    %739 = tpu.concatenate %23, %545 in 1 : vector<4x32xf32>, vector<4x32xf32> -> vector<4x64xf32>
    %c2_255 = arith.constant 2 : index
    %c0_256 = arith.constant 0 : index
    %c0_257 = arith.constant 0 : index
    %740 = vector.load %arg10[%c2_255, %c0_256, %c0_257] : memref<3x64x96xf32, #tpu.memory_space<vmem>>, vector<1x64x96xf32>
    %741 = vector.shape_cast %740 : vector<1x64x96xf32> to vector<64x96xf32>
    %cst_258 = arith.constant dense<0.000000e+00> : vector<4x96xf32>
    %742 = tpu.matmul %739, %741, %cst_258 {dimension_numbers = #tpu.dot_dimension_numbers<[1], [0], [0], [1], [0, 0, 1, 1], [], []>} : vector<4x64xf32>, vector<64x96xf32>, vector<4x96xf32> -> vector<4x96xf32>
    %c2_259 = arith.constant 2 : index
    %c0_260 = arith.constant 0 : index
    %c0_261 = arith.constant 0 : index
    %743 = vector.load %arg12[%c2_259, %c0_260, %c0_261] : memref<3x1x96xf32, #tpu.memory_space<vmem>>, vector<1x1x96xf32>
    %744 = vector.shape_cast %743 : vector<1x1x96xf32> to vector<1x96xf32>
    %745 = vector.broadcast %744 : vector<1x96xf32> to vector<4x96xf32>
    %746 = arith.addf %742, %745 : vector<4x96xf32>
    %747 = vector.shape_cast %746 : vector<4x96xf32> to vector<4x1x96xf32>
    %748 = vector.extract_strided_slice %7 {offsets = [2, 0, 0, 0], sizes = [1, 4, 2, 32], strides = [1, 1, 1, 1]} : vector<3x4x2x32xf32> to vector<1x4x2x32xf32>
    %749 = vector.shape_cast %748 : vector<1x4x2x32xf32> to vector<4x2x32xf32>
    %750 = vector.shape_cast %749 : vector<4x2x32xf32> to vector<8x32xf32>
    %c2_262 = arith.constant 2 : index
    %c0_263 = arith.constant 0 : index
    %c0_264 = arith.constant 0 : index
    %751 = vector.load %arg11[%c2_262, %c0_263, %c0_264] : memref<3x32x96xf32, #tpu.memory_space<vmem>>, vector<1x32x96xf32>
    %752 = vector.shape_cast %751 : vector<1x32x96xf32> to vector<32x96xf32>
    %cst_265 = arith.constant dense<0.000000e+00> : vector<8x96xf32>
    %753 = tpu.matmul %750, %752, %cst_265 {dimension_numbers = #tpu.dot_dimension_numbers<[1], [0], [0], [1], [0, 0, 1, 1], [], []>} : vector<8x32xf32>, vector<32x96xf32>, vector<8x96xf32> -> vector<8x96xf32>
    %c2_266 = arith.constant 2 : index
    %c0_267 = arith.constant 0 : index
    %c0_268 = arith.constant 0 : index
    %754 = vector.load %arg13[%c2_266, %c0_267, %c0_268] : memref<3x1x96xf32, #tpu.memory_space<vmem>>, vector<1x1x96xf32>
    %755 = vector.shape_cast %754 : vector<1x1x96xf32> to vector<1x96xf32>
    %756 = vector.broadcast %755 : vector<1x96xf32> to vector<8x96xf32>
    %757 = arith.addf %753, %756 : vector<8x96xf32>
    %758 = vector.shape_cast %757 : vector<8x96xf32> to vector<4x2x96xf32>
    %759 = vector.extract_strided_slice %7 {offsets = [2, 0, 0, 0], sizes = [1, 4, 2, 32], strides = [1, 1, 1, 1]} : vector<3x4x2x32xf32> to vector<1x4x2x32xf32>
    %760 = vector.shape_cast %759 : vector<1x4x2x32xf32> to vector<4x2x32xf32>
    %761 = vector.extract_strided_slice %747 {offsets = [0, 0, 0], sizes = [4, 1, 32], strides = [1, 1, 1]} : vector<4x1x96xf32> to vector<4x1x32xf32>
    %762 = vector.extract_strided_slice %758 {offsets = [0, 0, 0], sizes = [4, 2, 32], strides = [1, 1, 1]} : vector<4x2x96xf32> to vector<4x2x32xf32>
    %763 = vector.broadcast %761 : vector<4x1x32xf32> to vector<4x2x32xf32>
    %764 = arith.addf %763, %762 : vector<4x2x32xf32>
    %765 = arith.negf %764 : vector<4x2x32xf32>
    %766 = math.exp %765 : vector<4x2x32xf32>
    %cst_269 = arith.constant 1.000000e+00 : f32
    %767 = vector.broadcast %cst_269 : f32 to vector<4x2x32xf32>
    %768 = arith.addf %767, %766 : vector<4x2x32xf32>
    %769 = arith.divf %767, %768 : vector<4x2x32xf32>
    %770 = vector.extract_strided_slice %747 {offsets = [0, 0, 32], sizes = [4, 1, 32], strides = [1, 1, 1]} : vector<4x1x96xf32> to vector<4x1x32xf32>
    %771 = vector.extract_strided_slice %758 {offsets = [0, 0, 32], sizes = [4, 2, 32], strides = [1, 1, 1]} : vector<4x2x96xf32> to vector<4x2x32xf32>
    %772 = vector.broadcast %770 : vector<4x1x32xf32> to vector<4x2x32xf32>
    %773 = arith.addf %772, %771 : vector<4x2x32xf32>
    %774 = arith.negf %773 : vector<4x2x32xf32>
    %775 = math.exp %774 : vector<4x2x32xf32>
    %cst_270 = arith.constant 1.000000e+00 : f32
    %776 = vector.broadcast %cst_270 : f32 to vector<4x2x32xf32>
    %777 = arith.addf %776, %775 : vector<4x2x32xf32>
    %778 = arith.divf %776, %777 : vector<4x2x32xf32>
    %779 = vector.extract_strided_slice %747 {offsets = [0, 0, 64], sizes = [4, 1, 32], strides = [1, 1, 1]} : vector<4x1x96xf32> to vector<4x1x32xf32>
    %780 = vector.extract_strided_slice %758 {offsets = [0, 0, 64], sizes = [4, 2, 32], strides = [1, 1, 1]} : vector<4x2x96xf32> to vector<4x2x32xf32>
    %781 = arith.mulf %769, %780 : vector<4x2x32xf32>
    %782 = vector.broadcast %779 : vector<4x1x32xf32> to vector<4x2x32xf32>
    %783 = arith.addf %782, %781 : vector<4x2x32xf32>
    %784 = math.tanh %783 : vector<4x2x32xf32>
    %cst_271 = arith.constant 1.000000e+00 : f32
    %785 = vector.broadcast %cst_271 : f32 to vector<4x2x32xf32>
    %786 = arith.subf %785, %778 : vector<4x2x32xf32>
    %787 = arith.mulf %786, %784 : vector<4x2x32xf32>
    %788 = arith.mulf %778, %760 : vector<4x2x32xf32>
    %789 = arith.addf %787, %788 : vector<4x2x32xf32>
    %790 = vector.shape_cast %4 : vector<4x2xf32> to vector<4x2x1xf32>
    %791 = vector.extract_strided_slice %7 {offsets = [2, 0, 0, 0], sizes = [1, 4, 2, 32], strides = [1, 1, 1, 1]} : vector<3x4x2x32xf32> to vector<1x4x2x32xf32>
    %792 = vector.shape_cast %791 : vector<1x4x2x32xf32> to vector<4x2x32xf32>
    %cst_272 = arith.constant 1.000000e+00 : f32
    %793 = vector.broadcast %cst_272 : f32 to vector<4x2x1xf32>
    %794 = arith.subf %793, %790 : vector<4x2x1xf32>
    %795 = vector.broadcast %794 : vector<4x2x1xf32> to vector<4x2x32xf32>
    %796 = arith.mulf %792, %795 : vector<4x2x32xf32>
    %797 = vector.broadcast %790 : vector<4x2x1xf32> to vector<4x2x32xf32>
    %798 = arith.mulf %789, %797 : vector<4x2x32xf32>
    %799 = arith.addf %796, %798 : vector<4x2x32xf32>
    %800 = vector.shape_cast %677 : vector<4x2x32xf32> to vector<1x4x2x32xf32>
    %801 = vector.shape_cast %738 : vector<4x2x32xf32> to vector<1x4x2x32xf32>
    %802 = vector.shape_cast %799 : vector<4x2x32xf32> to vector<1x4x2x32xf32>
    %803 = tpu.concatenate %800, %801, %802 in 0 : vector<1x4x2x32xf32>, vector<1x4x2x32xf32>, vector<1x4x2x32xf32> -> vector<3x4x2x32xf32>
    %c0_273 = arith.constant 0 : index
    %c0_274 = arith.constant 0 : index
    %c0_275 = arith.constant 0 : index
    %c0_276 = arith.constant 0 : index
    %804 = vector.load %arg25[%c0_273, %c0_274, %c0_275, %c0_276] : memref<3x4x2x32xf32, #tpu.memory_space<vmem>>, vector<3x4x2x32xf32>
    tpu.vector_store %arg25[%c0_273, %c0_274, %c0_275, %c0_276], %803 {strides = array<i32>} : memref<3x4x2x32xf32, #tpu.memory_space<vmem>>, vector<3x4x2x32xf32>,
    %805 = vector.shape_cast %6 : vector<4x2xf32> to vector<4x2x1xf32>
    %806 = vector.broadcast %805 : vector<4x2x1xf32> to vector<4x2x32xf32>
    %807 = arith.mulf %806, %677 : vector<4x2x32xf32>
    %cst_277 = arith.constant dense<0.000000e+00> : vector<4x32xf32>
    %808 = vector.multi_reduction <add>, %807, %cst_277 [1] : vector<4x2x32xf32> to vector<4x32xf32>
    %c0_278 = arith.constant 0 : index
    %c0_279 = arith.constant 0 : index
    %c0_280 = arith.constant 0 : index
    %809 = vector.load %arg14[%c0_278, %c0_279, %c0_280] : memref<3x32x96xf32, #tpu.memory_space<vmem>>, vector<1x32x96xf32>
    %810 = vector.shape_cast %809 : vector<1x32x96xf32> to vector<32x96xf32>
    %cst_281 = arith.constant dense<0.000000e+00> : vector<4x96xf32>
    %811 = tpu.matmul %808, %810, %cst_281 {dimension_numbers = #tpu.dot_dimension_numbers<[1], [0], [0], [1], [0, 0, 1, 1], [], []>} : vector<4x32xf32>, vector<32x96xf32>, vector<4x96xf32> -> vector<4x96xf32>
    %c0_282 = arith.constant 0 : index
    %c0_283 = arith.constant 0 : index
    %c0_284 = arith.constant 0 : index
    %812 = vector.load %arg16[%c0_282, %c0_283, %c0_284] : memref<3x1x96xf32, #tpu.memory_space<vmem>>, vector<1x1x96xf32>
    %813 = vector.shape_cast %812 : vector<1x1x96xf32> to vector<1x96xf32>
    %814 = vector.broadcast %813 : vector<1x96xf32> to vector<4x96xf32>
    %815 = arith.addf %811, %814 : vector<4x96xf32>
    %816 = vector.extract_strided_slice %8 {offsets = [0, 0, 0], sizes = [1, 4, 32], strides = [1, 1, 1]} : vector<3x4x32xf32> to vector<1x4x32xf32>
    %817 = vector.shape_cast %816 : vector<1x4x32xf32> to vector<4x32xf32>
    %c0_285 = arith.constant 0 : index
    %c0_286 = arith.constant 0 : index
    %c0_287 = arith.constant 0 : index
    %818 = vector.load %arg15[%c0_285, %c0_286, %c0_287] : memref<3x32x96xf32, #tpu.memory_space<vmem>>, vector<1x32x96xf32>
    %819 = vector.shape_cast %818 : vector<1x32x96xf32> to vector<32x96xf32>
    %cst_288 = arith.constant dense<0.000000e+00> : vector<4x96xf32>
    %820 = tpu.matmul %817, %819, %cst_288 {dimension_numbers = #tpu.dot_dimension_numbers<[1], [0], [0], [1], [0, 0, 1, 1], [], []>} : vector<4x32xf32>, vector<32x96xf32>, vector<4x96xf32> -> vector<4x96xf32>
    %c0_289 = arith.constant 0 : index
    %c0_290 = arith.constant 0 : index
    %c0_291 = arith.constant 0 : index
    %821 = vector.load %arg17[%c0_289, %c0_290, %c0_291] : memref<3x1x96xf32, #tpu.memory_space<vmem>>, vector<1x1x96xf32>
    %822 = vector.shape_cast %821 : vector<1x1x96xf32> to vector<1x96xf32>
    %823 = vector.broadcast %822 : vector<1x96xf32> to vector<4x96xf32>
    %824 = arith.addf %820, %823 : vector<4x96xf32>
    %825 = vector.extract_strided_slice %8 {offsets = [0, 0, 0], sizes = [1, 4, 32], strides = [1, 1, 1]} : vector<3x4x32xf32> to vector<1x4x32xf32>
    %826 = vector.shape_cast %825 : vector<1x4x32xf32> to vector<4x32xf32>
    %827 = vector.extract_strided_slice %815 {offsets = [0, 0], sizes = [4, 32], strides = [1, 1]} : vector<4x96xf32> to vector<4x32xf32>
    %828 = vector.extract_strided_slice %824 {offsets = [0, 0], sizes = [4, 32], strides = [1, 1]} : vector<4x96xf32> to vector<4x32xf32>
    %829 = arith.addf %827, %828 : vector<4x32xf32>
    %830 = arith.negf %829 : vector<4x32xf32>
    %831 = math.exp %830 : vector<4x32xf32>
    %cst_292 = arith.constant 1.000000e+00 : f32
    %832 = vector.broadcast %cst_292 : f32 to vector<4x32xf32>
    %833 = arith.addf %832, %831 : vector<4x32xf32>
    %834 = arith.divf %832, %833 : vector<4x32xf32>
    %835 = vector.extract_strided_slice %815 {offsets = [0, 32], sizes = [4, 32], strides = [1, 1]} : vector<4x96xf32> to vector<4x32xf32>
    %836 = vector.extract_strided_slice %824 {offsets = [0, 32], sizes = [4, 32], strides = [1, 1]} : vector<4x96xf32> to vector<4x32xf32>
    %837 = arith.addf %835, %836 : vector<4x32xf32>
    %838 = arith.negf %837 : vector<4x32xf32>
    %839 = math.exp %838 : vector<4x32xf32>
    %cst_293 = arith.constant 1.000000e+00 : f32
    %840 = vector.broadcast %cst_293 : f32 to vector<4x32xf32>
    %841 = arith.addf %840, %839 : vector<4x32xf32>
    %842 = arith.divf %840, %841 : vector<4x32xf32>
    %843 = vector.extract_strided_slice %815 {offsets = [0, 64], sizes = [4, 32], strides = [1, 1]} : vector<4x96xf32> to vector<4x32xf32>
    %844 = vector.extract_strided_slice %824 {offsets = [0, 64], sizes = [4, 32], strides = [1, 1]} : vector<4x96xf32> to vector<4x32xf32>
    %845 = arith.mulf %834, %844 : vector<4x32xf32>
    %846 = arith.addf %843, %845 : vector<4x32xf32>
    %847 = math.tanh %846 : vector<4x32xf32>
    %cst_294 = arith.constant 1.000000e+00 : f32
    %848 = vector.broadcast %cst_294 : f32 to vector<4x32xf32>
    %849 = arith.subf %848, %842 : vector<4x32xf32>
    %850 = arith.mulf %849, %847 : vector<4x32xf32>
    %851 = arith.mulf %842, %826 : vector<4x32xf32>
    %852 = arith.addf %850, %851 : vector<4x32xf32>
    %853 = vector.shape_cast %6 : vector<4x2xf32> to vector<4x2x1xf32>
    %854 = vector.broadcast %853 : vector<4x2x1xf32> to vector<4x2x32xf32>
    %855 = arith.mulf %854, %738 : vector<4x2x32xf32>
    %cst_295 = arith.constant dense<0.000000e+00> : vector<4x32xf32>
    %856 = vector.multi_reduction <add>, %855, %cst_295 [1] : vector<4x2x32xf32> to vector<4x32xf32>
    %c1_296 = arith.constant 1 : index
    %c0_297 = arith.constant 0 : index
    %c0_298 = arith.constant 0 : index
    %857 = vector.load %arg14[%c1_296, %c0_297, %c0_298] : memref<3x32x96xf32, #tpu.memory_space<vmem>>, vector<1x32x96xf32>
    %858 = vector.shape_cast %857 : vector<1x32x96xf32> to vector<32x96xf32>
    %cst_299 = arith.constant dense<0.000000e+00> : vector<4x96xf32>
    %859 = tpu.matmul %856, %858, %cst_299 {dimension_numbers = #tpu.dot_dimension_numbers<[1], [0], [0], [1], [0, 0, 1, 1], [], []>} : vector<4x32xf32>, vector<32x96xf32>, vector<4x96xf32> -> vector<4x96xf32>
    %c1_300 = arith.constant 1 : index
    %c0_301 = arith.constant 0 : index
    %c0_302 = arith.constant 0 : index
    %860 = vector.load %arg16[%c1_300, %c0_301, %c0_302] : memref<3x1x96xf32, #tpu.memory_space<vmem>>, vector<1x1x96xf32>
    %861 = vector.shape_cast %860 : vector<1x1x96xf32> to vector<1x96xf32>
    %862 = vector.broadcast %861 : vector<1x96xf32> to vector<4x96xf32>
    %863 = arith.addf %859, %862 : vector<4x96xf32>
    %864 = vector.extract_strided_slice %8 {offsets = [1, 0, 0], sizes = [1, 4, 32], strides = [1, 1, 1]} : vector<3x4x32xf32> to vector<1x4x32xf32>
    %865 = vector.shape_cast %864 : vector<1x4x32xf32> to vector<4x32xf32>
    %c1_303 = arith.constant 1 : index
    %c0_304 = arith.constant 0 : index
    %c0_305 = arith.constant 0 : index
    %866 = vector.load %arg15[%c1_303, %c0_304, %c0_305] : memref<3x32x96xf32, #tpu.memory_space<vmem>>, vector<1x32x96xf32>
    %867 = vector.shape_cast %866 : vector<1x32x96xf32> to vector<32x96xf32>
    %cst_306 = arith.constant dense<0.000000e+00> : vector<4x96xf32>
    %868 = tpu.matmul %865, %867, %cst_306 {dimension_numbers = #tpu.dot_dimension_numbers<[1], [0], [0], [1], [0, 0, 1, 1], [], []>} : vector<4x32xf32>, vector<32x96xf32>, vector<4x96xf32> -> vector<4x96xf32>
    %c1_307 = arith.constant 1 : index
    %c0_308 = arith.constant 0 : index
    %c0_309 = arith.constant 0 : index
    %869 = vector.load %arg17[%c1_307, %c0_308, %c0_309] : memref<3x1x96xf32, #tpu.memory_space<vmem>>, vector<1x1x96xf32>
    %870 = vector.shape_cast %869 : vector<1x1x96xf32> to vector<1x96xf32>
    %871 = vector.broadcast %870 : vector<1x96xf32> to vector<4x96xf32>
    %872 = arith.addf %868, %871 : vector<4x96xf32>
    %873 = vector.extract_strided_slice %8 {offsets = [1, 0, 0], sizes = [1, 4, 32], strides = [1, 1, 1]} : vector<3x4x32xf32> to vector<1x4x32xf32>
    %874 = vector.shape_cast %873 : vector<1x4x32xf32> to vector<4x32xf32>
    %875 = vector.extract_strided_slice %863 {offsets = [0, 0], sizes = [4, 32], strides = [1, 1]} : vector<4x96xf32> to vector<4x32xf32>
    %876 = vector.extract_strided_slice %872 {offsets = [0, 0], sizes = [4, 32], strides = [1, 1]} : vector<4x96xf32> to vector<4x32xf32>
    %877 = arith.addf %875, %876 : vector<4x32xf32>
    %878 = arith.negf %877 : vector<4x32xf32>
    %879 = math.exp %878 : vector<4x32xf32>
    %cst_310 = arith.constant 1.000000e+00 : f32
    %880 = vector.broadcast %cst_310 : f32 to vector<4x32xf32>
    %881 = arith.addf %880, %879 : vector<4x32xf32>
    %882 = arith.divf %880, %881 : vector<4x32xf32>
    %883 = vector.extract_strided_slice %863 {offsets = [0, 32], sizes = [4, 32], strides = [1, 1]} : vector<4x96xf32> to vector<4x32xf32>
    %884 = vector.extract_strided_slice %872 {offsets = [0, 32], sizes = [4, 32], strides = [1, 1]} : vector<4x96xf32> to vector<4x32xf32>
    %885 = arith.addf %883, %884 : vector<4x32xf32>
    %886 = arith.negf %885 : vector<4x32xf32>
    %887 = math.exp %886 : vector<4x32xf32>
    %cst_311 = arith.constant 1.000000e+00 : f32
    %888 = vector.broadcast %cst_311 : f32 to vector<4x32xf32>
    %889 = arith.addf %888, %887 : vector<4x32xf32>
    %890 = arith.divf %888, %889 : vector<4x32xf32>
    %891 = vector.extract_strided_slice %863 {offsets = [0, 64], sizes = [4, 32], strides = [1, 1]} : vector<4x96xf32> to vector<4x32xf32>
    %892 = vector.extract_strided_slice %872 {offsets = [0, 64], sizes = [4, 32], strides = [1, 1]} : vector<4x96xf32> to vector<4x32xf32>
    %893 = arith.mulf %882, %892 : vector<4x32xf32>
    %894 = arith.addf %891, %893 : vector<4x32xf32>
    %895 = math.tanh %894 : vector<4x32xf32>
    %cst_312 = arith.constant 1.000000e+00 : f32
    %896 = vector.broadcast %cst_312 : f32 to vector<4x32xf32>
    %897 = arith.subf %896, %890 : vector<4x32xf32>
    %898 = arith.mulf %897, %895 : vector<4x32xf32>
    %899 = arith.mulf %890, %874 : vector<4x32xf32>
    %900 = arith.addf %898, %899 : vector<4x32xf32>
    %901 = vector.shape_cast %6 : vector<4x2xf32> to vector<4x2x1xf32>
    %902 = vector.broadcast %901 : vector<4x2x1xf32> to vector<4x2x32xf32>
    %903 = arith.mulf %902, %799 : vector<4x2x32xf32>
    %cst_313 = arith.constant dense<0.000000e+00> : vector<4x32xf32>
    %904 = vector.multi_reduction <add>, %903, %cst_313 [1] : vector<4x2x32xf32> to vector<4x32xf32>
    %c2_314 = arith.constant 2 : index
    %c0_315 = arith.constant 0 : index
    %c0_316 = arith.constant 0 : index
    %905 = vector.load %arg14[%c2_314, %c0_315, %c0_316] : memref<3x32x96xf32, #tpu.memory_space<vmem>>, vector<1x32x96xf32>
    %906 = vector.shape_cast %905 : vector<1x32x96xf32> to vector<32x96xf32>
    %cst_317 = arith.constant dense<0.000000e+00> : vector<4x96xf32>
    %907 = tpu.matmul %904, %906, %cst_317 {dimension_numbers = #tpu.dot_dimension_numbers<[1], [0], [0], [1], [0, 0, 1, 1], [], []>} : vector<4x32xf32>, vector<32x96xf32>, vector<4x96xf32> -> vector<4x96xf32>
    %c2_318 = arith.constant 2 : index
    %c0_319 = arith.constant 0 : index
    %c0_320 = arith.constant 0 : index
    %908 = vector.load %arg16[%c2_318, %c0_319, %c0_320] : memref<3x1x96xf32, #tpu.memory_space<vmem>>, vector<1x1x96xf32>
    %909 = vector.shape_cast %908 : vector<1x1x96xf32> to vector<1x96xf32>
    %910 = vector.broadcast %909 : vector<1x96xf32> to vector<4x96xf32>
    %911 = arith.addf %907, %910 : vector<4x96xf32>
    %912 = vector.extract_strided_slice %8 {offsets = [2, 0, 0], sizes = [1, 4, 32], strides = [1, 1, 1]} : vector<3x4x32xf32> to vector<1x4x32xf32>
    %913 = vector.shape_cast %912 : vector<1x4x32xf32> to vector<4x32xf32>
    %c2_321 = arith.constant 2 : index
    %c0_322 = arith.constant 0 : index
    %c0_323 = arith.constant 0 : index
    %914 = vector.load %arg15[%c2_321, %c0_322, %c0_323] : memref<3x32x96xf32, #tpu.memory_space<vmem>>, vector<1x32x96xf32>
    %915 = vector.shape_cast %914 : vector<1x32x96xf32> to vector<32x96xf32>
    %cst_324 = arith.constant dense<0.000000e+00> : vector<4x96xf32>
    %916 = tpu.matmul %913, %915, %cst_324 {dimension_numbers = #tpu.dot_dimension_numbers<[1], [0], [0], [1], [0, 0, 1, 1], [], []>} : vector<4x32xf32>, vector<32x96xf32>, vector<4x96xf32> -> vector<4x96xf32>
    %c2_325 = arith.constant 2 : index
    %c0_326 = arith.constant 0 : index
    %c0_327 = arith.constant 0 : index
    %917 = vector.load %arg17[%c2_325, %c0_326, %c0_327] : memref<3x1x96xf32, #tpu.memory_space<vmem>>, vector<1x1x96xf32>
    %918 = vector.shape_cast %917 : vector<1x1x96xf32> to vector<1x96xf32>
    %919 = vector.broadcast %918 : vector<1x96xf32> to vector<4x96xf32>
    %920 = arith.addf %916, %919 : vector<4x96xf32>
    %921 = vector.extract_strided_slice %8 {offsets = [2, 0, 0], sizes = [1, 4, 32], strides = [1, 1, 1]} : vector<3x4x32xf32> to vector<1x4x32xf32>
    %922 = vector.shape_cast %921 : vector<1x4x32xf32> to vector<4x32xf32>
    %923 = vector.extract_strided_slice %911 {offsets = [0, 0], sizes = [4, 32], strides = [1, 1]} : vector<4x96xf32> to vector<4x32xf32>
    %924 = vector.extract_strided_slice %920 {offsets = [0, 0], sizes = [4, 32], strides = [1, 1]} : vector<4x96xf32> to vector<4x32xf32>
    %925 = arith.addf %923, %924 : vector<4x32xf32>
    %926 = arith.negf %925 : vector<4x32xf32>
    %927 = math.exp %926 : vector<4x32xf32>
    %cst_328 = arith.constant 1.000000e+00 : f32
    %928 = vector.broadcast %cst_328 : f32 to vector<4x32xf32>
    %929 = arith.addf %928, %927 : vector<4x32xf32>
    %930 = arith.divf %928, %929 : vector<4x32xf32>
    %931 = vector.extract_strided_slice %911 {offsets = [0, 32], sizes = [4, 32], strides = [1, 1]} : vector<4x96xf32> to vector<4x32xf32>
    %932 = vector.extract_strided_slice %920 {offsets = [0, 32], sizes = [4, 32], strides = [1, 1]} : vector<4x96xf32> to vector<4x32xf32>
    %933 = arith.addf %931, %932 : vector<4x32xf32>
    %934 = arith.negf %933 : vector<4x32xf32>
    %935 = math.exp %934 : vector<4x32xf32>
    %cst_329 = arith.constant 1.000000e+00 : f32
    %936 = vector.broadcast %cst_329 : f32 to vector<4x32xf32>
    %937 = arith.addf %936, %935 : vector<4x32xf32>
    %938 = arith.divf %936, %937 : vector<4x32xf32>
    %939 = vector.extract_strided_slice %911 {offsets = [0, 64], sizes = [4, 32], strides = [1, 1]} : vector<4x96xf32> to vector<4x32xf32>
    %940 = vector.extract_strided_slice %920 {offsets = [0, 64], sizes = [4, 32], strides = [1, 1]} : vector<4x96xf32> to vector<4x32xf32>
    %941 = arith.mulf %930, %940 : vector<4x32xf32>
    %942 = arith.addf %939, %941 : vector<4x32xf32>
    %943 = math.tanh %942 : vector<4x32xf32>
    %cst_330 = arith.constant 1.000000e+00 : f32
    %944 = vector.broadcast %cst_330 : f32 to vector<4x32xf32>
    %945 = arith.subf %944, %938 : vector<4x32xf32>
    %946 = arith.mulf %945, %943 : vector<4x32xf32>
    %947 = arith.mulf %938, %922 : vector<4x32xf32>
    %948 = arith.addf %946, %947 : vector<4x32xf32>
    %949 = vector.shape_cast %852 : vector<4x32xf32> to vector<1x4x32xf32>
    %950 = vector.shape_cast %900 : vector<4x32xf32> to vector<1x4x32xf32>
    %951 = vector.shape_cast %948 : vector<4x32xf32> to vector<1x4x32xf32>
    %952 = tpu.concatenate %949, %950, %951 in 0 : vector<1x4x32xf32>, vector<1x4x32xf32>, vector<1x4x32xf32> -> vector<3x4x32xf32>
    %c0_331 = arith.constant 0 : index
    %c0_332 = arith.constant 0 : index
    %c0_333 = arith.constant 0 : index
    %953 = vector.load %arg26[%c0_331, %c0_332, %c0_333] : memref<3x4x32xf32, #tpu.memory_space<vmem>>, vector<3x4x32xf32>
    tpu.vector_store %arg26[%c0_331, %c0_332, %c0_333], %952 {strides = array<i32>} : memref<3x4x32xf32, #tpu.memory_space<vmem>>, vector<3x4x32xf32>,
    %954 = vector.shape_cast %677 : vector<4x2x32xf32> to vector<4x64xf32>
    %955 = vector.shape_cast %738 : vector<4x2x32xf32> to vector<4x64xf32>
    %956 = vector.shape_cast %799 : vector<4x2x32xf32> to vector<4x64xf32>
    %957 = tpu.transpose %401, [1, 0] : vector<6x4xf32> -> vector<4x6xf32>
    %cst_334 = arith.constant 0.000000e+00 : f32
    %958 = vector.broadcast %cst_334 : f32 to vector<4x122xf32>
    %959 = tpu.concatenate %74, %125, %176, %954, %955, %956, %852, %900, %948, %957, %958 in 1 : vector<4x32xf32>, vector<4x32xf32>, vector<4x32xf32>, vector<4x64xf32>, vector<4x64xf32>, vector<4x64xf32>, vector<4x32xf32>, vector<4x32xf32>, vector<4x32xf32>, vector<4x6xf32>, vector<4x122xf32> -> vector<4x512xf32>
    %c0_335 = arith.constant 0 : index
    %c0_336 = arith.constant 0 : index
    %c0_337 = arith.constant 0 : index
    %960 = vector.load %arg23[%c0_335, %c0_336, %c0_337] : memref<1x4x512xf32, #tpu.memory_space<vmem>>, vector<1x4x512xf32>
    %961 = vector.shape_cast %960 : vector<1x4x512xf32> to vector<4x512xf32>
    %962 = vector.shape_cast %959 : vector<4x512xf32> to vector<1x4x512xf32>
    tpu.vector_store %arg23[%c0_335, %c0_336, %c0_337], %962 {strides = array<i32>} : memref<1x4x512xf32, #tpu.memory_space<vmem>>, vector<1x4x512xf32>,
    return
  }
  func.func @transform_0(%arg0: i32) -> (i32, i32, i32) {
    %c0_i32 = arith.constant 0 : i32
    %c0_i32_0 = arith.constant 0 : i32
    %c0_i32_1 = arith.constant 0 : i32
    return %arg0, %c0_i32, %c0_i32_0 : i32, i32, i32
  }
  func.func @transform_1(%arg0: i32) -> (i32, i32, i32) {
    %c0_i32 = arith.constant 0 : i32
    %c0_i32_0 = arith.constant 0 : i32
    %c0_i32_1 = arith.constant 0 : i32
    return %arg0, %c0_i32, %c0_i32_0 : i32, i32, i32
  }
  func.func @transform_2(%arg0: i32) -> (i32, i32, i32) {
    %c0_i32 = arith.constant 0 : i32
    %c0_i32_0 = arith.constant 0 : i32
    %c0_i32_1 = arith.constant 0 : i32
    return %arg0, %c0_i32, %c0_i32_0 : i32, i32, i32
  }
  func.func @transform_3(%arg0: i32) -> (i32, i32) {
    %c0_i32 = arith.constant 0 : i32
    %c0_i32_0 = arith.constant 0 : i32
    %c0_i32_1 = arith.constant 0 : i32
    return %c0_i32, %c0_i32_0 : i32, i32
  }
  func.func @transform_4(%arg0: i32) -> (i32, i32) {
    %c0_i32 = arith.constant 0 : i32
    %c0_i32_0 = arith.constant 0 : i32
    %c0_i32_1 = arith.constant 0 : i32
    return %c0_i32, %c0_i32_0 : i32, i32
  }
  func.func @transform_5(%arg0: i32) -> (i32, i32, i32) {
    %c0_i32 = arith.constant 0 : i32
    %c0_i32_0 = arith.constant 0 : i32
    %c0_i32_1 = arith.constant 0 : i32
    %c0_i32_2 = arith.constant 0 : i32
    return %c0_i32, %c0_i32_0, %c0_i32_1 : i32, i32, i32
  }
  func.func @transform_6(%arg0: i32) -> (i32, i32, i32) {
    %c0_i32 = arith.constant 0 : i32
    %c0_i32_0 = arith.constant 0 : i32
    %c0_i32_1 = arith.constant 0 : i32
    %c0_i32_2 = arith.constant 0 : i32
    return %c0_i32, %c0_i32_0, %c0_i32_1 : i32, i32, i32
  }
  func.func @transform_7(%arg0: i32) -> (i32, i32, i32) {
    %c0_i32 = arith.constant 0 : i32
    %c0_i32_0 = arith.constant 0 : i32
    %c0_i32_1 = arith.constant 0 : i32
    %c0_i32_2 = arith.constant 0 : i32
    return %c0_i32, %c0_i32_0, %c0_i32_1 : i32, i32, i32
  }
  func.func @transform_8(%arg0: i32) -> (i32, i32, i32) {
    %c0_i32 = arith.constant 0 : i32
    %c0_i32_0 = arith.constant 0 : i32
    %c0_i32_1 = arith.constant 0 : i32
    %c0_i32_2 = arith.constant 0 : i32
    return %c0_i32, %c0_i32_0, %c0_i32_1 : i32, i32, i32
  }
  func.func @transform_9(%arg0: i32) -> (i32, i32, i32) {
    %c0_i32 = arith.constant 0 : i32
    %c0_i32_0 = arith.constant 0 : i32
    %c0_i32_1 = arith.constant 0 : i32
    %c0_i32_2 = arith.constant 0 : i32
    return %c0_i32, %c0_i32_0, %c0_i32_1 : i32, i32, i32
  }
  func.func @transform_10(%arg0: i32) -> (i32, i32, i32) {
    %c0_i32 = arith.constant 0 : i32
    %c0_i32_0 = arith.constant 0 : i32
    %c0_i32_1 = arith.constant 0 : i32
    %c0_i32_2 = arith.constant 0 : i32
    return %c0_i32, %c0_i32_0, %c0_i32_1 : i32, i32, i32
  }
  func.func @transform_11(%arg0: i32) -> (i32, i32, i32) {
    %c0_i32 = arith.constant 0 : i32
    %c0_i32_0 = arith.constant 0 : i32
    %c0_i32_1 = arith.constant 0 : i32
    %c0_i32_2 = arith.constant 0 : i32
    return %c0_i32, %c0_i32_0, %c0_i32_1 : i32, i32, i32
  }
  func.func @transform_12(%arg0: i32) -> (i32, i32, i32) {
    %c0_i32 = arith.constant 0 : i32
    %c0_i32_0 = arith.constant 0 : i32
    %c0_i32_1 = arith.constant 0 : i32
    %c0_i32_2 = arith.constant 0 : i32
    return %c0_i32, %c0_i32_0, %c0_i32_1 : i32, i32, i32
  }
  func.func @transform_13(%arg0: i32) -> (i32, i32, i32) {
    %c0_i32 = arith.constant 0 : i32
    %c0_i32_0 = arith.constant 0 : i32
    %c0_i32_1 = arith.constant 0 : i32
    %c0_i32_2 = arith.constant 0 : i32
    return %c0_i32, %c0_i32_0, %c0_i32_1 : i32, i32, i32
  }
  func.func @transform_14(%arg0: i32) -> (i32, i32, i32) {
    %c0_i32 = arith.constant 0 : i32
    %c0_i32_0 = arith.constant 0 : i32
    %c0_i32_1 = arith.constant 0 : i32
    %c0_i32_2 = arith.constant 0 : i32
    return %c0_i32, %c0_i32_0, %c0_i32_1 : i32, i32, i32
  }
  func.func @transform_15(%arg0: i32) -> (i32, i32, i32) {
    %c0_i32 = arith.constant 0 : i32
    %c0_i32_0 = arith.constant 0 : i32
    %c0_i32_1 = arith.constant 0 : i32
    %c0_i32_2 = arith.constant 0 : i32
    return %c0_i32, %c0_i32_0, %c0_i32_1 : i32, i32, i32
  }
  func.func @transform_16(%arg0: i32) -> (i32, i32, i32) {
    %c0_i32 = arith.constant 0 : i32
    %c0_i32_0 = arith.constant 0 : i32
    %c0_i32_1 = arith.constant 0 : i32
    %c0_i32_2 = arith.constant 0 : i32
    return %c0_i32, %c0_i32_0, %c0_i32_1 : i32, i32, i32
  }
  func.func @transform_17(%arg0: i32) -> (i32, i32, i32) {
    %c0_i32 = arith.constant 0 : i32
    %c0_i32_0 = arith.constant 0 : i32
    %c0_i32_1 = arith.constant 0 : i32
    %c0_i32_2 = arith.constant 0 : i32
    return %c0_i32, %c0_i32_0, %c0_i32_1 : i32, i32, i32
  }
  func.func @transform_18(%arg0: i32) -> (i32, i32, i32) {
    %c0_i32 = arith.constant 0 : i32
    %c0_i32_0 = arith.constant 0 : i32
    %c0_i32_1 = arith.constant 0 : i32
    %c0_i32_2 = arith.constant 0 : i32
    return %c0_i32, %c0_i32_0, %c0_i32_1 : i32, i32, i32
  }
  func.func @transform_19(%arg0: i32) -> (i32, i32, i32) {
    %c0_i32 = arith.constant 0 : i32
    %c0_i32_0 = arith.constant 0 : i32
    %c0_i32_1 = arith.constant 0 : i32
    %c0_i32_2 = arith.constant 0 : i32
    return %c0_i32, %c0_i32_0, %c0_i32_1 : i32, i32, i32
  }
  func.func @transform_20(%arg0: i32) -> (i32, i32, i32) {
    %c0_i32 = arith.constant 0 : i32
    %c0_i32_0 = arith.constant 0 : i32
    %c0_i32_1 = arith.constant 0 : i32
    %c0_i32_2 = arith.constant 0 : i32
    return %c0_i32, %c0_i32_0, %c0_i32_1 : i32, i32, i32
  }
  func.func @transform_21(%arg0: i32) -> (i32, i32, i32) {
    %c0_i32 = arith.constant 0 : i32
    %c0_i32_0 = arith.constant 0 : i32
    %c0_i32_1 = arith.constant 0 : i32
    %c0_i32_2 = arith.constant 0 : i32
    return %c0_i32, %c0_i32_0, %c0_i32_1 : i32, i32, i32
  }
  func.func @transform_22(%arg0: i32) -> (i32, i32, i32) {
    %c0_i32 = arith.constant 0 : i32
    %c0_i32_0 = arith.constant 0 : i32
    %c0_i32_1 = arith.constant 0 : i32
    return %arg0, %c0_i32, %c0_i32_0 : i32, i32, i32
  }
}

</mosaic_0001>

<bundles_post_ra>
// kernel: dialogue_rnn_tri_scan.1
= control target key start
LH: loop header
LB: loop body
LE: loop exit
PB: predicated region body
PF: predicated region fallthrough
CT: control target
= control target key end

     0   :  { %s10176_s0 = inlined_call_operand.vmem [shape: f32[6,4,48], index: 0, kind: input, shape index: {}]   ;;  %s10177_s1 = inlined_call_operand.vmem [shape: f32[6,4,2], index: 1, kind: input, shape index: {}]   ;;  %s10178_s2 = inlined_call_operand.vmem [shape: f32[6,4,2], index: 2, kind: input, shape index: {}]   ;;  %s10179_s3 = inlined_call_operand.hbm [shape: f32[48,96], index: 3, kind: input, shape index: {}]   ;;  %s10180_s4 = inlined_call_operand.hbm [shape: f32[1,96], index: 4, kind: input, shape index: {}]   ;;  %s10181_s5 = inlined_call_operand.vmem [shape: f32[3,64,96], index: 5, kind: input, shape index: {}]   ;;  %s10182_s6 = inlined_call_operand.vmem [shape: f32[3,32,96], index: 6, kind: input, shape index: {}]   ;;  %s10183_s7 = inlined_call_operand.vmem [shape: f32[3,1,96], index: 7, kind: input, shape index: {}]   ;;  %s10184_s8 = inlined_call_operand.vmem [shape: f32[3,1,96], index: 8, kind: input, shape index: {}]   ;;  %s10185_s9 = inlined_call_operand.vmem [shape: f32[3,64,96], index: 9, kind: input, shape index: {}]   ;;  %s10186_s10 = inlined_call_operand.vmem [shape: f32[3,32,96], index: 10, kind: input, shape index: {}]   ;;  %s10187_s11 = inlined_call_operand.vmem [shape: f32[3,1,96], index: 11, kind: input, shape index: {}]   ;;  %s10188_s12 = inlined_call_operand.hbm [shape: f32[3,1,96], index: 12, kind: input, shape index: {}]   ;;  %s10189_s13 = inlined_call_operand.hbm [shape: f32[3,32,96], index: 13, kind: input, shape index: {}]   ;;  %s10190_s14 = inlined_call_operand.hbm [shape: f32[3,32,96], index: 14, kind: input, shape index: {}]   ;;  %s10191_s15 = inlined_call_operand.hbm [shape: f32[3,1,96], index: 15, kind: input, shape index: {}]   ;;  %s10192_s16 = inlined_call_operand.hbm [shape: f32[3,1,96], index: 16, kind: input, shape index: {}]   ;;  %s10193_s17 = inlined_call_operand.vmem [shape: f32[3,32,3], index: 17, kind: input, shape index: {}]   ;;  %s10194_s18 = inlined_call_operand.hbm [shape: f32[3,1,32], index: 18, kind: input, shape index: {}]   ;;  %s10195_s19 = inlined_call_operand.vmem [shape: f32[3,1,1], index: 19, kind: input, shape index: {}]   ;;  %s10196_s20 = inlined_call_operand.vmem [shape: f32[3,96,32], index: 20, kind: input, shape index: {}]   ;;  %s10197_s21 = inlined_call_operand.hbm [shape: f32[3,1,32], index: 21, kind: input, shape index: {}]   ;;  %s10198_s22 = inlined_call_operand.vmem [shape: f32[6,4,512], index: 22, kind: output, shape index: {}]  }
   0x1   :  { %10228 = sst [smem:[#allocation40_spill]] %s10176_s0 }
   0x2   :  { %10229 = sst [smem:[#allocation41_spill]] %s10177_s1 }
   0x3   :  { %10230 = sst [smem:[#allocation42_spill]] %s10178_s2 }
   0x4   :  { %10231 = sst [smem:[#allocation43_spill]] %s10179_s3 }
   0x5   :  { %10232 = sst [smem:[#allocation44_spill]] %s10180_s4 }
   0x6   :  { %10233 = sst [smem:[#allocation45_spill]] %s10181_s5 }
   0x7   :  { %10234 = sst [smem:[#allocation46_spill]] %s10182_s6 }
   0x8   :  { %10235 = sst [smem:[#allocation47_spill]] %s10187_s11 }
   0x9   :  { %10236 = sst [smem:[#allocation48_spill]] %s10188_s12 }
   0xa   :  { %10237 = sst [smem:[#allocation49_spill]] %s10189_s13 }
   0xb   :  { %10238 = sst [smem:[#allocation50_spill]] %s10191_s15 }
   0xc   :  { %27 = vsyncpa [#allocation6], 0 }
   0xd   :  { %28 = vsyncpa [#allocation8], 0 }
   0xe   :  { %29 = vsyncpa [#allocation11], 0 }
   0xf   :  { %30 = vsyncpa [#allocation14], 0 }
  0x10   :  { %31 = vsyncpa [#allocation17], 0  ;;  %s7899_s3 = smov 0  }
  0x11 LB: > { %10239 = sst [smem:[#allocation24_spill]] %s7757_s3  ;;  %s7759_s28 = smov [#allocation7]   ;;  %s7757_s3 = sphi %s7899_s3, %s37_s3  }
  0x12   : > { %s571_s29 = sshll.u32 %s7759_s28, 4  ;;  %s7905_s30 = sadd.s32 4294967295, %s7757_s3   ;;  %s572_s29 = int_to_ptr.vmem [resolvable:$true] %s571_s29 }
  0x13   : > { %p6366_p0 = scmp.ge.s32.totalorder %s7757_s3, 1  ;;  %p545_p1 = scmp.lt.s32.totalorder %s7757_s3, 7 }
  0x14   : > { %p6367_p2 = scmp.ne.s32.totalorder %s7905_s30, 0  ;;  %p7201_p3 = scmp.eq.s32.totalorder %s7905_s30, 0 }
  0x15   : > { %p7911_p4 = pnand %p6366_p0, %p545_p1  ;;  %s7760_s0 = smov [#allocation10]  }
  0x16   : > { %s615_s23 = sshll.u32 %s7760_s0, 4  ;;  %s7761_s5 = smov [#allocation13]   ;;  %s7917_s23 = int_to_ptr.vmem [resolvable:$true] %s615_s23 }
  0x17   : > { %p7173_p5 = pneg %p7911_p4  ;;  %s641_s24 = sshll.u32 %s7761_s5, 4  ;;  %s642_s24 = int_to_ptr.vmem [resolvable:$true] %s641_s24 }
  0x18   : > { %s7508_s25 = scalar_lea.vmem %s572_s29, 16  ;;  %s7515_s26 = scalar_lea.vmem %s572_s29, 32 }
  0x19   : > { %p7921_p6 = pnand %p7201_p3, %p7173_p5  ;;  %p7509_p8 = scmp.ne.s32.totalorder %s572_s29, %s7508_s25 }
  0x1a   : > { %p7516_p11 = scmp.lt.s32.totalorder %s572_s29, %s572_s29  ;;  %p7517_p12 = scmp.lt.s32.totalorder %s7515_s26, %s7508_s25 }
  0x1b   : > { %p7927_p7 = pneg %p7921_p6 }
  0x1c   : > { %p7518_p13 = por %p7517_p12, %p7516_p11 }
  0x1d   : > { %p7511_p9 = pnand %p7509_p8, %p7927_p7 }
  0x1f   : > { %p7512_p10 = pneg %p7511_p9 }
  0x21   : > { %p7519_p0 = pnand %p7518_p13, %p7512_p10 }
  0x23   : > { %7522 = shalt.err (!%p7519_p0)
}
  0x24   : > { %s10243_s28 = sld [smem:[#allocation44_spill]]  ;;  %s7534_s0 = scalar_lea.vmem %s7917_s23, 1536 }
  0x25   : > { %p7535_p1 = scmp.ne.s32.totalorder %s7917_s23, %s7534_s0  ;;  %p7542_p9 = scmp.lt.s32.totalorder %s7917_s23, %s7917_s23 }
  0x26   : > { %p7543_p11 = scmp.lt.s32.totalorder %s7534_s0, %s7534_s0 }
  0x27   : > { %p7537_p5 = pnand %p7535_p1, %p7927_p7 }
  0x28   : > { %p7544_p10 = por %p7543_p11, %p7542_p9 }
  0x29   : > { %p7538_p8 = pneg %p7537_p5 }
  0x2a   : > { %7179 = dma.hbm_to_vmem [thread:$0]  (!%p7921_p6), %s10243_s28, 16, %s572_s29, [#allocation8]  }
  0x2b   : > { %p7545_p12 = pnand %p7544_p10, %p7538_p8 }
  0x2d   : > { %7548 = shalt.err (!%p7545_p12)
}
  0x2e   : > { %s10203_s5 = smov 128   ;;  %s10205_s25 = smov 8  }
  0x2f   : > { %s10244_s13 = sld [smem:[#allocation49_spill]]  ;;  %s7764_s2 = smov [#allocation16]  }
  0x30   : > { %s670_s27 = sshll.u32 %s7764_s2, 4  ;;  %s7560_s28 = scalar_lea.vmem %s642_s24, 48  ;;  %s671_s27 = int_to_ptr.vmem [resolvable:$true] %s670_s27 }
  0x31   : > { %p7561_p13 = scmp.ne.s32.totalorder %s642_s24, %s7560_s28  ;;  %s7567_s0 = scalar_lea.vmem %s642_s24, 64 }
  0x32   : > { %p7568_p5 = scmp.lt.s32.totalorder %s642_s24, %s642_s24  ;;  %p7569_p8 = scmp.lt.s32.totalorder %s7567_s0, %s7560_s28 }
  0x33   : > { %p7563_p0 = pnand %p7561_p13, %p7927_p7 }
  0x34   : > { %p7570_p9 = por %p7569_p8, %p7568_p5 }
  0x35   : > { %7185 = dma.hbm_to_vmem [thread:$0]  (!%p7921_p6), %s10244_s13, 1536, %s7917_s23, [#allocation11], %s10203_s5, %s10203_s5, %s10205_s25  }
  0x36   : > { %p7564_p1 = pneg %p7563_p0 }
  0x38   : > { %p7571_p11 = pnand %p7570_p9, %p7564_p1 }
  0x3a   : > { %7574 = shalt.err (!%p7571_p11)
}
  0x3b   : > { %s7765_s3 = smov 16   ;;  %s7766_s11 = smov 1  }
  0x3c   : > { %s10245_s15 = sld [smem:[#allocation50_spill]]  ;;  %s7586_s26 = scalar_lea.vmem %s671_s27, 48 }
  0x3d   : > { %p7587_p10 = scmp.ne.s32.totalorder %s671_s27, %s7586_s26  ;;  %s7593_s2 = scalar_lea.vmem %s671_s27, 64 }
  0x3e   : > { %p7594_p0 = scmp.lt.s32.totalorder %s671_s27, %s671_s27  ;;  %p7595_p1 = scmp.lt.s32.totalorder %s7593_s2, %s7586_s26 }
  0x3f   : > { %p7589_p12 = pnand %p7587_p10, %p7927_p7 }
  0x40   : > { %p7596_p5 = por %p7595_p1, %p7594_p0 }
  0x41   : > { %p7590_p13 = pneg %p7589_p12 }
  0x42   : > { %7191 = dma.hbm_to_vmem [thread:$0]  (!%p7921_p6), %s10245_s15, 48, %s642_s24, [#allocation14], %s7765_s3, %s7765_s3, %s7766_s11  }
  0x43   : > { %p7597_p8 = pnand %p7596_p5, %p7590_p13 }
  0x45   : > { %7600 = shalt.err (!%p7597_p8)
}
  0x46   : > { %7197 = dma.hbm_to_vmem [thread:$0]  (!%p7921_p6), %s10194_s18, 48, %s671_s27, [#allocation17], %s7765_s3, %s7765_s3, %s7766_s11  }
  0x47   : > { %s7767_s24 = smov [#allocation5]   ;;  %s7768_s29 = smov [#allocation9]  }
  0x48   : > { %s557_s23 = sshll.u32 %s7767_s24, 4  ;;  %s602_s5 = sshll.u32 %s7768_s29, 4  ;;  %s558_s23 = int_to_ptr.vmem [resolvable:$true] %s557_s23  ;;  %s603_s5 = int_to_ptr.vmem [resolvable:$true] %s602_s5 }
  0x49   : > { %s7612_s25 = scalar_lea.vmem %s558_s23, 768  ;;  %p7620_p12 = scmp.lt.s32.totalorder %s558_s23, %s558_s23 }
  0x4a   : > { %p7613_p9 = scmp.ne.s32.totalorder %s558_s23, %s7612_s25  ;;  %p7621_p13 = scmp.lt.s32.totalorder %s7612_s25, %s7612_s25 }
  0x4c   : > { %p7615_p11 = pnand %p7613_p9, %p7927_p7  ;;  %p7622_p0 = por %p7621_p13, %p7620_p12 }
  0x4e   : > { %p7616_p10 = pneg %p7615_p11 }
  0x50   : > { %p7623_p1 = pnand %p7622_p0, %p7616_p10 }
  0x52   : > { %7626 = shalt.err (!%p7623_p1)
}
  0x53   : > { %s10246_s26 = smov 8   ;;  %s10247_s2 = smov 128  }
  0x54   : > { %s10248_s0 = sld [smem:[#allocation43_spill]]  ;;  %s7638_s24 = scalar_lea.vmem %s603_s5, 48 }
  0x55   : > { %p7639_p5 = scmp.ne.s32.totalorder %s603_s5, %s7638_s24  ;;  %s7645_s25 = scalar_lea.vmem %s603_s5, 64 }
  0x56   : > { %p7646_p11 = scmp.lt.s32.totalorder %s603_s5, %s603_s5  ;;  %p7647_p10 = scmp.lt.s32.totalorder %s7645_s25, %s7638_s24 }
  0x57   : > { %p7641_p8 = pnand %p7639_p5, %p7927_p7 }
  0x58   : > { %p7648_p12 = por %p7647_p10, %p7646_p11 }
  0x59   : > { %p7642_p9 = pneg %p7641_p8 }
  0x5a   : > { %7176 = dma.hbm_to_vmem [thread:$0]  (!%p7921_p6), %s10248_s0, 768, %s558_s23, [#allocation6], %s10247_s2, %s10247_s2, %s10246_s26  }
  0x5b   : > { %p7649_p13 = pnand %p7648_p12, %p7642_p9 }
  0x5d   : > { %7652 = shalt.err (!%p7649_p13)
}
  0x5e   : > { %s10249_s12 = sld [smem:[#allocation48_spill]]  ;;  %s7769_s23 = smov [#allocation12]  }
  0x5f   : > { %s628_s28 = sshll.u32 %s7769_s23, 4  ;;  %s7770_s0 = smov [#allocation15]   ;;  %s629_s28 = int_to_ptr.vmem [resolvable:$true] %s628_s28 }
  0x60   : > { %s654_s13 = sshll.u32 %s7770_s0, 4  ;;  %s7664_s15 = scalar_lea.vmem %s629_s28, 1536  ;;  %s655_s13 = int_to_ptr.vmem [resolvable:$true] %s654_s13 }
  0x61   : > { %p7665_p0 = scmp.ne.s32.totalorder %s629_s28, %s7664_s15  ;;  %p7672_p8 = scmp.lt.s32.totalorder %s629_s28, %s629_s28 }
  0x62   : > { %p7673_p9 = scmp.lt.s32.totalorder %s7664_s15, %s7664_s15 }
  0x63   : > { %p7667_p1 = pnand %p7665_p0, %p7927_p7 }
  0x64   : > { %7182 = dma.hbm_to_vmem [thread:$0]  (!%p7921_p6), %s10249_s12, 48, %s603_s5, [#allocation8], %s7765_s3, %s7765_s3, %s7766_s11  }
  0x65   : > { %p7668_p5 = pneg %p7667_p1  ;;  %p7674_p11 = por %p7673_p9, %p7672_p8 }
  0x67   : > { %p7675_p10 = pnand %p7674_p11, %p7668_p5 }
  0x69   : > { %7678 = shalt.err (!%p7675_p10)
}
  0x6a   : > { %7188 = dma.hbm_to_vmem [thread:$0]  (!%p7921_p6), %s10190_s14, 1536, %s629_s28, [#allocation11], %s10247_s2, %s10247_s2, %s10246_s26  }
  0x6b   : > { %s7690_s25 = scalar_lea.vmem %s655_s13, 48  ;;  %s7697_s15 = scalar_lea.vmem %s655_s13, 64 }
  0x6c   : > { %p7691_p12 = scmp.ne.s32.totalorder %s655_s13, %s7690_s25  ;;  %p7698_p1 = scmp.lt.s32.totalorder %s655_s13, %s655_s13 }
  0x6d   : > { %p7699_p5 = scmp.lt.s32.totalorder %s7697_s15, %s7690_s25 }
  0x6e   : > { %p7693_p13 = pnand %p7691_p12, %p7927_p7 }
  0x6f   : > { %p7700_p8 = por %p7699_p5, %p7698_p1 }
  0x70   : > { %p7694_p0 = pneg %p7693_p13 }
  0x72   : > { %p7701_p9 = pnand %p7700_p8, %p7694_p0 }
  0x74   : > { %7704 = shalt.err (!%p7701_p9)
}
  0x75   : > { %7194 = dma.hbm_to_vmem [thread:$0]  (!%p7921_p6), %s10192_s16, 48, %s655_s13, [#allocation14], %s7765_s3, %s7765_s3, %s7766_s11  }
  0x76   : > { %s7771_s26 = smov [#allocation18]  }
  0x77   : > { %s689_s2 = sshll.u32 %s7771_s26, 4  ;;  %s690_s2 = int_to_ptr.vmem [resolvable:$true] %s689_s2 }
  0x78   : > { %s7716_s23 = scalar_lea.vmem %s690_s2, 48  ;;  %s7723_s28 = scalar_lea.vmem %s690_s2, 64 }
  0x79   : > { %p7717_p11 = scmp.ne.s32.totalorder %s690_s2, %s7716_s23  ;;  %p7724_p13 = scmp.lt.s32.totalorder %s690_s2, %s690_s2 }
  0x7a   : > { %p7725_p0 = scmp.lt.s32.totalorder %s7723_s28, %s7716_s23 }
  0x7b   : > { %p7719_p10 = pnand %p7717_p11, %p7927_p7 }
  0x7c   : > { %p7726_p1 = por %p7725_p0, %p7724_p13 }
  0x7d   : > { %p7720_p12 = pneg %p7719_p10 }
  0x7f   : > { %p7727_p5 = pnand %p7726_p1, %p7720_p12 }
  0x81   : > { %7730 = shalt.err (!%p7727_p5)
}
  0x82   : > { %7200 = dma.hbm_to_vmem [thread:$0]  (!%p7921_p6), %s10197_s21, 48, %s690_s2, [#allocation17], %s7765_s3, %s7765_s3, %s7766_s11  }
  0x83   : > { %726 = sbr.rel (%p7911_p4) target bundleno = 3959 (0xf77), region = 108 }
  0x88   : > { %7736 = dma.done.wait (%p7201_p3), [#allocation6], 768  }
  0x89   : > { %7738 = vsyncadd (%p7201_p3), [#allocation6], 4294966528 }
  0x8a   : > { %7740 = dma.done.wait (%p7201_p3), [#allocation8], 64  }
  0x8b   : > { %7742 = vsyncadd (%p7201_p3), [#allocation8], 4294967232 }
  0x8c   : > { %7744 = dma.done.wait (%p7201_p3), [#allocation11], 3072  }
  0x8d   : > { %7746 = vsyncadd (%p7201_p3), [#allocation11], 4294964224 }
  0x8e   : > { %7748 = dma.done.wait (%p7201_p3), [#allocation14], 96  }
  0x8f   : > { %7750 = vsyncadd (%p7201_p3), [#allocation14], 4294967200 }
  0x90   : > { %7752 = dma.done.wait (%p7201_p3), [#allocation17], 96  }
  0x91   : > { %7754 = vsyncadd (%p7201_p3), [#allocation17], 4294967200  ;;  %p827_p4 = scmp.lt.s32.totalorder %s7905_s30, 5  ;;  %s10250_s5 = sld [smem:[#allocation40_spill]] }
  0x92   : > { %s10251_s29 = sld [smem:[#allocation41_spill]] }
  0x93   : > { %s828_s11 = scalar_select %p827_p4, %s7905_s30, 5 }
  0x94   : > { %s10252_s23 = sld [smem:[#allocation42_spill]] }
  0x95   : > { %s8047_s3 = sshll.u32 %s828_s11, 2  ;;  %s6562_s4 = sshll.u32 %s828_s11, 4 }
  0x96   : > { %s8064_s12 = scalar_lea.vmem %s10198_s22, %s6562_s4  ;;  %847 = sbr.rel (%p6367_p2) target bundleno = 173 (0xad), region = 148 }
  0x97   : > { %s830_s24 = scalar_lea.vmem %s10250_s5, %s8047_s3 }
  0x98   : > { %s834_s27 = scalar_lea.vmem %s10251_s29, %s8047_s3 }
  0x9a   : > { %s838_s28 = scalar_lea.vmem %s10252_s23, %s8047_s3 }
  0x9b   : > { %vm848_vm0 = vcmask 257024   ;;  %vm867_vm1 = vcmask 254976   ;;  %v7772_v0 = vmov 0.0  }
  0x9c   : > { %849 = vst.msk [vmem:[#allocation2] sm:$0xf] %vm848_vm0, %v7772_v0  ;;  %850 = vst.msk [vmem:[#allocation2 + $0x4] sm:$0xf] %vm848_vm0, %v7772_v0 }
  0x9d   : > { %851 = vst.msk [vmem:[#allocation2 + $0x8] sm:$0xf] %vm848_vm0, %v7772_v0  ;;  %852 = vst.msk [vmem:[#allocation2 + $0xc] sm:$0xf] %vm848_vm0, %v7772_v0 }
  0x9e   : > { %853 = vst.msk [vmem:[#allocation2 + $0x10] sm:$0xf] %vm848_vm0, %v7772_v0  ;;  %854 = vst.msk [vmem:[#allocation2 + $0x14] sm:$0xf] %vm848_vm0, %v7772_v0 }
  0x9f   : > { %855 = vst.msk [vmem:[#allocation2 + $0x18] sm:$0xf] %vm848_vm0, %v7772_v0  ;;  %856 = vst.msk [vmem:[#allocation2 + $0x1c] sm:$0xf] %vm848_vm0, %v7772_v0 }
  0xa0   : > { %857 = vst.msk [vmem:[#allocation2 + $0x20] sm:$0xf] %vm848_vm0, %v7772_v0  ;;  %858 = vst.msk [vmem:[#allocation2 + $0x24] sm:$0xf] %vm848_vm0, %v7772_v0 }
  0xa1   : > { %859 = vst.msk [vmem:[#allocation2 + $0x28] sm:$0xf] %vm848_vm0, %v7772_v0  ;;  %860 = vst.msk [vmem:[#allocation2 + $0x2c] sm:$0xf] %vm848_vm0, %v7772_v0 }
  0xa2   : > { %861 = vst.msk [vmem:[#allocation2 + $0x30] sm:$0xf] %vm848_vm0, %v7772_v0  ;;  %862 = vst.msk [vmem:[#allocation2 + $0x34] sm:$0xf] %vm848_vm0, %v7772_v0 }
  0xa3   : > { %863 = vst.msk [vmem:[#allocation2 + $0x38] sm:$0xf] %vm848_vm0, %v7772_v0  ;;  %864 = vst.msk [vmem:[#allocation2 + $0x3c] sm:$0xf] %vm848_vm0, %v7772_v0 }
  0xa4   : > { %865 = vst.msk [vmem:[#allocation2 + $0x40] sm:$0xf] %vm848_vm0, %v7772_v0  ;;  %866 = vst.msk [vmem:[#allocation2 + $0x44] sm:$0xf] %vm848_vm0, %v7772_v0 }
  0xa5   : > { %880 = vst.msk [vmem:[#allocation4] sm:$0xf] %vm848_vm0, %v7772_v0  ;;  %881 = vst.msk [vmem:[#allocation4 + $0x4] sm:$0xf] %vm848_vm0, %v7772_v0 }
  0xa6   : > { %882 = vst.msk [vmem:[#allocation4 + $0x8] sm:$0xf] %vm848_vm0, %v7772_v0 }
  0xa7   : > { %868 = vst.msk [vmem:[#allocation3] sm:$0x3] %vm867_vm1, %v7772_v0  ;;  %869 = vst.msk [vmem:[#allocation3 + $0x2] sm:$0x3] %vm867_vm1, %v7772_v0 }
  0xa8   : > { %870 = vst.msk [vmem:[#allocation3 + $0x4] sm:$0x3] %vm867_vm1, %v7772_v0  ;;  %871 = vst.msk [vmem:[#allocation3 + $0x6] sm:$0x3] %vm867_vm1, %v7772_v0 }
  0xa9   : > { %872 = vst.msk [vmem:[#allocation3 + $0x8] sm:$0x3] %vm867_vm1, %v7772_v0  ;;  %873 = vst.msk [vmem:[#allocation3 + $0xa] sm:$0x3] %vm867_vm1, %v7772_v0 }
  0xaa   : > { %874 = vst.msk [vmem:[#allocation3 + $0xc] sm:$0x3] %vm867_vm1, %v7772_v0  ;;  %875 = vst.msk [vmem:[#allocation3 + $0xe] sm:$0x3] %vm867_vm1, %v7772_v0 }
  0xab   : > { %876 = vst.msk [vmem:[#allocation3 + $0x10] sm:$0x3] %vm867_vm1, %v7772_v0  ;;  %877 = vst.msk [vmem:[#allocation3 + $0x12] sm:$0x3] %vm867_vm1, %v7772_v0 }
  0xac   : > { %878 = vst.msk [vmem:[#allocation3 + $0x14] sm:$0x3] %vm867_vm1, %v7772_v0  ;;  %879 = vst.msk [vmem:[#allocation3 + $0x16] sm:$0x3] %vm867_vm1, %v7772_v0 }
  0xad PF: > { %v914_v1 = vld [vmem:[#allocation5 + $0x28] sm:$0xff]  ;;  %v996_v2 = vlaneseq  ;;  %v10207_v3 = vmov 0.0   ;;  %v913_v4 = vld [vmem:[#allocation5 + $0x20] sm:$0xff]  ;;  %vm7774_vm2 = vmmov 0   ;;  %v912_v6 = vld [vmem:[#allocation5 + $0x18] sm:$0xff]  ;;  %vm922_vm3 = vcmask 392192  }
  0xae   : > { %6744 = vmatprep.subr.mxu0 %v10207_v3  ;;  %6759 = vmatprep.subr.mxu1 %v10207_v3  ;;  %v884_v7 = vld [vmem:[%s838_s28] sm:$0xf]  ;;  %v910_v15 = vld [vmem:[#allocation5 + $0x8] sm:$0xff]  ;;  %v909_v17 = vld [vmem:[#allocation5] sm:$0xff]  ;;  %s10259_s26 = sld [smem:[#allocation46_spill]]  ;;  %s6393_s11 = sadd.s32 4294967295, %s7905_s30 }
  0xaf   : > { %6745 = vmatpush3.msra.mxu0 %v914_v1  ;;  %v8104_v5 = vshrl.u32 %v996_v2, 7  ;;  %6756 = vmatprep.mubr.msk.f32.mxu0 %vm7774_vm2, %v10207_v3  ;;  %v911_v11 = vld [vmem:[#allocation5 + $0x10] sm:$0xff]  ;;  %p901_p2 = scmp.gt.s32.totalorder %s6393_s11, 0  ;;  %vm1070_vm4 = vcmask 261120   ;;  %s10260_s23 = sld [smem:[#allocation45_spill]]  ;;  %vm1028_vm5 = vcmask 254976  }
  0xb0   : > { %6746 = vmatprep.subr.mxu0 %v10207_v3  ;;  %6775 = vmatprep.mubr.msk.f32.mxu1 %vm7774_vm2, %v10207_v3  ;;  %v908_v19 = vld [vmem:[%s830_s24] sm:$0xf]  ;;  %v885_v37 = vld [vmem:[#allocation3] sm:$0x3]  ;;  %v889_v38 = vld [vmem:[#allocation3 + $0x8] sm:$0x3] }
  0xb1   : > { %6747 = vmatpush3.msra.mxu0 %v913_v4  ;;  %v8117_v8 = vsub.s32 0, %v8104_v5  ;;  %v8120_v9 = vsub.s32 2, %v8104_v5  ;;  %v8123_v10 = vsub.s32 1, %v8104_v5  ;;  %v8127_v12 = vsub.s32 3, %v8104_v5  ;;  %s10294_s11 = smov (!%p901_p2, %s6393_s11), 0  ;;  %s7775_s29 = smov 32  }
  0xb2   : > { %6748 = vmatprep.subr.mxu0 %v10207_v3  ;;  %s903_s4 = smul.u32 12, %s10294_s11  ;;  %v893_v39 = vld [vmem:[#allocation3 + $0x10] sm:$0x3]  ;;  %v887_v40 = vld [vmem:[#allocation3 + $0x4] sm:$0x3]  ;;  %vm1061_vm6 = vcmask 1041409  }
  0xb3   : > { %10254 = vst [vmem:[#allocation25_spill] sm:$0xff] %v8117_v8  ;;  %10255 = vst [vmem:[#allocation26_spill] sm:$0xff] %v8120_v9  ;;  %6749 = vmatpush3.msra.mxu0 %v912_v6  ;;  %v999_v13 = vrot.slane %v884_v7, %v8117_v8  ;;  %v1013_v14 = vrot.slane %v884_v7, %v8120_v9  ;;  %v1006_v16 = vrot.slane %v884_v7, %v8123_v10  ;;  %v891_v41 = vld [vmem:[#allocation3 + $0xc] sm:$0x3]  ;;  %v895_v43 = vld [vmem:[#allocation3 + $0x14] sm:$0x3] }
  0xb4   : > { %10256 = vst [vmem:[#allocation27_spill] sm:$0xff] %v8123_v10  ;;  %10257 = vst [vmem:[#allocation28_spill] sm:$0xff] %v8127_v12  ;;  %6750 = vmatprep.subr.mxu0 %v10207_v3  ;;  %v1020_v18 = vrot.slane %v884_v7, %v8127_v12  ;;  %v1164_v20 = vld [vmem:[%s10259_s26 + $0x18] sm:$0xff]  ;;  %v1163_v21 = vld [vmem:[%s10259_s26 + $0x10] sm:$0xff]  ;;  %s8161_s1 = scalar_lea.vmem [#allocation2], %s903_s4  ;;  %vm1063_vm7 = vcmask 1042434  }
  0xb5   : > { %6751 = vmatpush3.msra.mxu0 %v911_v11  ;;  %1001 = vbcast.lane.b32.xlu0 %v999_v13, 256  ;;  %v1162_v22 = vld [vmem:[%s10259_s26 + $0x8] sm:$0xff]  ;;  %v1161_v23 = vld [vmem:[%s10259_s26] sm:$0xff]  ;;  %v6415_v25 = vld [vmem:[%s10259_s26 + $0x38] sm:$0xff]  ;;  %vm1065_vm8 = vcmask 1043459   ;;  %s7776_s24 = smov 96  }
  0xb6   : > { %6752 = vmatprep.subr.mxu0 %v10207_v3  ;;  %1015 = vbcast.lane.b32.xlu1 %v1013_v14, 256  ;;  %v8164_v24 = vld [vmem:[%s8161_s1] sm:$0xf]  ;;  %v6414_v26 = vld [vmem:[%s10259_s26 + $0x30] sm:$0xff]  ;;  %v1079_v27 = vld [vmem:[%s10260_s23 + $0x38] sm:$0xff]  ;;  %s7777_s28 = smov 64  }
  0xb7   : > { %6753 = vmatpush3.msra.mxu0 %v910_v15  ;;  %v6413_v28 = vld [vmem:[%s10259_s26 + $0x28] sm:$0xff]  ;;  %6760 = vmatpush3.msra.mxu1 %v1079_v27  ;;  %v1078_v29 = vld [vmem:[%s10260_s23 + $0x30] sm:$0xff]  ;;  %v6412_v31 = vld [vmem:[%s10259_s26 + $0x20] sm:$0xff]  ;;  %vm1087_vm9 = vcmask 523264   ;;  %s1789_s6 = smul.u32 12, %s7905_s30  ;;  %vm1791_vm10 = vcmask 257024  }
  0xb8   : > { %6754 = vmatprep.subr.mxu0 %v10207_v3  ;;  %6761 = vmatprep.subr.mxu1 %v10207_v3  ;;  %v1077_v30 = vld [vmem:[%s10260_s23 + $0x28] sm:$0xff]  ;;  %v8195_v32 = vld [vmem:[%s8161_s1 + $0x4] sm:$0xf]  ;;  %v1075_v34 = vld [vmem:[%s10260_s23 + $0x18] sm:$0xff]  ;;  %vm1971_vm11 = vcmask 1044484   ;;  %vm1973_vm12 = vcmask 1045509  }
  0xb9   : > { %6755 = vmatpush3.msra.mxu0 %v909_v17  ;;  %1008 = vbcast.lane.b32.xlu0 %v1006_v16, 256  ;;  %v1076_v33 = vld [vmem:[%s10260_s23 + $0x20] sm:$0xff]  ;;  %v1074_v35 = vld [vmem:[%s10260_s23 + $0x10] sm:$0xff]  ;;  %v1073_v36 = vld [vmem:[%s10260_s23 + $0x8] sm:$0xff]  ;;  %s1790_s5 = scalar_lea.vmem [#allocation2], %s1789_s6  ;;  %vm1977_vm14 = vcmask 29696  }
  0xba   : > { %6757 = vmatmul.mubr.msk.f32.vlgmr.msra.gmra.mxu0 %vm922_vm3, %v908_v19  ;;  %1022 = vbcast.lane.b32.xlu1 %v1020_v18, 256  ;;  %v886_v48 = vld [vmem:[#allocation3 + $0x2] sm:$0x3]  ;;  %v890_v49 = vld [vmem:[#allocation3 + $0xa] sm:$0x3]  ;;  %vm3332_vm15 = vcmask 3072  }
  0xbb   : > { %6778 = vmatprep.subr.mxu0 %v10207_v3  ;;  %6786 = vmatprep.mubr.msk.f32.mxu0 %vm7774_vm2, %v10207_v3  ;;  %v894_v50 = vld [vmem:[#allocation3 + $0x12] sm:$0x3]  ;;  %v888_v51 = vld [vmem:[#allocation3 + $0x6] sm:$0x3]  ;;  %v892_v55 = vld [vmem:[#allocation3 + $0xe] sm:$0x3] }
  0xbc   : > { %6779 = vmatpush3.msra.mxu0 %v1164_v20  ;;  %6762 = vmatpush3.msra.mxu1 %v1078_v29  ;;  %v1072_v29 = vld [vmem:[%s10260_s23] sm:$0xff]  ;;  %vm3450_vm0 = vcmask 785408   ;;  %p3311_p3 = scmp.gt.s32.totalorder %s7905_s30, 0  ;;  %s10276_s4 = sld [smem:[#allocation47_spill]]  ;;  %vm6181_vm1 = vcmask 48128  }
  0xbd   : > { %6780 = vmatprep.subr.mxu0 %v10207_v3  ;;  %6763 = vmatprep.subr.mxu1 %v10207_v3 }
  0xbe   : > { %6781 = vmatpush3.msra.mxu0 %v1163_v21  ;;  %6764 = vmatpush3.msra.mxu1 %v1077_v30  ;;  %s3312_s6 = scalar_select %p3311_p3, 1.0, 0.0 }
  0xbf   : > { %6782 = vmatprep.subr.mxu0 %v10207_v3  ;;  %6765 = vmatprep.subr.mxu1 %v10207_v3 }
  0xc0   : > { %6783 = vmatpush3.msra.mxu0 %v1162_v22  ;;  %6766 = vmatpush3.msra.mxu1 %v1076_v33 }
  0xc1   : > { %6784 = vmatprep.subr.mxu0 %v10207_v3  ;;  %6767 = vmatprep.subr.mxu1 %v10207_v3 }
  0xc2   : > { %6785 = vmatpush3.msra.mxu0 %v1161_v23  ;;  %6768 = vmatpush3.msra.mxu1 %v1075_v34 }
  0xc3   : > { %6808 = vmatprep.subr.mxu0 %v10207_v3  ;;  %6787 = vmatmul.mubr.msk.f32.vlgmr.msra.gmra.mxu0 %vm1070_vm4, %v8164_v24 }
  0xc4   : > { %6816 = vmatprep.mubr.msk.f32.mxu0 %vm7774_vm2, %v10207_v3  ;;  %6809 = vmatpush3.msra.mxu0 %v6415_v25 }
  0xc5   : > { %6810 = vmatprep.subr.mxu0 %v10207_v3  ;;  %6769 = vmatprep.subr.mxu1 %v10207_v3 }
  0xc6   : > { %6811 = vmatpush3.msra.mxu0 %v6414_v26  ;;  %6770 = vmatpush3.msra.mxu1 %v1074_v35 }
  0xc7   : > { %6812 = vmatprep.subr.mxu0 %v10207_v3  ;;  %6771 = vmatprep.subr.mxu1 %v10207_v3 }
  0xc8   : > { %6813 = vmatpush3.msra.mxu0 %v6413_v28  ;;  %6772 = vmatpush3.msra.mxu1 %v1073_v36 }
  0xc9   : > { %6814 = vmatprep.subr.mxu0 %v10207_v3  ;;  %6773 = vmatprep.subr.mxu1 %v10207_v3 }
  0xca   : > { %6815 = vmatpush3.msra.mxu0 %v6412_v31  ;;  %6774 = vmatpush3.msra.mxu1 %v1072_v29 }
  0xcb   : > { %6817 = vmatmul.mubr.msk.f32.vlgmr.msra.gmra.mxu0 %vm1070_vm4, %v8195_v32  ;;  %6819 = vmatprep.subr.mxu0 %v10207_v3 }
  0xcc   : > { %6835 = vmatprep.mubr.msk.f32.mxu0 %vm7774_vm2, %v10207_v3  ;;  %6789 = vmatprep.subr.mxu1 %v10207_v3 }
 0x127   : > { %v8221_v42 = vpop.permute.xlu0 %1001 }
 0x128   : > { %10261 = vst [vmem:[#allocation29_spill] sm:$0xff] %v8221_v42  ;;  %v1024_v44 = vmul.f32 %v8221_v42, %v885_v37  ;;  %v1274_v45 = vmul.f32 %v8221_v42, %v889_v38  ;;  %v1526_v46 = vmul.f32 %v8221_v42, %v893_v39  ;;  %v8226_v47 = vpop.permute.xlu1 %1015 }
 0x129   : > { %10262 = vst [vmem:[#allocation30_spill] sm:$0xff] %v8226_v47  ;;  %v1026_v52 = vmul.f32 %v8226_v47, %v887_v40  ;;  %v1276_v53 = vmul.f32 %v8226_v47, %v891_v41  ;;  %v8233_v57 = vmul.f32 %v8226_v47, %v895_v43 }
 0x12a   : > { %v1029_v54 = vsel %vm1028_vm5, %v1024_v44, 0.0  ;;  %v1278_v56 = vsel %vm1028_vm5, %v1274_v45, 0.0  ;;  %v8236_v58 = vsel %vm1028_vm5, %v1526_v46, 0.0 }
 0x12b   : > { %v8238_v59 = vpop.permute.xlu0 %1008  ;;  %v1030_v60 = vrot.slane %v1029_v54, 4  ;;  %v1043_v61 = vsel %vm1028_vm5, %v1026_v52, 0.0  ;;  %v1279_v62 = vrot.slane %v1278_v56, 4  ;;  %v1292_v63 = vsel %vm1028_vm5, %v1276_v53, 0.0 }
 0x12c   : > { %10263 = vst [vmem:[#allocation31_spill] sm:$0xff] %v8238_v59  ;;  %v1025_v0 = vmul.f32 %v8238_v59, %v886_v48  ;;  %v1275_v1 = vmul.f32 %v8238_v59, %v890_v49  ;;  %v1527_v4 = vmul.f32 %v8238_v59, %v894_v50  ;;  %v8245_v6 = vpop.permute.xlu1 %1022  ;;  %v1044_v7 = vrot.slane %v1043_v61, 4  ;;  %v896_v49 = vld [vmem:[#allocation3 + $0x16] sm:$0x3] }
 0x12d   : > { %10264 = vst [vmem:[#allocation32_spill] sm:$0xff] %v8245_v6  ;;  %v1027_v11 = vmul.f32 %v8245_v6, %v888_v51  ;;  %v1031_v13 = vadd.f32 %v1030_v60, %v1029_v54  ;;  %v1277_v14 = vmul.f32 %v8245_v6, %v892_v55  ;;  %v1280_v15 = vadd.f32 %v1279_v62, %v1278_v56 }
 0x12e   : > { %v1036_v16 = vsel %vm1028_vm5, %v1025_v0, 0.0  ;;  %v1045_v17 = vadd.f32 %v1044_v7, %v1043_v61  ;;  %v1285_v18 = vsel %vm1028_vm5, %v1275_v1, 0.0  ;;  %v1293_v19 = vrot.slane %v1292_v63, 4 }
 0x12f   : > { %v1032_v20 = vrot.slane %v1031_v13, 2  ;;  %v1037_v21 = vrot.slane %v1036_v16, 4  ;;  %v1050_v22 = vsel %vm1028_vm5, %v1027_v11, 0.0  ;;  %v1281_v23 = vrot.slane %v1280_v15, 2 }
 0x130   : > { %v1046_v25 = vrot.slane %v1045_v17, 2  ;;  %v1051_v26 = vrot.slane %v1050_v22, 4  ;;  %v1286_v27 = vrot.slane %v1285_v18, 4  ;;  %v1294_v28 = vadd.f32 %v1293_v19, %v1292_v63 }
 0x131   : > { %v1033_v30 = vadd.f32 %v1032_v20, %v1031_v13  ;;  %v1038_v31 = vadd.f32 %v1037_v21, %v1036_v16  ;;  %v1282_v33 = vadd.f32 %v1281_v23, %v1280_v15  ;;  %v1299_v34 = vsel %vm1028_vm5, %v1277_v14, 0.0 }
 0x132   : > { %v1047_v35 = vadd.f32 %v1046_v25, %v1045_v17  ;;  %v1052_v36 = vadd.f32 %v1051_v26, %v1050_v22  ;;  %v1287_v37 = vadd.f32 %v1286_v27, %v1285_v18  ;;  %v1295_v38 = vrot.slane %v1294_v28, 2 }
 0x133   : > { %v1034_v39 = vrot.slane %v1033_v30, 1  ;;  %v1039_v40 = vrot.slane %v1038_v31, 2  ;;  %v1283_v41 = vrot.slane %v1282_v33, 1  ;;  %v1300_v43 = vrot.slane %v1299_v34, 4 }
 0x134   : > { %v1048_v44 = vrot.slane %v1047_v35, 1  ;;  %v1053_v45 = vrot.slane %v1052_v36, 2  ;;  %v1288_v46 = vrot.slane %v1287_v37, 2  ;;  %v1296_v48 = vadd.f32 %v1295_v38, %v1294_v28 }
 0x135   : > { %v1035_v50 = vadd.f32 %v1034_v39, %v1033_v30  ;;  %v1040_v51 = vadd.f32 %v1039_v40, %v1038_v31  ;;  %v1284_v52 = vadd.f32 %v1283_v41, %v1282_v33  ;;  %v1301_v53 = vadd.f32 %v1300_v43, %v1299_v34  ;;  %v6426_v34 = vld [vmem:[%s10260_s23 + $0xb0] sm:$0xff]  ;;  %v6425_v40 = vld [vmem:[%s10260_s23 + $0xa8] sm:$0xff] }
 0x136   : > { %v1049_v54 = vadd.f32 %v1048_v44, %v1047_v35  ;;  %v1054_v55 = vadd.f32 %v1053_v45, %v1052_v36  ;;  %v1289_v56 = vadd.f32 %v1288_v46, %v1287_v37  ;;  %v1297_v60 = vrot.slane %v1296_v48, 1  ;;  %v6424_v45 = vld [vmem:[%s10260_s23 + $0xa0] sm:$0xff] }
 0x137   : > { %v1041_v61 = vrot.slane %v1040_v51, 1  ;;  %v1302_v62 = vrot.slane %v1301_v53, 2  ;;  %v1529_v63 = vmul.f32 %v8245_v6, %v896_v49  ;;  %v1531_v0 = vrot.slane %v8236_v58, 4 }
 0x138   : > { %v1055_v1 = vrot.slane %v1054_v55, 1  ;;  %v1290_v7 = vrot.slane %v1289_v56, 1  ;;  %v1298_v11 = vadd.f32 %v1297_v60, %v1296_v48  ;;  %v1537_v13 = vsel %vm1028_vm5, %v1527_v4, 0.0 }
 0x139   : > { %v1042_v14 = vadd.f32 %v1041_v61, %v1040_v51  ;;  %v1303_v15 = vadd.f32 %v1302_v62, %v1301_v53  ;;  %v1532_v16 = vadd.f32 %v1531_v0, %v8236_v58  ;;  %v1538_v17 = vrot.slane %v1537_v13, 4  ;;  %v6423_v51 = vld [vmem:[%s10260_s23 + $0x98] sm:$0xff]  ;;  %v6421_v0 = vld [vmem:[%s10260_s23 + $0x88] sm:$0xff] }
 0x13a   : > { %v1056_v18 = vadd.f32 %v1055_v1, %v1054_v55  ;;  %v1291_v19 = vadd.f32 %v1290_v7, %v1289_v56  ;;  %v1544_v20 = vsel %vm1028_vm5, %v8233_v57, 0.0  ;;  %v1551_v21 = vsel %vm1028_vm5, %v1529_v63, 0.0  ;;  %v6427_v57 = vld [vmem:[%s10260_s23 + $0xb8] sm:$0xff]  ;;  %v6422_v63 = vld [vmem:[%s10260_s23 + $0x90] sm:$0xff]  ;;  %v6420_v1 = vld [vmem:[%s10260_s23 + $0x80] sm:$0xff] }
 0x13b   : > { %v1062_v22 = vsel %vm1061_vm6, %v1042_v14, %v1035_v50  ;;  %v1304_v23 = vrot.slane %v1303_v15, 1  ;;  %v1533_v25 = vrot.slane %v1532_v16, 2  ;;  %v1539_v26 = vadd.f32 %v1538_v17, %v1537_v13  ;;  %6820 = vmatpush3.msra.mxu0 %v6427_v57  ;;  %v6394_v7 = vld [vmem:[#allocation7] ss:$0 sm:$0xff] }
 0x13c   : > { %v1064_v27 = vsel %vm1063_vm7, %v1049_v54, %v1062_v22  ;;  %v1314_v4 = vsel %vm1061_vm6, %v1291_v19, %v1284_v52  ;;  %v1545_v28 = vrot.slane %v1544_v20, 4  ;;  %v1552_v29 = vrot.slane %v1551_v21, 4  ;;  %6821 = vmatprep.subr.mxu0 %v10207_v3  ;;  %v6407_v22 = vld [vmem:[%s10260_s23 + $0x70] sm:$0xff] }
 0x13d   : > { %v1066_v58 = vsel %vm1065_vm8, %v1056_v18, %v1064_v27  ;;  %v1305_v30 = vadd.f32 %v1304_v23, %v1303_v15  ;;  %v1315_v31 = vsel %vm1063_vm7, %v1298_v11, %v1314_v4  ;;  %v1534_v33 = vadd.f32 %v1533_v25, %v1532_v16  ;;  %6822 = vmatpush3.msra.mxu0 %v6426_v34  ;;  %v6398_v15 = vld [vmem:[%s10184_s8] ss:$0 sm:$0xff]  ;;  %v6406_v23 = vld [vmem:[%s10260_s23 + $0x68] sm:$0xff]  ;;  %v6403_v27 = vld [vmem:[%s10260_s23 + $0x50] sm:$0xff] }
 0x13e   : > { %1067 = vrot.lane.b32.xlu0 %v1066_v58, %s7775_s29  ;;  %v1540_v35 = vrot.slane %v1539_v26, 2  ;;  %v1546_v36 = vadd.f32 %v1545_v28, %v1544_v20  ;;  %v1553_v37 = vadd.f32 %v1552_v29, %v1551_v21  ;;  %6823 = vmatprep.subr.mxu0 %v10207_v3  ;;  %v6408_v20 = vld [vmem:[%s10260_s23 + $0x78] sm:$0xff]  ;;  %v6405_v25 = vld [vmem:[%s10260_s23 + $0x60] sm:$0xff]  ;;  %v6402_v4 = vld [vmem:[%s10260_s23 + $0x48] sm:$0xff] }
 0x13f   : > { %v1316_v38 = vsel %vm1065_vm8, %v1305_v30, %v1315_v31  ;;  %v1535_v39 = vrot.slane %v1534_v33, 1  ;;  %6824 = vmatpush3.msra.mxu0 %v6425_v40  ;;  %v6401_v28 = vld [vmem:[%s10260_s23 + $0x40] sm:$0xff]  ;;  %v6434_v34 = vld [vmem:[%s10259_s26 + $0x58] sm:$0xff] }
 0x140   : > { %v1541_v41 = vadd.f32 %v1540_v35, %v1539_v26  ;;  %v1547_v43 = vrot.slane %v1546_v36, 2  ;;  %v1554_v44 = vrot.slane %v1553_v37, 2  ;;  %6825 = vmatprep.subr.mxu0 %v10207_v3  ;;  %v6404_v26 = vld [vmem:[%s10260_s23 + $0x58] sm:$0xff]  ;;  %v6417_v29 = vld [vmem:[%s10184_s8 + $0x1] ss:$0 sm:$0xff] }
 0x141   : > { %v1536_v46 = vadd.f32 %v1535_v39, %v1534_v33  ;;  %6826 = vmatpush3.msra.mxu0 %v6424_v45  ;;  %v6432_v39 = vld [vmem:[%s10259_s26 + $0x48] sm:$0xff] }
 0x142   : > { %1317 = vrot.lane.b32.xlu0 %v1316_v38, %s7775_s29  ;;  %v1542_v48 = vrot.slane %v1541_v41, 1  ;;  %v1548_v49 = vadd.f32 %v1547_v43, %v1546_v36  ;;  %v1555_v50 = vadd.f32 %v1554_v44, %v1553_v37  ;;  %6827 = vmatprep.subr.mxu0 %v10207_v3  ;;  %v6433_v36 = vld [vmem:[%s10259_s26 + $0x50] sm:$0xff]  ;;  %v907_v43 = vld [vmem:[%s8161_s1 + $0x8] sm:$0xf]  ;;  %v6396_v44 = vld [vmem:[%s10183_s7] ss:$0 sm:$0xff] }
 0x143   : > { %6828 = vmatpush3.msra.mxu0 %v6423_v51 }
 0x144   : > { %v1543_v52 = vadd.f32 %v1542_v48, %v1541_v41  ;;  %v1549_v53 = vrot.slane %v1548_v49, 1  ;;  %v1556_v54 = vrot.slane %v1555_v50, 1  ;;  %6829 = vmatprep.subr.mxu0 %v10207_v3  ;;  %v6431_v41 = vld [vmem:[%s10259_s26 + $0x40] sm:$0xff] }
 0x145   : > { %6830 = vmatpush3.msra.mxu0 %v6422_v63 }
 0x146   : > { %v1550_v55 = vadd.f32 %v1549_v53, %v1548_v49  ;;  %v1557_v56 = vadd.f32 %v1556_v54, %v1555_v50  ;;  %v1565_v60 = vsel %vm1061_vm6, %v1543_v52, %v1536_v46  ;;  %6831 = vmatprep.subr.mxu0 %v10207_v3 }
 0x147   : > { %6832 = vmatpush3.msra.mxu0 %v6421_v0 }
 0x148   : > { %v1566_v61 = vsel %vm1063_vm7, %v1550_v55, %v1565_v60  ;;  %6833 = vmatprep.subr.mxu0 %v10207_v3 }
 0x149   : > { %v1567_v62 = vsel %vm1065_vm8, %v1557_v56, %v1566_v61  ;;  %6834 = vmatpush3.msra.mxu0 %v6420_v1  ;;  %v6410_v56 = vld [vmem:[%s10183_s7 + $0x1] ss:$0 sm:$0xff] }
 0x14a   : > { %1568 = vrot.lane.b32.xlu0 %v1567_v62, %s7775_s29  ;;  %6866 = vmatprep.subr.mxu0 %v10207_v3 }
 0x17a   : > { %v992_v11 = vpop.f32.mrf.mxu0 }
 0x17b   : > { %v8308_v13 = vadd.f32 %v6394_v7, %v992_v11  ;;  %v6436_v11 = vld [vmem:[%s10184_s8 + $0x2] ss:$0 sm:$0xff] }
 0x17c   : > { %v6758_v14 = vpop.f32.mrf.mxu0 }
 0x17d   : > { %1307 = vrot.lane.b32.xlu1 %v8308_v13, %s7776_s24 }
 0x181   : > { %1558 = vrot.lane.b32.xlu1 %v8308_v13, %s7777_s28 }
 0x183   : > { %v1241_v16 = vpop.f32.mrf.mxu0 }
 0x184   : > { %v8317_v17 = vadd.f32 %v6398_v15, %v1241_v16 }
 0x185   : > { %v6788_v18 = vpop.f32.mrf.mxu0 }
 0x186   : > { %1253 = vrot.lane.b32.xlu1 %v8317_v17, %s7777_s28 }
 0x18b   : > { %v1493_v58 = vpop.f32.mrf.mxu0 }
 0x18c   : > { %v1494_v30 = vadd.f32 %v6417_v29, %v1493_v58 }
 0x18d   : > { %v6818_v31 = vpop.f32.mrf.mxu0 }
 0x18e   : > { %1505 = vrot.lane.b32.xlu0 %v1494_v30, %s7777_s28 }
 0x1b0   : > { %v1068_v19 = vpop.permute.xlu0 %1067 }
 0x1b1   : > { %v1071_v21 = vsel %vm1070_vm4, %v8308_v13, %v1068_v19 }
 0x1b2   : > { %6776 = vmatmul.mubr.msk.f32.vlgmr.msra.gmra.mxu1 %vm1087_vm9, %v1071_v21 }
 0x1b3   : > { %6790 = vmatpush3.msra.mxu1 %v6408_v20  ;;  %6805 = vmatprep.mubr.msk.f32.mxu1 %vm7774_vm2, %v10207_v3 }
 0x1b4   : > { %6791 = vmatprep.subr.mxu1 %v10207_v3  ;;  %v1318_v33 = vpop.permute.xlu0 %1317 }
 0x1b5   : > { %6792 = vmatpush3.msra.mxu1 %v6407_v22  ;;  %v6429_v22 = vld [vmem:[%s10183_s7 + $0x2] ss:$0 sm:$0xff] }
 0x1b6   : > { %6793 = vmatprep.subr.mxu1 %v10207_v3 }
 0x1b7   : > { %6794 = vmatpush3.msra.mxu1 %v6406_v23 }
 0x1b8   : > { %6795 = vmatprep.subr.mxu1 %v10207_v3 }
 0x1b9   : > { %6796 = vmatpush3.msra.mxu1 %v6405_v25 }
 0x1ba   : > { %6797 = vmatprep.subr.mxu1 %v10207_v3 }
 0x1bb   : > { %6798 = vmatpush3.msra.mxu1 %v6404_v26 }
 0x1bc   : > { %6799 = vmatprep.subr.mxu1 %v10207_v3  ;;  %v1569_v37 = vpop.permute.xlu0 %1568 }
 0x1bd   : > { %6800 = vmatpush3.msra.mxu1 %v6403_v27 }
 0x1be   : > { %6801 = vmatprep.subr.mxu1 %v10207_v3 }
 0x1bf   : > { %6802 = vmatpush3.msra.mxu1 %v6402_v4 }
 0x1c0   : > { %6803 = vmatprep.subr.mxu1 %v10207_v3 }
 0x1c1   : > { %6804 = vmatpush3.msra.mxu1 %v6401_v28 }
 0x1c2   : > { %6838 = vmatprep.subr.mxu1 %v10207_v3 }
 0x1ef   : > { %v8362_v57 = vpop.permute.xlu1 %1307 }
 0x1f0   : > { %v1320_v35 = vsel %vm1070_vm4, %v8362_v57, %v1318_v33 }
 0x1f1   : > { %6806 = vmatmul.mubr.msk.f32.vlgmr.msra.gmra.mxu1 %vm1087_vm9, %v1320_v35 }
 0x1f2   : > { %6839 = vmatpush3.msra.mxu1 %v6434_v34  ;;  %6846 = vmatprep.mubr.msk.f32.mxu1 %vm7774_vm2, %v10207_v3 }
 0x1f3   : > { %6840 = vmatprep.subr.mxu1 %v10207_v3  ;;  %v8376_v38 = vpop.permute.xlu1 %1558 }
 0x1f4   : > { %10265 = vst [vmem:[#allocation33_spill] sm:$0xff] %v8376_v38  ;;  %v1571_v40 = vsel %vm1070_vm4, %v8376_v38, %v1569_v37  ;;  %6841 = vmatpush3.msra.mxu1 %v6433_v36 }
 0x1f5   : > { %6842 = vmatprep.subr.mxu1 %v10207_v3  ;;  %6836 = vmatmul.mubr.msk.f32.vlgmr.msra.gmra.mxu0 %vm1087_vm9, %v1571_v40 }
 0x1f6   : > { %6843 = vmatpush3.msra.mxu1 %v6432_v39  ;;  %6874 = vmatprep.mubr.msk.f32.mxu0 %vm7774_vm2, %v10207_v3 }
 0x1f7   : > { %6844 = vmatprep.subr.mxu1 %v10207_v3 }
 0x1f8   : > { %6845 = vmatpush3.msra.mxu1 %v6431_v41  ;;  %v1254_v53 = vpop.permute.xlu1 %1253 }
 0x1f9   : > { %6847 = vmatmul.mubr.msk.f32.vlgmr.msra.gmra.mxu1 %vm1070_vm4, %v907_v43  ;;  %6849 = vmatprep.subr.mxu1 %v10207_v3 }
 0x1fa   : > { %6857 = vmatprep.mubr.msk.f32.mxu1 %vm7774_vm2, %v10207_v3 }
 0x200   : > { %v1506_v19 = vpop.permute.xlu0 %1505 }
 0x272   : > { %v1157_v45 = vpop.f32.mrf.mxu1 }
 0x273   : > { %v1158_v46 = vadd.f32 %v6396_v44, %v1157_v45 }
 0x274   : > { %v6777_v48 = vpop.f32.mrf.mxu1 }
 0x275   : > { %v1245_v49 = vadd.f32 %v8317_v17, %v1158_v46 }
 0x277   : > { %v6400_v50 = vmul.f32 -1.442695, %v1245_v49 }
 0x279   : > { %7275 = vpow2.f32 %v6400_v50 }
 0x286   : > { %v7276_v51 = vpop.eup %7275 }
 0x287   : > { %v1249_v52 = vadd.f32 1.0, %v7276_v51 }
 0x289   : > { %7277 = vrcp.f32 %v1249_v52 }
 0x296   : > { %v7278_v54 = vpop.eup %7277 }
 0x297   : > { %v1256_v55 = vmul.f32 %v7278_v54, %v1254_v53  ;;  %v1263_v44 = vsub.f32 1.0, %v7278_v54  ;;  %v1822_v53 = vld [vmem:[%s10193_s17 + $0x18] sm:$0xff] }
 0x298   : > { %6850 = vmatpush3.msra.mxu1 %v1822_v53 }
 0x299   : > { %1258 = vrot.lane.b32.xlu0 %v1256_v55, %s7777_s28  ;;  %v1821_v55 = vld [vmem:[%s10193_s17 + $0x10] sm:$0xff]  ;;  %6851 = vmatprep.subr.mxu1 %v10207_v3 }
 0x29a   : > { %6852 = vmatpush3.msra.mxu1 %v1821_v55 }
 0x29b   : > { %6853 = vmatprep.subr.mxu1 %v10207_v3 }
 0x2b1   : > { %v1407_v60 = vpop.f32.mrf.mxu1 }
 0x2b2   : > { %v1408_v61 = vadd.f32 %v6410_v56, %v1407_v60  ;;  %v6445_v56 = vld [vmem:[%s10193_s17 + $0x30] sm:$0xff]  ;;  %v1820_v60 = vld [vmem:[%s10193_s17 + $0x8] sm:$0xff] }
 0x2b3   : > { %v6807_v62 = vpop.f32.mrf.mxu1  ;;  %6854 = vmatpush3.msra.mxu1 %v1820_v60 }
 0x2b4   : > { %v1497_v63 = vadd.f32 %v1494_v30, %v1408_v61  ;;  %v1819_v62 = vld [vmem:[%s10193_s17] sm:$0xff]  ;;  %6855 = vmatprep.subr.mxu1 %v10207_v3 }
 0x2b5   : > { %v1658_v0 = vpop.f32.mrf.mxu0  ;;  %6856 = vmatpush3.msra.mxu1 %v1819_v62 }
 0x2b6   : > { %v6419_v1 = vmul.f32 -1.442695, %v1497_v63  ;;  %v1659_v23 = vadd.f32 %v6429_v22, %v1658_v0  ;;  %v6443_v63 = vld [vmem:[%s10193_s17 + $0x20] sm:$0xff]  ;;  %6883 = vmatprep.subr.mxu1 %v10207_v3 }
 0x2b7   : > { %v6837_v7 = vpop.f32.mrf.mxu0 }
 0x2b8   : > { %7279 = vpow2.f32 %v6419_v1 }
 0x2b9   : > { %v1744_v14 = vpop.f32.mrf.mxu1 }
 0x2ba   : > { %v1745_v15 = vadd.f32 %v6436_v11, %v1744_v14 }
 0x2bb   : > { %v6848_v16 = vpop.f32.mrf.mxu1 }
 0x2bc   : > { %1756 = vrot.lane.b32.xlu1 %v1745_v15, %s7777_s28  ;;  %v1748_v25 = vadd.f32 %v1745_v15, %v1659_v23 }
 0x2be   : > { %v6438_v26 = vmul.f32 -1.442695, %v1748_v25 }
 0x2c5   : > { %v7280_v17 = vpop.eup %7279 }
 0x2c6   : > { %v1501_v18 = vadd.f32 1.0, %v7280_v17  ;;  %v7778_v17 = vmov 1  }
 0x2c7   : > { %7252 = vset.pattern.permute.xlu1 %v7778_v17  ;;  %7254 = vset.pattern.permute.xlu0 %v7778_v17 }
 0x2c8   : > { %7281 = vrcp.f32 %v1501_v18 }
 0x2c9   : > { %7283 = vpow2.f32 %v6438_v26  ;;  %v6453_v26 = vld [vmem:[%s10193_s17 + $0x58] sm:$0xff] }
 0x2d5   : > { %v7282_v20 = vpop.eup %7281 }
 0x2d6   : > { %v1508_v21 = vmul.f32 %v7282_v20, %v1506_v19  ;;  %v7284_v28 = vpop.eup %7283  ;;  %v1515_v48 = vsub.f32 1.0, %v7282_v20 }
 0x2d7   : > { %v1752_v58 = vadd.f32 1.0, %v7284_v28 }
 0x2d8   : > { %1510 = vrot.lane.b32.xlu1 %v1508_v21, %s7777_s28 }
 0x30b   : > { %v1259_v27 = vpop.permute.xlu0 %1258 }
 0x30c   : > { %v1261_v4 = vadd.f32 %v1259_v27, %v1158_v46 }
 0x30e   : > { %7285 = vtanh.f32 %v1261_v4 }
 0x30f   : > { %7287 = vrcp.f32 %v1752_v58 }
 0x31b   : > { %v7286_v29 = vpop.eup %7285 }
 0x31c   : > { %1265 = vrot.lane.b32.xlu1 %v7286_v29, %s7776_s24  ;;  %v7288_v30 = vpop.eup %7287  ;;  %v6452_v29 = vld [vmem:[%s10193_s17 + $0x50] sm:$0xff] }
 0x31d   : > { %v1766_v1 = vsub.f32 1.0, %v7288_v30 }
 0x32e   : > { %v1757_v31 = vpop.permute.xlu1 %1756 }
 0x32f   : > { %v1759_v33 = vmul.f32 %v7288_v30, %v1757_v31 }
 0x331   : > { %1761 = vrot.lane.b32.xlu0 %v1759_v33, %s7777_s28  ;;  %v6451_v33 = vld [vmem:[%s10193_s17 + $0x48] sm:$0xff] }
 0x335   : > { %1269 = vrot.lane.b32.xlu0 %v8164_v24, %s7775_s29 }
 0x339   : > { %1521 = vrot.lane.b32.xlu0 %v8195_v32, %s7775_s29 }
 0x33d   : > { %1772 = vrot.lane.b32.xlu0 %v907_v43, %s7775_s29 }
 0x34a   : > { %v1511_v34 = vpop.permute.xlu1 %1510 }
 0x34b   : > { %v1513_v35 = vadd.f32 %v1511_v34, %v1408_v61  ;;  %v6444_v61 = vld [vmem:[%s10193_s17 + $0x28] sm:$0xff] }
 0x34d   : > { %7289 = vtanh.f32 %v1513_v35 }
 0x35a   : > { %v7290_v36 = vpop.eup %7289 }
 0x35b   : > { %1517 = vrot.lane.b32.xlu1 %v7290_v36, %s7776_s24 }
 0x38e   : > { %v1266_v41 = vpop.permute.xlu1 %1265 }
 0x38f   : > { %v1268_v24 = vmul.f32 %v1266_v41, %v1263_v44  ;;  %v6450_v41 = vld [vmem:[%s10193_s17 + $0x40] sm:$0xff] }
 0x3a3   : > { %v1762_v37 = vpop.permute.xlu0 %1761 }
 0x3a4   : > { %v1764_v39 = vadd.f32 %v1762_v37, %v1659_v23 }
 0x3a6   : > { %7291 = vtanh.f32 %v1764_v39 }
 0x3a7   : > { %v1270_v40 = vpop.permute.xlu0 %1269 }
 0x3a8   : > { %v1272_v45 = vmul.f32 %v7278_v54, %v1270_v40  ;;  %v6446_v54 = vld [vmem:[%s10193_s17 + $0x38] sm:$0xff] }
 0x3a9   : > { %6867 = vmatpush3.msra.mxu0 %v6446_v54 }
 0x3aa   : > { %v1273_v32 = vadd.f32 %v1272_v45, %v1268_v24  ;;  %6868 = vmatprep.subr.mxu0 %v10207_v3 }
 0x3ab   : > { %v1522_v43 = vpop.permute.xlu0 %1521  ;;  %6869 = vmatpush3.msra.mxu0 %v6445_v56 }
 0x3ac   : > { %v1524_v50 = vmul.f32 %v7282_v20, %v1522_v43  ;;  %6870 = vmatprep.subr.mxu0 %v10207_v3 }
 0x3ad   : > { %6871 = vmatpush3.msra.mxu0 %v6444_v61 }
 0x3ae   : > { %6872 = vmatprep.subr.mxu0 %v10207_v3 }
 0x3af   : > { %v1773_v0 = vpop.permute.xlu0 %1772  ;;  %6873 = vmatpush3.msra.mxu0 %v6443_v63  ;;  %v7779_v63 = vmov 2  }
 0x3b0   : > { %6900 = vmatprep.subr.mxu0 %v10207_v3  ;;  %v1775_v11 = vmul.f32 %v7288_v30, %v1773_v0 }
 0x3b3   : > { %v7292_v46 = vpop.eup %7291 }
 0x3b4   : > { %1768 = vrot.lane.b32.xlu1 %v7292_v46, %s7776_s24 }
 0x3b8   : > { %1780 = vrot.lane.b32.xlu1 %v1273_v32, %s7776_s24 }
 0x3cd   : > { %v1518_v49 = vpop.permute.xlu1 %1517 }
 0x3ce   : > { %v1520_v51 = vmul.f32 %v1518_v49, %v1515_v48 }
 0x3d0   : > { %v8422_v52 = vadd.f32 %v1524_v50, %v1520_v51 }
 0x3d2   : > { %10266 = vst [vmem:[#allocation34_spill] sm:$0xff] %v8422_v52  ;;  %1782 = vrot.lane.b32.xlu0 %v8422_v52, %s7776_s24 }
 0x426   : > { %v1769_v7 = vpop.permute.xlu1 %1768 }
 0x427   : > { %v1771_v14 = vmul.f32 %v1769_v7, %v1766_v1 }
 0x429   : > { %v8459_v15 = vadd.f32 %v1775_v11, %v1771_v14 }
 0x42a   : > { %v8461_v16 = vpop.permute.xlu1 %1780 }
 0x42b   : > { %10267 = vst [vmem:[#allocation35_spill] sm:$0xff] %v8459_v15  ;;  %10268 = vst [vmem:[#allocation36_spill] sm:$0xff] %v8461_v16  ;;  %1784 = vrot.lane.b32.xlu1 %v8459_v15, %s7776_s24 }
 0x42c   : > { %1792 = vst.msk [vmem:[%s1790_s5] sm:$0xf] %vm1791_vm10, %v8461_v16 }
 0x444   : > { %v1783_v18 = vpop.permute.xlu0 %1782 }
 0x445   : > { %1793 = vst.msk [vmem:[%s1790_s5 + $0x4] sm:$0xf] %vm1791_vm10, %v1783_v18 }
 0x49d   : > { %v1785_v19 = vpop.permute.xlu1 %1784 }
 0x49e   : > { %1794 = vst.msk [vmem:[%s1790_s5 + $0x8] sm:$0xf] %vm1791_vm10, %v1785_v19 }
 0x4a5   : > { %v1795_v20 = vld [vmem:[#allocation2] sm:$0xf]  ;;  %v1798_v21 = vld [vmem:[#allocation2 + $0xc] sm:$0xf]  ;;  %v1796_v22 = vld [vmem:[#allocation2 + $0x4] sm:$0xf] }
 0x4a6   : > { %v1829_v23 = vcombine.low %v1795_v20, %v1798_v21  ;;  %v1799_v25 = vld [vmem:[#allocation2 + $0x10] sm:$0xf]  ;;  %v1801_v4 = vld [vmem:[#allocation2 + $0x18] sm:$0xf]  ;;  %v1804_v28 = vld [vmem:[#allocation2 + $0x24] sm:$0xf] }
 0x4a7   : > { %v2330_v27 = vcombine.low %v1796_v22, %v1799_v25  ;;  %v1802_v58 = vld [vmem:[#allocation2 + $0x1c] sm:$0xf]  ;;  %v1805_v30 = vld [vmem:[#allocation2 + $0x28] sm:$0xf]  ;;  %v1830_v31 = vcombine.low %v1801_v4, %v1804_v28  ;;  %v1807_v35 = vld [vmem:[#allocation2 + $0x30] sm:$0xf] }
 0x4a8   : > { %6858 = vmatmul.mubr.msk.f32.vlgmr.msra.gmra.mxu1 %vm1070_vm4, %v1829_v23  ;;  %v2331_v34 = vcombine.low %v1802_v58, %v1805_v30  ;;  %v1810_v36 = vld [vmem:[#allocation2 + $0x3c] sm:$0xf]  ;;  %v1808_v37 = vld [vmem:[#allocation2 + $0x34] sm:$0xf]  ;;  %v1811_v39 = vld [vmem:[#allocation2 + $0x40] sm:$0xf] }
 0x4a9   : > { %6875 = vmatmul.mubr.msk.f32.vlgmr.msra.gmra.mxu0 %vm1070_vm4, %v2330_v27  ;;  %6884 = vmatpush3.msra.mxu1 %v6453_v26  ;;  %v1831_v40 = vcombine.low %v1807_v35, %v1810_v36  ;;  %v2332_v44 = vcombine.low %v1808_v37, %v1811_v39  ;;  %v1797_v45 = vld [vmem:[#allocation2 + $0x8] sm:$0xf]  ;;  %v1800_v46 = vld [vmem:[#allocation2 + $0x14] sm:$0xf]  ;;  %v1803_v32 = vld [vmem:[#allocation2 + $0x20] sm:$0xf] }
 0x4aa   : > { %6885 = vmatprep.subr.mxu1 %v10207_v3  ;;  %6860 = vmatprep.mubr.msk.f32.mxu1 %vm7774_vm2, %v10207_v3  ;;  %v2826_v24 = vcombine.low %v1797_v45, %v1800_v46  ;;  %v1806_v43 = vld [vmem:[#allocation2 + $0x2c] sm:$0xf]  ;;  %v1809_v49 = vld [vmem:[#allocation2 + $0x38] sm:$0xf]  ;;  %v1812_v50 = vld [vmem:[#allocation2 + $0x44] sm:$0xf] }
 0x4ab   : > { %6877 = vmatprep.mubr.msk.f32.mxu0 %vm7774_vm2, %v10207_v3  ;;  %6886 = vmatpush3.msra.mxu1 %v6452_v29  ;;  %v2827_v48 = vcombine.low %v1803_v32, %v1806_v43  ;;  %v2828_v51 = vcombine.low %v1809_v49, %v1812_v50  ;;  %v1943_v37 = vand.u32 127, %v996_v2  ;;  %v1815_v49 = vstv %s7905_s30 }
 0x4ac   : > { %6861 = vmatmul.mubr.msk.f32.gmra.mxu1 %vm1070_vm4, %v1830_v31  ;;  %6887 = vmatprep.subr.mxu1 %v10207_v3  ;;  %vm8601_vm13 = vcmp.lt.s32.totalorder %v8104_v5, %v1815_v49 }
 0x4ad   : > { %6878 = vmatmul.mubr.msk.f32.gmra.mxu0 %vm1070_vm4, %v2331_v34  ;;  %6888 = vmatpush3.msra.mxu1 %v6451_v33  ;;  %v7780_v33 = vmov 0  }
 0x4ae   : > { %6863 = vmatprep.mubr.msk.f32.mxu1 %vm7774_vm2, %v10207_v3  ;;  %6880 = vmatprep.mubr.msk.f32.mxu0 %vm7774_vm2, %v10207_v3 }
 0x4af   : > { %6889 = vmatprep.subr.mxu1 %v10207_v3 }
 0x4b0   : > { %6864 = vmatmul.mubr.msk.f32.gmra.mxu1 %vm1070_vm4, %v1831_v40 }
 0x4b1   : > { %6881 = vmatmul.mubr.msk.f32.gmra.mxu0 %vm1070_vm4, %v2332_v44  ;;  %6890 = vmatpush3.msra.mxu1 %v6450_v41  ;;  %v8589_v41 = vsub.s32 %v1943_v37, %v8104_v5 }
 0x4b2   : > { %6891 = vmatprep.mubr.msk.f32.mxu1 %vm7774_vm2, %v10207_v3  ;;  %6924 = vmatprep.mubr.msk.f32.mxu0 %vm7774_vm2, %v10207_v3 }
 0x4b3   : > { %6927 = vmatprep.subr.mxu1 %v10207_v3 }
 0x4b4   : > { %6892 = vmatmul.mubr.msk.f32.vlgmr.msra.gmra.mxu1 %vm1070_vm4, %v2826_v24 }
 0x4b5   : > { %6894 = vmatprep.mubr.msk.f32.mxu1 %vm7774_vm2, %v10207_v3 }
 0x4b8   : > { %6895 = vmatmul.mubr.msk.f32.gmra.mxu1 %vm1070_vm4, %v2827_v48 }
 0x4b9   : > { %6897 = vmatprep.mubr.msk.f32.mxu1 %vm7774_vm2, %v10207_v3 }
 0x4bc   : > { %6898 = vmatmul.mubr.msk.f32.gmra.mxu1 %vm1070_vm4, %v2828_v51 }
 0x4bd   : > { %6951 = vmatprep.mubr.msk.f32.mxu1 %vm7774_vm2, %v10207_v3 }
 0x568   : > { %v8514_v53 = vpop.f32.mrf.mxu1 }
 0x569   : > { %v8516_v54 = vpop.f32.mrf.mxu0  ;;  %v1921_v58 = vcombine.high %v8514_v53, %v8514_v53 }
 0x56a   : > { %2556 = vperm.xlu1 %7252, %v8516_v54   ;;  %v6859_v55 = vpop.f32.mrf.mxu1  ;;  %v8521_v56 = vcombine.high %v8516_v54, %v8516_v54 }
 0x56b   : > { %v6876_v60 = vpop.f32.mrf.mxu0 }
 0x56c   : > { %2559 = vperm.xlu0 %7254, %v8521_v56   ;;  %v8524_v61 = vpop.f32.mrf.mxu1 }
 0x56d   : > { %v8526_v62 = vpop.f32.mrf.mxu0  ;;  %v1922_v30 = vcombine.high %v8524_v61, %v8524_v61 }
 0x56e   : > { %7253 = vset.pattern.permute.xlu1 %v7779_v63  ;;  %v6862_v0 = vpop.f32.mrf.mxu1  ;;  %v2423_v18 = vcombine.high %v8526_v62, %v8526_v62 }
 0x56f   : > { %v6879_v1 = vpop.f32.mrf.mxu0  ;;  %2190 = vperm.xlu1 %7253, %v8514_v53  }
 0x570   : > { %2562 = vperm.xlu0 %7254, %v8526_v62   ;;  %v8531_v7 = vpop.f32.mrf.mxu1 }
 0x571   : > { %v8533_v11 = vpop.f32.mrf.mxu0  ;;  %v1923_v31 = vcombine.high %v8531_v7, %v8531_v7 }
 0x572   : > { %v6865_v14 = vpop.f32.mrf.mxu1  ;;  %v2424_v26 = vcombine.high %v8533_v11, %v8533_v11 }
 0x573   : > { %v6882_v19 = vpop.f32.mrf.mxu0  ;;  %2196 = vperm.xlu1 %7253, %v8524_v61  }
 0x574   : > { %2565 = vperm.xlu0 %7254, %v2423_v18   ;;  %v8538_v20 = vpop.f32.mrf.mxu1 }
 0x575   : > { %v2918_v21 = vcombine.high %v8538_v20, %v8538_v20 }
 0x576   : > { %v6893_v22 = vpop.f32.mrf.mxu1 }
 0x577   : > { %7255 = vset.pattern.permute.xlu1 %v7778_v17 }
 0x578   : > { %2568 = vperm.xlu0 %7254, %v8533_v11   ;;  %3055 = vperm.xlu1 %7255, %v2918_v21   ;;  %v8544_v23 = vpop.f32.mrf.mxu1 }
 0x579   : > { %v2919_v28 = vcombine.high %v8544_v23, %v8544_v23 }
 0x57a   : > { %v6896_v25 = vpop.f32.mrf.mxu1 }
 0x57c   : > { %2571 = vperm.xlu0 %7254, %v2424_v26   ;;  %3058 = vperm.xlu1 %7255, %v8544_v23   ;;  %v2911_v27 = vpop.f32.mrf.mxu1 }
 0x57d   : > { %v2920_v29 = vcombine.high %v2911_v27, %v2911_v27 }
 0x57e   : > { %v6899_v4 = vpop.f32.mrf.mxu1 }
 0x580   : > { %3052 = vperm.xlu0 %7254, %v8538_v20   ;;  %3061 = vperm.xlu1 %7255, %v2919_v28  }
 0x584   : > { %2060 = vperm.xlu0 %7254, %v8514_v53   ;;  %3064 = vperm.xlu1 %7255, %v2911_v27  }
 0x588   : > { %7257 = vset.pattern.permute.xlu0 %v7779_v63  ;;  %3067 = vperm.xlu1 %7255, %v2920_v29  }
 0x589   : > { %2193 = vperm.xlu0 %7257, %v1921_v58  }
 0x58c   : > { %7256 = vset.pattern.permute.xlu1 %v7779_v63 }
 0x58d   : > { %3185 = vperm.xlu0 %7257, %v2918_v21   ;;  %3182 = vperm.xlu1 %7256, %v8538_v20  }
 0x591   : > { %3188 = vperm.xlu0 %7257, %v8544_v23   ;;  %2199 = vperm.xlu1 %7256, %v1922_v30  }
 0x595   : > { %3191 = vperm.xlu0 %7257, %v2919_v28   ;;  %2202 = vperm.xlu1 %7256, %v8531_v7  }
 0x599   : > { %3194 = vperm.xlu0 %7257, %v2911_v27   ;;  %2205 = vperm.xlu1 %7256, %v1923_v31  }
 0x59d   : > { %2686 = vperm.xlu0 %7257, %v8516_v54   ;;  %7258 = vset.pattern.permute.xlu1 %v7778_v17 }
 0x59e   : > { %2063 = vperm.xlu1 %7258, %v1921_v58  }
 0x5a1   : > { %2692 = vperm.xlu0 %7257, %v8526_v62  }
 0x5a2   : > { %7259 = vset.pattern.permute.xlu1 %v7779_v63 }
 0x5a3   : > { %3197 = vperm.xlu1 %7259, %v2920_v29  }
 0x5a5   : > { %2695 = vperm.xlu0 %7257, %v2423_v18  }
 0x5a7   : > { %7260 = vset.pattern.permute.xlu1 %v7778_v17 }
 0x5a8   : > { %2066 = vperm.xlu1 %7260, %v8524_v61  }
 0x5a9   : > { %2698 = vperm.xlu0 %7257, %v8533_v11  }
 0x5ac   : > { %7261 = vset.pattern.permute.xlu1 %v7779_v63 }
 0x5ad   : > { %7264 = vset.pattern.permute.xlu0 %v7780_v33  ;;  %2689 = vperm.xlu1 %7261, %v8521_v56  }
 0x5ae   : > { %1925 = vperm.xlu0 %7264, %v8514_v53  }
 0x5b1   : > { %7262 = vset.pattern.permute.xlu1 %v7778_v17 }
 0x5b2   : > { %1934 = vperm.xlu0 %7264, %v1922_v30   ;;  %2069 = vperm.xlu1 %7262, %v1922_v30  }
 0x5b6   : > { %1940 = vperm.xlu0 %7264, %v1923_v31   ;;  %2072 = vperm.xlu1 %7262, %v8531_v7  }
 0x5ba   : > { %2429 = vperm.xlu0 %7264, %v8521_v56   ;;  %2075 = vperm.xlu1 %7262, %v1923_v31  }
 0x5be   : > { %2435 = vperm.xlu0 %7264, %v2423_v18   ;;  %7263 = vset.pattern.permute.xlu1 %v7779_v63 }
 0x5bf   : > { %2701 = vperm.xlu1 %7263, %v2424_v26  }
 0x5c2   : > { %2441 = vperm.xlu0 %7264, %v2424_v26  }
 0x5c3   : > { %7265 = vset.pattern.permute.xlu1 %v7780_v33 }
 0x5c4   : > { %1928 = vperm.xlu1 %7265, %v1921_v58  }
 0x5c6   : > { %2925 = vperm.xlu0 %7264, %v2918_v21  }
 0x5c8   : > { %1931 = vperm.xlu1 %7265, %v8524_v61  }
 0x5ca   : > { %2931 = vperm.xlu0 %7264, %v2919_v28  }
 0x5cc   : > { %1937 = vperm.xlu1 %7265, %v8531_v7  }
 0x5ce   : > { %2937 = vperm.xlu0 %7264, %v2920_v29  }
 0x5d0   : > { %2426 = vperm.xlu1 %7265, %v8516_v54  }
 0x5d4   : > { %2432 = vperm.xlu1 %7265, %v8526_v62  }
 0x5d8   : > { %2438 = vperm.xlu1 %7265, %v8533_v11  }
 0x5dc   : > { %2922 = vperm.xlu1 %7265, %v8538_v20  }
 0x5e0   : > { %2928 = vperm.xlu1 %7265, %v8544_v23  }
 0x5e4   : > { %2934 = vperm.xlu1 %7265, %v2911_v27  }
 0x5e5   : > { %v2557_v17 = vpop.permute.xlu1 %2556 }
 0x5e6   : > { %v2576_v32 = vrot.slane %v2557_v17, %v8589_v41 }
 0x5e7   : > { %v2560_v34 = vpop.permute.xlu0 %2559 }
 0x5e8   : > { %v2580_v44 = vrot.slane %v2560_v34, %v8589_v41 }
 0x5ea   : > { %v2191_v35 = vpop.permute.xlu1 %2190  ;;  %v2597_v2 = vsel %vm1061_vm6, %v2580_v44, %v2576_v32 }
 0x5eb   : > { %v2563_v36 = vpop.permute.xlu0 %2562  ;;  %v2210_v34 = vrot.slane %v2191_v35, %v8589_v41 }
 0x5ec   : > { %v2584_v45 = vrot.slane %v2563_v36, %v8589_v41 }
 0x5ee   : > { %v8586_v39 = vpop.permute.xlu1 %2196  ;;  %v2598_v50 = vsel %vm1063_vm7, %v2584_v45, %v2597_v2 }
 0x5ef   : > { %v2566_v40 = vpop.permute.xlu0 %2565 }
 0x5f0   : > { %v2588_v43 = vrot.slane %v2566_v40, %v8589_v41 }
 0x5f2   : > { %v2599_v54 = vsel %vm1065_vm8, %v2588_v43, %v2598_v50 }
 0x5f3   : > { %v2569_v46 = vpop.permute.xlu0 %2568  ;;  %v3056_v24 = vpop.permute.xlu1 %3055 }
 0x5f4   : > { %v2592_v48 = vrot.slane %v2569_v46, %v8589_v41  ;;  %v3076_v58 = vrot.slane %v3056_v24, %v8589_v41  ;;  %v2218_v24 = vrot.slane %v8586_v39, %v8589_v41 }
 0x5f6   : > { %v2600_v60 = vsel %vm1971_vm11, %v2592_v48, %v2599_v54 }
 0x5f7   : > { %v2572_v51 = vpop.permute.xlu0 %2571  ;;  %v3059_v53 = vpop.permute.xlu1 %3058 }
 0x5f8   : > { %v2596_v56 = vrot.slane %v2572_v51, %v8589_v41  ;;  %v3080_v36 = vrot.slane %v3059_v53, %v8589_v41 }
 0x5fa   : > { %v2601_v61 = vsel %vm1973_vm12, %v2596_v56, %v2600_v60 }
 0x5fb   : > { %v2603_v62 = vsel %vm8601_vm13, %v2601_v61, -1e+30  ;;  %v3053_v63 = vpop.permute.xlu0 %3052  ;;  %v3062_v0 = vpop.permute.xlu1 %3061  ;;  %v8648_v61 = vsel %vm8601_vm13, 1.0, %v10207_v3 }
 0x5fc   : > { %v2604_v1 = vsel %vm1977_vm14, %v2603_v62, -inf  ;;  %v3072_v28 = vrot.slane %v3053_v63, %v8589_v41  ;;  %v3084_v32 = vrot.slane %v3062_v0, %v8589_v41 }
 0x5fd   : > { %v2605_v7 = vrot.slane %v2604_v1, 4 }
 0x5fe   : > { %v3093_v17 = vsel %vm1061_vm6, %v3076_v58, %v3072_v28 }
 0x5ff   : > { %v2606_v11 = vmax.f32 %v2604_v1, %v2605_v7  ;;  %v8611_v14 = vpop.permute.xlu0 %2060  ;;  %v3065_v18 = vpop.permute.xlu1 %3064  ;;  %v3094_v44 = vsel %vm1063_vm7, %v3080_v36, %v3093_v17 }
 0x600   : > { %v3088_v35 = vrot.slane %v3065_v18, %v8589_v41  ;;  %v3095_v48 = vsel %vm1065_vm8, %v3084_v32, %v3094_v44 }
 0x601   : > { %v2607_v19 = vrot.slane %v2606_v11, 2 }
 0x602   : > { %v3096_v56 = vsel %vm1971_vm11, %v3088_v35, %v3095_v48 }
 0x603   : > { %v2608_v20 = vmax.f32 %v2606_v11, %v2607_v19  ;;  %v3068_v21 = vpop.permute.xlu1 %3067 }
 0x604   : > { %v2194_v22 = vpop.permute.xlu0 %2193  ;;  %v3092_v49 = vrot.slane %v3068_v21, %v8589_v41 }
 0x605   : > { %v2609_v23 = vrot.slane %v2608_v20, 1  ;;  %v2214_v33 = vrot.slane %v2194_v22, %v8589_v41 }
 0x607   : > { %v2610_v25 = vmax.f32 %v2608_v20, %v2609_v23  ;;  %v2231_v45 = vsel %vm1061_vm6, %v2214_v33, %v2210_v34 }
 0x608   : > { %v8613_v26 = vpop.permute.xlu0 %3185  ;;  %v8615_v27 = vpop.permute.xlu1 %3182  ;;  %v2232_v2 = vsel %vm1063_vm7, %v2218_v24, %v2231_v45 }
 0x609   : > { %v2611_v4 = vsub.f32 %v2603_v62, %v2610_v25  ;;  %v3097_v62 = vsel %vm1973_vm12, %v3092_v49, %v3096_v56  ;;  %v3202_v56 = vrot.slane %v8615_v27, %v8589_v41 }
 0x60a   : > { %v8659_v20 = vsel %vm8601_vm13, %v3097_v62, -1e+30 }
 0x60b   : > { %v2612_v29 = vmul.f32 1.442695, %v2611_v4  ;;  %v3100_v4 = vsel %vm1977_vm14, %v8659_v20, -inf }
 0x60c   : > { %v8619_v30 = vpop.permute.xlu0 %3188  ;;  %v2200_v31 = vpop.permute.xlu1 %2199  ;;  %v3101_v33 = vrot.slane %v3100_v4, 4 }
 0x60d   : > { %7293 = vpow2.f32 %v2612_v29  ;;  %v2222_v46 = vrot.slane %v2200_v31, %v8589_v41 }
 0x60f   : > { %v2233_v53 = vsel %vm1065_vm8, %v2222_v46, %v2232_v2  ;;  %v3102_v46 = vmax.f32 %v3100_v4, %v3101_v33 }
 0x610   : > { %v8625_v37 = vpop.permute.xlu0 %3191  ;;  %v2203_v40 = vpop.permute.xlu1 %2202 }
 0x611   : > { %v2226_v43 = vrot.slane %v2203_v40, %v8589_v41  ;;  %v3103_v49 = vrot.slane %v3102_v46, 2 }
 0x613   : > { %v2234_v39 = vsel %vm1971_vm11, %v2226_v43, %v2233_v53  ;;  %v3104_v53 = vmax.f32 %v3102_v46, %v3103_v49 }
 0x614   : > { %v8638_v50 = vpop.permute.xlu0 %3194  ;;  %v2206_v51 = vpop.permute.xlu1 %2205 }
 0x615   : > { %v2230_v54 = vrot.slane %v2206_v51, %v8589_v41 }
 0x617   : > { %v2235_v60 = vsel %vm1973_vm12, %v2230_v54, %v2234_v39  ;;  %v3206_v39 = vrot.slane %v8613_v26, %v8589_v41 }
 0x618   : > { %v2237_v63 = vsel %vm8601_vm13, %v2235_v60, -1e+30  ;;  %v2687_v0 = vpop.permute.xlu0 %2686  ;;  %v3210_v60 = vrot.slane %v8619_v30, %v8589_v41  ;;  %v2080_v30 = vrot.slane %v8611_v14, %v8589_v41 }
 0x619   : > { %v2238_v1 = vsel %vm1977_vm14, %v2237_v63, -inf  ;;  %v2064_v7 = vpop.permute.xlu1 %2063  ;;  %v2706_v26 = vrot.slane %v2687_v0, %v8589_v41 }
 0x61a   : > { %v7294_v11 = vpop.eup %7293  ;;  %v2239_v18 = vrot.slane %v2238_v1, 4 }
 0x61b   : > { %v8655_v19 = vmul.f32 %v7294_v11, %v8648_v61  ;;  %v2084_v11 = vrot.slane %v2064_v7, %v8589_v41 }
 0x61c   : > { %v2240_v21 = vmax.f32 %v2238_v1, %v2239_v18  ;;  %v2693_v23 = vpop.permute.xlu0 %2692  ;;  %v3214_v1 = vrot.slane %v8625_v37, %v8589_v41  ;;  %v3105_v18 = vrot.slane %v3104_v53, 1 }
 0x61d   : > { %v2615_v22 = vsel %vm1977_vm14, %v8655_v19, 0.0 }
 0x61e   : > { %v2616_v25 = vrot.slane %v2615_v22, 4  ;;  %v2241_v28 = vrot.slane %v2240_v21, 2  ;;  %v3198_v29 = vpop.permute.xlu1 %3197  ;;  %v3106_v33 = vmax.f32 %v3104_v53, %v3105_v18 }
 0x61f   : > { %v3222_v4 = vrot.slane %v3198_v29, %v8589_v41 }
 0x620   : > { %v2617_v58 = vadd.f32 %v2616_v25, %v2615_v22  ;;  %v2242_v31 = vmax.f32 %v2240_v21, %v2241_v28  ;;  %v2696_v36 = vpop.permute.xlu0 %2695  ;;  %v3218_v21 = vrot.slane %v8638_v50, %v8589_v41  ;;  %v3223_v25 = vsel %vm1061_vm6, %v3206_v39, %v3202_v56 }
 0x621   : > { %v3224_v7 = vsel %vm1063_vm7, %v3210_v60, %v3223_v25  ;;  %v3107_v49 = vsub.f32 %v8659_v20, %v3106_v33 }
 0x622   : > { %v2618_v17 = vrot.slane %v2617_v58, 2  ;;  %v2243_v34 = vrot.slane %v2242_v31, 1  ;;  %v3225_v0 = vsel %vm1065_vm8, %v3214_v1, %v3224_v7 }
 0x623   : > { %v2067_v40 = vpop.permute.xlu1 %2066  ;;  %v3226_v14 = vsel %vm1971_vm11, %v3218_v21, %v3225_v0 }
 0x624   : > { %v2619_v44 = vadd.f32 %v2618_v17, %v2617_v58  ;;  %v2244_v45 = vmax.f32 %v2242_v31, %v2243_v34  ;;  %v2699_v2 = vpop.permute.xlu0 %2698  ;;  %v2088_v27 = vrot.slane %v2067_v40, %v8589_v41  ;;  %v2101_v58 = vsel %vm1061_vm6, %v2084_v11, %v2080_v30 }
 0x625   : > { %v2714_v31 = vrot.slane %v2693_v23, %v8589_v41  ;;  %v3227_v40 = vsel %vm1973_vm12, %v3222_v4, %v3226_v14  ;;  %v2722_v56 = vrot.slane %v2699_v2, %v8589_v41 }
 0x626   : > { %v2620_v24 = vrot.slane %v2619_v44, 1  ;;  %v2245_v32 = vsub.f32 %v2237_v63, %v2244_v45  ;;  %v2102_v17 = vsel %vm1063_vm7, %v2088_v27, %v2101_v58  ;;  %v3108_v27 = vmul.f32 1.442695, %v3107_v49 }
 0x627   : > { %v8747_v49 = vsub.s32 4, %v8104_v5 }
 0x628   : > { %v2621_v43 = vadd.f32 %v2620_v24, %v2619_v44  ;;  %v2246_v35 = vmul.f32 1.442695, %v2245_v32  ;;  %v2690_v48 = vpop.permute.xlu1 %2689  ;;  %v2718_v32 = vrot.slane %v2696_v36, %v8589_v41 }
 0x629   : > { %v2710_v62 = vrot.slane %v2690_v48, %v8589_v41  ;;  %v8672_v63 = vpop.permute.xlu0 %1925 }
 0x62a   : > { %v2622_v51 = vmax.f32 %v2621_v43, 1e-30  ;;  %7295 = vpow2.f32 %v2246_v35 }
 0x62b   : > { %v2727_v28 = vsel %vm1061_vm6, %v2710_v62, %v2706_v26 }
 0x62c   : > { %7297 = vrcp.f32 %v2622_v51  ;;  %v2728_v44 = vsel %vm1063_vm7, %v2714_v31, %v2727_v28  ;;  %v8709_v51 = vsel %vm8601_vm13, %v3227_v40, -1e+30 }
 0x62d   : > { %v2070_v54 = vpop.permute.xlu1 %2069  ;;  %v8694_v29 = vpop.permute.xlu0 %1934  ;;  %v2729_v36 = vsel %vm1065_vm8, %v2718_v32, %v2728_v44  ;;  %v3230_v21 = vsel %vm1977_vm14, %v8709_v51, -inf  ;;  %7299 = vpow2.f32 %v3108_v27 }
 0x62e   : > { %v2092_v37 = vrot.slane %v2070_v54, %v8589_v41  ;;  %v3231_v7 = vrot.slane %v3230_v21, 4 }
 0x630   : > { %v2103_v45 = vsel %vm1065_vm8, %v2092_v37, %v2102_v17 }
 0x631   : > { %v2073_v22 = vpop.permute.xlu1 %2072  ;;  %v8724_v1 = vpop.permute.xlu0 %1940 }
 0x632   : > { %v2096_v50 = vrot.slane %v2073_v22, %v8589_v41 }
 0x634   : > { %v2104_v23 = vsel %vm1971_vm11, %v2096_v50, %v2103_v45  ;;  %v3232_v45 = vmax.f32 %v3230_v21, %v3231_v7 }
 0x635   : > { %v2076_v34 = vpop.permute.xlu1 %2075  ;;  %v2430_v14 = vpop.permute.xlu0 %2429 }
 0x636   : > { %v2100_v46 = vrot.slane %v2076_v34, %v8589_v41 }
 0x637   : > { %v7296_v24 = vpop.eup %7295 }
 0x638   : > { %v8703_v43 = vmul.f32 %v7296_v24, %v8648_v61  ;;  %v2105_v35 = vsel %vm1973_vm12, %v2100_v46, %v2104_v23  ;;  %v1947_v46 = vrot.slane %v8672_v63, %v8589_v41 }
 0x639   : > { %v7298_v48 = vpop.eup %7297  ;;  %v8713_v53 = vsel %vm8601_vm13, %v2105_v35, -1e+30  ;;  %v2436_v21 = vpop.permute.xlu0 %2435 }
 0x63a   : > { %v8717_v54 = vmul.f32 %v7298_v48, %v8655_v19  ;;  %v2249_v39 = vsel %vm1977_vm14, %v8703_v43, 0.0  ;;  %v2108_v20 = vsel %vm1977_vm14, %v8713_v53, -inf  ;;  %v2702_v60 = vpop.permute.xlu1 %2701  ;;  %v2730_v19 = vsel %vm1971_vm11, %v2722_v56, %v2729_v36 }
 0x63b   : > { %v2250_v62 = vrot.slane %v2249_v39, 4  ;;  %v2109_v11 = vrot.slane %v2108_v20, 4  ;;  %v2726_v18 = vrot.slane %v2702_v60, %v8589_v41 }
 0x63c   : > { %v2635_v26 = vrot.slane %v8717_v54, %v8123_v10  ;;  %v2628_v2 = vrot.slane %v8717_v54, %v8117_v8  ;;  %v2642_v31 = vrot.slane %v8717_v54, %v8120_v9  ;;  %v2649_v48 = vrot.slane %v8717_v54, %v8127_v12 }
 0x63d   : > { %v2251_v22 = vadd.f32 %v2250_v62, %v2249_v39  ;;  %v2110_v30 = vmax.f32 %v2108_v20, %v2109_v11  ;;  %v2731_v25 = vsel %vm1973_vm12, %v2726_v18, %v2730_v19  ;;  %v3233_v62 = vrot.slane %v3232_v45, 2 }
 0x63e   : > { %v2733_v4 = vsel %vm8601_vm13, %v2731_v25, -1e+30  ;;  %2637 = vbcast.lane.b32.xlu0 %v2635_v26, 256  ;;  %2630 = vbcast.lane.b32.xlu1 %v2628_v2, 256  ;;  %v1959_v11 = vrot.slane %v8694_v29, %v8589_v41  ;;  %v2656_v27 = vrot.slane %v8717_v54, %v8747_v49 }
 0x63f   : > { %v2252_v37 = vrot.slane %v2251_v22, 2  ;;  %v2111_v28 = vrot.slane %v2110_v30, 2  ;;  %v2734_v50 = vsel %vm1977_vm14, %v2733_v4, -inf  ;;  %v1929_v0 = vpop.permute.xlu1 %1928  ;;  %v3234_v7 = vmax.f32 %v3232_v45, %v3233_v62 }
 0x640   : > { %v2735_v58 = vrot.slane %v2734_v50, 4  ;;  %v1951_v34 = vrot.slane %v1929_v0, %v8589_v41 }
 0x641   : > { %v2253_v33 = vadd.f32 %v2252_v37, %v2251_v22  ;;  %v2112_v17 = vmax.f32 %v2110_v30, %v2111_v28  ;;  %v8758_v22 = vsub.s32 5, %v8104_v5  ;;  %v1967_v30 = vrot.slane %v8724_v1, %v8589_v41  ;;  %v2442_v1 = vpop.permute.xlu0 %2441 }
 0x642   : > { %v2736_v40 = vmax.f32 %v2734_v50, %v2735_v58  ;;  %2644 = vbcast.lane.b32.xlu0 %v2642_v31, 256  ;;  %v1968_v56 = vsel %vm1061_vm6, %v1951_v34, %v1947_v46  ;;  %v7300_v34 = vpop.eup %7299  ;;  %v3235_v45 = vrot.slane %v3234_v7, 1  ;;  %v2450_v46 = vrot.slane %v2430_v14, %v8589_v41 }
 0x643   : > { %v2254_v44 = vrot.slane %v2253_v33, 1  ;;  %v2113_v24 = vrot.slane %v2112_v17, 1  ;;  %v1932_v32 = vpop.permute.xlu1 %1931  ;;  %v2663_v31 = vrot.slane %v8717_v54, %v8758_v22 }
 0x644   : > { %v2737_v23 = vrot.slane %v2736_v40, 2  ;;  %v1955_v35 = vrot.slane %v1932_v32, %v8589_v41 }
 0x645   : > { %v2255_v36 = vadd.f32 %v2254_v44, %v2253_v33  ;;  %v2114_v39 = vmax.f32 %v2112_v17, %v2113_v24 }
 0x646   : > { %v2738_v20 = vmax.f32 %v2736_v40, %v2737_v23  ;;  %v1969_v60 = vsel %vm1063_vm7, %v1955_v35, %v1968_v56  ;;  %2651 = vbcast.lane.b32.xlu0 %v2649_v48, 256  ;;  %v8774_v23 = vmul.f32 %v7300_v34, %v8648_v61  ;;  %v2458_v56 = vrot.slane %v2436_v21, %v8589_v41 }
 0x647   : > { %v2256_v63 = vmax.f32 %v2255_v36, 1e-30  ;;  %v2115_v18 = vsub.f32 %v8713_v53, %v2114_v39  ;;  %v1938_v19 = vpop.permute.xlu1 %1937  ;;  %v1970_v29 = vsel %vm1065_vm8, %v1959_v11, %v1969_v60  ;;  %v3236_v39 = vmax.f32 %v3234_v7, %v3235_v45 }
 0x648   : > { %v2739_v26 = vrot.slane %v2738_v20, 1  ;;  %v1963_v2 = vrot.slane %v1938_v19, %v8589_v41  ;;  %v3111_v62 = vsel %vm1977_vm14, %v8774_v23, 0.0  ;;  %v2466_v11 = vrot.slane %v2442_v1, %v8589_v41 }
 0x649   : > { %7301 = vrcp.f32 %v2256_v63  ;;  %v2116_v25 = vmul.f32 1.442695, %v2115_v18  ;;  %v3237_v21 = vsub.f32 %v8709_v51, %v3236_v39 }
 0x64a   : > { %v2740_v37 = vmax.f32 %v2738_v20, %v2739_v26  ;;  %v1972_v53 = vsel %vm1971_vm11, %v1963_v2, %v1970_v29  ;;  %2658 = vbcast.lane.b32.xlu0 %v2656_v27, 256  ;;  %v2926_v20 = vpop.permute.xlu0 %2925 }
 0x64b   : > { %7303 = vpow2.f32 %v2116_v25  ;;  %v1974_v28 = vsel %vm1973_vm12, %v1967_v30, %v1972_v53  ;;  %v2427_v50 = vpop.permute.xlu1 %2426 }
 0x64c   : > { %v2741_v0 = vsub.f32 %v2733_v4, %v2740_v37  ;;  %v1976_v58 = vsel %vm8601_vm13, %v1974_v28, -1e+30  ;;  %v2446_v17 = vrot.slane %v2427_v50, %v8589_v41  ;;  %v3112_v37 = vrot.slane %v3111_v62, 4 }
 0x64d   : > { %v1978_v33 = vsel %vm1977_vm14, %v1976_v58, -inf }
 0x64e   : > { %v2742_v40 = vmul.f32 1.442695, %v2741_v0  ;;  %v1979_v44 = vrot.slane %v1978_v33, 4  ;;  %2665 = vbcast.lane.b32.xlu0 %v2663_v31, 256  ;;  %v2467_v35 = vsel %vm1061_vm6, %v2450_v46, %v2446_v17  ;;  %v2932_v0 = vpop.permute.xlu0 %2931  ;;  %v3238_v17 = vmul.f32 1.442695, %v3237_v21 }
 0x64f   : > { %v2433_v24 = vpop.permute.xlu1 %2432 }
 0x650   : > { %7305 = vpow2.f32 %v2742_v40  ;;  %v1980_v4 = vmax.f32 %v1978_v33, %v1979_v44  ;;  %v2454_v32 = vrot.slane %v2433_v24, %v8589_v41  ;;  %v2946_v40 = vrot.slane %v2926_v20, %v8589_v41 }
 0x652   : > { %v1981_v48 = vrot.slane %v1980_v4, 2  ;;  %v2468_v36 = vsel %vm1063_vm7, %v2454_v32, %v2467_v35  ;;  %v3113_v35 = vadd.f32 %v3112_v37, %v3111_v62  ;;  %v2938_v20 = vpop.permute.xlu0 %2937 }
 0x653   : > { %v2439_v60 = vpop.permute.xlu1 %2438  ;;  %v2469_v18 = vsel %vm1065_vm8, %v2458_v56, %v2468_v36 }
 0x654   : > { %v1982_v63 = vmax.f32 %v1980_v4, %v1981_v48  ;;  %v2462_v14 = vrot.slane %v2439_v60, %v8589_v41 }
 0x656   : > { %v7302_v19 = vpop.eup %7301  ;;  %v1983_v26 = vrot.slane %v1982_v63, 1  ;;  %v2470_v2 = vsel %vm1971_vm11, %v2462_v14, %v2469_v18 }
 0x657   : > { %v8786_v27 = vmul.f32 %v7302_v19, %v8703_v43  ;;  %v2471_v30 = vsel %vm1973_vm12, %v2466_v11, %v2470_v2  ;;  %v2923_v25 = vpop.permute.xlu1 %2922  ;;  %v2954_v11 = vrot.slane %v2932_v0, %v8589_v41  ;;  %v3114_v19 = vrot.slane %v3113_v35, 2 }
 0x658   : > { %v7304_v29 = vpop.eup %7303  ;;  %v1984_v53 = vmax.f32 %v1982_v63, %v1983_v26  ;;  %v2473_v7 = vsel %vm8601_vm13, %v2471_v30, -1e+30  ;;  %v2942_v28 = vrot.slane %v2923_v25, %v8589_v41  ;;  %v2962_v25 = vrot.slane %v2938_v20, %v8589_v41 }
 0x659   : > { %v8794_v50 = vmul.f32 %v7304_v29, %v8648_v61  ;;  %v2474_v43 = vsel %vm1977_vm14, %v2473_v7, -inf  ;;  %v2269_v51 = vrot.slane %v8786_v27, %v8123_v10  ;;  %v2262_v31 = vrot.slane %v8786_v27, %v8117_v8 }
 0x65a   : > { %v1985_v1 = vsub.f32 %v1976_v58, %v1984_v53  ;;  %v2475_v33 = vrot.slane %v2474_v43, 4  ;;  %v2963_v48 = vsel %vm1061_vm6, %v2946_v40, %v2942_v28  ;;  %v2276_v58 = vrot.slane %v8786_v27, %v8120_v9 }
 0x65b   : > { %v2119_v34 = vsel %vm1977_vm14, %v8794_v50, 0.0  ;;  %2271 = vbcast.lane.b32.xlu0 %v2269_v51, 256  ;;  %2264 = vbcast.lane.b32.xlu1 %v2262_v31, 256  ;;  %v2929_v44 = vpop.permute.xlu1 %2928  ;;  %v2283_v21 = vrot.slane %v8786_v27, %v8127_v12 }
 0x65c   : > { %v2120_v45 = vrot.slane %v2119_v34, 4  ;;  %v1986_v46 = vmul.f32 1.442695, %v1985_v1  ;;  %v2476_v24 = vmax.f32 %v2474_v43, %v2475_v33  ;;  %v2950_v4 = vrot.slane %v2929_v44, %v8589_v41 }
 0x65d   : > { %v7306_v32 = vpop.eup %7305  ;;  %v2290_v33 = vrot.slane %v8786_v27, %v8747_v49 }
 0x65e   : > { %v2121_v36 = vadd.f32 %v2120_v45, %v2119_v34  ;;  %v8809_v39 = vmul.f32 %v7306_v32, %v8648_v61  ;;  %7307 = vpow2.f32 %v1986_v46  ;;  %v2477_v56 = vrot.slane %v2476_v24, 2 }
 0x65f   : > { %7309 = vpow2.f32 %v3238_v17  ;;  %v2964_v60 = vsel %vm1063_vm7, %v2950_v4, %v2963_v48  ;;  %2278 = vbcast.lane.b32.xlu1 %v2276_v58, 256  ;;  %v2935_v63 = vpop.permute.xlu1 %2934  ;;  %v3115_v17 = vadd.f32 %v3114_v19, %v3113_v35  ;;  %v2297_v48 = vrot.slane %v8786_v27, %v8758_v22 }
 0x660   : > { %v2122_v14 = vrot.slane %v2121_v36, 2  ;;  %v2745_v62 = vsel %vm1977_vm14, %v8809_v39, 0.0  ;;  %v2478_v18 = vmax.f32 %v2476_v24, %v2477_v56  ;;  %v2958_v2 = vrot.slane %v2935_v63, %v8589_v41 }
 0x661   : > { %v2746_v26 = vrot.slane %v2745_v62, 4  ;;  %v2965_v37 = vsel %vm1065_vm8, %v2954_v11, %v2964_v60  ;;  %v3116_v55 = vrot.slane %v3115_v17, 1 }
 0x662   : > { %v2123_v30 = vadd.f32 %v2122_v14, %v2121_v36  ;;  %v2479_v29 = vrot.slane %v2478_v18, 1  ;;  %v2966_v28 = vsel %vm1971_vm11, %v2958_v2, %v2965_v37 }
 0x663   : > { %v2747_v53 = vadd.f32 %v2746_v26, %v2745_v62  ;;  %2285 = vbcast.lane.b32.xlu1 %v2283_v21, 256  ;;  %v2967_v51 = vsel %vm1973_vm12, %v2962_v25, %v2966_v28  ;;  %v3117_v63 = vadd.f32 %v3116_v55, %v3115_v17 }
 0x664   : > { %v2124_v43 = vrot.slane %v2123_v30, 1  ;;  %v2480_v0 = vmax.f32 %v2478_v18, %v2479_v29  ;;  %v2969_v1 = vsel %vm8601_vm13, %v2967_v51, -1e+30 }
 0x665   : > { %v2748_v31 = vrot.slane %v2747_v53, 2  ;;  %v2970_v40 = vsel %vm1977_vm14, %v2969_v1, -inf  ;;  %v3118_v2 = vmax.f32 %v3117_v63, 1e-30 }
 0x666   : > { %v2125_v41 = vadd.f32 %v2124_v43, %v2123_v30  ;;  %v2481_v34 = vsub.f32 %v2473_v7, %v2480_v0  ;;  %v2971_v45 = vrot.slane %v2970_v40, 4 }
 0x667   : > { %v2749_v44 = vadd.f32 %v2748_v31, %v2747_v53  ;;  %2292 = vbcast.lane.b32.xlu1 %v2290_v33, 256 }
 0x668   : > { %v2126_v46 = vmax.f32 %v2125_v41, 1e-30  ;;  %v2482_v24 = vmul.f32 1.442695, %v2481_v34  ;;  %v2972_v32 = vmax.f32 %v2970_v40, %v2971_v45 }
 0x669   : > { %v2750_v4 = vrot.slane %v2749_v44, 1 }
 0x66a   : > { %7311 = vrcp.f32 %v2126_v46  ;;  %v2973_v35 = vrot.slane %v2972_v32, 2 }
 0x66b   : > { %v7308_v58 = vpop.eup %7307  ;;  %v2751_v36 = vadd.f32 %v2750_v4, %v2749_v44  ;;  %7313 = vpow2.f32 %v2482_v24  ;;  %2299 = vbcast.lane.b32.xlu1 %v2297_v48, 256 }
 0x66c   : > { %v7310_v7 = vpop.eup %7309  ;;  %v8830_v56 = vmul.f32 %v7308_v58, %v8648_v61  ;;  %v2974_v60 = vmax.f32 %v2972_v32, %v2973_v35 }
 0x66d   : > { %v2752_v20 = vmax.f32 %v2751_v36, 1e-30  ;;  %v8835_v18 = vmul.f32 %v7310_v7, %v8648_v61 }
 0x66e   : > { %v1989_v14 = vsel %vm1977_vm14, %v8830_v56, 0.0  ;;  %v2975_v11 = vrot.slane %v2974_v60, 1 }
 0x66f   : > { %7315 = vrcp.f32 %v2752_v20  ;;  %v1990_v62 = vrot.slane %v1989_v14, 4  ;;  %v3241_v25 = vsel %vm1977_vm14, %v8835_v18, 0.0 }
 0x670   : > { %v2976_v26 = vmax.f32 %v2974_v60, %v2975_v11  ;;  %7317 = vrcp.f32 %v3118_v2  ;;  %v3242_v28 = vrot.slane %v3241_v25, 4 }
 0x671   : > { %v1991_v19 = vadd.f32 %v1990_v62, %v1989_v14 }
 0x672   : > { %v2977_v30 = vsub.f32 %v2969_v1, %v2976_v26  ;;  %v3243_v41 = vadd.f32 %v3242_v28, %v3241_v25 }
 0x673   : > { %v1992_v21 = vrot.slane %v1991_v19, 2 }
 0x674   : > { %v2978_v37 = vmul.f32 1.442695, %v2977_v30  ;;  %v3244_v24 = vrot.slane %v3243_v41, 2 }
 0x675   : > { %v1993_v29 = vadd.f32 %v1992_v21, %v1991_v19 }
 0x676   : > { %7319 = vpow2.f32 %v2978_v37  ;;  %v3245_v36 = vadd.f32 %v3244_v24, %v3243_v41 }
 0x677   : > { %v7312_v53 = vpop.eup %7311  ;;  %v1994_v43 = vrot.slane %v1993_v29, 1 }
 0x678   : > { %v7314_v0 = vpop.eup %7313  ;;  %v8840_v51 = vmul.f32 %v7312_v53, %v8794_v50  ;;  %v3246_v62 = vrot.slane %v3245_v36, 1 }
 0x679   : > { %v1995_v31 = vadd.f32 %v1994_v43, %v1993_v29  ;;  %v8843_v33 = vmul.f32 %v7314_v0, %v8648_v61 }
 0x67a   : > { %v2139_v1 = vrot.slane %v8840_v51, %v8123_v10  ;;  %v2132_v17 = vrot.slane %v8840_v51, %v8117_v8  ;;  %v2153_v26 = vrot.slane %v8840_v51, %v8127_v12  ;;  %v3247_v25 = vadd.f32 %v3246_v62, %v3245_v36 }
 0x67b   : > { %v1996_v34 = vmax.f32 %v1995_v31, 1e-30  ;;  %v2485_v40 = vsel %vm1977_vm14, %v8843_v33, 0.0  ;;  %v2167_v24 = vrot.slane %v8840_v51, %v8758_v22 }
 0x67c   : > { %v7316_v44 = vpop.eup %7315  ;;  %v2486_v45 = vrot.slane %v2485_v40, 4  ;;  %2141 = vbcast.lane.b32.xlu0 %v2139_v1, 256  ;;  %2134 = vbcast.lane.b32.xlu1 %v2132_v17, 256  ;;  %v3248_v43 = vmax.f32 %v3247_v25, 1e-30 }
 0x67d   : > { %v8852_v50 = vmul.f32 %v7316_v44, %v8809_v39  ;;  %7321 = vrcp.f32 %v1996_v34  ;;  %v7318_v58 = vpop.eup %7317  ;;  %v2146_v39 = vrot.slane %v8840_v51, %v8120_v9 }
 0x67e   : > { %v2487_v46 = vadd.f32 %v2486_v45, %v2485_v40  ;;  %v8864_v63 = vmul.f32 %v7318_v58, %v8774_v23 }
 0x67f   : > { %v2765_v4 = vrot.slane %v8852_v50, %v8123_v10  ;;  %v2758_v32 = vrot.slane %v8852_v50, %v8117_v8  ;;  %v2772_v35 = vrot.slane %v8852_v50, %v8120_v9  ;;  %v2779_v19 = vrot.slane %v8852_v50, %v8127_v12 }
 0x680   : > { %v2488_v48 = vrot.slane %v2487_v46, 2  ;;  %10271 = vst [vmem:[#allocation37_spill] sm:$0xff] %v8864_v63  ;;  %v3131_v23 = vrot.slane %v8864_v63, %v8123_v10  ;;  %v3124_v29 = vrot.slane %v8864_v63, %v8117_v8  ;;  %v3138_v0 = vrot.slane %v8864_v63, %v8120_v9 }
 0x681   : > { %2767 = vbcast.lane.b32.xlu0 %v2765_v4, 256  ;;  %2760 = vbcast.lane.b32.xlu1 %v2758_v32, 256  ;;  %v2786_v40 = vrot.slane %v8852_v50, %v8747_v49  ;;  %v3159_v4 = vrot.slane %v8864_v63, %v8758_v22 }
 0x682   : > { %v2489_v55 = vadd.f32 %v2488_v48, %v2487_v46  ;;  %v3152_v46 = vrot.slane %v8864_v63, %v8747_v49 }
 0x683   : > { %v7320_v7 = vpop.eup %7319 }
 0x684   : > { %v2490_v20 = vrot.slane %v2489_v55, 1  ;;  %v2980_v60 = vmul.f32 %v7320_v7, %v8648_v61 }
 0x685   : > { %2774 = vbcast.lane.b32.xlu0 %v2772_v35, 256  ;;  %2148 = vbcast.lane.b32.xlu1 %v2146_v39, 256 }
 0x686   : > { %v2491_v14 = vadd.f32 %v2490_v20, %v2489_v55  ;;  %v2981_v11 = vsel %vm1977_vm14, %v2980_v60, 0.0  ;;  %v2160_v20 = vrot.slane %v8840_v51, %v8747_v49 }
 0x687   : > { %v2982_v21 = vrot.slane %v2981_v11, 4 }
 0x688   : > { %v2492_v2 = vmax.f32 %v2491_v14, 1e-30 }
 0x689   : > { %2781 = vbcast.lane.b32.xlu0 %v2779_v19, 256  ;;  %2155 = vbcast.lane.b32.xlu1 %v2153_v26, 256  ;;  %v2983_v30 = vadd.f32 %v2982_v21, %v2981_v11 }
 0x68a   : > { %v7322_v61 = vpop.eup %7321  ;;  %7323 = vrcp.f32 %v2492_v2 }
 0x68b   : > { %v1998_v37 = vmul.f32 %v7322_v61, %v8830_v56  ;;  %v2984_v53 = vrot.slane %v2983_v30, 2  ;;  %7325 = vrcp.f32 %v3248_v43  ;;  %v3145_v56 = vrot.slane %v8864_v63, %v8127_v12 }
 0x68d   : > { %3133 = vbcast.lane.b32.xlu0 %v3131_v23, 256  ;;  %3126 = vbcast.lane.b32.xlu1 %v3124_v29, 256  ;;  %v2985_v28 = vadd.f32 %v2984_v53, %v2983_v30  ;;  %v2009_v31 = vrot.slane %v1998_v37, %v8123_v10  ;;  %v2188_v1 = vadd.f32 %v8840_v51, %v1998_v37 }
 0x68e   : > { %v2023_v32 = vrot.slane %v1998_v37, %v8127_v12  ;;  %v2037_v58 = vrot.slane %v1998_v37, %v8758_v22  ;;  %v2002_v36 = vrot.slane %v1998_v37, %v8117_v8  ;;  %v2030_v2 = vrot.slane %v1998_v37, %v8747_v49 }
 0x68f   : > { %v2986_v17 = vrot.slane %v2985_v28, 1  ;;  %v2318_v41 = vadd.f32 %v8786_v27, %v2188_v1 }
 0x691   : > { %3140 = vbcast.lane.b32.xlu1 %v3138_v0, 256  ;;  %2011 = vbcast.lane.b32.xlu0 %v2009_v31, 256  ;;  %v2987_v34 = vadd.f32 %v2986_v17, %v2985_v28 }
 0x693   : > { %v2988_v44 = vmax.f32 %v2987_v34, 1e-30 }
 0x695   : > { %3147 = vbcast.lane.b32.xlu1 %v3145_v56, 256  ;;  %2788 = vbcast.lane.b32.xlu0 %v2786_v40, 256  ;;  %7327 = vrcp.f32 %v2988_v44  ;;  %v8937_v40 = vld [vmem:[#allocation2 + $0x10] sm:$0xf] }
 0x697   : > { %v7324_v45 = vpop.eup %7323 }
 0x698   : > { %v2494_v27 = vmul.f32 %v7324_v45, %v8843_v33  ;;  %v7326_v39 = vpop.eup %7325  ;;  %v8940_v45 = vld [vmem:[#allocation2 + $0x4] sm:$0xf] }
 0x699   : > { %3154 = vbcast.lane.b32.xlu1 %v3152_v46, 256  ;;  %2169 = vbcast.lane.b32.xlu0 %v2167_v24, 256  ;;  %v8898_v7 = vmul.f32 %v7326_v39, %v8835_v18 }
 0x69a   : > { %v2554_v48 = vadd.f32 %v2494_v27, %v2318_v41  ;;  %v2498_v14 = vrot.slane %v2494_v27, %v8117_v8  ;;  %v2505_v30 = vrot.slane %v2494_v27, %v8123_v10  ;;  %v2519_v23 = vrot.slane %v2494_v27, %v8127_v12 }
 0x69b   : > { %10272 = vst [vmem:[#allocation38_spill] sm:$0xff] %v8898_v7  ;;  %v3261_v11 = vrot.slane %v8898_v7, %v8123_v10  ;;  %v3254_v18 = vrot.slane %v8898_v7, %v8117_v8  ;;  %v3268_v51 = vrot.slane %v8898_v7, %v8120_v9  ;;  %v3275_v26 = vrot.slane %v8898_v7, %v8127_v12 }
 0x69c   : > { %v2684_v55 = vadd.f32 %v8717_v54, %v2554_v48  ;;  %v2016_v54 = vrot.slane %v1998_v37, %v8120_v9  ;;  %v3282_v21 = vrot.slane %v8898_v7, %v8747_v49  ;;  %v3289_v25 = vrot.slane %v8898_v7, %v8758_v22 }
 0x69d   : > { %3161 = vbcast.lane.b32.xlu1 %v3159_v4, 256  ;;  %2025 = vbcast.lane.b32.xlu0 %v2023_v32, 256  ;;  %v2526_v37 = vrot.slane %v2494_v27, %v8747_v49  ;;  %v2533_v53 = vrot.slane %v2494_v27, %v8758_v22 }
 0x69e   : > { %v2814_v35 = vadd.f32 %v8852_v50, %v2684_v55 }
 0x6a1   : > { %2039 = vbcast.lane.b32.xlu0 %v2037_v58, 256  ;;  %2004 = vbcast.lane.b32.xlu1 %v2002_v36, 256  ;;  %v8948_v58 = vld [vmem:[#allocation2 + $0x28] sm:$0xf] }
 0x6a2   : > { %v7328_v33 = vpop.eup %7327 }
 0x6a3   : > { %v8903_v62 = vmul.f32 %v7328_v33, %v2980_v60  ;;  %v2793_v60 = vrot.slane %v8852_v50, %v8758_v22  ;;  %v2512_v50 = vrot.slane %v2494_v27, %v8120_v9  ;;  %v8943_v27 = vld [vmem:[#allocation2 + $0x1c] sm:$0xf]  ;;  %v8954_v33 = vld [vmem:[#allocation2] sm:$0xf] }
 0x6a5   : > { %2162 = vbcast.lane.b32.xlu1 %v2160_v20, 256  ;;  %2500 = vbcast.lane.b32.xlu0 %v2498_v14, 256  ;;  %v8909_v19 = vadd.f32 %v8903_v62, %v2814_v35  ;;  %v3001_v43 = vrot.slane %v8903_v62, %v8123_v10  ;;  %v2994_v0 = vrot.slane %v8903_v62, %v8117_v8  ;;  %v8951_v35 = vld [vmem:[#allocation2 + $0xc] sm:$0xf] }
 0x6a6   : > { %v3008_v31 = vrot.slane %v8903_v62, %v8120_v9  ;;  %v3015_v1 = vrot.slane %v8903_v62, %v8127_v12 }
 0x6a7   : > { %10273 = vst [vmem:[#allocation39_spill] sm:$0xff] %v8909_v19 }
 0x6a9   : > { %2018 = vbcast.lane.b32.xlu1 %v2016_v54, 256  ;;  %3263 = vbcast.lane.b32.xlu0 %v3261_v11, 256  ;;  %v8958_v11 = vld [vmem:[#allocation2 + $0x34] sm:$0xf] }
 0x6ad   : > { %3256 = vbcast.lane.b32.xlu1 %v3254_v18, 256  ;;  %3270 = vbcast.lane.b32.xlu0 %v3268_v51, 256 }
 0x6b0   : > { %v2638_v61 = vpop.permute.xlu0 %2637  ;;  %v2631_v41 = vpop.permute.xlu1 %2630 }
 0x6b1   : > { %2795 = vbcast.lane.b32.xlu1 %v2793_v60, 256  ;;  %3277 = vbcast.lane.b32.xlu0 %v3275_v26, 256  ;;  %v2668_v44 = vmul.f32 %v8937_v40, %v2638_v61  ;;  %v2667_v46 = vmul.f32 %v8940_v45, %v2631_v41  ;;  %v8961_v60 = vld [vmem:[#allocation2 + $0x18] sm:$0xf] }
 0x6b3   : > { %v2674_v48 = vsel %vm1791_vm10, %v2668_v44, 0.0  ;;  %v2673_v55 = vsel %vm1791_vm10, %v2667_v46, 0.0  ;;  %v8980_v46 = vld [vmem:[#allocation2 + $0x3c] sm:$0xf] }
 0x6b4   : > { %v2645_v29 = vpop.permute.xlu0 %2644  ;;  %v2675_v51 = vadd.f32 %v2674_v48, %v2673_v55  ;;  %v8986_v55 = vld [vmem:[#allocation16] ss:$0 sm:$0xff] }
 0x6b5   : > { %2032 = vbcast.lane.b32.xlu1 %v2030_v2, 256  ;;  %3284 = vbcast.lane.b32.xlu0 %v3282_v21, 256  ;;  %v2669_v4 = vmul.f32 %v8943_v27, %v2645_v29  ;;  %v8965_v21 = vld [vmem:[#allocation2 + $0x40] sm:$0xf] }
 0x6b7   : > { %v2676_v54 = vsel %vm1791_vm10, %v2669_v4, 0.0 }
 0x6b8   : > { %v2652_v28 = vpop.permute.xlu0 %2651 }
 0x6b9   : > { %2507 = vbcast.lane.b32.xlu1 %v2505_v30, 256  ;;  %3291 = vbcast.lane.b32.xlu0 %v3289_v25, 256  ;;  %v2670_v36 = vmul.f32 %v8948_v58, %v2652_v28  ;;  %v2677_v30 = vadd.f32 %v2676_v54, %v2675_v51  ;;  %v8993_v54 = vld [vmem:[#allocation16 + $0x2] ss:$0 sm:$0xff] }
 0x6bb   : > { %v2678_v2 = vsel %vm1791_vm10, %v2670_v36, 0.0 }
 0x6bc   : > { %v2659_v17 = vpop.permute.xlu0 %2658  ;;  %v2679_v28 = vadd.f32 %v2678_v2, %v2677_v30 }
 0x6bd   : > { %2514 = vbcast.lane.b32.xlu1 %v2512_v50, 256  ;;  %2521 = vbcast.lane.b32.xlu0 %v2519_v23, 256  ;;  %v2671_v18 = vmul.f32 %v8958_v11, %v2659_v17  ;;  %v8970_v23 = vld [vmem:[#allocation2 + $0x24] sm:$0xf] }
 0x6c0   : > { %v2666_v56 = vpop.permute.xlu0 %2665 }
 0x6c1   : > { %2528 = vbcast.lane.b32.xlu1 %v2526_v37, 256  ;;  %2535 = vbcast.lane.b32.xlu0 %v2533_v53, 256  ;;  %v2672_v61 = vmul.f32 %v8965_v21, %v2666_v56  ;;  %v2680_v53 = vsel %vm1791_vm10, %v2671_v18, 0.0 }
 0x6c2   : > { %v2681_v41 = vadd.f32 %v2680_v53, %v2679_v28 }
 0x6c5   : > { %3003 = vbcast.lane.b32.xlu1 %v3001_v43, 256  ;;  %2996 = vbcast.lane.b32.xlu0 %v2994_v0, 256  ;;  %v8975_v0 = vld [vmem:[#allocation2 + $0x30] sm:$0xf] }
 0x6c9   : > { %3010 = vbcast.lane.b32.xlu1 %v3008_v31, 256  ;;  %3017 = vbcast.lane.b32.xlu0 %v3015_v1, 256  ;;  %v2682_v1 = vsel %vm1791_vm10, %v2672_v61, 0.0 }
 0x6ca   : > { %v8983_v4 = vadd.f32 %v2682_v1, %v2681_v41 }
 0x6cd   : > { %v2265_v34 = vpop.permute.xlu1 %2264  ;;  %v2272_v32 = vpop.permute.xlu0 %2271 }
 0x6ce   : > { %v2302_v39 = vmul.f32 %v8951_v35, %v2272_v32  ;;  %v2301_v20 = vmul.f32 %v8954_v33, %v2265_v34 }
 0x6d0   : > { %v2308_v25 = vsel %vm1791_vm10, %v2302_v39, 0.0  ;;  %v2307_v50 = vsel %vm1791_vm10, %v2301_v20, 0.0  ;;  %v3390_v20 = vmul.f32 %v8986_v55, %v8983_v4 }
 0x6d1   : > { %v2279_v24 = vpop.permute.xlu1 %2278  ;;  %v2309_v17 = vadd.f32 %v2308_v25, %v2307_v50 }
 0x6d2   : > { %v2303_v26 = vmul.f32 %v8961_v60, %v2279_v24  ;;  %v3391_v18 = vsel %vm1791_vm10, %v3390_v20, 0.0  ;;  %v9030_v20 = vld [vmem:[#allocation2 + $0x2c] sm:$0xf] }
 0x6d4   : > { %v2310_v43 = vsel %vm1791_vm10, %v2303_v26, 0.0 }
 0x6d5   : > { %v2286_v14 = vpop.permute.xlu1 %2285  ;;  %v2311_v44 = vadd.f32 %v2310_v43, %v2309_v17  ;;  %v9017_v17 = vld [vmem:[#allocation2 + $0x14] sm:$0xf] }
 0x6d6   : > { %v2304_v29 = vmul.f32 %v8970_v23, %v2286_v14 }
 0x6d8   : > { %v2312_v34 = vsel %vm1791_vm10, %v2304_v29, 0.0 }
 0x6d9   : > { %v2293_v37 = vpop.permute.xlu1 %2292  ;;  %v2313_v48 = vadd.f32 %v2312_v34, %v2311_v44  ;;  %v9020_v34 = vld [vmem:[#allocation2 + $0x8] sm:$0xf]  ;;  %v9023_v44 = vld [vmem:[#allocation2 + $0x20] sm:$0xf] }
 0x6da   : > { %v2305_v31 = vmul.f32 %v8975_v0, %v2293_v37 }
 0x6dc   : > { %v2314_v32 = vsel %vm1791_vm10, %v2305_v31, 0.0 }
 0x6dd   : > { %v2300_v56 = vpop.permute.xlu1 %2299  ;;  %v2315_v39 = vadd.f32 %v2314_v32, %v2313_v48 }
 0x6de   : > { %v2306_v24 = vmul.f32 %v8980_v46, %v2300_v56 }
 0x6e0   : > { %v2316_v36 = vsel %vm1791_vm10, %v2306_v24, 0.0 }
 0x6e1   : > { %v8991_v14 = vadd.f32 %v2316_v36, %v2315_v39 }
 0x6e3   : > { %v3787_v51 = vmul.f32 %v8993_v54, %v8991_v14 }
 0x6e5   : > { %v3788_v26 = vsel %vm1791_vm10, %v3787_v51, 0.0 }
 0x6e8   : > { %3392 = vadd.xlane.f32.xlu0 %v3391_v18 }
 0x6ed   : > { %3789 = vadd.xlane.f32.xlu1 %v3788_v26 }
 0x6ee   : > { %v8999_v2 = vpop.permute.xlu0 %2141  ;;  %v9001_v61 = vpop.permute.xlu1 %2134 }
 0x6f3   : > { %v9003_v30 = vpop.permute.xlu0 %2767  ;;  %v9005_v25 = vpop.permute.xlu1 %2760 }
 0x6f7   : > { %v9007_v50 = vpop.permute.xlu0 %2774  ;;  %v9009_v29 = vpop.permute.xlu1 %2148 }
 0x6fb   : > { %v9011_v37 = vpop.permute.xlu0 %2781  ;;  %v9013_v53 = vpop.permute.xlu1 %2155 }
 0x6ff   : > { %v3134_v28 = vpop.permute.xlu0 %3133  ;;  %v3127_v43 = vpop.permute.xlu1 %3126 }
 0x700   : > { %v3164_v41 = vmul.f32 %v9017_v17, %v3134_v28  ;;  %v3163_v56 = vmul.f32 %v9020_v34, %v3127_v43 }
 0x702   : > { %v3170_v36 = vsel %vm1791_vm10, %v3164_v41, 0.0  ;;  %v3169_v39 = vsel %vm1791_vm10, %v3163_v56, 0.0 }
 0x703   : > { %v9015_v31 = vpop.permute.xlu0 %2011  ;;  %v3141_v1 = vpop.permute.xlu1 %3140  ;;  %v3171_v26 = vadd.f32 %v3170_v36, %v3169_v39 }
 0x704   : > { %v3165_v24 = vmul.f32 %v9023_v44, %v3141_v1  ;;  %v9037_v1 = vld [vmem:[#allocation2 + $0x38] sm:$0xf] }
 0x706   : > { %v3172_v51 = vsel %vm1791_vm10, %v3165_v24, 0.0 }
 0x707   : > { %v9026_v32 = vpop.permute.xlu0 %2788  ;;  %v3148_v48 = vpop.permute.xlu1 %3147  ;;  %v3173_v52 = vadd.f32 %v3172_v51, %v3171_v26 }
 0x708   : > { %v3166_v18 = vmul.f32 %v9030_v20, %v3148_v48  ;;  %v9043_v48 = vld [vmem:[#allocation2 + $0x44] sm:$0xf] }
 0x70a   : > { %v3174_v3 = vsel %vm1791_vm10, %v3166_v18, 0.0 }
 0x70b   : > { %v9034_v28 = vpop.permute.xlu0 %2169  ;;  %v3155_v43 = vpop.permute.xlu1 %3154  ;;  %v3175_v56 = vadd.f32 %v3174_v3, %v3173_v52 }
 0x70c   : > { %v3167_v16 = vmul.f32 %v9037_v1, %v3155_v43 }
 0x70e   : > { %v3176_v41 = vsel %vm1791_vm10, %v3167_v16, 0.0 }
 0x70f   : > { %v9041_v7 = vpop.permute.xlu0 %2025  ;;  %v3162_v63 = vpop.permute.xlu1 %3161  ;;  %v3177_v36 = vadd.f32 %v3176_v41, %v3175_v56 }
 0x710   : > { %v3168_v24 = vmul.f32 %v9043_v48, %v3162_v63 }
 0x712   : > { %v3178_v39 = vsel %vm1791_vm10, %v3168_v24, 0.0 }
 0x713   : > { %v9047_v19 = vadd.f32 %v3178_v39, %v3177_v36  ;;  %v9049_v18 = vpop.permute.xlu0 %2039  ;;  %v9051_v15 = vpop.permute.xlu1 %2004 }
 0x715   : > { %v3359_v16 = vmul.f32 %v8986_v55, %v9047_v19 }
 0x717   : > { %v2501_v3 = vpop.permute.xlu0 %2500  ;;  %v2163_v52 = vpop.permute.xlu1 %2162  ;;  %v3360_v51 = vsel %vm1791_vm10, %v3359_v16, 0.0 }
 0x718   : > { %3361 = vadd.xlane.f32.xlu1 %v3360_v51 }
 0x71b   : > { %v3264_v26 = vpop.permute.xlu0 %3263  ;;  %v9056_v43 = vpop.permute.xlu1 %2018 }
 0x71c   : > { %v3294_v63 = vmul.f32 %v9017_v17, %v3264_v26 }
 0x71e   : > { %v3300_v36 = vsel %vm1791_vm10, %v3294_v63, 0.0 }
 0x71f   : > { %v3271_v41 = vpop.permute.xlu0 %3270  ;;  %v3257_v56 = vpop.permute.xlu1 %3256 }
 0x720   : > { %v3293_v24 = vmul.f32 %v9020_v34, %v3257_v56  ;;  %v3295_v39 = vmul.f32 %v9023_v44, %v3271_v41  ;;  %v3022_v56 = vrot.slane %v8903_v62, %v8747_v49 }
 0x722   : > { %v3299_v6 = vsel %vm1791_vm10, %v3293_v24, 0.0  ;;  %v3302_v51 = vsel %vm1791_vm10, %v3295_v39, 0.0 }
 0x723   : > { %v3301_v59 = vadd.f32 %v3300_v36, %v3299_v6  ;;  %v3278_v47 = vpop.permute.xlu0 %3277  ;;  %v9063_v42 = vpop.permute.xlu1 %2795 }
 0x724   : > { %v3296_v16 = vmul.f32 %v9030_v20, %v3278_v47 }
 0x725   : > { %v3303_v12 = vadd.f32 %v3302_v51, %v3301_v59 }
 0x726   : > { %v3304_v63 = vsel %vm1791_vm10, %v3296_v16, 0.0  ;;  %v2172_v16 = vmul.f32 %v8951_v35, %v8999_v2  ;;  %v2174_v2 = vmul.f32 %v8970_v23, %v9013_v53 }
 0x727   : > { %v3285_v26 = vpop.permute.xlu0 %3284  ;;  %v9067_v10 = vpop.permute.xlu1 %2032  ;;  %v3305_v24 = vadd.f32 %v3304_v63, %v3303_v12  ;;  %v2173_v63 = vmul.f32 %v8961_v60, %v9009_v29  ;;  %v2175_v29 = vmul.f32 %v8975_v0, %v2163_v52 }
 0x728   : > { %v3297_v41 = vmul.f32 %v9037_v1, %v3285_v26  ;;  %v2171_v26 = vmul.f32 %v8954_v33, %v9001_v61 }
 0x729   : > { %3024 = vbcast.lane.b32.xlu1 %v3022_v56, 256 }
 0x72a   : > { %v3306_v6 = vsel %vm1791_vm10, %v3297_v41, 0.0  ;;  %v2537_v41 = vmul.f32 %v8940_v45, %v2501_v3 }
 0x72b   : > { %v3292_v36 = vpop.permute.xlu0 %3291  ;;  %v2508_v9 = vpop.permute.xlu1 %2507  ;;  %v3307_v39 = vadd.f32 %v3306_v6, %v3305_v24  ;;  %v2178_v24 = vsel %vm1791_vm10, %v2172_v16, 0.0  ;;  %v2182_v16 = vsel %vm1791_vm10, %v2174_v2, 0.0 }
 0x72c   : > { %v3298_v47 = vmul.f32 %v9043_v48, %v3292_v36  ;;  %v2538_v12 = vmul.f32 %v8937_v40, %v2508_v9  ;;  %v2177_v36 = vsel %vm1791_vm10, %v2171_v26, 0.0 }
 0x72e   : > { %v3308_v59 = vsel %vm1791_vm10, %v3298_v47, 0.0  ;;  %v2544_v61 = vsel %vm1791_vm10, %v2538_v12, 0.0  ;;  %v2180_v47 = vsel %vm1791_vm10, %v2173_v63, 0.0  ;;  %v2184_v12 = vsel %vm1791_vm10, %v2175_v29, 0.0  ;;  %v9111_v29 = vld [vmem:[#allocation16 + $0x1] ss:$0 sm:$0xff] }
 0x72f   : > { %v9076_v51 = vadd.f32 %v3308_v59, %v3307_v39  ;;  %v2515_v8 = vpop.permute.xlu1 %2514  ;;  %v2522_v9 = vpop.permute.xlu0 %2521  ;;  %v2543_v39 = vsel %vm1791_vm10, %v2537_v41, 0.0  ;;  %v2179_v59 = vadd.f32 %v2178_v24, %v2177_v36  ;;  %v2176_v41 = vmul.f32 %v8980_v46, %v9034_v28 }
 0x730   : > { %v2539_v6 = vmul.f32 %v8943_v27, %v2515_v8  ;;  %v2545_v8 = vadd.f32 %v2544_v61, %v2543_v39  ;;  %v2540_v26 = vmul.f32 %v8948_v58, %v2522_v9  ;;  %v3029_v28 = vrot.slane %v8903_v62, %v8758_v22 }
 0x731   : > { %v3818_v49 = vmul.f32 %v8993_v54, %v9076_v51  ;;  %v2186_v2 = vsel %vm1791_vm10, %v2176_v41, 0.0  ;;  %v2797_v22 = vmul.f32 %v8940_v45, %v9005_v25  ;;  %v2041_v62 = vmul.f32 %v8954_v33, %v9051_v15 }
 0x732   : > { %v2546_v3 = vsel %vm1791_vm10, %v2539_v6, 0.0  ;;  %v2548_v52 = vsel %vm1791_vm10, %v2540_v26, 0.0  ;;  %v2798_v26 = vmul.f32 %v8937_v40, %v9003_v30  ;;  %v2800_v45 = vmul.f32 %v8948_v58, %v9011_v37 }
 0x733   : > { %v3819_v56 = vsel %vm1791_vm10, %v3818_v49, 0.0  ;;  %v2529_v49 = vpop.permute.xlu1 %2528  ;;  %v2547_v53 = vadd.f32 %v2546_v3, %v2545_v8  ;;  %v2536_v24 = vpop.permute.xlu0 %2535  ;;  %v2803_v40 = vsel %vm1791_vm10, %v2797_v22, 0.0  ;;  %v2047_v30 = vsel %vm1791_vm10, %v2041_v62, 0.0 }
 0x734   : > { %3820 = vadd.xlane.f32.xlu0 %v3819_v56  ;;  %v2181_v56 = vadd.f32 %v2180_v47, %v2179_v59  ;;  %v2541_v38 = vmul.f32 %v8958_v11, %v2529_v49  ;;  %v2542_v9 = vmul.f32 %v8965_v21, %v2536_v24  ;;  %v2802_v58 = vmul.f32 %v8965_v21, %v9063_v42 }
 0x735   : > { %v2549_v36 = vadd.f32 %v2548_v52, %v2547_v53  ;;  %v2042_v53 = vmul.f32 %v8951_v35, %v9015_v31  ;;  %v2044_v31 = vmul.f32 %v8970_v23, %v9041_v7  ;;  %v2045_v37 = vmul.f32 %v8975_v0, %v9067_v10 }
 0x736   : > { %v2183_v63 = vadd.f32 %v2182_v16, %v2181_v56  ;;  %v2550_v61 = vsel %vm1791_vm10, %v2541_v38, 0.0  ;;  %v2552_v3 = vsel %vm1791_vm10, %v2542_v9, 0.0  ;;  %v2799_v56 = vmul.f32 %v8943_v27, %v9007_v50 }
 0x737   : > { %v2551_v47 = vadd.f32 %v2550_v61, %v2549_v36  ;;  %v2048_v33 = vsel %vm1791_vm10, %v2042_v53, 0.0  ;;  %v2801_v27 = vmul.f32 %v8958_v11, %v9026_v32  ;;  %v2808_v50 = vsel %vm1791_vm10, %v2800_v45, 0.0  ;;  %v2997_v9 = vpop.permute.xlu0 %2996 }
 0x738   : > { %v2185_v6 = vadd.f32 %v2184_v12, %v2183_v63  ;;  %v2804_v12 = vsel %vm1791_vm10, %v2798_v26, 0.0  ;;  %v2806_v15 = vsel %vm1791_vm10, %v2799_v56, 0.0  ;;  %v2052_v32 = vsel %vm1791_vm10, %v2044_v31, 0.0 }
 0x739   : > { %v9118_v8 = vadd.f32 %v2552_v3, %v2551_v47  ;;  %v2805_v25 = vadd.f32 %v2804_v12, %v2803_v40  ;;  %v2810_v41 = vsel %vm1791_vm10, %v2801_v27, 0.0  ;;  %v2812_v52 = vsel %vm1791_vm10, %v2802_v58, 0.0  ;;  %v9173_v3 = vld [vmem:[%s10195_s19] ss:$0 sm:$0xff] }
 0x73a   : > { %v9109_v39 = vadd.f32 %v2186_v2, %v2185_v6  ;;  %v2054_v6 = vsel %vm1791_vm10, %v2045_v37, 0.0  ;;  %v2046_v7 = vmul.f32 %v8980_v46, %v9049_v18  ;;  %v3004_v46 = vpop.permute.xlu1 %3003 }
 0x73b   : > { %v3750_v49 = vmul.f32 %v8993_v54, %v9118_v8  ;;  %v2043_v54 = vmul.f32 %v8961_v60, %v9056_v43  ;;  %v2049_v60 = vadd.f32 %v2048_v33, %v2047_v30  ;;  %v2807_v43 = vadd.f32 %v2806_v15, %v2805_v25  ;;  %v3018_v18 = vpop.permute.xlu0 %3017 }
 0x73c   : > { %v3573_v59 = vmul.f32 %v9111_v29, %v9109_v39  ;;  %v2056_v10 = vsel %vm1791_vm10, %v2046_v7, 0.0 }
 0x73d   : > { %v3751_v16 = vsel %vm1791_vm10, %v3750_v49, 0.0  ;;  %v2050_v35 = vsel %vm1791_vm10, %v2043_v54, 0.0  ;;  %v2809_v11 = vadd.f32 %v2808_v50, %v2807_v43 }
 0x73e   : > { %v3574_v38 = vsel %vm1791_vm10, %v3573_v59, 0.0  ;;  %v2051_v63 = vadd.f32 %v2050_v35, %v2049_v60  ;;  %v3011_v59 = vpop.permute.xlu1 %3010 }
 0x73f   : > { %v2811_v24 = vadd.f32 %v2810_v41, %v2809_v11 }
 0x740   : > { %v2053_v36 = vadd.f32 %v2052_v32, %v2051_v63 }
 0x741   : > { %v9159_v42 = vadd.f32 %v2812_v52, %v2811_v24 }
 0x742   : > { %v2055_v21 = vadd.f32 %v2054_v6, %v2053_v36 }
 0x743   : > { %v3604_v23 = vmul.f32 %v9111_v29, %v9159_v42 }
 0x744   : > { %v9164_v0 = vadd.f32 %v2056_v10, %v2055_v21 }
 0x745   : > { %v3605_v61 = vsel %vm1791_vm10, %v3604_v23, 0.0 }
 0x746   : > { %v3321_v2 = vmul.f32 %v8986_v55, %v9164_v0  ;;  %v9179_v55 = vld [vmem:[%s10195_s19 + $0x2] ss:$0 sm:$0xff] }
 0x748   : > { %v3322_v47 = vsel %vm1791_vm10, %v3321_v2, 0.0  ;;  %v3034_v2 = vmul.f32 %v9017_v17, %v3004_v46  ;;  %v3036_v17 = vmul.f32 %v9030_v20, %v3018_v18 }
 0x74a   : > { %3031 = vbcast.lane.b32.xlu0 %v3029_v28, 256 }
 0x74d   : > { %3575 = vadd.xlane.f32.xlu1 %v3574_v38 }
 0x751   : > { %3752 = vadd.xlane.f32.xlu1 %v3751_v16 }
 0x769   : > { %3606 = vadd.xlane.f32.xlu0 %v3605_v61  ;;  %v3033_v61 = vmul.f32 %v9020_v34, %v2997_v9 }
 0x76d   : > { %3323 = vadd.xlane.f32.xlu0 %v3322_v47 }
 0x771   : > { %v3393_v28 = vpop.xlane.xlu0 %3392 }
 0x772   : > { %v3394_v38 = vadd.f32 %v9173_v3, %v3393_v28  ;;  %v3035_v28 = vmul.f32 %v9023_v44, %v3011_v59 }
 0x774   : > { %v3395_v16 = vsel %vm3332_vm15, %v3394_v38, -inf }
 0x775   : > { %v3396_v22 = vrot.slane %v3395_v16, 4 }
 0x776   : > { %v3790_v49 = vpop.xlane.xlu1 %3789 }
 0x777   : > { %v3791_v26 = vadd.f32 %v9179_v55, %v3790_v49  ;;  %v3397_v56 = vmax.f32 %v3395_v16, %v3396_v22  ;;  %v3039_v16 = vsel %vm1791_vm10, %v3033_v61, 0.0 }
 0x779   : > { %v3792_v62 = vsel %vm3332_vm15, %v3791_v26, -inf  ;;  %v3398_v54 = vrot.slane %v3397_v56, 2 }
 0x77a   : > { %v3793_v53 = vrot.slane %v3792_v62, 4 }
 0x77b   : > { %v3399_v40 = vmax.f32 %v3397_v56, %v3398_v54 }
 0x77c   : > { %v3794_v12 = vmax.f32 %v3792_v62, %v3793_v53  ;;  %v3042_v62 = vsel %vm1791_vm10, %v3035_v28, 0.0 }
 0x77d   : > { %v3400_v30 = vrot.slane %v3399_v40, 1 }
 0x77e   : > { %v3795_v45 = vrot.slane %v3794_v12, 2 }
 0x77f   : > { %v3401_v33 = vmax.f32 %v3399_v40, %v3400_v30  ;;  %v3044_v40 = vsel %vm1791_vm10, %v3036_v17, 0.0 }
 0x780   : > { %v3796_v15 = vmax.f32 %v3794_v12, %v3795_v45 }
 0x781   : > { %v3402_v35 = vsub.f32 %v3394_v38, %v3401_v33 }
 0x782   : > { %v3797_v27 = vrot.slane %v3796_v15, 1 }
 0x783   : > { %v3403_v60 = vmul.f32 1.442695, %v3402_v35 }
 0x784   : > { %v3798_v25 = vmax.f32 %v3796_v15, %v3797_v27 }
 0x785   : > { %7329 = vpow2.f32 %v3403_v60 }
 0x786   : > { %v3799_v50 = vsub.f32 %v3791_v26, %v3798_v25  ;;  %v3040_v26 = vsel %vm1791_vm10, %v3034_v2, 0.0 }
 0x787   : > { %v3041_v53 = vadd.f32 %v3040_v26, %v3039_v16 }
 0x788   : > { %v3800_v31 = vmul.f32 1.442695, %v3799_v50 }
 0x789   : > { %v3043_v46 = vadd.f32 %v3042_v62, %v3041_v53 }
 0x78a   : > { %7331 = vpow2.f32 %v3800_v31 }
 0x78b   : > { %v3045_v15 = vadd.f32 %v3044_v40, %v3043_v46 }
 0x792   : > { %v9186_v52 = vpop.eup %7329 }
 0x793   : > { %v3405_v24 = vsel %vm3332_vm15, %v9186_v52, 0.0 }
 0x794   : > { %v3406_v10 = vrot.slane %v3405_v24, 4 }
 0x796   : > { %v3407_v38 = vadd.f32 %v3406_v10, %v3405_v24 }
 0x797   : > { %v9190_v7 = vpop.eup %7331 }
 0x798   : > { %v3802_v47 = vsel %vm3332_vm15, %v9190_v7, 0.0  ;;  %v3408_v56 = vrot.slane %v3407_v38, 2 }
 0x799   : > { %v3803_v49 = vrot.slane %v3802_v47, 4 }
 0x79a   : > { %v3409_v12 = vadd.f32 %v3408_v56, %v3407_v38 }
 0x79b   : > { %v3804_v34 = vadd.f32 %v3803_v49, %v3802_v47 }
 0x79c   : > { %v3410_v25 = vrot.slane %v3409_v12, 1 }
 0x79d   : > { %v3805_v59 = vrot.slane %v3804_v34, 2 }
 0x7a1   : > { %v3362_v58 = vpop.xlane.xlu1 %3361 }
 0x7a2   : > { %v3363_v37 = vadd.f32 %v9173_v3, %v3362_v58 }
 0x7a4   : > { %v3364_v43 = vsel %vm3332_vm15, %v3363_v37, -inf }
 0x7a5   : > { %v3365_v63 = vrot.slane %v3364_v43, 4  ;;  %v3025_v22 = vpop.permute.xlu1 %3024 }
 0x7a6   : > { %v3037_v9 = vmul.f32 %v9037_v1, %v3025_v22  ;;  %v3806_v1 = vadd.f32 %v3805_v59, %v3804_v34 }
 0x7a7   : > { %v3366_v41 = vmax.f32 %v3364_v43, %v3365_v63 }
 0x7a8   : > { %v3046_v45 = vsel %vm1791_vm10, %v3037_v9, 0.0 }
 0x7a9   : > { %v3367_v11 = vrot.slane %v3366_v41, 2  ;;  %v3047_v60 = vadd.f32 %v3046_v45, %v3045_v15 }
 0x7ab   : > { %v3368_v32 = vmax.f32 %v3366_v41, %v3367_v11  ;;  %v3411_v41 = vadd.f32 %v3410_v25, %v3409_v12  ;;  %v3807_v11 = vrot.slane %v3806_v1, 1 }
 0x7ad   : > { %v3369_v6 = vrot.slane %v3368_v32, 1 }
 0x7af   : > { %v3370_v36 = vmax.f32 %v3368_v32, %v3369_v6 }
 0x7b1   : > { %v3371_v21 = vsub.f32 %v3363_v37, %v3370_v36 }
 0x7b3   : > { %v3372_v23 = vmul.f32 1.442695, %v3371_v21 }
 0x7b5   : > { %7333 = vpow2.f32 %v3372_v23  ;;  %v3808_v23 = vadd.f32 %v3807_v11, %v3806_v1 }
 0x7b6   : > { %7335 = vrcp.f32 %v3411_v41 }
 0x7b7   : > { %7337 = vrcp.f32 %v3808_v23 }
 0x7bd   : > { %v3821_v54 = vpop.xlane.xlu0 %3820 }
 0x7be   : > { %v3822_v44 = vadd.f32 %v9179_v55, %v3821_v54 }
 0x7c0   : > { %v3823_v30 = vsel %vm3332_vm15, %v3822_v44, -inf }
 0x7c1   : > { %v3824_v33 = vrot.slane %v3823_v30, 4  ;;  %v3032_v27 = vpop.permute.xlu0 %3031 }
 0x7c2   : > { %v7334_v35 = vpop.eup %7333  ;;  %v3038_v20 = vmul.f32 %v9043_v48, %v3032_v27 }
 0x7c3   : > { %v3374_v18 = vsel %vm3332_vm15, %v7334_v35, 0.0  ;;  %v3825_v50 = vmax.f32 %v3823_v30, %v3824_v33  ;;  %v7336_v49 = vpop.eup %7335 }
 0x7c4   : > { %v3375_v31 = vrot.slane %v3374_v18, 4  ;;  %v3048_v58 = vsel %vm1791_vm10, %v3038_v20, 0.0  ;;  %v3413_v62 = vmul.f32 %v7336_v49, %v9186_v52  ;;  %v7338_v56 = vpop.eup %7337 }
 0x7c5   : > { %v3826_v37 = vrot.slane %v3825_v50, 2  ;;  %v9209_v43 = vadd.f32 %v3048_v58, %v3047_v60  ;;  %v3810_v45 = vmul.f32 %v7338_v56, %v9190_v7 }
 0x7c6   : > { %v3376_v63 = vadd.f32 %v3375_v31, %v3374_v18  ;;  %v3414_v46 = vadd.f32 1.0, %v3413_v62 }
 0x7c7   : > { %v3827_v32 = vmax.f32 %v3825_v50, %v3826_v37  ;;  %v3536_v6 = vmul.f32 %v9111_v29, %v9209_v43  ;;  %v9217_v29 = vld [vmem:[%s10195_s19 + $0x1] ss:$0 sm:$0xff]  ;;  %v3811_v27 = vadd.f32 1.0, %v3810_v45 }
 0x7c8   : > { %v3377_v24 = vrot.slane %v3376_v63, 2 }
 0x7c9   : > { %v3828_v48 = vrot.slane %v3827_v32, 1  ;;  %v3537_v36 = vsel %vm1791_vm10, %v3536_v6, 0.0 }
 0x7ca   : > { %v3378_v21 = vadd.f32 %v3377_v24, %v3376_v63  ;;  %3538 = vadd.xlane.f32.xlu0 %v3537_v36 }
 0x7cb   : > { %v3829_v10 = vmax.f32 %v3827_v32, %v3828_v48 }
 0x7cc   : > { %v3379_v61 = vrot.slane %v3378_v21, 1 }
 0x7cd   : > { %v3830_v2 = vsub.f32 %v3822_v44, %v3829_v10 }
 0x7ce   : > { %v3380_v47 = vadd.f32 %v3379_v61, %v3378_v21 }
 0x7cf   : > { %v3831_v28 = vmul.f32 1.442695, %v3830_v2 }
 0x7d0   : > { %7339 = vrcp.f32 %v3380_v47 }
 0x7d1   : > { %7341 = vpow2.f32 %v3831_v28 }
 0x7d6   : > { %v3576_v38 = vpop.xlane.xlu1 %3575 }
 0x7d7   : > { %v3577_v16 = vadd.f32 %v9217_v29, %v3576_v38 }
 0x7d9   : > { %v3578_v26 = vsel %vm3332_vm15, %v3577_v16, -inf }
 0x7da   : > { %v3579_v22 = vrot.slane %v3578_v26, 4  ;;  %v3753_v24 = vpop.xlane.xlu1 %3752 }
 0x7db   : > { %v3760_v61 = vadd.f32 %v9179_v55, %v3753_v24 }
 0x7dc   : > { %v3580_v53 = vmax.f32 %v3578_v26, %v3579_v22 }
 0x7dd   : > { %v7340_v34 = vpop.eup %7339  ;;  %v3761_v26 = vsel %vm3332_vm15, %v3760_v61, -inf }
 0x7de   : > { %v7342_v17 = vpop.eup %7341  ;;  %v3581_v9 = vrot.slane %v3580_v53, 2  ;;  %v3382_v54 = vmul.f32 %v7340_v34, %v7334_v35 }
 0x7df   : > { %v3833_v12 = vsel %vm3332_vm15, %v7342_v17, 0.0 }
 0x7e0   : > { %v3834_v44 = vrot.slane %v3833_v12, 4  ;;  %v3582_v59 = vmax.f32 %v3580_v53, %v3581_v9  ;;  %3417 = vperm.xlu0 %7264, %v3414_v46   ;;  %v3383_v40 = vadd.f32 1.0, %v3382_v54  ;;  %v3762_v9 = vrot.slane %v3761_v26, 4 }
 0x7e2   : > { %v3835_v30 = vadd.f32 %v3834_v44, %v3833_v12  ;;  %v3583_v15 = vrot.slane %v3582_v59, 1  ;;  %3386 = vperm.xlu1 %7265, %v3383_v40   ;;  %v3763_v12 = vmax.f32 %v3761_v26, %v3762_v9  ;;  %v3439_v26 = vld [vmem:[%s10196_s20 + $0x40] sm:$0xff] }
 0x7e3   : > { %v3435_v9 = vld [vmem:[%s10196_s20 + $0x20] sm:$0xff] }
 0x7e4   : > { %v3836_v33 = vrot.slane %v3835_v30, 2  ;;  %v3584_v52 = vmax.f32 %v3582_v59, %v3583_v15  ;;  %v3764_v59 = vrot.slane %v3763_v12, 2 }
 0x7e6   : > { %v3837_v25 = vadd.f32 %v3836_v33, %v3835_v30  ;;  %v3585_v20 = vsub.f32 %v3577_v16, %v3584_v52  ;;  %3814 = vperm.xlu1 %7265, %v3811_v27   ;;  %v3765_v40 = vmax.f32 %v3763_v12, %v3764_v59 }
 0x7e8   : > { %v3838_v1 = vrot.slane %v3837_v25, 1  ;;  %v3586_v18 = vmul.f32 1.442695, %v3585_v20  ;;  %v3766_v15 = vrot.slane %v3765_v40, 1 }
 0x7ea   : > { %7343 = vpow2.f32 %v3586_v18  ;;  %v3839_v35 = vadd.f32 %v3838_v1, %v3837_v25  ;;  %v3767_v1 = vmax.f32 %v3765_v40, %v3766_v15 }
 0x7ec   : > { %7345 = vrcp.f32 %v3839_v35 }
 0x7f2   : > { %v3607_v60 = vpop.xlane.xlu0 %3606 }
 0x7f3   : > { %v3608_v50 = vadd.f32 %v9217_v29, %v3607_v60 }
 0x7f5   : > { %v3609_v31 = vsel %vm3332_vm15, %v3608_v50, -inf }
 0x7f6   : > { %v3610_v7 = vrot.slane %v3609_v31, 4  ;;  %v3324_v58 = vpop.xlane.xlu0 %3323 }
 0x7f7   : > { %v7344_v37 = vpop.eup %7343  ;;  %v3331_v63 = vadd.f32 %v9173_v3, %v3324_v58 }
 0x7f8   : > { %v3588_v41 = vsel %vm3332_vm15, %v7344_v37, 0.0  ;;  %v3611_v11 = vmax.f32 %v3609_v31, %v3610_v7  ;;  %v3768_v31 = vsub.f32 %v3760_v61, %v3767_v1 }
 0x7f9   : > { %v7346_v32 = vpop.eup %7345  ;;  %v3589_v6 = vrot.slane %v3588_v41, 4  ;;  %v3333_v48 = vsel %vm3332_vm15, %v3331_v63, -inf }
 0x7fa   : > { %v3612_v36 = vrot.slane %v3611_v11, 2  ;;  %v3334_v21 = vrot.slane %v3333_v48, 4  ;;  %v3841_v10 = vmul.f32 %v7346_v32, %v7342_v17 }
 0x7fb   : > { %v3590_v23 = vadd.f32 %v3589_v6, %v3588_v41 }
 0x7fc   : > { %v3613_v2 = vmax.f32 %v3611_v11, %v3612_v36  ;;  %v3335_v47 = vmax.f32 %v3333_v48, %v3334_v21  ;;  %v3842_v28 = vadd.f32 1.0, %v3841_v10  ;;  %v3769_v11 = vmul.f32 1.442695, %v3768_v31 }
 0x7fd   : > { %v3591_v38 = vrot.slane %v3590_v23, 2 }
 0x7fe   : > { %v3614_v49 = vrot.slane %v3613_v2, 1  ;;  %v3336_v3 = vrot.slane %v3335_v47, 2  ;;  %3845 = vperm.xlu1 %7265, %v3842_v28   ;;  %v3441_v28 = vld [vmem:[%s10196_s20 + $0x50] sm:$0xff] }
 0x7ff   : > { %v3592_v16 = vadd.f32 %v3591_v38, %v3590_v23 }
 0x800   : > { %v3615_v22 = vmax.f32 %v3613_v2, %v3614_v49  ;;  %v3337_v62 = vmax.f32 %v3335_v47, %v3336_v3  ;;  %v3442_v47 = vld [vmem:[%s10196_s20 + $0x58] sm:$0xff]  ;;  %v10274_v49 = vmov 0.0   ;;  %v3440_v3 = vld [vmem:[%s10196_s20 + $0x48] sm:$0xff] }
 0x801   : > { %v3593_v56 = vrot.slane %v3592_v16, 1  ;;  %6901 = vmatpush3.msra.mxu0 %v3442_v47 }
 0x802   : > { %v3616_v53 = vsub.f32 %v3608_v50, %v3615_v22  ;;  %v3338_v34 = vrot.slane %v3337_v62, 1  ;;  %6902 = vmatprep.subr.mxu0 %v10274_v49  ;;  %v3438_v22 = vld [vmem:[%s10196_s20 + $0x38] sm:$0xff] }
 0x803   : > { %v3594_v17 = vadd.f32 %v3593_v56, %v3592_v16  ;;  %6903 = vmatpush3.msra.mxu0 %v3441_v28  ;;  %v3437_v56 = vld [vmem:[%s10196_s20 + $0x30] sm:$0xff]  ;;  %v6472_v28 = vld [vmem:[%s10196_s20 + $0xa0] sm:$0xff] }
 0x804   : > { %v3617_v46 = vmul.f32 1.442695, %v3616_v53  ;;  %v3339_v54 = vmax.f32 %v3337_v62, %v3338_v34  ;;  %6904 = vmatprep.subr.mxu0 %v10274_v49  ;;  %v3436_v53 = vld [vmem:[%s10196_s20 + $0x28] sm:$0xff] }
 0x805   : > { %7347 = vrcp.f32 %v3594_v17  ;;  %6905 = vmatpush3.msra.mxu0 %v3440_v3  ;;  %v3434_v17 = vld [vmem:[%s10196_s20 + $0x18] sm:$0xff] }
 0x806   : > { %7349 = vpow2.f32 %v3617_v46  ;;  %v3340_v55 = vsub.f32 %v3331_v63, %v3339_v54  ;;  %6906 = vmatprep.subr.mxu0 %v10274_v49  ;;  %v3433_v54 = vld [vmem:[%s10196_s20 + $0x10] sm:$0xff]  ;;  %v6471_v3 = vld [vmem:[%s10196_s20 + $0x98] sm:$0xff] }
 0x807   : > { %6907 = vmatpush3.msra.mxu0 %v3439_v26  ;;  %v6468_v26 = vld [vmem:[%s10196_s20 + $0x80] sm:$0xff] }
 0x808   : > { %v3341_v44 = vmul.f32 1.442695, %v3340_v55  ;;  %6908 = vmatprep.subr.mxu0 %v10274_v49 }
 0x809   : > { %6909 = vmatpush3.msra.mxu0 %v3438_v22  ;;  %v6467_v22 = vld [vmem:[%s10196_s20 + $0x78] sm:$0xff] }
 0x80a   : > { %7351 = vpow2.f32 %v3341_v44  ;;  %6910 = vmatprep.subr.mxu0 %v10274_v49  ;;  %v3432_v44 = vld [vmem:[%s10196_s20 + $0x8] sm:$0xff] }
 0x80b   : > { %6911 = vmatpush3.msra.mxu0 %v3437_v56  ;;  %v6465_v56 = vld [vmem:[%s10196_s20 + $0x68] sm:$0xff] }
 0x80c   : > { %6912 = vmatprep.subr.mxu0 %v10274_v49 }
 0x80d   : > { %6913 = vmatpush3.msra.mxu0 %v3436_v53  ;;  %v6464_v53 = vld [vmem:[%s10196_s20 + $0x60] sm:$0xff] }
 0x80e   : > { %6914 = vmatprep.subr.mxu0 %v10274_v49 }
 0x80f   : > { %6915 = vmatpush3.msra.mxu0 %v3435_v9 }
 0x810   : > { %6916 = vmatprep.subr.mxu0 %v10274_v49 }
 0x811   : > { %6917 = vmatpush3.msra.mxu0 %v3434_v17 }
 0x812   : > { %v7348_v45 = vpop.eup %7347  ;;  %6918 = vmatprep.subr.mxu0 %v10274_v49 }
 0x813   : > { %v7350_v30 = vpop.eup %7349  ;;  %v3596_v33 = vmul.f32 %v7348_v45, %v7344_v37  ;;  %6919 = vmatpush3.msra.mxu0 %v3433_v54  ;;  %v3431_v45 = vld [vmem:[%s10196_s20] sm:$0xff] }
 0x814   : > { %v3619_v52 = vsel %vm3332_vm15, %v7350_v30, 0.0  ;;  %6920 = vmatprep.subr.mxu0 %v10274_v49 }
 0x815   : > { %v3620_v27 = vrot.slane %v3619_v52, 4  ;;  %v3597_v25 = vadd.f32 1.0, %v3596_v33  ;;  %6921 = vmatpush3.msra.mxu0 %v3432_v44  ;;  %v6492_v44 = vld [vmem:[%s10196_s20 + $0x118] sm:$0xff] }
 0x816   : > { %6922 = vmatprep.subr.mxu0 %v10274_v49 }
 0x817   : > { %v7352_v20 = vpop.eup %7351  ;;  %v3621_v18 = vadd.f32 %v3620_v27, %v3619_v52  ;;  %3600 = vperm.xlu0 %7264, %v3597_v25   ;;  %6923 = vmatpush3.msra.mxu0 %v3431_v45  ;;  %v6488_v45 = vld [vmem:[%s10196_s20 + $0xf8] sm:$0xff] }
 0x818   : > { %v3343_v35 = vsel %vm3332_vm15, %v7352_v20, 0.0  ;;  %6954 = vmatprep.subr.mxu0 %v10274_v49 }
 0x819   : > { %v3622_v60 = vrot.slane %v3621_v18, 2  ;;  %v3344_v50 = vrot.slane %v3343_v35, 4 }
 0x81b   : > { %v3623_v7 = vadd.f32 %v3622_v60, %v3621_v18  ;;  %v3345_v58 = vadd.f32 %v3344_v50, %v3343_v35 }
 0x81d   : > { %v3624_v63 = vrot.slane %v3623_v7, 1  ;;  %v3346_v41 = vrot.slane %v3345_v58, 2 }
 0x81f   : > { %v3347_v32 = vadd.f32 %v3346_v41, %v3345_v58  ;;  %v3625_v37 = vadd.f32 %v3624_v63, %v3623_v7 }
 0x821   : > { %v3348_v6 = vrot.slane %v3347_v32, 1  ;;  %7353 = vrcp.f32 %v3625_v37 }
 0x822   : > { %7355 = vpow2.f32 %v3769_v11 }
 0x823   : > { %v3349_v24 = vadd.f32 %v3348_v6, %v3347_v32 }
 0x825   : > { %7357 = vrcp.f32 %v3349_v24 }
 0x82e   : > { %v7354_v48 = vpop.eup %7353 }
 0x82f   : > { %v3627_v36 = vmul.f32 %v7354_v48, %v7350_v30  ;;  %v9233_v21 = vpop.eup %7355 }
 0x830   : > { %v3771_v61 = vsel %vm3332_vm15, %v9233_v21, 0.0 }
 0x831   : > { %v3628_v10 = vadd.f32 1.0, %v3627_v36  ;;  %v3772_v16 = vrot.slane %v3771_v61, 4 }
 0x832   : > { %v7358_v23 = vpop.eup %7357 }
 0x833   : > { %3631 = vperm.xlu1 %7265, %v3628_v10   ;;  %v3351_v2 = vmul.f32 %v7358_v23, %v7352_v20  ;;  %v3773_v62 = vadd.f32 %v3772_v16, %v3771_v61  ;;  %v6474_v61 = vld [vmem:[%s10196_s20 + $0xb0] sm:$0xff] }
 0x834   : > { %v6470_v16 = vld [vmem:[%s10196_s20 + $0x90] sm:$0xff] }
 0x835   : > { %v3352_v38 = vadd.f32 1.0, %v3351_v2  ;;  %v3774_v34 = vrot.slane %v3773_v62, 2 }
 0x837   : > { %3355 = vperm.xlu0 %7264, %v3352_v38   ;;  %v3775_v46 = vadd.f32 %v3774_v34, %v3773_v62  ;;  %v6466_v62 = vld [vmem:[%s10196_s20 + $0x70] sm:$0xff] }
 0x839   : > { %v3776_v55 = vrot.slane %v3775_v46, 1 }
 0x83b   : > { %v3777_v12 = vadd.f32 %v3776_v55, %v3775_v46 }
 0x83d   : > { %7359 = vrcp.f32 %v3777_v12 }
 0x84a   : > { %v7360_v52 = vpop.eup %7359 }
 0x84b   : > { %v3779_v35 = vmul.f32 %v7360_v52, %v9233_v21  ;;  %v6475_v21 = vld [vmem:[%s10196_s20 + $0xb8] sm:$0xff] }
 0x84c   : > { %6928 = vmatpush3.msra.mxu1 %v6475_v21  ;;  %v6484_v52 = vld [vmem:[%s10196_s20 + $0xd8] sm:$0xff] }
 0x84d   : > { %v3780_v58 = vadd.f32 1.0, %v3779_v35  ;;  %6929 = vmatprep.subr.mxu1 %v10274_v49 }
 0x84e   : > { %6930 = vmatpush3.msra.mxu1 %v6474_v61 }
 0x84f   : > { %6931 = vmatprep.subr.mxu1 %v10274_v49 }
 0x853   : > { %v3539_v59 = vpop.xlane.xlu0 %3538 }
 0x854   : > { %v3546_v40 = vadd.f32 %v9217_v29, %v3539_v59 }
 0x856   : > { %v3547_v30 = vsel %vm3332_vm15, %v3546_v40, -inf }
 0x857   : > { %v3548_v15 = vrot.slane %v3547_v30, 4 }
 0x859   : > { %v3549_v33 = vmax.f32 %v3547_v30, %v3548_v15  ;;  %v6487_v30 = vld [vmem:[%s10196_s20 + $0xf0] sm:$0xff]  ;;  %v6486_v15 = vld [vmem:[%s10196_s20 + $0xe8] sm:$0xff] }
 0x85b   : > { %v3550_v27 = vrot.slane %v3549_v33, 2  ;;  %v3418_v25 = vpop.permute.xlu0 %3417 }
 0x85c   : > { %v3420_v20 = vmul.f32 %v3418_v25, %v8983_v4 }
 0x85d   : > { %v3551_v1 = vmax.f32 %v3549_v33, %v3550_v27  ;;  %v3387_v18 = vpop.permute.xlu1 %3386  ;;  %v6485_v33 = vld [vmem:[%s10196_s20 + $0xe0] sm:$0xff]  ;;  %v6483_v27 = vld [vmem:[%s10196_s20 + $0xd0] sm:$0xff] }
 0x85e   : > { %v3389_v29 = vmul.f32 %v3387_v18, %v9047_v19  ;;  %3426 = vrot.lane.b32.xlu0 %v3420_v20, %s7777_s28  ;;  %v6482_v20 = vld [vmem:[%s10196_s20 + $0xc8] sm:$0xff] }
 0x85f   : > { %v3552_v60 = vrot.slane %v3551_v1, 1 }
 0x860   : > { %3422 = vrot.lane.b32.xlu1 %v3389_v29, %s7775_s29 }
 0x861   : > { %v3553_v50 = vmax.f32 %v3551_v1, %v3552_v60  ;;  %v3815_v31 = vpop.permute.xlu1 %3814  ;;  %v6481_v1 = vld [vmem:[%s10196_s20 + $0xc0] sm:$0xff] }
 0x862   : > { %v3817_v7 = vmul.f32 %v3815_v31, %v8991_v14 }
 0x863   : > { %v3554_v63 = vsub.f32 %v3546_v40, %v3553_v50  ;;  %v6489_v40 = vld [vmem:[%s10196_s20 + $0x100] sm:$0xff] }
 0x864   : > { %3783 = vperm.xlu1 %7265, %v3780_v58   ;;  %3850 = vrot.lane.b32.xlu0 %v3817_v7, %s7775_s29 }
 0x865   : > { %v3555_v4 = vmul.f32 1.442695, %v3554_v63 }
 0x867   : > { %7361 = vpow2.f32 %v3555_v4 }
 0x874   : > { %v7362_v41 = vpop.eup %7361 }
 0x875   : > { %v3557_v19 = vsel %vm3332_vm15, %v7362_v41, 0.0 }
 0x876   : > { %v3558_v11 = vrot.slane %v3557_v19, 4 }
 0x878   : > { %v3559_v32 = vadd.f32 %v3558_v11, %v3557_v19 }
 0x879   : > { %v3846_v37 = vpop.permute.xlu1 %3845 }
 0x87a   : > { %v3560_v6 = vrot.slane %v3559_v32, 2  ;;  %v3848_v24 = vmul.f32 %v3846_v37, %v9076_v51  ;;  %v6473_v51 = vld [vmem:[%s10196_s20 + $0xa8] sm:$0xff]  ;;  %v4074_v37 = vld [vmem:[%s10186_s10 + $0x10] sm:$0xff] }
 0x87b   : > { %6932 = vmatpush3.msra.mxu1 %v6473_v51  ;;  %v4072_v51 = vld [vmem:[%s10186_s10] sm:$0xff] }
 0x87c   : > { %v3561_v48 = vadd.f32 %v3560_v6, %v3559_v32  ;;  %3854 = vrot.lane.b32.xlu1 %v3848_v24, %s7777_s28  ;;  %6933 = vmatprep.subr.mxu1 %v10274_v49  ;;  %v9424_v6 = vld [vmem:[#allocation3] sm:$0x3]  ;;  %v9426_v24 = vld [vmem:[#allocation3 + $0x2] sm:$0x3] }
 0x87d   : > { %6934 = vmatpush3.msra.mxu1 %v6472_v28  ;;  %v9448_v28 = vld [vmem:[#allocation3 + $0xa] sm:$0x3] }
 0x87e   : > { %v3562_v14 = vrot.slane %v3561_v48, 1  ;;  %6935 = vmatprep.subr.mxu1 %v10274_v49 }
 0x87f   : > { %6936 = vmatpush3.msra.mxu1 %v6471_v3  ;;  %v9452_v3 = vld [vmem:[#allocation3 + $0xc] sm:$0x3] }
 0x880   : > { %v3563_v36 = vadd.f32 %v3562_v14, %v3561_v48  ;;  %6937 = vmatprep.subr.mxu1 %v10274_v49  ;;  %v4087_v48 = vcombine.low %v9424_v6, %v9426_v24  ;;  %v9430_v14 = vld [vmem:[#allocation3 + $0x4] sm:$0x3] }
 0x881   : > { %6938 = vmatpush3.msra.mxu1 %v6470_v16  ;;  %v9454_v16 = vld [vmem:[#allocation3 + $0xe] sm:$0x3] }
 0x882   : > { %7363 = vrcp.f32 %v3563_v36  ;;  %6939 = vmatprep.subr.mxu1 %v10274_v49  ;;  %v9432_v36 = vld [vmem:[#allocation3 + $0x6] sm:$0x3] }
 0x883   : > { %v4088_v21 = vcombine.low %v9430_v14, %v9432_v36 }
 0x88f   : > { %v7364_v10 = vpop.eup %7363 }
 0x890   : > { %v3565_v23 = vmul.f32 %v7364_v10, %v7362_v41  ;;  %v7781_v41 = vmov 1983009808   ;;  %v4073_v10 = vld [vmem:[%s10186_s10 + $0x8] sm:$0xff] }
 0x891   : > { %v4090_v19 = vunpack.c.l.s4 %v7781_v41 }
 0x892   : > { %v3601_v2 = vpop.permute.xlu0 %3600  ;;  %v3566_v47 = vadd.f32 1.0, %v3565_v23 }
 0x893   : > { %v3603_v38 = vmul.f32 %v3601_v2, %v9109_v39  ;;  %v6469_v39 = vld [vmem:[%s10196_s20 + $0x88] sm:$0xff]  ;;  %v4091_v11 = vunpack.c.0.s8 %v4090_v19 }
 0x894   : > { %3569 = vperm.xlu0 %7264, %v3566_v47   ;;  %6940 = vmatpush3.msra.mxu1 %v6469_v39  ;;  %v9446_v47 = vld [vmem:[#allocation3 + $0x8] sm:$0x3]  ;;  %v4556_v39 = vcombine.low %v9452_v3, %v9454_v16 }
 0x895   : > { %3636 = vrot.lane.b32.xlu1 %v3603_v38, %s7775_s29  ;;  %6941 = vmatprep.subr.mxu1 %v10274_v49  ;;  %v9416_v32 = vsub.s32 %v4091_v11, %v8104_v5  ;;  %v4555_v38 = vcombine.low %v9446_v47, %v9448_v28  ;;  %v6497_v11 = vld [vmem:[#allocation9] ss:$0 sm:$0xff] }
 0x896   : > { %6942 = vmatpush3.msra.mxu1 %v6468_v26  ;;  %v6517_v26 = vld [vmem:[%s10186_s10 + $0x38] sm:$0xff] }
 0x897   : > { %6943 = vmatprep.subr.mxu1 %v10274_v49  ;;  %v4095_v23 = vrot.slane %v4087_v48, %v9416_v32  ;;  %v4102_v61 = vrot.slane %v4088_v21, %v9416_v32 }
 0x898   : > { %6944 = vmatpush3.msra.mxu1 %v6467_v22  ;;  %v6516_v22 = vld [vmem:[%s10186_s10 + $0x30] sm:$0xff] }
 0x899   : > { %6945 = vmatprep.subr.mxu1 %v10274_v49  ;;  %v4103_v2 = vcombine.low %v4095_v23, %v4102_v61 }
 0x89a   : > { %6946 = vmatpush3.msra.mxu1 %v6466_v62  ;;  %v4563_v62 = vrot.slane %v4555_v38, %v9416_v32 }
 0x89b   : > { %6947 = vmatprep.subr.mxu1 %v10274_v49 }
 0x89c   : > { %6948 = vmatpush3.msra.mxu1 %v6465_v56  ;;  %v4570_v56 = vrot.slane %v4556_v39, %v9416_v32 }
 0x89d   : > { %6949 = vmatprep.subr.mxu1 %v10274_v49 }
 0x89e   : > { %6950 = vmatpush3.msra.mxu1 %v6464_v53  ;;  %v6515_v53 = vld [vmem:[%s10186_s10 + $0x28] sm:$0xff] }
 0x89f   : > { %6981 = vmatprep.subr.mxu1 %v10274_v49 }
 0x8ae   : > { %v3632_v34 = vpop.permute.xlu1 %3631 }
 0x8af   : > { %v3634_v9 = vmul.f32 %v3632_v34, %v9159_v42  ;;  %v6491_v42 = vld [vmem:[%s10196_s20 + $0x110] sm:$0xff]  ;;  %v6514_v34 = vld [vmem:[%s10186_s10 + $0x20] sm:$0xff] }
 0x8b1   : > { %3640 = vrot.lane.b32.xlu0 %v3634_v9, %s7777_s28  ;;  %v4571_v9 = vcombine.low %v4563_v62, %v4570_v56 }
 0x8b2   : > { %v3356_v17 = vpop.permute.xlu0 %3355 }
 0x8b3   : > { %v3358_v46 = vmul.f32 %v3356_v17, %v9164_v0  ;;  %v6490_v0 = vld [vmem:[%s10196_s20 + $0x108] sm:$0xff]  ;;  %v3966_v17 = vld [vmem:[%s10185_s9 + $0x38] sm:$0xff] }
 0x8d0   : > { %v3427_v55 = vpop.permute.xlu0 %3426 }
 0x8d2   : > { %v3423_v54 = vpop.permute.xlu1 %3422 }
 0x8d3   : > { %v3429_v12 = vsel %vm1070_vm4, %v3358_v46, %v3423_v54  ;;  %v3965_v46 = vld [vmem:[%s10185_s9 + $0x30] sm:$0xff]  ;;  %v3964_v54 = vld [vmem:[%s10185_s9 + $0x28] sm:$0xff] }
 0x8d4   : > { %v3430_v59 = vsel %vm1087_vm9, %v3429_v12, %v3427_v55  ;;  %v3963_v55 = vld [vmem:[%s10185_s9 + $0x20] sm:$0xff]  ;;  %v3962_v12 = vld [vmem:[%s10185_s9 + $0x18] sm:$0xff] }
 0x8d5   : > { %6925 = vmatmul.mubr.msk.f32.vlgmr.msra.gmra.mxu0 %vm3450_vm0, %v3430_v59  ;;  %v3960_v59 = vld [vmem:[%s10185_s9 + $0x8] sm:$0xff] }
 0x8d6   : > { %6955 = vmatpush3.msra.mxu0 %v6492_v44  ;;  %6978 = vmatprep.mubr.msk.f32.mxu0 %vm7774_vm2, %v10274_v49  ;;  %v3851_v29 = vpop.permute.xlu0 %3850  ;;  %v3961_v44 = vld [vmem:[%s10185_s9 + $0x10] sm:$0xff] }
 0x8d7   : > { %6956 = vmatprep.subr.mxu0 %v10274_v49 }
 0x8d8   : > { %6957 = vmatpush3.msra.mxu0 %v6491_v42  ;;  %v3959_v42 = vld [vmem:[%s10185_s9] sm:$0xff] }
 0x8d9   : > { %6958 = vmatprep.subr.mxu0 %v10274_v49 }
 0x8da   : > { %6959 = vmatpush3.msra.mxu0 %v6490_v0  ;;  %v6459_v0 = vld [vmem:[#allocation18] ss:$0 sm:$0xff] }
 0x8db   : > { %6960 = vmatprep.subr.mxu0 %v10274_v49 }
 0x8dc   : > { %6961 = vmatpush3.msra.mxu0 %v6489_v40 }
 0x8dd   : > { %6962 = vmatprep.subr.mxu0 %v10274_v49 }
 0x8de   : > { %6963 = vmatpush3.msra.mxu0 %v6488_v45  ;;  %v3524_v45 = vstv %s3312_s6 }
 0x8df   : > { %6964 = vmatprep.subr.mxu0 %v10274_v49  ;;  %v3784_v25 = vpop.permute.xlu1 %3783 }
 0x8e0   : > { %6965 = vmatpush3.msra.mxu0 %v6487_v30  ;;  %v3786_v18 = vmul.f32 %v3784_v25, %v9118_v8 }
 0x8e1   : > { %6966 = vmatprep.subr.mxu0 %v10274_v49 }
 0x8e2   : > { %6967 = vmatpush3.msra.mxu0 %v6486_v15  ;;  %v3857_v35 = vsel %vm1070_vm4, %v3786_v18, %v3851_v29 }
 0x8e3   : > { %6968 = vmatprep.subr.mxu0 %v10274_v49 }
 0x8e4   : > { %6969 = vmatpush3.msra.mxu0 %v6485_v33 }
 0x8e5   : > { %6970 = vmatprep.subr.mxu0 %v10274_v49 }
 0x8e6   : > { %6971 = vmatpush3.msra.mxu0 %v6484_v52  ;;  %v6493_v52 = vld [vmem:[#allocation18 + $0x2] ss:$0 sm:$0xff] }
 0x8e7   : > { %6972 = vmatprep.subr.mxu0 %v10274_v49 }
 0x8e8   : > { %6973 = vmatpush3.msra.mxu0 %v6483_v27 }
 0x8e9   : > { %6974 = vmatprep.subr.mxu0 %v10274_v49 }
 0x8ea   : > { %6975 = vmatpush3.msra.mxu0 %v6482_v20  ;;  %v6531_v20 = vld [vmem:[%s10185_s9 + $0xb8] sm:$0xff] }
 0x8eb   : > { %6976 = vmatprep.subr.mxu0 %v10274_v49 }
 0x8ec   : > { %6977 = vmatpush3.msra.mxu0 %v6481_v1  ;;  %v6530_v1 = vld [vmem:[%s10185_s9 + $0xb0] sm:$0xff] }
 0x8ed   : > { %7000 = vmatprep.subr.mxu0 %v10274_v49 }
 0x8ee   : > { %v3855_v60 = vpop.permute.xlu1 %3854 }
 0x8ef   : > { %v3858_v50 = vsel %vm1087_vm9, %v3857_v35, %v3855_v60  ;;  %v6529_v35 = vld [vmem:[%s10185_s9 + $0xa8] sm:$0xff]  ;;  %v6528_v60 = vld [vmem:[%s10185_s9 + $0xa0] sm:$0xff] }
 0x8f0   : > { %6979 = vmatmul.mubr.msk.f32.vlgmr.msra.gmra.mxu0 %vm3450_vm0, %v3858_v50  ;;  %v6527_v50 = vld [vmem:[%s10185_s9 + $0x98] sm:$0xff] }
 0x8f1   : > { %7008 = vmatprep.mubr.msk.f32.mxu0 %vm7774_vm2, %v10274_v49 }
 0x907   : > { %v3637_v7 = vpop.permute.xlu1 %3636 }
 0x90f   : > { %v3570_v31 = vpop.permute.xlu0 %3569 }
 0x910   : > { %v3572_v8 = vmul.f32 %v3570_v31, %v9209_v43  ;;  %v4075_v43 = vld [vmem:[%s10186_s10 + $0x18] sm:$0xff]  ;;  %v6526_v31 = vld [vmem:[%s10185_s9 + $0x90] sm:$0xff] }
 0x911   : > { %7001 = vmatpush3.msra.mxu0 %v4075_v43 }
 0x912   : > { %v3643_v63 = vsel %vm1070_vm4, %v3572_v8, %v3637_v7  ;;  %7002 = vmatprep.subr.mxu0 %v10274_v49  ;;  %v6525_v8 = vld [vmem:[%s10185_s9 + $0x88] sm:$0xff]  ;;  %v6524_v7 = vld [vmem:[%s10185_s9 + $0x80] sm:$0xff] }
 0x913   : > { %7003 = vmatpush3.msra.mxu0 %v4074_v37 }
 0x914   : > { %7004 = vmatprep.subr.mxu0 %v10274_v49 }
 0x915   : > { %7005 = vmatpush3.msra.mxu0 %v4073_v10 }
 0x916   : > { %7006 = vmatprep.subr.mxu0 %v10274_v49 }
 0x917   : > { %7007 = vmatpush3.msra.mxu0 %v4072_v51 }
 0x918   : > { %7009 = vmatmul.mubr.msk.f32.vlgmr.msra.gmra.mxu0 %vm1070_vm4, %v4103_v2  ;;  %7030 = vmatprep.subr.mxu0 %v10274_v49  ;;  %v6518_v2 = vld [vmem:[#allocation9 + $0x1] ss:$0 sm:$0xff] }
 0x919   : > { %7031 = vmatpush3.msra.mxu0 %v6517_v26  ;;  %7038 = vmatprep.mubr.msk.f32.mxu0 %vm7774_vm2, %v10274_v49 }
 0x91a   : > { %7032 = vmatprep.subr.mxu0 %v10274_v49 }
 0x91b   : > { %7033 = vmatpush3.msra.mxu0 %v6516_v22 }
 0x91c   : > { %7034 = vmatprep.subr.mxu0 %v10274_v49 }
 0x91d   : > { %7035 = vmatpush3.msra.mxu0 %v6515_v53 }
 0x91e   : > { %7036 = vmatprep.subr.mxu0 %v10274_v49 }
 0x91f   : > { %7037 = vmatpush3.msra.mxu0 %v6514_v34 }
 0x920   : > { %7039 = vmatmul.mubr.msk.f32.vlgmr.msra.gmra.mxu0 %vm1070_vm4, %v4571_v9  ;;  %7041 = vmatprep.subr.mxu0 %v10274_v49 }
 0x921   : > { %7057 = vmatprep.mubr.msk.f32.mxu0 %vm7774_vm2, %v10274_v49  ;;  %7042 = vmatpush3.msra.mxu0 %v6531_v20  ;;  %v9643_v20 = vld [vmem:[#allocation3 + $0x12] sm:$0x3] }
 0x922   : > { %7043 = vmatprep.subr.mxu0 %v10274_v49 }
 0x923   : > { %v3641_v58 = vpop.permute.xlu0 %3640  ;;  %7044 = vmatpush3.msra.mxu0 %v6530_v1 }
 0x924   : > { %v3644_v4 = vsel %vm1087_vm9, %v3643_v63, %v3641_v58  ;;  %7045 = vmatprep.subr.mxu0 %v10274_v49  ;;  %v6476_v58 = vld [vmem:[#allocation18 + $0x1] ss:$0 sm:$0xff] }
 0x925   : > { %6952 = vmatmul.mubr.msk.f32.vlgmr.msra.gmra.mxu1 %vm3450_vm0, %v3644_v4  ;;  %7046 = vmatpush3.msra.mxu0 %v6529_v35 }
 0x926   : > { %6997 = vmatprep.mubr.msk.f32.mxu1 %vm7774_vm2, %v10274_v49  ;;  %6982 = vmatpush3.msra.mxu1 %v3966_v17 }
 0x927   : > { %6983 = vmatprep.subr.mxu1 %v10274_v49  ;;  %7047 = vmatprep.subr.mxu0 %v10274_v49 }
 0x928   : > { %6984 = vmatpush3.msra.mxu1 %v3965_v46  ;;  %7048 = vmatpush3.msra.mxu0 %v6528_v60 }
 0x929   : > { %6985 = vmatprep.subr.mxu1 %v10274_v49  ;;  %7049 = vmatprep.subr.mxu0 %v10274_v49 }
 0x92a   : > { %6986 = vmatpush3.msra.mxu1 %v3964_v54  ;;  %7050 = vmatpush3.msra.mxu0 %v6527_v50  ;;  %v6538_v50 = vld [vmem:[%s10186_s10 + $0x58] sm:$0xff] }
 0x92b   : > { %6987 = vmatprep.subr.mxu1 %v10274_v49  ;;  %7051 = vmatprep.subr.mxu0 %v10274_v49 }
 0x92c   : > { %6988 = vmatpush3.msra.mxu1 %v3963_v55  ;;  %7052 = vmatpush3.msra.mxu0 %v6526_v31 }
 0x92d   : > { %6989 = vmatprep.subr.mxu1 %v10274_v49  ;;  %7053 = vmatprep.subr.mxu0 %v10274_v49 }
 0x92e   : > { %6990 = vmatpush3.msra.mxu1 %v3962_v12  ;;  %7054 = vmatpush3.msra.mxu0 %v6525_v8  ;;  %v6510_v12 = vld [vmem:[%s10185_s9 + $0x78] sm:$0xff]  ;;  %v6537_v8 = vld [vmem:[%s10186_s10 + $0x50] sm:$0xff] }
 0x92f   : > { %6991 = vmatprep.subr.mxu1 %v10274_v49  ;;  %7055 = vmatprep.subr.mxu0 %v10274_v49 }
 0x930   : > { %6992 = vmatpush3.msra.mxu1 %v3961_v44  ;;  %7056 = vmatpush3.msra.mxu0 %v6524_v7 }
 0x931   : > { %6993 = vmatprep.subr.mxu1 %v10274_v49  ;;  %7082 = vmatprep.subr.mxu0 %v10274_v49 }
 0x932   : > { %6994 = vmatpush3.msra.mxu1 %v3960_v59 }
 0x933   : > { %6995 = vmatprep.subr.mxu1 %v10274_v49 }
 0x934   : > { %6996 = vmatpush3.msra.mxu1 %v3959_v42 }
 0x935   : > { %7011 = vmatprep.subr.mxu1 %v10274_v49 }
 0x995   : > { %v3520_v40 = vpop.f32.mrf.mxu0 }
 0x996   : > { %v3521_v30 = vadd.f32 %v6459_v0, %v3520_v40  ;;  %v6509_v40 = vld [vmem:[%s10185_s9 + $0x70] sm:$0xff] }
 0x997   : > { %v6926_v15 = vpop.f32.mrf.mxu0 }
 0x998   : > { %v3525_v33 = vmul.f32 %v3524_v45, %v3521_v30  ;;  %v6507_v30 = vld [vmem:[%s10185_s9 + $0x60] sm:$0xff]  ;;  %v6506_v15 = vld [vmem:[%s10185_s9 + $0x58] sm:$0xff] }
 0x99a   : > { %3955 = vrot.lane.b32.xlu1 %v3525_v33, %s7775_s29  ;;  %v6505_v33 = vld [vmem:[%s10185_s9 + $0x50] sm:$0xff] }
 0x9b0   : > { %v3949_v27 = vpop.f32.mrf.mxu0 }
 0x9b1   : > { %v3950_v25 = vadd.f32 %v6493_v52, %v3949_v27  ;;  %v6504_v52 = vld [vmem:[%s10185_s9 + $0x48] sm:$0xff]  ;;  %v6503_v27 = vld [vmem:[%s10185_s9 + $0x40] sm:$0xff] }
 0x9b2   : > { %v6980_v18 = vpop.f32.mrf.mxu0 }
 0x9b3   : > { %v3953_v29 = vmul.f32 %v3950_v25, %v3524_v45  ;;  %v9641_v25 = vld [vmem:[#allocation3 + $0x10] sm:$0x3]  ;;  %v9647_v18 = vld [vmem:[#allocation3 + $0x14] sm:$0x3] }
 0x9b4   : > { %v4991_v1 = vcombine.low %v9641_v25, %v9643_v20 }
 0x9b5   : > { %4419 = vrot.lane.b32.xlu0 %v3953_v29, %s7775_s29  ;;  %v9649_v29 = vld [vmem:[#allocation3 + $0x16] sm:$0x3] }
 0x9b6   : > { %v4992_v35 = vcombine.low %v9647_v18, %v9649_v29  ;;  %v4999_v7 = vrot.slane %v4991_v1, %v9416_v32 }
 0x9d8   : > { %v4172_v43 = vpop.f32.mrf.mxu0 }
 0x9d9   : > { %v4173_v37 = vadd.f32 %v6497_v11, %v4172_v43  ;;  %v7782_v43 = vmov 1966171168  }
 0x9da   : > { %v7010_v48 = vpop.f32.mrf.mxu0 }
 0x9db   : > { %v4177_v21 = vcombine.high %v4173_v37, %v4173_v37  ;;  %v9553_v10 = vrot.slane %v4173_v37, %v9416_v32  ;;  %v4049_v37 = vunpack.c.l.s4 %v7782_v43 }
 0x9dd   : > { %v9556_v23 = vrot.slane %v4177_v21, %v9416_v32  ;;  %v9560_v61 = vcombine.high %v9553_v10, %v9553_v10  ;;  %v4252_v51 = vrot.slane %v9553_v10, %v9416_v32  ;;  %v4050_v48 = vunpack.c.0.s8 %v4049_v37  ;;  %v6495_v21 = vld [vmem:[%s10276_s4] ss:$0 sm:$0xff] }
 0x9df   : > { %v9566_v38 = vcombine.high %v9556_v23, %v9556_v23  ;;  %4274 = vrot.lane.b32.xlu0 %v4252_v51, %s7777_s28  ;;  %v4259_v39 = vrot.slane %v9560_v61, %v9416_v32  ;;  %v4266_v26 = vrot.slane %v9556_v23, %v9416_v32  ;;  %v9688_v51 = vsub.s32 %v4050_v48, %v8104_v5 }
 0x9e0   : > { %v4640_v22 = vpop.f32.mrf.mxu0 }
 0x9e1   : > { %v4273_v62 = vrot.slane %v9566_v38, %v9416_v32  ;;  %v4641_v56 = vadd.f32 %v6518_v2, %v4640_v22 }
 0x9e2   : > { %v7040_v53 = vpop.f32.mrf.mxu0 }
 0x9e3   : > { %4278 = vrot.lane.b32.xlu0 %v4266_v26, %s7777_s28  ;;  %v4645_v34 = vcombine.high %v4641_v56, %v4641_v56  ;;  %v9578_v9 = vrot.slane %v4641_v56, %v9416_v32 }
 0x9e5   : > { %v3735_v63 = vpop.f32.mrf.mxu1  ;;  %v9582_v17 = vrot.slane %v4645_v34, %v9416_v32  ;;  %v9586_v46 = vcombine.high %v9578_v9, %v9578_v9  ;;  %v4720_v54 = vrot.slane %v9578_v9, %v9416_v32 }
 0x9e6   : > { %v3736_v4 = vadd.f32 %v6476_v58, %v3735_v63  ;;  %v5006_v58 = vrot.slane %v4992_v35, %v9416_v32  ;;  %v6535_v63 = vld [vmem:[%s10186_s10 + $0x40] sm:$0xff] }
 0x9e7   : > { %v6953_v41 = vpop.f32.mrf.mxu1  ;;  %v9595_v44 = vcombine.high %v9582_v17, %v9582_v17  ;;  %4742 = vrot.lane.b32.xlu0 %v4720_v54, %s7777_s28  ;;  %v4727_v59 = vrot.slane %v9586_v46, %v9416_v32  ;;  %v4734_v42 = vrot.slane %v9582_v17, %v9416_v32  ;;  %v10277_v54 = vld [vmem:[#allocation25_spill] sm:$0xff] }
 0x9e8   : > { %v3739_v19 = vmul.f32 %v3736_v4, %v3524_v45  ;;  %v5007_v4 = vcombine.low %v4999_v7, %v5006_v58 }
 0x9e9   : > { %v4741_v45 = vrot.slane %v9595_v44, %v9416_v32 }
 0x9ea   : > { %4855 = vrot.lane.b32.xlu1 %v3739_v19, %s7775_s29  ;;  %v10275_v19 = vld [vmem:[#allocation33_spill] sm:$0xff] }
 0x9eb   : > { %4746 = vrot.lane.b32.xlu0 %v4734_v42, %s7777_s28 }
 0x9ee   : > { %4276 = vrot.lane.b32.xlu1 %v4259_v39, %s7777_s28 }
 0x9f2   : > { %4280 = vrot.lane.b32.xlu1 %v4273_v62, %s7777_s28 }
 0x9f6   : > { %4744 = vrot.lane.b32.xlu1 %v4727_v59, %s7777_s28 }
 0x9fa   : > { %4748 = vrot.lane.b32.xlu1 %v4741_v45, %s7777_s28 }
 0xa0c   : > { %v3956_v55 = vpop.permute.xlu1 %3955 }
 0xa0d   : > { %v3958_v0 = vsel %vm1070_vm4, %v8308_v13, %v3956_v55  ;;  %v6508_v13 = vld [vmem:[%s10185_s9 + $0x68] sm:$0xff] }
 0xa0e   : > { %6998 = vmatmul.mubr.msk.f32.vlgmr.msra.gmra.mxu1 %vm1087_vm9, %v3958_v0 }
 0xa0f   : > { %7012 = vmatpush3.msra.mxu1 %v6510_v12  ;;  %7027 = vmatprep.mubr.msk.f32.mxu1 %vm7774_vm2, %v10274_v49 }
 0xa10   : > { %7013 = vmatprep.subr.mxu1 %v10274_v49 }
 0xa11   : > { %7014 = vmatpush3.msra.mxu1 %v6509_v40 }
 0xa12   : > { %7015 = vmatprep.subr.mxu1 %v10274_v49 }
 0xa13   : > { %7016 = vmatpush3.msra.mxu1 %v6508_v13 }
 0xa14   : > { %7017 = vmatprep.subr.mxu1 %v10274_v49 }
 0xa15   : > { %7018 = vmatpush3.msra.mxu1 %v6507_v30 }
 0xa16   : > { %7019 = vmatprep.subr.mxu1 %v10274_v49 }
 0xa17   : > { %7020 = vmatpush3.msra.mxu1 %v6506_v15 }
 0xa18   : > { %7021 = vmatprep.subr.mxu1 %v10274_v49 }
 0xa19   : > { %7022 = vmatpush3.msra.mxu1 %v6505_v33 }
 0xa1a   : > { %7023 = vmatprep.subr.mxu1 %v10274_v49 }
 0xa1b   : > { %7024 = vmatpush3.msra.mxu1 %v6504_v52 }
 0xa1c   : > { %7025 = vmatprep.subr.mxu1 %v10274_v49 }
 0xa1d   : > { %7026 = vmatpush3.msra.mxu1 %v6503_v27 }
 0xa1e   : > { %7060 = vmatprep.subr.mxu1 %v10274_v49 }
 0xa27   : > { %v4420_v60 = vpop.permute.xlu0 %4419 }
 0xa28   : > { %v4422_v31 = vsel %vm1070_vm4, %v8362_v57, %v4420_v60  ;;  %v6536_v57 = vld [vmem:[%s10186_s10 + $0x48] sm:$0xff] }
 0xa29   : > { %7028 = vmatmul.mubr.msk.f32.vlgmr.msra.gmra.mxu1 %vm1087_vm9, %v4422_v31 }
 0xa2a   : > { %7061 = vmatpush3.msra.mxu1 %v6538_v50  ;;  %7068 = vmatprep.mubr.msk.f32.mxu1 %vm7774_vm2, %v10274_v49 }
 0xa2b   : > { %7062 = vmatprep.subr.mxu1 %v10274_v49 }
 0xa2c   : > { %7063 = vmatpush3.msra.mxu1 %v6537_v8 }
 0xa2d   : > { %7064 = vmatprep.subr.mxu1 %v10274_v49 }
 0xa2e   : > { %7065 = vmatpush3.msra.mxu1 %v6536_v57 }
 0xa2f   : > { %7066 = vmatprep.subr.mxu1 %v10274_v49 }
 0xa30   : > { %7067 = vmatpush3.msra.mxu1 %v6535_v63 }
 0xa31   : > { %7069 = vmatmul.mubr.msk.f32.vlgmr.msra.gmra.mxu1 %vm1070_vm4, %v5007_v4  ;;  %7071 = vmatprep.subr.mxu1 %v10274_v49 }
 0xa32   : > { %7079 = vmatprep.mubr.msk.f32.mxu1 %vm7774_vm2, %v10274_v49 }
 0xa5c   : > { %v4856_v41 = vpop.permute.xlu1 %4855 }
 0xa5d   : > { %v4858_v11 = vsel %vm1070_vm4, %v10275_v19, %v4856_v41 }
 0xa5e   : > { %7058 = vmatmul.mubr.msk.f32.vlgmr.msra.gmra.mxu0 %vm1087_vm9, %v4858_v11  ;;  %v6539_v11 = vld [vmem:[#allocation9 + $0x2] ss:$0 sm:$0xff] }
 0xa5f   : > { %7090 = vmatprep.mubr.msk.f32.mxu0 %vm7774_vm2, %v10274_v49 }
 0xace   : > { %v4043_v2 = vpop.f32.mrf.mxu1 }
 0xacf   : > { %v4044_v39 = vadd.f32 %v6495_v21, %v4043_v2 }
 0xad0   : > { %v6999_v26 = vpop.f32.mrf.mxu1 }
 0xad1   : > { %v4054_v22 = vrot.slane %v4044_v39, %v9688_v51 }
 0xad3   : > { %v4055_v62 = vcombine.high %v4054_v22, %v4054_v22  ;;  %v4062_v56 = vrot.slane %v4054_v22, %v9688_v51 }
 0xad5   : > { %v4069_v53 = vrot.slane %v4055_v62, %v9688_v51  ;;  %v4070_v34 = vcombine.high %v4062_v56, %v4062_v56  ;;  %v9694_v55 = vrot.slane %v4062_v56, %v10277_v54 }
 0xad7   : > { %v4071_v12 = vcombine.high %v4069_v53, %v4069_v53  ;;  %v9697_v59 = vrot.slane %v4069_v53, %v10277_v54  ;;  %v9700_v42 = vrot.slane %v4070_v34, %v10277_v54  ;;  %v4218_v0 = vadd.f32 %v9694_v55, %v9553_v10  ;;  %v6512_v10 = vld [vmem:[%s10276_s4 + $0x1] ss:$0 sm:$0xff] }
 0xad9   : > { %v9705_v40 = vrot.slane %v4071_v12, %v10277_v54  ;;  %v4219_v45 = vadd.f32 %v9697_v59, %v9560_v61  ;;  %v4220_v13 = vadd.f32 %v9700_v42, %v9556_v23  ;;  %v6499_v30 = vmul.f32 -1.442695, %v4218_v0 }
 0xadb   : > { %v4221_v15 = vadd.f32 %v9705_v40, %v9566_v38  ;;  %7365 = vpow2.f32 %v6499_v30  ;;  %v6500_v33 = vmul.f32 -1.442695, %v4219_v45  ;;  %v6501_v52 = vmul.f32 -1.442695, %v4220_v13 }
 0xadd   : > { %7367 = vpow2.f32 %v6500_v33  ;;  %v6502_v27 = vmul.f32 -1.442695, %v4221_v15 }
 0xade   : > { %7369 = vpow2.f32 %v6501_v52  ;;  %v4275_v52 = vpop.permute.xlu0 %4274 }
 0xadf   : > { %7371 = vpow2.f32 %v6502_v27 }
 0xae8   : > { %v7366_v1 = vpop.eup %7365 }
 0xae9   : > { %v4509_v61 = vpop.f32.mrf.mxu1  ;;  %v4234_v23 = vadd.f32 1.0, %v7366_v1  ;;  %v4277_v1 = vpop.permute.xlu1 %4276 }
 0xaea   : > { %v7368_v35 = vpop.eup %7367  ;;  %v4510_v60 = vadd.f32 %v6512_v10, %v4509_v61 }
 0xaeb   : > { %v7029_v50 = vpop.f32.mrf.mxu1  ;;  %v7370_v31 = vpop.eup %7369  ;;  %v4235_v8 = vadd.f32 1.0, %v7368_v35  ;;  %7373 = vrcp.f32 %v4234_v23 }
 0xaec   : > { %v4520_v38 = vrot.slane %v4510_v60, %v9688_v51  ;;  %v7372_v7 = vpop.eup %7371  ;;  %v4236_v63 = vadd.f32 1.0, %v7370_v31  ;;  %v4279_v50 = vpop.permute.xlu0 %4278 }
 0xaed   : > { %v4237_v43 = vadd.f32 1.0, %v7372_v7  ;;  %7375 = vrcp.f32 %v4235_v8  ;;  %v4281_v8 = vpop.permute.xlu1 %4280 }
 0xaee   : > { %v4521_v58 = vcombine.high %v4520_v38, %v4520_v38  ;;  %v4528_v57 = vrot.slane %v4520_v38, %v9688_v51  ;;  %7377 = vrcp.f32 %v4236_v63 }
 0xaef   : > { %7379 = vrcp.f32 %v4237_v43 }
 0xaf0   : > { %v4535_v4 = vrot.slane %v4521_v58, %v9688_v51  ;;  %v4536_v41 = vcombine.high %v4528_v57, %v4528_v57  ;;  %v9720_v19 = vrot.slane %v4528_v57, %v10277_v54 }
 0xaf1   : > { %v5076_v37 = vpop.f32.mrf.mxu1 }
 0xaf2   : > { %v4537_v48 = vcombine.high %v4535_v4, %v4535_v4  ;;  %v9723_v21 = vrot.slane %v4535_v4, %v10277_v54  ;;  %v9726_v2 = vrot.slane %v4536_v41, %v10277_v54  ;;  %v4686_v39 = vadd.f32 %v9720_v19, %v9578_v9 }
 0xaf3   : > { %v5077_v26 = vadd.f32 %v6539_v11, %v5076_v37  ;;  %v7070_v22 = vpop.f32.mrf.mxu1 }
 0xaf4   : > { %v9731_v62 = vrot.slane %v4537_v48, %v10277_v54  ;;  %v4687_v56 = vadd.f32 %v9723_v21, %v9586_v46  ;;  %v4688_v53 = vadd.f32 %v9726_v2, %v9582_v17  ;;  %v6520_v34 = vmul.f32 -1.442695, %v4686_v39  ;;  %v4743_v39 = vpop.permute.xlu0 %4742 }
 0xaf5   : > { %v5081_v12 = vcombine.high %v5077_v26, %v5077_v26  ;;  %v9738_v0 = vrot.slane %v5077_v26, %v9416_v32  ;;  %v4745_v26 = vpop.permute.xlu1 %4744 }
 0xaf6   : > { %v4689_v9 = vadd.f32 %v9731_v62, %v9595_v44  ;;  %7381 = vpow2.f32 %v6520_v34  ;;  %v6521_v45 = vmul.f32 -1.442695, %v4687_v56  ;;  %v6522_v13 = vmul.f32 -1.442695, %v4688_v53 }
 0xaf7   : > { %v9743_v30 = vrot.slane %v5081_v12, %v9416_v32  ;;  %v9747_v46 = vcombine.high %v9738_v0, %v9738_v0  ;;  %v5156_v17 = vrot.slane %v9738_v0, %v9416_v32 }
 0xaf8   : > { %7383 = vpow2.f32 %v6521_v45  ;;  %v6523_v15 = vmul.f32 -1.442695, %v4689_v9  ;;  %v9761_v10 = vpop.eup %7373  ;;  %v4747_v34 = vpop.permute.xlu0 %4746 }
 0xaf9   : > { %7385 = vpow2.f32 %v6522_v13  ;;  %v9753_v33 = vcombine.high %v9743_v30, %v9743_v30  ;;  %5178 = vrot.lane.b32.xlu0 %v5156_v17, %s7777_s28  ;;  %v5163_v44 = vrot.slane %v9747_v46, %v9416_v32  ;;  %v5170_v27 = vrot.slane %v9743_v30, %v9416_v32  ;;  %v4749_v13 = vpop.permute.xlu1 %4748 }
 0xafa   : > { %7387 = vpow2.f32 %v6523_v15  ;;  %v9766_v35 = vpop.eup %7375  ;;  %v4286_v60 = vmul.f32 %v9761_v10, %v4275_v52 }
 0xafb   : > { %5180 = vrot.lane.b32.xlu1 %v5163_v44, %s7777_s28  ;;  %v5177_v61 = vrot.slane %v9753_v33, %v9416_v32  ;;  %v9770_v23 = vpop.eup %7377  ;;  %v4287_v31 = vmul.f32 %v9766_v35, %v4277_v1 }
 0xafc   : > { %v9774_v38 = vpop.eup %7379  ;;  %v4288_v58 = vmul.f32 %v9770_v23, %v4279_v50 }
 0xafd   : > { %5182 = vrot.lane.b32.xlu0 %v5170_v27, %s7777_s28  ;;  %v4289_v4 = vmul.f32 %v9774_v38, %v4281_v8  ;;  %v6533_v27 = vld [vmem:[%s10276_s4 + $0x2] ss:$0 sm:$0xff] }
 0xaff   : > { %5184 = vrot.lane.b32.xlu1 %v5177_v61, %s7777_s28 }
 0xb01   : > { %4294 = vrot.lane.b32.xlu0 %v4286_v60, %s7777_s28 }
 0xb03   : > { %v7382_v7 = vpop.eup %7381  ;;  %4296 = vrot.lane.b32.xlu1 %v4287_v31, %s7777_s28 }
 0xb04   : > { %v4702_v57 = vadd.f32 1.0, %v7382_v7 }
 0xb05   : > { %v7384_v63 = vpop.eup %7383  ;;  %4298 = vrot.lane.b32.xlu0 %v4288_v58, %s7777_s28 }
 0xb06   : > { %v7386_v41 = vpop.eup %7385  ;;  %v4703_v11 = vadd.f32 1.0, %v7384_v63  ;;  %7389 = vrcp.f32 %v4702_v57 }
 0xb07   : > { %v7388_v43 = vpop.eup %7387  ;;  %v4704_v37 = vadd.f32 1.0, %v7386_v41  ;;  %4300 = vrot.lane.b32.xlu1 %v4289_v4, %s7777_s28 }
 0xb08   : > { %v4705_v48 = vadd.f32 1.0, %v7388_v43  ;;  %7391 = vrcp.f32 %v4703_v11 }
 0xb09   : > { %7393 = vrcp.f32 %v4704_v37 }
 0xb0a   : > { %7395 = vrcp.f32 %v4705_v48 }
 0xb13   : > { %v9781_v22 = vpop.eup %7389 }
 0xb14   : > { %v4754_v56 = vmul.f32 %v9781_v22, %v4743_v39 }
 0xb15   : > { %v9784_v53 = vpop.eup %7391 }
 0xb16   : > { %v9786_v12 = vpop.eup %7393  ;;  %v4755_v9 = vmul.f32 %v9784_v53, %v4745_v26  ;;  %4762 = vrot.lane.b32.xlu0 %v4754_v56, %s7777_s28 }
 0xb17   : > { %v9790_v45 = vpop.eup %7395  ;;  %v4756_v17 = vmul.f32 %v9786_v12, %v4747_v34 }
 0xb18   : > { %4764 = vrot.lane.b32.xlu1 %v4755_v9, %s7777_s28  ;;  %v4757_v15 = vmul.f32 %v9790_v45, %v4749_v13 }
 0xb1a   : > { %4766 = vrot.lane.b32.xlu0 %v4756_v17, %s7777_s28 }
 0xb1c   : > { %4768 = vrot.lane.b32.xlu1 %v4757_v15, %s7777_s28 }
 0xb1e   : > { %v4945_v44 = vpop.f32.mrf.mxu0 }
 0xb1f   : > { %v4946_v1 = vadd.f32 %v6533_v27, %v4945_v44 }
 0xb20   : > { %v7059_v52 = vpop.f32.mrf.mxu0 }
 0xb21   : > { %v4956_v61 = vrot.slane %v4946_v1, %v9688_v51 }
 0xb23   : > { %v4957_v60 = vcombine.high %v4956_v61, %v4956_v61  ;;  %v4964_v50 = vrot.slane %v4956_v61, %v9688_v51 }
 0xb25   : > { %v4971_v31 = vrot.slane %v4957_v60, %v9688_v51  ;;  %v4972_v8 = vcombine.high %v4964_v50, %v4964_v50  ;;  %v9804_v7 = vrot.slane %v4964_v50, %v10277_v54 }
 0xb27   : > { %v4973_v58 = vcombine.high %v4971_v31, %v4971_v31  ;;  %v9807_v57 = vrot.slane %v4971_v31, %v10277_v54  ;;  %v9810_v63 = vrot.slane %v4972_v8, %v10277_v54  ;;  %v5122_v4 = vadd.f32 %v9804_v7, %v9738_v0 }
 0xb29   : > { %v9815_v41 = vrot.slane %v4973_v58, %v10277_v54  ;;  %v5123_v51 = vadd.f32 %v9807_v57, %v9747_v46  ;;  %v5124_v11 = vadd.f32 %v9810_v63, %v9743_v30  ;;  %v6541_v43 = vmul.f32 -1.442695, %v5122_v4 }
 0xb2b   : > { %v5125_v37 = vadd.f32 %v9815_v41, %v9753_v33  ;;  %v6542_v48 = vmul.f32 -1.442695, %v5123_v51  ;;  %7397 = vpow2.f32 %v6541_v43  ;;  %v6543_v39 = vmul.f32 -1.442695, %v5124_v11  ;;  %v883_v51 = vld [vmem:[%s834_s27] sm:$0xf] }
 0xb2c   : > { %v4361_v11 = vrot.slane %v883_v51, %v10277_v54  ;;  %v10280_v54 = vld [vmem:[#allocation27_spill] sm:$0xff] }
 0xb2d   : > { %7399 = vpow2.f32 %v6542_v48  ;;  %v6544_v26 = vmul.f32 -1.442695, %v5125_v37 }
 0xb2e   : > { %7401 = vpow2.f32 %v6543_v39  ;;  %v10279_v39 = vld [vmem:[#allocation26_spill] sm:$0xff] }
 0xb2f   : > { %7403 = vpow2.f32 %v6544_v26  ;;  %v4375_v26 = vrot.slane %v883_v51, %v10279_v39 }
 0xb38   : > { %v7398_v0 = vpop.eup %7397 }
 0xb39   : > { %v5138_v34 = vadd.f32 1.0, %v7398_v0 }
 0xb3a   : > { %v7400_v56 = vpop.eup %7399 }
 0xb3b   : > { %v7402_v9 = vpop.eup %7401  ;;  %v5139_v13 = vadd.f32 1.0, %v7400_v56  ;;  %7405 = vrcp.f32 %v5138_v34 }
 0xb3c   : > { %v7404_v46 = vpop.eup %7403  ;;  %v5140_v17 = vadd.f32 1.0, %v7402_v9 }
 0xb3d   : > { %v5141_v30 = vadd.f32 1.0, %v7404_v46  ;;  %7407 = vrcp.f32 %v5139_v13 }
 0xb3e   : > { %7409 = vrcp.f32 %v5140_v17 }
 0xb3f   : > { %7411 = vrcp.f32 %v5141_v30 }
 0xb48   : > { %v9823_v33 = vpop.eup %7405 }
 0xb4a   : > { %v9826_v52 = vpop.eup %7407 }
 0xb4b   : > { %v9830_v61 = vpop.eup %7409 }
 0xb4c   : > { %v9834_v31 = vpop.eup %7411 }
 0xb6b   : > { %v5179_v15 = vpop.permute.xlu0 %5178 }
 0xb6c   : > { %v5190_v44 = vmul.f32 %v9823_v33, %v5179_v15  ;;  %v5425_v15 = vld [vmem:[#allocation12 + $0x8] sm:$0xff] }
 0xb6d   : > { %v5181_v27 = vpop.permute.xlu1 %5180 }
 0xb6e   : > { %v5191_v1 = vmul.f32 %v9826_v52, %v5181_v27  ;;  %5198 = vrot.lane.b32.xlu0 %v5190_v44, %s7777_s28  ;;  %v5424_v44 = vld [vmem:[#allocation12] sm:$0xff]  ;;  %v5665_v27 = vld [vmem:[#allocation12 + $0x38] sm:$0xff] }
 0xb6f   : > { %v5183_v60 = vpop.permute.xlu0 %5182 }
 0xb70   : > { %v5192_v50 = vmul.f32 %v9830_v61, %v5183_v60  ;;  %5200 = vrot.lane.b32.xlu1 %v5191_v1, %s7777_s28  ;;  %v5664_v1 = vld [vmem:[#allocation12 + $0x30] sm:$0xff]  ;;  %v5663_v60 = vld [vmem:[#allocation12 + $0x28] sm:$0xff] }
 0xb71   : > { %v5185_v8 = vpop.permute.xlu1 %5184 }
 0xb72   : > { %v5193_v58 = vmul.f32 %v9834_v31, %v5185_v8  ;;  %5202 = vrot.lane.b32.xlu0 %v5192_v50, %s7777_s28  ;;  %v5662_v50 = vld [vmem:[#allocation12 + $0x20] sm:$0xff] }
 0xb73   : > { %v4295_v4 = vpop.permute.xlu0 %4294 }
 0xb74   : > { %5204 = vrot.lane.b32.xlu1 %v5193_v58, %s7777_s28  ;;  %v4306_v37 = vadd.f32 %v4295_v4, %v9694_v55  ;;  %v10281_v55 = vld [vmem:[#allocation28_spill] sm:$0xff] }
 0xb75   : > { %v4297_v43 = vpop.permute.xlu1 %4296 }
 0xb76   : > { %4338 = vrot.lane.b32.xlu0 %v9424_v6, %s7775_s29  ;;  %7413 = vtanh.f32 %v4306_v37  ;;  %v4307_v34 = vadd.f32 %v4297_v43, %v9697_v59 }
 0xb77   : > { %v4299_v48 = vpop.permute.xlu0 %4298 }
 0xb78   : > { %4340 = vrot.lane.b32.xlu1 %v9426_v24, %s7775_s29  ;;  %v4308_v0 = vadd.f32 %v4299_v48, %v9700_v42  ;;  %v4368_v24 = vrot.slane %v883_v51, %v10280_v54  ;;  %v4382_v42 = vrot.slane %v883_v51, %v10281_v55 }
 0xb79   : > { %v4301_v56 = vpop.permute.xlu1 %4300 }
 0xb7a   : > { %4363 = vbcast.lane.b32.xlu0 %v4361_v11, 256  ;;  %7415 = vtanh.f32 %v4308_v0  ;;  %v4309_v6 = vadd.f32 %v4301_v56, %v9705_v40 }
 0xb7c   : > { %4342 = vrot.lane.b32.xlu1 %v9430_v14, %s7775_s29  ;;  %7417 = vtanh.f32 %v4309_v6 }
 0xb7d   : > { %7419 = vtanh.f32 %v4307_v34 }
 0xb7e   : > { %4377 = vbcast.lane.b32.xlu0 %v4375_v26, 256 }
 0xb80   : > { %4344 = vrot.lane.b32.xlu1 %v9432_v36, %s7775_s29 }
 0xb82   : > { %4806 = vrot.lane.b32.xlu0 %v9446_v47, %s7775_s29 }
 0xb83   : > { %v7414_v40 = vpop.eup %7413 }
 0xb84   : > { %4370 = vbcast.lane.b32.xlu1 %v4368_v24, 256 }
 0xb86   : > { %5242 = vrot.lane.b32.xlu0 %v9641_v25, %s7775_s29 }
 0xb87   : > { %v7416_v13 = vpop.eup %7415 }
 0xb88   : > { %4384 = vbcast.lane.b32.xlu1 %v4382_v42, 256  ;;  %v4763_v14 = vpop.permute.xlu0 %4762 }
 0xb89   : > { %v4774_v9 = vadd.f32 %v4763_v14, %v9720_v19  ;;  %v7418_v17 = vpop.eup %7417  ;;  %v4314_v14 = vsub.f32 1.0, %v9761_v10 }
 0xb8a   : > { %4322 = vrot.lane.b32.xlu0 %v7414_v40, %s7776_s24  ;;  %v4765_v36 = vpop.permute.xlu1 %4764 }
 0xb8b   : > { %7421 = vtanh.f32 %v4774_v9  ;;  %v4775_v46 = vadd.f32 %v4765_v36, %v9723_v21 }
 0xb8c   : > { %4808 = vrot.lane.b32.xlu1 %v9448_v28, %s7775_s29  ;;  %v4767_v47 = vpop.permute.xlu0 %4766  ;;  %v7420_v28 = vpop.eup %7419 }
 0xb8d   : > { %v4776_v59 = vadd.f32 %v4767_v47, %v9726_v2 }
 0xb8e   : > { %4326 = vrot.lane.b32.xlu0 %v7416_v13, %s7776_s24  ;;  %v4769_v25 = vpop.permute.xlu1 %4768 }
 0xb8f   : > { %7423 = vtanh.f32 %v4776_v59  ;;  %v4777_v19 = vadd.f32 %v4769_v25, %v9731_v62  ;;  %v5426_v62 = vld [vmem:[#allocation12 + $0x10] sm:$0xff]  ;;  %v4316_v59 = vsub.f32 1.0, %v9770_v23 }
 0xb90   : > { %4810 = vrot.lane.b32.xlu1 %v9452_v3, %s7775_s29  ;;  %7425 = vtanh.f32 %v4775_v46  ;;  %v5427_v3 = vld [vmem:[#allocation12 + $0x18] sm:$0xff] }
 0xb91   : > { %7427 = vtanh.f32 %v4777_v19  ;;  %7083 = vmatpush3.msra.mxu0 %v5427_v3 }
 0xb92   : > { %4328 = vrot.lane.b32.xlu0 %v7418_v17, %s7776_s24  ;;  %7084 = vmatprep.subr.mxu0 %v10274_v49 }
 0xb93   : > { %7085 = vmatpush3.msra.mxu0 %v5426_v62  ;;  %v4315_v62 = vsub.f32 1.0, %v9766_v35 }
 0xb94   : > { %4812 = vrot.lane.b32.xlu1 %v9454_v16, %s7775_s29  ;;  %7086 = vmatprep.subr.mxu0 %v10274_v49 }
 0xb95   : > { %7087 = vmatpush3.msra.mxu0 %v5425_v15 }
 0xb96   : > { %7088 = vmatprep.subr.mxu0 %v10274_v49 }
 0xb97   : > { %7089 = vmatpush3.msra.mxu0 %v5424_v44 }
 0xb98   : > { %v7422_v2 = vpop.eup %7421  ;;  %4324 = vrot.lane.b32.xlu1 %v7420_v28, %s7776_s24  ;;  %7104 = vmatprep.subr.mxu0 %v10274_v49 }
 0xb99   : > { %4790 = vrot.lane.b32.xlu0 %v7422_v2, %s7776_s24 }
 0xb9c   : > { %v7424_v21 = vpop.eup %7423  ;;  %5244 = vrot.lane.b32.xlu1 %v9643_v20, %s7775_s29  ;;  %v9886_v20 = vld [vmem:[#allocation4] sm:$0xf] }
 0xb9d   : > { %4794 = vrot.lane.b32.xlu0 %v7424_v21, %s7776_s24  ;;  %v7426_v30 = vpop.eup %7425  ;;  %7091 = vmatmul.mubr.msk.f32.vlgmr.msra.gmra.mxu0 %vm1070_vm4, %v9886_v20 }
 0xb9e   : > { %v7428_v16 = vpop.eup %7427  ;;  %7105 = vmatpush3.msra.mxu0 %v5665_v27  ;;  %7112 = vmatprep.mubr.msk.f32.mxu0 %vm7774_vm2, %v10274_v49 }
 0xb9f   : > { %7106 = vmatprep.subr.mxu0 %v10274_v49 }
 0xba0   : > { %4792 = vrot.lane.b32.xlu1 %v7426_v30, %s7776_s24  ;;  %7107 = vmatpush3.msra.mxu0 %v5664_v1 }
 0xba1   : > { %4796 = vrot.lane.b32.xlu0 %v7428_v16, %s7776_s24  ;;  %7108 = vmatprep.subr.mxu0 %v10274_v49 }
 0xba2   : > { %7109 = vmatpush3.msra.mxu0 %v5663_v60 }
 0xba3   : > { %7110 = vmatprep.subr.mxu0 %v10274_v49 }
 0xba4   : > { %5246 = vrot.lane.b32.xlu1 %v9647_v18, %s7775_s29  ;;  %v9898_v18 = vld [vmem:[#allocation4 + $0x4] sm:$0xf]  ;;  %7111 = vmatpush3.msra.mxu0 %v5662_v50 }
 0xba5   : > { %7113 = vmatmul.mubr.msk.f32.vlgmr.msra.gmra.mxu0 %vm1070_vm4, %v9898_v18  ;;  %7126 = vmatprep.subr.mxu0 %v10274_v49 }
 0xba6   : > { %7134 = vmatprep.mubr.msk.f32.mxu0 %vm7774_vm2, %v10274_v49 }
 0xbe0   : > { %v5199_v8 = vpop.permute.xlu0 %5198 }
 0xbe1   : > { %v5210_v58 = vadd.f32 %v5199_v8, %v9804_v7 }
 0xbe2   : > { %v5201_v4 = vpop.permute.xlu1 %5200 }
 0xbe3   : > { %7429 = vtanh.f32 %v5210_v58  ;;  %v5211_v51 = vadd.f32 %v5201_v4, %v9807_v57 }
 0xbe4   : > { %v5203_v11 = vpop.permute.xlu0 %5202 }
 0xbe5   : > { %7431 = vtanh.f32 %v5211_v51  ;;  %v5212_v43 = vadd.f32 %v5203_v11, %v9810_v63  ;;  %v4784_v51 = vsub.f32 1.0, %v9786_v12 }
 0xbe6   : > { %v5205_v37 = vpop.permute.xlu1 %5204 }
 0xbe7   : > { %7433 = vtanh.f32 %v5212_v43  ;;  %v5213_v48 = vadd.f32 %v5205_v37, %v9815_v41 }
 0xbe8   : > { %v4339_v39 = vpop.permute.xlu0 %4338 }
 0xbe9   : > { %7435 = vtanh.f32 %v5213_v48  ;;  %v4350_v9 = vmul.f32 %v9761_v10, %v4339_v39  ;;  %v4317_v10 = vsub.f32 1.0, %v9774_v38 }
 0xbea   : > { %v4341_v26 = vpop.permute.xlu1 %4340 }
 0xbeb   : > { %v4351_v15 = vmul.f32 %v9766_v35, %v4341_v26 }
 0xbec   : > { %v9910_v0 = vpop.permute.xlu0 %4363 }
 0xbee   : > { %v4343_v56 = vpop.permute.xlu1 %4342 }
 0xbf0   : > { %v7430_v6 = vpop.eup %7429  ;;  %v9912_v7 = vpop.permute.xlu0 %4377 }
 0xbf1   : > { %5226 = vrot.lane.b32.xlu0 %v7430_v6, %s7776_s24 }
 0xbf2   : > { %v7432_v57 = vpop.eup %7431  ;;  %v4345_v54 = vpop.permute.xlu1 %4344 }
 0xbf3   : > { %5228 = vrot.lane.b32.xlu1 %v7432_v57, %s7776_s24  ;;  %v4353_v50 = vmul.f32 %v9774_v38, %v4345_v54 }
 0xbf4   : > { %v7434_v63 = vpop.eup %7433  ;;  %v4807_v24 = vpop.permute.xlu0 %4806 }
 0xbf5   : > { %5230 = vrot.lane.b32.xlu0 %v7434_v63, %s7776_s24  ;;  %v4818_v1 = vmul.f32 %v9781_v22, %v4807_v24 }
 0xbf6   : > { %v9917_v41 = vpop.permute.xlu1 %4370  ;;  %v7436_v55 = vpop.eup %7435 }
 0xbf7   : > { %5248 = vrot.lane.b32.xlu1 %v9649_v29, %s7775_s29  ;;  %v4352_v29 = vmul.f32 %v9770_v23, %v4343_v56  ;;  %v4782_v23 = vsub.f32 1.0, %v9781_v22  ;;  %v4783_v22 = vsub.f32 1.0, %v9784_v53  ;;  %v4785_v56 = vsub.f32 1.0, %v9790_v45 }
 0xbf8   : > { %v9921_v42 = vpop.permute.xlu0 %5242 }
 0xbf9   : > { %5232 = vrot.lane.b32.xlu0 %v7436_v55, %s7776_s24 }
 0xbfa   : > { %v9924_v34 = vpop.permute.xlu1 %4384 }
 0xbfc   : > { %v4323_v40 = vpop.permute.xlu0 %4322 }
 0xbfd   : > { %v4334_v36 = vmul.f32 %v4323_v40, %v4314_v14  ;;  %v5337_v14 = vld [vmem:[#allocation10 + $0x18] sm:$0xff] }
 0xbfe   : > { %v4809_v47 = vpop.permute.xlu1 %4808  ;;  %7072 = vmatpush3.msra.mxu1 %v5337_v14  ;;  %v10283_v14 = vld [vmem:[#allocation30_spill] sm:$0xff] }
 0xbff   : > { %v4354_v13 = vadd.f32 %v4350_v9, %v4334_v36  ;;  %v4819_v6 = vmul.f32 %v9784_v53, %v4809_v47  ;;  %7073 = vmatprep.subr.mxu1 %v10274_v49  ;;  %v5336_v53 = vld [vmem:[#allocation10 + $0x10] sm:$0xff] }
 0xc00   : > { %v4327_v46 = vpop.permute.xlu0 %4326  ;;  %7074 = vmatpush3.msra.mxu1 %v5336_v53 }
 0xc01   : > { %v4394_v25 = vmul.f32 %v9910_v0, %v4354_v13  ;;  %v4336_v19 = vmul.f32 %v4327_v46, %v4316_v59  ;;  %7075 = vmatprep.subr.mxu1 %v10274_v49  ;;  %v5334_v13 = vld [vmem:[#allocation10] sm:$0xff]  ;;  %v5904_v59 = vld [vmem:[#allocation12 + $0x58] sm:$0xff]  ;;  %v5903_v46 = vld [vmem:[#allocation12 + $0x50] sm:$0xff] }
 0xc02   : > { %v4811_v17 = vpop.permute.xlu1 %4810  ;;  %7127 = vmatpush3.msra.mxu0 %v5904_v59  ;;  %v10021_v59 = vsub.f32 1.0, %v9924_v34 }
 0xc03   : > { %v4356_v28 = vadd.f32 %v4352_v29, %v4336_v19  ;;  %4402 = vrot.lane.b32.xlu0 %v4394_v25, %s7776_s24  ;;  %v4820_v48 = vmul.f32 %v9786_v12, %v4811_v17  ;;  %7128 = vmatprep.subr.mxu0 %v10274_v49  ;;  %v5902_v29 = vld [vmem:[#allocation12 + $0x48] sm:$0xff]  ;;  %v5901_v25 = vld [vmem:[#allocation12 + $0x40] sm:$0xff] }
 0xc04   : > { %v4329_v3 = vpop.permute.xlu0 %4328  ;;  %7129 = vmatpush3.msra.mxu0 %v5903_v46  ;;  %v9964_v19 = vld [vmem:[#allocation4 + $0x8] sm:$0xf] }
 0xc05   : > { %v4396_v2 = vmul.f32 %v9912_v7, %v4356_v28  ;;  %v4337_v16 = vmul.f32 %v4329_v3, %v4317_v10  ;;  %7130 = vmatprep.subr.mxu0 %v10274_v49  ;;  %v5218_v28 = vsub.f32 1.0, %v9823_v33  ;;  %v5219_v10 = vsub.f32 1.0, %v9826_v52 }
 0xc06   : > { %v4813_v21 = vpop.permute.xlu1 %4812  ;;  %7131 = vmatpush3.msra.mxu0 %v5902_v29  ;;  %v7487_v29 = vld [vmem:[#allocation3 + $0x2] sm:$0x3] }
 0xc07   : > { %4406 = vrot.lane.b32.xlu0 %v4396_v2, %s7776_s24  ;;  %v4357_v11 = vadd.f32 %v4353_v50, %v4337_v16  ;;  %v4821_v12 = vmul.f32 %v9790_v45, %v4813_v21  ;;  %v5335_v45 = vld [vmem:[#allocation10 + $0x8] sm:$0xff]  ;;  %7132 = vmatprep.subr.mxu0 %v10274_v49  ;;  %v5254_v21 = vmul.f32 %v9823_v33, %v9921_v42  ;;  %v5220_v16 = vsub.f32 1.0, %v9830_v61 }
 0xc08   : > { %7076 = vmatpush3.msra.mxu1 %v5335_v45  ;;  %7133 = vmatpush3.msra.mxu0 %v5901_v25 }
 0xc09   : > { %v4397_v57 = vmul.f32 %v9924_v34, %v4357_v11  ;;  %7077 = vmatprep.subr.mxu1 %v10274_v49  ;;  %7135 = vmatmul.mubr.msk.f32.vlgmr.msra.gmra.mxu0 %vm1070_vm4, %v9964_v19 }
 0xc0a   : > { %v4325_v30 = vpop.permute.xlu1 %4324  ;;  %7078 = vmatpush3.msra.mxu1 %v5334_v13 }
 0xc0b   : > { %v4335_v44 = vmul.f32 %v4325_v30, %v4315_v62  ;;  %v4791_v27 = vpop.permute.xlu0 %4790  ;;  %7093 = vmatprep.subr.mxu1 %v10274_v49 }
 0xc0c   : > { %v4802_v60 = vmul.f32 %v4791_v27, %v4782_v23 }
 0xc0d   : > { %v4355_v8 = vadd.f32 %v4351_v15, %v4335_v44 }
 0xc0e   : > { %v4822_v58 = vadd.f32 %v4818_v1, %v4802_v60  ;;  %v5245_v4 = vpop.permute.xlu1 %5244 }
 0xc0f   : > { %v4395_v43 = vmul.f32 %v9917_v41, %v4355_v8  ;;  %v4795_v37 = vpop.permute.xlu0 %4794  ;;  %v5255_v30 = vmul.f32 %v9826_v52, %v5245_v4 }
 0xc10   : > { %v4830_v35 = vmul.f32 %v4822_v58, %v9910_v0  ;;  %v4804_v39 = vmul.f32 %v4795_v37, %v4784_v51  ;;  %v5221_v58 = vsub.f32 1.0, %v9834_v31 }
 0xc11   : > { %4404 = vrot.lane.b32.xlu1 %v4395_v43, %s7776_s24  ;;  %v9985_v43 = vsub.f32 1.0, %v9910_v0 }
 0xc12   : > { %v4824_v26 = vadd.f32 %v4820_v48, %v4804_v39  ;;  %v4793_v38 = vpop.permute.xlu1 %4792  ;;  %4838 = vrot.lane.b32.xlu0 %v4830_v35, %s7776_s24  ;;  %v9990_v48 = vsub.f32 1.0, %v9912_v7  ;;  %v7485_v35 = vld [vmem:[#allocation3] sm:$0x3] }
 0xc13   : > { %v4803_v54 = vmul.f32 %v4793_v38, %v4783_v22  ;;  %v4797_v63 = vpop.permute.xlu0 %4796  ;;  %v4390_v39 = vmul.f32 %v7485_v35, %v9985_v43 }
 0xc14   : > { %v4832_v24 = vmul.f32 %v4824_v26, %v9912_v7  ;;  %v4805_v55 = vmul.f32 %v4797_v63, %v4785_v56  ;;  %v6547_v26 = vld [vmem:[#allocation15] ss:$0 sm:$0xff] }
 0xc15   : > { %v4823_v40 = vadd.f32 %v4819_v6, %v4803_v54  ;;  %4408 = vrot.lane.b32.xlu1 %v4397_v57, %s7776_s24  ;;  %v7486_v6 = vld [vmem:[#allocation3 + $0x4] sm:$0x3] }
 0xc16   : > { %v4825_v9 = vadd.f32 %v4821_v12, %v4805_v55  ;;  %4842 = vrot.lane.b32.xlu0 %v4832_v24, %s7776_s24  ;;  %v5247_v17 = vpop.permute.xlu1 %5246  ;;  %v6552_v12 = vld [vmem:[#allocation15 + $0x1] ss:$0 sm:$0xff] }
 0xc17   : > { %v4831_v36 = vmul.f32 %v4823_v40, %v9917_v41  ;;  %v5256_v27 = vmul.f32 %v9830_v61, %v5247_v17 }
 0xc18   : > { %v4833_v47 = vmul.f32 %v4825_v9, %v9924_v34 }
 0xc19   : > { %4840 = vrot.lane.b32.xlu1 %v4831_v36, %s7776_s24 }
 0xc1d   : > { %4844 = vrot.lane.b32.xlu1 %v4833_v47, %s7776_s24  ;;  %v10015_v47 = vsub.f32 1.0, %v9917_v41 }
 0xc1f   : > { %v4391_v25 = vmul.f32 %v7487_v29, %v10015_v47 }
 0xc5d   : > { %v5504_v38 = vpop.f32.mrf.mxu0 }
 0xc5e   : > { %v10002_v57 = vadd.f32 %v6547_v26, %v5504_v38 }
 0xc5f   : > { %v7092_v63 = vpop.f32.mrf.mxu0 }
 0xc63   : > { %v5227_v2 = vpop.permute.xlu0 %5226 }
 0xc64   : > { %v5238_v3 = vmul.f32 %v5227_v2, %v5218_v28  ;;  %v7488_v28 = vld [vmem:[#allocation3 + $0x8] sm:$0x3] }
 0xc65   : > { %v5229_v62 = vpop.permute.xlu1 %5228  ;;  %v4826_v2 = vmul.f32 %v7488_v28, %v9985_v43 }
 0xc66   : > { %v5258_v23 = vadd.f32 %v5254_v21, %v5238_v3  ;;  %v5239_v15 = vmul.f32 %v5229_v62, %v5219_v10 }
 0xc67   : > { %v5231_v44 = vpop.permute.xlu0 %5230 }
 0xc68   : > { %v5266_v1 = vmul.f32 %v5258_v23, %v9910_v0  ;;  %v5259_v60 = vadd.f32 %v5255_v30, %v5239_v15  ;;  %v5240_v50 = vmul.f32 %v5231_v44, %v5220_v16  ;;  %v10282_v0 = vld [vmem:[#allocation29_spill] sm:$0xff]  ;;  %v10284_v30 = vld [vmem:[#allocation31_spill] sm:$0xff] }
 0xc69   : > { %v5249_v8 = vpop.permute.xlu1 %5248 }
 0xc6a   : > { %v5267_v33 = vmul.f32 %v5259_v60, %v9917_v41  ;;  %v5260_v42 = vadd.f32 %v5256_v27, %v5240_v50  ;;  %5274 = vrot.lane.b32.xlu0 %v5266_v1, %s7776_s24  ;;  %v5257_v51 = vmul.f32 %v9834_v31, %v5249_v8  ;;  %v7490_v27 = vld [vmem:[#allocation3 + $0xc] sm:$0x3] }
 0xc6b   : > { %v5233_v52 = vpop.permute.xlu0 %5232  ;;  %v4828_v1 = vmul.f32 %v7490_v27, %v9990_v48 }
 0xc6c   : > { %v5268_v4 = vmul.f32 %v5260_v42, %v9912_v7  ;;  %v5241_v11 = vmul.f32 %v5233_v52, %v5221_v58  ;;  %5276 = vrot.lane.b32.xlu1 %v5267_v33, %s7776_s24  ;;  %v4392_v7 = vmul.f32 %v7486_v6, %v9990_v48  ;;  %v7491_v33 = vld [vmem:[#allocation3 + $0xa] sm:$0x3]  ;;  %v7492_v58 = vld [vmem:[#allocation3 + $0xe] sm:$0x3] }
 0xc6d   : > { %v4827_v42 = vmul.f32 %v7491_v33, %v10015_v47  ;;  %v4829_v52 = vmul.f32 %v7492_v58, %v10021_v59 }
 0xc6e   : > { %v5261_v61 = vadd.f32 %v5257_v51, %v5241_v11  ;;  %5278 = vrot.lane.b32.xlu0 %v5268_v4, %s7776_s24 }
 0xc70   : > { %v5269_v37 = vmul.f32 %v5261_v61, %v9924_v34  ;;  %v7489_v34 = vld [vmem:[#allocation3 + $0x6] sm:$0x3] }
 0xc71   : > { %v4393_v15 = vmul.f32 %v7489_v34, %v10021_v59 }
 0xc72   : > { %5280 = vrot.lane.b32.xlu1 %v5269_v37, %s7776_s24  ;;  %5516 = vrot.lane.b32.xlu0 %v10002_v57, %s7777_s28 }
 0xc75   : > { %v4403_v31 = vpop.permute.xlu0 %4402 }
 0xc76   : > { %v9993_v22 = vadd.f32 %v4403_v31, %v4390_v39  ;;  %5532 = vrot.lane.b32.xlu1 %v9886_v20, %s7775_s29  ;;  %v5743_v20 = vpop.f32.mrf.mxu0  ;;  %v10285_v39 = vld [vmem:[#allocation32_spill] sm:$0xff] }
 0xc77   : > { %v10012_v53 = vadd.f32 %v6552_v12, %v5743_v20 }
 0xc78   : > { %5290 = vst.msk [vmem:[#allocation3] sm:$0x3] %vm1028_vm5, %v9993_v22  ;;  %v5302_v56 = vmul.f32 %v9993_v22, %v10282_v0  ;;  %v7114_v45 = vpop.f32.mrf.mxu0 }
 0xc79   : > { %v4407_v54 = vpop.permute.xlu0 %4406  ;;  %5755 = vrot.lane.b32.xlu0 %v10012_v53, %s7777_s28 }
 0xc7a   : > { %v5306_v24 = vsel %vm1028_vm5, %v5302_v56, 0.0  ;;  %v4416_v55 = vadd.f32 %v4407_v54, %v4392_v7  ;;  %5771 = vrot.lane.b32.xlu1 %v9898_v18, %s7775_s29 }
 0xc7b   : > { %v5307_v36 = vrot.slane %v5306_v24, 4 }
 0xc7c   : > { %5292 = vst.msk [vmem:[#allocation3 + $0x4] sm:$0x3] %vm1028_vm5, %v4416_v55  ;;  %v5304_v40 = vmul.f32 %v4416_v55, %v10283_v14  ;;  %v6030_v9 = vcombine.low %v9993_v22, %v4416_v55 }
 0xc7d   : > { %v5308_v18 = vadd.f32 %v5307_v36, %v5306_v24 }
 0xc7e   : > { %v5320_v13 = vsel %vm1028_vm5, %v5304_v40, 0.0  ;;  %v10042_v26 = vrot.slane %v6030_v9, %v9416_v32 }
 0xc7f   : > { %v5321_v46 = vrot.slane %v5320_v13, 4  ;;  %v5309_v3 = vrot.slane %v5308_v18, 2 }
 0xc81   : > { %v5322_v62 = vadd.f32 %v5321_v46, %v5320_v13  ;;  %v5310_v4 = vadd.f32 %v5309_v3, %v5308_v18 }
 0xc83   : > { %v4405_v17 = vpop.permute.xlu1 %4404  ;;  %v5323_v37 = vrot.slane %v5322_v62, 2  ;;  %v5311_v55 = vrot.slane %v5310_v4, 1 }
 0xc84   : > { %v4415_v21 = vadd.f32 %v4405_v17, %v4391_v25  ;;  %v4839_v41 = vpop.permute.xlu0 %4838 }
 0xc85   : > { %v10025_v10 = vadd.f32 %v4839_v41, %v4826_v2  ;;  %v5324_v36 = vadd.f32 %v5323_v37, %v5322_v62  ;;  %v5312_v41 = vadd.f32 %v5311_v55, %v5310_v4 }
 0xc86   : > { %5291 = vst.msk [vmem:[#allocation3 + $0x2] sm:$0x3] %vm1028_vm5, %v4415_v21  ;;  %v5303_v23 = vmul.f32 %v4415_v21, %v10284_v30 }
 0xc87   : > { %5294 = vst.msk [vmem:[#allocation3 + $0x8] sm:$0x3] %vm1028_vm5, %v10025_v10  ;;  %v5537_v16 = vmul.f32 %v10025_v10, %v10282_v0  ;;  %v4409_v44 = vpop.permute.xlu1 %4408 }
 0xc88   : > { %v5313_v60 = vsel %vm1028_vm5, %v5303_v23, 0.0  ;;  %v4417_v50 = vadd.f32 %v4409_v44, %v4393_v15  ;;  %v4843_v8 = vpop.permute.xlu0 %4842  ;;  %v5325_v23 = vrot.slane %v5324_v36, 1 }
 0xc89   : > { %v5314_v51 = vrot.slane %v5313_v60, 4  ;;  %v5541_v11 = vsel %vm1028_vm5, %v5537_v16, 0.0  ;;  %v4852_v61 = vadd.f32 %v4843_v8, %v4828_v1 }
 0xc8a   : > { %v5542_v35 = vrot.slane %v5541_v11, 4  ;;  %5293 = vst.msk [vmem:[#allocation3 + $0x6] sm:$0x3] %vm1028_vm5, %v4417_v50  ;;  %v5305_v31 = vmul.f32 %v4417_v50, %v10285_v39  ;;  %v6038_v22 = vcombine.low %v4415_v21, %v4417_v50 }
 0xc8b   : > { %v5315_v38 = vadd.f32 %v5314_v51, %v5313_v60  ;;  %5296 = vst.msk [vmem:[#allocation3 + $0xc] sm:$0x3] %vm1028_vm5, %v4852_v61  ;;  %v5539_v56 = vmul.f32 %v4852_v61, %v10283_v14  ;;  %v6060_v6 = vcombine.low %v10025_v10, %v4852_v61  ;;  %v4841_v7 = vpop.permute.xlu1 %4840  ;;  %v5326_v51 = vadd.f32 %v5325_v23, %v5324_v36 }
 0xc8c   : > { %v5543_v54 = vadd.f32 %v5542_v35, %v5541_v11  ;;  %v5327_v63 = vsel %vm1028_vm5, %v5305_v31, 0.0  ;;  %v10049_v12 = vrot.slane %v6038_v22, %v9416_v32  ;;  %v4851_v24 = vadd.f32 %v4841_v7, %v4827_v42 }
 0xc8d   : > { %v5316_v20 = vrot.slane %v5315_v38, 2  ;;  %v5328_v40 = vrot.slane %v5327_v63, 4  ;;  %v5555_v9 = vsel %vm1028_vm5, %v5539_v56, 0.0  ;;  %v10060_v50 = vrot.slane %v6060_v6, %v9416_v32  ;;  %v5573_v56 = vld [vmem:[#allocation10 + $0x38] sm:$0xff] }
 0xc8e   : > { %v6046_v45 = vcombine.low %v10042_v26, %v10049_v12  ;;  %v5556_v13 = vrot.slane %v5555_v9, 4  ;;  %5295 = vst.msk [vmem:[#allocation3 + $0xa] sm:$0x3] %vm1028_vm5, %v4851_v24  ;;  %v5538_v18 = vmul.f32 %v4851_v24, %v10284_v30  ;;  %v5544_v29 = vrot.slane %v5543_v54, 2 }
 0xc8f   : > { %v5317_v46 = vadd.f32 %v5316_v20, %v5315_v38  ;;  %v5329_v25 = vadd.f32 %v5328_v40, %v5327_v63  ;;  %v4845_v17 = vpop.permute.xlu1 %4844 }
 0xc90   : > { %v5557_v28 = vadd.f32 %v5556_v13, %v5555_v9  ;;  %v5548_v2 = vsel %vm1028_vm5, %v5538_v18, 0.0  ;;  %v4853_v21 = vadd.f32 %v4845_v17, %v4829_v52  ;;  %v5545_v27 = vadd.f32 %v5544_v29, %v5543_v54  ;;  %v5571_v9 = vld [vmem:[#allocation10 + $0x28] sm:$0xff]  ;;  %v5812_v17 = vld [vmem:[#allocation10 + $0x58] sm:$0xff] }
 0xc91   : > { %v5318_v3 = vrot.slane %v5317_v46, 1  ;;  %v5330_v10 = vrot.slane %v5329_v25, 2  ;;  %v5549_v62 = vrot.slane %v5548_v2, 4 }
 0xc92   : > { %v5558_v34 = vrot.slane %v5557_v28, 2  ;;  %5297 = vst.msk [vmem:[#allocation3 + $0xe] sm:$0x3] %vm1028_vm5, %v4853_v21  ;;  %v5540_v15 = vmul.f32 %v4853_v21, %v10285_v39  ;;  %v6068_v16 = vcombine.low %v4851_v24, %v4853_v21  ;;  %v5546_v37 = vrot.slane %v5545_v27, 1  ;;  %v5572_v24 = vld [vmem:[#allocation10 + $0x30] sm:$0xff]  ;;  %v5810_v21 = vld [vmem:[#allocation10 + $0x48] sm:$0xff] }
 0xc93   : > { %v5319_v44 = vadd.f32 %v5318_v3, %v5317_v46  ;;  %v5331_v1 = vadd.f32 %v5330_v10, %v5329_v25  ;;  %v5550_v60 = vadd.f32 %v5549_v62, %v5548_v2  ;;  %v5570_v46 = vld [vmem:[#allocation10 + $0x20] sm:$0xff]  ;;  %v5811_v2 = vld [vmem:[#allocation10 + $0x50] sm:$0xff] }
 0xc94   : > { %v5562_v8 = vsel %vm1028_vm5, %v5540_v15, 0.0  ;;  %v10064_v33 = vrot.slane %v6068_v16, %v9416_v32  ;;  %v5559_v11 = vadd.f32 %v5558_v34, %v5557_v28  ;;  %v5547_v55 = vadd.f32 %v5546_v37, %v5545_v27  ;;  %v7493_v3 = vld [vmem:[#allocation3 + $0x10] sm:$0x3]  ;;  %v7494_v34 = vld [vmem:[#allocation3 + $0x12] sm:$0x3] }
 0xc95   : > { %v5332_v42 = vrot.slane %v5331_v1, 1  ;;  %v5551_v58 = vrot.slane %v5550_v60, 2  ;;  %v5563_v52 = vrot.slane %v5562_v8, 4  ;;  %v5349_v4 = vsel %vm1061_vm6, %v5319_v44, %v5312_v41  ;;  %v5809_v41 = vld [vmem:[#allocation10 + $0x40] sm:$0xff] }
 0xc96   : > { %v6076_v61 = vcombine.low %v10060_v50, %v10064_v33  ;;  %v5350_v38 = vsel %vm1063_vm7, %v5326_v51, %v5349_v4  ;;  %v5560_v63 = vrot.slane %v5559_v11, 1  ;;  %v5262_v10 = vmul.f32 %v7493_v3, %v9985_v43  ;;  %v7496_v51 = vld [vmem:[#allocation3 + $0x16] sm:$0x3] }
 0xc97   : > { %v5552_v35 = vadd.f32 %v5551_v58, %v5550_v60  ;;  %v5564_v31 = vadd.f32 %v5563_v52, %v5562_v8  ;;  %v5333_v22 = vadd.f32 %v5332_v42, %v5331_v1  ;;  %v5263_v15 = vmul.f32 %v7494_v34, %v10015_v47  ;;  %v7495_v1 = vld [vmem:[#allocation3 + $0x14] sm:$0x3] }
 0xc98   : > { %v5561_v18 = vadd.f32 %v5560_v63, %v5559_v11  ;;  %v5264_v60 = vmul.f32 %v7495_v1, %v9990_v48  ;;  %v5265_v11 = vmul.f32 %v7496_v51, %v10021_v59 }
 0xc99   : > { %v5553_v6 = vrot.slane %v5552_v35, 1  ;;  %v5565_v7 = vrot.slane %v5564_v31, 2  ;;  %v5351_v54 = vsel %vm1065_vm8, %v5333_v22, %v5350_v38 }
 0xc9a   : > { %7080 = vmatmul.mubr.msk.f32.vlgmr.msra.gmra.mxu1 %vm1070_vm4, %v5351_v54 }
 0xc9b   : > { %v5554_v20 = vadd.f32 %v5553_v6, %v5552_v35  ;;  %v5566_v40 = vadd.f32 %v5565_v7, %v5564_v31  ;;  %7094 = vmatpush3.msra.mxu1 %v5573_v56  ;;  %7101 = vmatprep.mubr.msk.f32.mxu1 %vm7774_vm2, %v10274_v49 }
 0xc9c   : > { %7095 = vmatprep.subr.mxu1 %v10274_v49 }
 0xc9d   : > { %v5567_v36 = vrot.slane %v5566_v40, 1  ;;  %7096 = vmatpush3.msra.mxu1 %v5572_v24  ;;  %v5586_v13 = vsel %vm1061_vm6, %v5554_v20, %v5547_v55  ;;  %v6557_v55 = vld [vmem:[#allocation15 + $0x2] ss:$0 sm:$0xff] }
 0xc9e   : > { %7097 = vmatprep.subr.mxu1 %v10274_v49  ;;  %v5587_v25 = vsel %vm1063_vm7, %v5561_v18, %v5586_v13 }
 0xc9f   : > { %7098 = vmatpush3.msra.mxu1 %v5571_v9  ;;  %v5568_v29 = vadd.f32 %v5567_v36, %v5566_v40 }
 0xca0   : > { %7099 = vmatprep.subr.mxu1 %v10274_v49 }
 0xca1   : > { %7100 = vmatpush3.msra.mxu1 %v5570_v46  ;;  %v5588_v28 = vsel %vm1065_vm8, %v5568_v29, %v5587_v25 }
 0xca2   : > { %7102 = vmatmul.mubr.msk.f32.vlgmr.msra.gmra.mxu1 %vm1070_vm4, %v5588_v28  ;;  %7115 = vmatprep.subr.mxu1 %v10274_v49 }
 0xca3   : > { %7116 = vmatpush3.msra.mxu1 %v5812_v17  ;;  %7123 = vmatprep.mubr.msk.f32.mxu1 %vm7774_vm2, %v10274_v49 }
 0xca4   : > { %7117 = vmatprep.subr.mxu1 %v10274_v49 }
 0xca5   : > { %7118 = vmatpush3.msra.mxu1 %v5811_v2 }
 0xca6   : > { %7119 = vmatprep.subr.mxu1 %v10274_v49 }
 0xca7   : > { %7120 = vmatpush3.msra.mxu1 %v5810_v21 }
 0xca8   : > { %7121 = vmatprep.subr.mxu1 %v10274_v49 }
 0xca9   : > { %7122 = vmatpush3.msra.mxu1 %v5809_v41 }
 0xcc9   : > { %v5982_v6 = vpop.f32.mrf.mxu0 }
 0xcca   : > { %v5983_v36 = vadd.f32 %v6557_v55, %v5982_v6  ;;  %v7783_v55 = vmov 1934713408  }
 0xccb   : > { %v7136_v59 = vpop.f32.mrf.mxu0 }
 0xccc   : > { %5994 = vrot.lane.b32.xlu0 %v5983_v36, %s7777_s28  ;;  %v6048_v59 = vunpack.c.l.s4 %v7783_v55 }
 0xcdc   : > { %v5275_v62 = vpop.permute.xlu0 %5274 }
 0xcdd   : > { %v5286_v23 = vadd.f32 %v5275_v62, %v5262_v10 }
 0xcde   : > { %v5277_v16 = vpop.permute.xlu1 %5276 }
 0xcdf   : > { %5298 = vst.msk [vmem:[#allocation3 + $0x10] sm:$0x3] %vm1028_vm5, %v5286_v23  ;;  %v5776_v44 = vmul.f32 %v5286_v23, %v10282_v0  ;;  %v5287_v27 = vadd.f32 %v5277_v16, %v5263_v15 }
 0xce0   : > { %v5279_v8 = vpop.permute.xlu0 %5278 }
 0xce1   : > { %v5780_v42 = vsel %vm1028_vm5, %v5776_v44, 0.0  ;;  %5299 = vst.msk [vmem:[#allocation3 + $0x12] sm:$0x3] %vm1028_vm5, %v5287_v27  ;;  %v5777_v43 = vmul.f32 %v5287_v27, %v10284_v30  ;;  %v5288_v58 = vadd.f32 %v5279_v8, %v5264_v60  ;;  %v6545_v44 = vld [vmem:[#allocation13] ss:$0 sm:$0xff] }
 0xce2   : > { %v5781_v52 = vrot.slane %v5780_v42, 4 }
 0xce3   : > { %v5787_v47 = vsel %vm1028_vm5, %v5777_v43, 0.0  ;;  %5300 = vst.msk [vmem:[#allocation3 + $0x14] sm:$0x3] %vm1028_vm5, %v5288_v58  ;;  %v5778_v4 = vmul.f32 %v5288_v58, %v10283_v14  ;;  %v6090_v0 = vcombine.low %v5286_v23, %v5288_v58  ;;  %v6550_v43 = vld [vmem:[#allocation13 + $0x1] ss:$0 sm:$0xff] }
 0xce4   : > { %v5782_v48 = vadd.f32 %v5781_v52, %v5780_v42  ;;  %v5788_v37 = vrot.slane %v5787_v47, 4  ;;  %v5281_v35 = vpop.permute.xlu1 %5280 }
 0xce5   : > { %v5794_v31 = vsel %vm1028_vm5, %v5778_v4, 0.0  ;;  %v5289_v22 = vadd.f32 %v5281_v35, %v5265_v11  ;;  %v10103_v20 = vrot.slane %v6090_v0, %v9416_v32  ;;  %v5517_v35 = vpop.permute.xlu0 %5516 }
 0xce6   : > { %v5783_v38 = vrot.slane %v5782_v48, 2  ;;  %v5789_v30 = vadd.f32 %v5788_v37, %v5787_v47  ;;  %v5795_v56 = vrot.slane %v5794_v31, 4 }
 0xce7   : > { %5301 = vst.msk [vmem:[#allocation3 + $0x16] sm:$0x3] %vm1028_vm5, %v5289_v22  ;;  %v5779_v7 = vmul.f32 %v5289_v22, %v10285_v39  ;;  %v6098_v54 = vcombine.low %v5287_v27, %v5289_v22 }
 0xce8   : > { %v5784_v14 = vadd.f32 %v5783_v38, %v5782_v48  ;;  %v5790_v63 = vrot.slane %v5789_v30, 2  ;;  %v5796_v24 = vadd.f32 %v5795_v56, %v5794_v31  ;;  %v6555_v56 = vld [vmem:[#allocation13 + $0x2] ss:$0 sm:$0xff] }
 0xce9   : > { %v5801_v40 = vsel %vm1028_vm5, %v5779_v7, 0.0  ;;  %v10107_v9 = vrot.slane %v6098_v54, %v9416_v32 }
 0xcea   : > { %v5785_v13 = vrot.slane %v5784_v14, 1  ;;  %v5791_v18 = vadd.f32 %v5790_v63, %v5789_v30  ;;  %v5797_v46 = vrot.slane %v5796_v24, 2  ;;  %v5802_v29 = vrot.slane %v5801_v40, 4 }
 0xceb   : > { %v6106_v39 = vcombine.low %v10103_v20, %v10107_v9 }
 0xcec   : > { %v5792_v25 = vrot.slane %v5791_v18, 1  ;;  %v5798_v17 = vadd.f32 %v5797_v46, %v5796_v24  ;;  %v5803_v28 = vadd.f32 %v5802_v29, %v5801_v40  ;;  %v5786_v2 = vadd.f32 %v5785_v13, %v5784_v14 }
 0xced   : > { %v6049_v40 = vunpack.c.0.s8 %v6048_v59 }
 0xcee   : > { %v5793_v21 = vadd.f32 %v5792_v25, %v5791_v18  ;;  %v5799_v41 = vrot.slane %v5798_v17, 1  ;;  %v5804_v3 = vrot.slane %v5803_v28, 2 }
 0xcef   : > { %v6052_v29 = vsub.s32 %v6049_v40, %v8104_v5  ;;  %v5533_v5 = vpop.permute.xlu1 %5532 }
 0xcf0   : > { %v5800_v10 = vadd.f32 %v5799_v41, %v5798_v17  ;;  %v5805_v32 = vadd.f32 %v5804_v3, %v5803_v28  ;;  %v5825_v62 = vsel %vm1061_vm6, %v5793_v21, %v5786_v2 }
 0xcf1   : > { %v6053_v25 = vrot.slane %v6046_v45, %v6052_v29  ;;  %v6113_v17 = vrot.slane %v6106_v39, %v6052_v29  ;;  %v6083_v39 = vrot.slane %v6076_v61, %v6052_v29 }
 0xcf2   : > { %v5806_v23 = vrot.slane %v5805_v32, 1  ;;  %v5826_v34 = vsel %vm1063_vm7, %v5800_v10, %v5825_v62 }
 0xcf3   : > { %v6114_v28 = vcombine.high %v6113_v17, %v10274_v49  ;;  %v5772_v2 = vpop.permute.xlu1 %5771  ;;  %v6084_v10 = vcombine.high %v6083_v39, %v10274_v49 }
 0xcf4   : > { %v5807_v15 = vadd.f32 %v5806_v23, %v5805_v32 }
 0xcf6   : > { %v5827_v16 = vsel %vm1065_vm8, %v5807_v15, %v5826_v34 }
 0xcf7   : > { %7124 = vmatmul.mubr.msk.f32.vlgmr.msra.gmra.mxu1 %vm1070_vm4, %v5827_v16 }
 0xd5a   : > { %v5420_v27 = vpop.f32.mrf.mxu1 }
 0xd5b   : > { %v5421_v1 = vadd.f32 %v6545_v44, %v5420_v27 }
 0xd5c   : > { %v7081_v60 = vpop.f32.mrf.mxu1 }
 0xd5d   : > { %v5508_v8 = vadd.f32 %v10002_v57, %v5421_v1  ;;  %v5756_v57 = vpop.permute.xlu0 %5755 }
 0xd5f   : > { %v6549_v42 = vmul.f32 -1.442695, %v5508_v8 }
 0xd61   : > { %7437 = vpow2.f32 %v6549_v42  ;;  %v5995_v13 = vpop.permute.xlu0 %5994 }
 0xd62   : > { %v5657_v58 = vpop.f32.mrf.mxu1 }
 0xd63   : > { %v5658_v52 = vadd.f32 %v6550_v43, %v5657_v58 }
 0xd64   : > { %v7103_v47 = vpop.f32.mrf.mxu1 }
 0xd65   : > { %v5747_v4 = vadd.f32 %v10012_v53, %v5658_v52 }
 0xd67   : > { %v6554_v0 = vmul.f32 -1.442695, %v5747_v4 }
 0xd69   : > { %7439 = vpow2.f32 %v6554_v0 }
 0xd6e   : > { %v7438_v51 = vpop.eup %7437 }
 0xd6f   : > { %v5512_v11 = vadd.f32 1.0, %v7438_v51 }
 0xd71   : > { %7441 = vrcp.f32 %v5512_v11 }
 0xd76   : > { %v7440_v48 = vpop.eup %7439 }
 0xd77   : > { %v5751_v37 = vadd.f32 1.0, %v7440_v48  ;;  %v10287_v48 = vld [vmem:[#allocation39_spill] sm:$0xff] }
 0xd79   : > { %7443 = vrcp.f32 %v5751_v37  ;;  %v10288_v37 = vld [vmem:[#allocation37_spill] sm:$0xff] }
 0xd7e   : > { %v7442_v31 = vpop.eup %7441 }
 0xd7f   : > { %v5519_v22 = vmul.f32 %v7442_v31, %v5517_v35  ;;  %v5526_v32 = vsub.f32 1.0, %v7442_v31  ;;  %v5535_v23 = vmul.f32 %v7442_v31, %v5533_v5  ;;  %v3180_v35 = vadd.f32 %v10288_v37, %v10287_v48  ;;  %v10289_v31 = vld [vmem:[#allocation38_spill] sm:$0xff] }
 0xd81   : > { %5521 = vrot.lane.b32.xlu1 %v5519_v22, %s7777_s28  ;;  %v3310_v22 = vadd.f32 %v10289_v31, %v3180_v35 }
 0xd86   : > { %v7444_v38 = vpop.eup %7443 }
 0xd87   : > { %v5758_v30 = vmul.f32 %v7444_v38, %v5756_v57  ;;  %v5765_v16 = vsub.f32 1.0, %v7444_v38  ;;  %v5774_v27 = vmul.f32 %v7444_v38, %v5772_v2 }
 0xd89   : > { %5760 = vrot.lane.b32.xlu1 %v5758_v30, %s7777_s28 }
 0xdb7   : > { %v5896_v53 = vpop.f32.mrf.mxu1 }
 0xdb8   : > { %v5897_v6 = vadd.f32 %v6555_v56, %v5896_v53 }
 0xdb9   : > { %v7125_v7 = vpop.f32.mrf.mxu1 }
 0xdba   : > { %v5986_v54 = vadd.f32 %v5983_v36, %v5897_v6  ;;  %v6054_v36 = vcombine.high %v6053_v25, %v10274_v49  ;;  %v10286_v49 = vld [vmem:[#allocation35_spill] sm:$0xff]  ;;  %v10291_v7 = vld [vmem:[#allocation36_spill] sm:$0xff] }
 0xdbc   : > { %v6559_v14 = vmul.f32 -1.442695, %v5986_v54 }
 0xdbe   : > { %7445 = vpow2.f32 %v6559_v14 }
 0xdcb   : > { %v7446_v63 = vpop.eup %7445 }
 0xdcc   : > { %v5990_v24 = vadd.f32 1.0, %v7446_v63 }
 0xdce   : > { %7447 = vrcp.f32 %v5990_v24 }
 0xddb   : > { %v7448_v18 = vpop.eup %7447 }
 0xddc   : > { %v5997_v46 = vmul.f32 %v7448_v18, %v5995_v13  ;;  %v6004_v8 = vsub.f32 1.0, %v7448_v18 }
 0xdde   : > { %5999 = vrot.lane.b32.xlu1 %v5997_v46, %s7777_s28 }
 0xde2   : > { %6010 = vrot.lane.b32.xlu1 %v9964_v19, %s7775_s29 }
 0xde6   : > { %6056 = vrot.lane.b32.xlu1 %v6054_v36, %s7775_s29 }
 0xdea   : > { %6116 = vrot.lane.b32.xlu1 %v6114_v28, %s7775_s29 }
 0xdf3   : > { %v5522_v21 = vpop.permute.xlu1 %5521 }
 0xdf4   : > { %v5524_v26 = vadd.f32 %v5522_v21, %v5421_v1 }
 0xdf6   : > { %7449 = vtanh.f32 %v5524_v26 }
 0xdfb   : > { %v5761_v12 = vpop.permute.xlu1 %5760 }
 0xdfc   : > { %v5763_v45 = vadd.f32 %v5761_v12, %v5658_v52 }
 0xdfe   : > { %7451 = vtanh.f32 %v5763_v45 }
 0xe03   : > { %v7450_v19 = vpop.eup %7449 }
 0xe04   : > { %5528 = vrot.lane.b32.xlu0 %v7450_v19, %s7776_s24 }
 0xe0b   : > { %v7452_v41 = vpop.eup %7451 }
 0xe0c   : > { %5767 = vrot.lane.b32.xlu0 %v7452_v41, %s7776_s24 }
 0xe50   : > { %v6000_v20 = vpop.permute.xlu1 %5999 }
 0xe51   : > { %v6002_v9 = vadd.f32 %v6000_v20, %v5897_v6  ;;  %v10290_v6 = vld [vmem:[#allocation34_spill] sm:$0xff] }
 0xe52   : > { %v6173_v54 = vsel %vm1070_vm4, %v10291_v7, %v10290_v6 }
 0xe53   : > { %7453 = vtanh.f32 %v6002_v9 }
 0xe54   : > { %v6011_v50 = vpop.permute.xlu1 %6010 }
 0xe55   : > { %v6013_v43 = vmul.f32 %v7448_v18, %v6011_v50 }
 0xe58   : > { %v6057_v61 = vpop.permute.xlu1 %6056 }
 0xe59   : > { %v6059_v60 = vsel %vm1070_vm4, %v6053_v25, %v6057_v61 }
 0xe5c   : > { %v6117_v0 = vpop.permute.xlu1 %6116 }
 0xe5d   : > { %v6119_v51 = vsel %vm1070_vm4, %v6113_v17, %v6117_v0 }
 0xe60   : > { %v7454_v3 = vpop.eup %7453 }
 0xe61   : > { %6006 = vrot.lane.b32.xlu0 %v7454_v3, %s7776_s24 }
 0xe65   : > { %6086 = vrot.lane.b32.xlu0 %v6084_v10, %s7775_s29 }
 0xe76   : > { %v5529_v62 = vpop.permute.xlu0 %5528 }
 0xe77   : > { %v5531_v34 = vmul.f32 %v5529_v62, %v5526_v32 }
 0xe79   : > { %v5536_v15 = vadd.f32 %v5535_v23, %v5531_v34 }
 0xe7b   : > { %6018 = vrot.lane.b32.xlu0 %v5536_v15, %s7776_s24 }
 0xe7e   : > { %v5768_v44 = vpop.permute.xlu0 %5767 }
 0xe7f   : > { %v5770_v1 = vmul.f32 %v5768_v44, %v5765_v16 }
 0xe81   : > { %v5775_v33 = vadd.f32 %v5774_v27, %v5770_v1 }
 0xe83   : > { %6020 = vrot.lane.b32.xlu1 %v5775_v33, %s7776_s24 }
 0xe87   : > { %6152 = vrot.lane.b32.xlu1 %v10286_v49, %s7775_s29 }
 0xe8b   : > { %6156 = vrot.lane.b32.xlu1 %v6059_v60, %s7776_s24 }
 0xed3   : > { %v6007_v42 = vpop.permute.xlu0 %6006 }
 0xed4   : > { %v6009_v58 = vmul.f32 %v6007_v42, %v6004_v8 }
 0xed6   : > { %v6014_v52 = vadd.f32 %v6013_v43, %v6009_v58 }
 0xed7   : > { %v6087_v47 = vpop.permute.xlu0 %6086 }
 0xed8   : > { %v6089_v4 = vsel %vm1070_vm4, %v6083_v39, %v6087_v47  ;;  %6022 = vrot.lane.b32.xlu0 %v6014_v52, %s7776_s24 }
 0xed9   : > { %6160 = vrot.lane.b32.xlu1 %v6089_v4, %s7775_s29 }
 0xedd   : > { %6164 = vrot.lane.b32.xlu1 %v6119_v51, %s7776_s24 }
 0xee1   : > { %6167 = vrot.lane.b32.xlu1 %v5775_v33, %s7775_s29 }
 0xee5   : > { %6170 = vrot.lane.b32.xlu1 %v6014_v52, %s7777_s28 }
 0xeed   : > { %v6019_v11 = vpop.permute.xlu0 %6018 }
 0xeee   : > { %6027 = vst.msk [vmem:[#allocation4] sm:$0xf] %vm1791_vm10, %v6019_v11 }
 0xef5   : > { %v6021_v57 = vpop.permute.xlu1 %6020 }
 0xef6   : > { %6028 = vst.msk [vmem:[#allocation4 + $0x4] sm:$0xf] %vm1791_vm10, %v6021_v57  ;;  %6120 = vxpose.xlu0.b32.start.end [1/1] (short) (narrow) %v3310_v22, 8 }
 0xef9   : > { %v6153_v38 = vpop.permute.xlu1 %6152 }
 0xefa   : > { %v6174_v14 = vsel %vm1087_vm9, %v6173_v54, %v6153_v38 }
 0xefd   : > { %v6157_v30 = vpop.permute.xlu1 %6156 }
 0xefe   : > { %v6175_v55 = vsel %vm3450_vm0, %v6174_v14, %v6157_v30 }
 0xf4a   : > { %v6023_v56 = vpop.permute.xlu0 %6022 }
 0xf4b   : > { %6029 = vst.msk [vmem:[#allocation4 + $0x8] sm:$0xf] %vm1791_vm10, %v6023_v56  ;;  %v6161_v53 = vpop.permute.xlu1 %6160 }
 0xf4c   : > { %v6176_v63 = vsel %vm1070_vm4, %v6157_v30, %v6161_v53 }
 0xf4f   : > { %v6165_v24 = vpop.permute.xlu1 %6164 }
 0xf50   : > { %v6177_v59 = vsel %vm3450_vm0, %v6176_v63, %v6165_v24  ;;  %v6178_v46 = vsel %vm1070_vm4, %v6165_v24, %v5536_v15 }
 0xf51   : > { %v6187_v40 = vcombine.low %v6175_v55, %v6177_v59 }
 0xf53   : > { %6191 = vst [vmem:[%s8064_s12] sm:$0xff] %v6187_v40  ;;  %v6168_v13 = vpop.permute.xlu1 %6167 }
 0xf54   : > { %v6179_v29 = vsel %vm1087_vm9, %v6178_v46, %v6168_v13 }
 0xf57   : > { %v6171_v18 = vpop.permute.xlu1 %6170 }
 0xf58   : > { %v6180_v36 = vsel %vm3450_vm0, %v6179_v29, %v6171_v18 }
 0xf72   : > { %v6136_v25 = vpop.trf.xlu0 }
 0xf73   : > { %v6182_v17 = vsel %vm6181_vm1, %v6136_v25, 0.0 }
 0xf74   : > { %v6188_v28 = vcombine.low %v6180_v36, %v6182_v17 }
 0xf76   : > { %6192 = vst [vmem:[%s8064_s12 + $0x8] sm:$0xff] %v6188_v28 }
 0xf77 PF: > { %s10292_s3 = sld [smem:[#allocation24_spill]] }
 0xf7d   : > { %s37_s3 = sadd.s32 1, %s10292_s3  }
 0xf7e   : > { %p34_p6 = scmp.ge.s32.totalorder %s37_s3, 8  }
 0xf80   :  { %36 = sbr.rel (!%p34_p6) target bundleno = 17 (0x11), region = 221 }
 0xf85   :  { %6214 = vsyncpa [#allocation6], 1 }
 0xf86   :  { %6216 = vsyncpa [#allocation6 + $0x1], 1 }
 0xf87   :  { %6217 = vsyncpa [#allocation8], 1 }
 0xf88   :  { %6218 = vsyncpa [#allocation11], 1 }
 0xf89   :  { %6219 = vsyncpa [#allocation14], 1 }
 0xf8a   :  { %6220 = vsyncpa [#allocation17], 1 }

</bundles_post_ra>
